<compile_context>
chip_gen: v6e
topology: v6e:2x2x1
jax: 0.10.0
libtpu: 0.0.40
codegen_flags: <defaults>
</compile_context>

<pallas_src>
import jax
import jax.numpy as jnp
from jax.experimental import pallas as pl
from jax.experimental.pallas import tpu as pltpu


# ------------------------------ Fused kernel ------------------------------- #

def tiny_value_kernel(x_ref, w1c_ref, w2c_ref, fw1_hbm, fb1_ref, fw2_ref, fb2_ref,
                      out_ref,
                      pad_ref, patch_ref, act_ref, fw1_vmem, dma_sem):
    """Fused TinyBlock + FC head.

    x_ref:    (B, H, W, C) NHWC input (channels on the lane dim), f32.
    w?c_ref:  (9*C, C) conv weights, rows in (ky, kx, cin) im2col order, f32.
    fw1_hbm:  (H, W*C, D_hid) bf16 FC1 weight left in HBM, rows pre-permuted to
              (h, w, c) order and chunked per spatial row h.
    """
    B, H, W, C = x_ref.shape
    D_hid = fw1_hbm.shape[2]

    # Kick off all fw1 chunk DMAs immediately (bf16, ~2.4 MB total).  They
    # stream while the conv block computes; FC1 waits on them chunk-by-chunk.
    for h in range(H):
        pltpu.make_async_copy(fw1_hbm.at[h], fw1_vmem.at[h], dma_sem.at[h]).start()

    # ---------------- residual conv block (im2col + single MXU matmul) -------
    pad_ref[...] = jnp.zeros_like(pad_ref)      # halo stays zero; interior rewritten

    def conv3x3(w2d_ref):
        # Build the (B*H*W, 9*C) patch matrix in VMEM, then one long-K matmul.
        for ky in range(3):
            for kx in range(3):
                col = (ky * 3 + kx) * C
                win = pad_ref[:, ky:ky + H, kx:kx + W, :]          # (B, H, W, C)
                patch_ref[:, col:col + C] = win.reshape(B * H * W, C)
        return jnp.dot(patch_ref[...], w2d_ref[...],
                       preferred_element_type=jnp.float32)         # (B*H*W, C)

    x2 = x_ref[...].reshape(B * H * W, C)

    # conv1 + relu
    pad_ref[:, 1:H + 1, 1:W + 1, :] = x_ref[...]
    mid = jnp.maximum(conv3x3(w1c_ref), 0.0)                       # (B*H*W, C)

    # conv2 + residual + relu
    pad_ref[:, 1:H + 1, 1:W + 1, :] = mid.reshape(B, H, W, C)
    blk = jnp.maximum(conv3x3(w2c_ref) + x2, 0.0)                  # (B*H*W, C)

    # Stage the block output (f32) for per-position reads by the FC head.
    act_ref[...] = blk.reshape(B, H, W, C)

    # ------------- FC1 as a spatial-position sum, pipelined vs. the DMA ------
    # h1[b, j] = sum_{h,w,c} act[b,h,w,c] * fw1[(h,w,c), j]
    # No lane-collapsing flatten needed; fw1 rows are already in (h,w,c) order.
    h1 = jnp.zeros((B, D_hid), jnp.float32)
    for h in range(H):
        # Wait only for this spatial row's weight chunk; later chunks keep streaming.
        pltpu.make_async_copy(fw1_hbm.at[h], fw1_vmem.at[h], dma_sem.at[h]).wait()
        for w in range(W):
            lhs = act_ref[:, h, w, :].astype(jnp.bfloat16)         # (B, C)
            rhs = fw1_vmem[h, w * C:(w + 1) * C, :]                # (C, D_hid) bf16
            h1 = h1 + jnp.dot(lhs, rhs, preferred_element_type=jnp.float32)

    h1 = jnp.maximum(h1 + fb1_ref[...], 0.0)                       # (B, D_hid)

    # ---------------- FC2 (tiny, f32) ----------------------------------------
    out_ref[...] = jnp.dot(h1, fw2_ref[...],
                           preferred_element_type=jnp.float32) + fb2_ref[...]


# ----------------------- Wrapper + weight preprocessing --------------------- #

def prepare_params(params, spatial_hw=(6, 6)):
    """One-time weight preprocessing (zero runtime cost).

    * conv weights (3,3,Cin,Cout) -> (9*Cin, Cout), rows in (ky, kx, cin) order
      matching the kernel's im2col column order (f32).
    * fw1 rows permuted from PyTorch's (c,h,w) flatten order to (h,w,c) order,
      chunked per spatial row h -> (H, W*Cin, D_hid), and cast to bfloat16.
    """
    cw1, cw2, fw1, fb1, fw2, fb2 = params
    kh, kw, cin, cout = cw1.shape
    H, W = spatial_hw
    w1c = cw1.reshape(kh * kw * cin, cout)
    w2c = cw2.reshape(kh * kw * cin, cout)
    d_in, d_hid = fw1.shape
    fw1p = (fw1.reshape(cin, H, W, d_hid)
               .transpose(1, 2, 0, 3)                  # (H, W, C, D_hid)
               .reshape(H, W * cin, d_hid)
               .astype(jnp.bfloat16))                  # bf16 in HBM (review item 1)
    return (w1c, w2c, fw1p, fb1, fw2, fb2)


@jax.jit
def tiny_value_forward(x_nchw, prepared):
    """Full TinyValue forward. x_nchw: (B, 64, 6, 6) float32 (PyTorch layout)."""
    w1c, w2c, fw1p, fb1, fw2, fb2 = prepared
    B, C, H, W = x_nchw.shape
    D_hid = fw1p.shape[2]
    D_out = fw2.shape[1]

    x_nhwc = jnp.transpose(x_nchw, (0, 2, 3, 1))   # tiny glue: C -> lane dim

    full = lambda shape: pl.BlockSpec(shape, lambda i: (0,) * len(shape))

    return pl.pallas_call(
        tiny_value_kernel,
        out_shape=jax.ShapeDtypeStruct((B, D_out), jnp.float32),
        grid_spec=pltpu.PrefetchScalarGridSpec(
            num_scalar_prefetch=0,
            grid=(1,),
            in_specs=[full((B, H, W, C)),                   # x (NHWC)
                      full((9 * C, C)),                     # conv1 weight (im2col)
                      full((9 * C, C)),                     # conv2 weight (im2col)
                      pl.BlockSpec(memory_space=pl.ANY),    # fw1 (bf16) stays in HBM
                      full((1, D_hid)),                     # fb1
                      full((D_hid, D_out)),                 # fw2
                      full((1, D_out))],                    # fb2
            out_specs=full((B, D_out)),
            scratch_shapes=[
                pltpu.VMEM((B, H + 2, W + 2, C), jnp.float32),    # padded activation
                pltpu.VMEM((B * H * W, 9 * C), jnp.float32),      # im2col patches
                pltpu.VMEM((B, H, W, C), jnp.float32),            # block output
                pltpu.VMEM((H, W * C, D_hid), jnp.bfloat16),      # fw1 landing buffer
                pltpu.SemaphoreType.DMA((H,)),                    # per-chunk DMA sems
            ],
        ),
        compiler_params=pltpu.CompilerParams(
            dimension_semantics=("arbitrary",)),
    )(x_nhwc, w1c, w2c, fw1p, fb1, fw2, fb2)


# --------------------------- Pure-JAX reference ----------------------------- #

def tiny_value_reference(x_nchw, params):
    cw1, cw2, fw1, fb1, fw2, fb2 = params

    def conv(x, w):  # w stored (kh, kw, Cin, Cout) -> OIHW for lax
        w_oihw = jnp.transpose(w, (3, 2, 0, 1))
        return jax.lax.conv_general_dilated(
            x, w_oihw, window_strides=(1, 1), padding=((1, 1), (1, 1)),
            dimension_numbers=("NCHW", "OIHW", "NCHW"))

    out = jax.nn.relu(conv(x_nchw, cw1))
    out = jax.nn.relu(conv(out, cw2) + x_nchw)
    flat = out.reshape(out.shape[0], -1)
    v = jax.nn.relu(flat @ fw1 + fb1[0])
    return v @ fw2 + fb2[0]


# --------------------------------- Main ------------------------------------ #

if __name__ == "__main__":
    B, C, H, W = 2, 64, 6, 6
    D_IN, D_HID, VALUE_SUPPORT = C * H * W, 512, 16

    key = jax.random.PRNGKey(0)
    kx, k1, k2, k3, k4, k5, k6 = jax.random.split(key, 7)

    # Input (PyTorch NCHW convention).
    x = jax.random.normal(kx, (B, C, H, W), jnp.float32)

    # Deterministic synthetic parameters (shapes from the module's __init__).
    # TinyBlock convs use bias=False (matches the PyTorch spec); Linears have bias.
    conv_scale = 1.0 / (3 * 3 * C) ** 0.5
    cw1 = jax.random.normal(k1, (3, 3, C, C), jnp.float32) * conv_scale
    cw2 = jax.random.normal(k2, (3, 3, C, C), jnp.float32) * conv_scale
    fw1 = jax.random.normal(k3, (D_IN, D_HID), jnp.float32) * (1.0 / D_IN ** 0.5)
    fb1 = jax.random.normal(k4, (1, D_HID), jnp.float32) * 0.01
    fw2 = jax.random.normal(k5, (D_HID, VALUE_SUPPORT), jnp.float32) * (1.0 / D_HID ** 0.5)
    fb2 = jax.random.normal(k6, (1, VALUE_SUPPORT), jnp.float32) * 0.01

    params = (cw1, cw2, fw1, fb1, fw2, fb2)
    prepared = prepare_params(params, (H, W))     # one-time weight preprocessing

    y = jax.block_until_ready(tiny_value_forward(x, prepared))
    y_ref = jax.block_until_ready(tiny_value_reference(x, params))

    assert y.shape == (B, VALUE_SUPPORT), y.shape
    # bf16 FC1 weights (f32 accumulation): loosen tolerance vs. the f32 reference.
    assert jnp.allclose(y, y_ref, atol=3e-2, rtol=3e-2), \
        f"max abs err {jnp.max(jnp.abs(y - y_ref))}"

    print("KERNEL_OK")
</pallas_src>

<mosaic_0001>
module attributes {stable_mosaic.version = 11 : i64} {
  func.func @tiny_value_kernel(%arg0: i32, %arg1: memref<2x6x6x64xf32, #tpu.memory_space<vmem>>, %arg2: memref<576x64xf32, #tpu.memory_space<vmem>>, %arg3: memref<576x64xf32, #tpu.memory_space<vmem>>, %arg4: memref<6x384x512xbf16, #tpu.memory_space<any>>, %arg5: memref<1x512xf32, #tpu.memory_space<vmem>>, %arg6: memref<512x16xf32, #tpu.memory_space<vmem>>, %arg7: memref<1x16xf32, #tpu.memory_space<vmem>>, %arg8: memref<2x16xf32, #tpu.memory_space<vmem>>, %arg9: memref<2x8x8x64xf32, #tpu.memory_space<vmem>>, %arg10: memref<72x576xf32, #tpu.memory_space<vmem>>, %arg11: memref<2x6x6x64xf32, #tpu.memory_space<vmem>>, %arg12: memref<6x384x512xbf16, #tpu.memory_space<vmem>>, %arg13: memref<6x!tpu.dma_semaphore, #tpu.memory_space<semaphore_mem>>) attributes {dimension_semantics = [#tpu.dimension_semantics<arbitrary>], iteration_bounds = array<i64: 1>, scalar_prefetch = 0 : i64, scratch_operands = 5 : i64, tpu.core_type = #tpu.core_type<tc>, window_params = [{pipeline_mode = #tpu.pipeline_mode<synchronous>, transform_indices = @transform_0, window_bounds = array<i64: 2, 6, 6, 64>}, {pipeline_mode = #tpu.pipeline_mode<synchronous>, transform_indices = @transform_1, window_bounds = array<i64: 576, 64>}, {pipeline_mode = #tpu.pipeline_mode<synchronous>, transform_indices = @transform_2, window_bounds = array<i64: 576, 64>}, {}, {pipeline_mode = #tpu.pipeline_mode<synchronous>, transform_indices = @transform_4, window_bounds = array<i64: 1, 512>}, {pipeline_mode = #tpu.pipeline_mode<synchronous>, transform_indices = @transform_5, window_bounds = array<i64: 512, 16>}, {pipeline_mode = #tpu.pipeline_mode<synchronous>, transform_indices = @transform_6, window_bounds = array<i64: 1, 16>}, {pipeline_mode = #tpu.pipeline_mode<synchronous>, transform_indices = @transform_7, window_bounds = array<i64: 2, 16>}]} {
    %c0_i32 = arith.constant 0 : i32
    %c0_i32_0 = arith.constant 0 : i32
    %c0_i32_1 = arith.constant 0 : i32
    %c0_i32_2 = arith.constant 0 : i32
    %c0_i32_3 = arith.constant 0 : i32
    %0 = tpu.memref_slice %arg4[%c0_i32, %c0_i32_2, %c0_i32_3] : memref<6x384x512xbf16, #tpu.memory_space<any>> -> memref<1x384x512xbf16, #tpu.memory_space<any>>
    %1 = tpu.memref_squeeze %0 : memref<1x384x512xbf16, #tpu.memory_space<any>> -> memref<384x512xbf16, #tpu.memory_space<any>>
    %c0_i32_4 = arith.constant 0 : i32
    %c0_i32_5 = arith.constant 0 : i32
    %2 = tpu.memref_slice %arg12[%c0_i32_0, %c0_i32_4, %c0_i32_5] : memref<6x384x512xbf16, #tpu.memory_space<vmem>> -> memref<1x384x512xbf16, #tpu.memory_space<vmem>>
    %3 = tpu.memref_squeeze %2 : memref<1x384x512xbf16, #tpu.memory_space<vmem>> -> memref<384x512xbf16, #tpu.memory_space<vmem>>
    %4 = tpu.memref_slice %arg13[%c0_i32_1] : memref<6x!tpu.dma_semaphore, #tpu.memory_space<semaphore_mem>> -> memref<1x!tpu.dma_semaphore, #tpu.memory_space<semaphore_mem>>
    %5 = tpu.memref_squeeze %4 : memref<1x!tpu.dma_semaphore, #tpu.memory_space<semaphore_mem>> -> memref<!tpu.dma_semaphore, #tpu.memory_space<semaphore_mem>>
    tpu.enqueue_dma source(%1 : memref<384x512xbf16, #tpu.memory_space<any>>) target(%3 : memref<384x512xbf16, #tpu.memory_space<vmem>>) target_semaphore(%5 : memref<!tpu.dma_semaphore, #tpu.memory_space<semaphore_mem>>)
    %c1_i32 = arith.constant 1 : i32
    %c1_i32_6 = arith.constant 1 : i32
    %c1_i32_7 = arith.constant 1 : i32
    %c0_i32_8 = arith.constant 0 : i32
    %c0_i32_9 = arith.constant 0 : i32
    %6 = tpu.memref_slice %arg4[%c1_i32, %c0_i32_8, %c0_i32_9] : memref<6x384x512xbf16, #tpu.memory_space<any>> -> memref<1x384x512xbf16, #tpu.memory_space<any>>
    %7 = tpu.memref_squeeze %6 : memref<1x384x512xbf16, #tpu.memory_space<any>> -> memref<384x512xbf16, #tpu.memory_space<any>>
    %c0_i32_10 = arith.constant 0 : i32
    %c0_i32_11 = arith.constant 0 : i32
    %8 = tpu.memref_slice %arg12[%c1_i32_6, %c0_i32_10, %c0_i32_11] : memref<6x384x512xbf16, #tpu.memory_space<vmem>> -> memref<1x384x512xbf16, #tpu.memory_space<vmem>>
    %9 = tpu.memref_squeeze %8 : memref<1x384x512xbf16, #tpu.memory_space<vmem>> -> memref<384x512xbf16, #tpu.memory_space<vmem>>
    %10 = tpu.memref_slice %arg13[%c1_i32_7] : memref<6x!tpu.dma_semaphore, #tpu.memory_space<semaphore_mem>> -> memref<1x!tpu.dma_semaphore, #tpu.memory_space<semaphore_mem>>
    %11 = tpu.memref_squeeze %10 : memref<1x!tpu.dma_semaphore, #tpu.memory_space<semaphore_mem>> -> memref<!tpu.dma_semaphore, #tpu.memory_space<semaphore_mem>>
    tpu.enqueue_dma source(%7 : memref<384x512xbf16, #tpu.memory_space<any>>) target(%9 : memref<384x512xbf16, #tpu.memory_space<vmem>>) target_semaphore(%11 : memref<!tpu.dma_semaphore, #tpu.memory_space<semaphore_mem>>)
    %c2_i32 = arith.constant 2 : i32
    %c2_i32_12 = arith.constant 2 : i32
    %c2_i32_13 = arith.constant 2 : i32
    %c0_i32_14 = arith.constant 0 : i32
    %c0_i32_15 = arith.constant 0 : i32
    %12 = tpu.memref_slice %arg4[%c2_i32, %c0_i32_14, %c0_i32_15] : memref<6x384x512xbf16, #tpu.memory_space<any>> -> memref<1x384x512xbf16, #tpu.memory_space<any>>
    %13 = tpu.memref_squeeze %12 : memref<1x384x512xbf16, #tpu.memory_space<any>> -> memref<384x512xbf16, #tpu.memory_space<any>>
    %c0_i32_16 = arith.constant 0 : i32
    %c0_i32_17 = arith.constant 0 : i32
    %14 = tpu.memref_slice %arg12[%c2_i32_12, %c0_i32_16, %c0_i32_17] : memref<6x384x512xbf16, #tpu.memory_space<vmem>> -> memref<1x384x512xbf16, #tpu.memory_space<vmem>>
    %15 = tpu.memref_squeeze %14 : memref<1x384x512xbf16, #tpu.memory_space<vmem>> -> memref<384x512xbf16, #tpu.memory_space<vmem>>
    %16 = tpu.memref_slice %arg13[%c2_i32_13] : memref<6x!tpu.dma_semaphore, #tpu.memory_space<semaphore_mem>> -> memref<1x!tpu.dma_semaphore, #tpu.memory_space<semaphore_mem>>
    %17 = tpu.memref_squeeze %16 : memref<1x!tpu.dma_semaphore, #tpu.memory_space<semaphore_mem>> -> memref<!tpu.dma_semaphore, #tpu.memory_space<semaphore_mem>>
    tpu.enqueue_dma source(%13 : memref<384x512xbf16, #tpu.memory_space<any>>) target(%15 : memref<384x512xbf16, #tpu.memory_space<vmem>>) target_semaphore(%17 : memref<!tpu.dma_semaphore, #tpu.memory_space<semaphore_mem>>)
    %c3_i32 = arith.constant 3 : i32
    %c3_i32_18 = arith.constant 3 : i32
    %c3_i32_19 = arith.constant 3 : i32
    %c0_i32_20 = arith.constant 0 : i32
    %c0_i32_21 = arith.constant 0 : i32
    %18 = tpu.memref_slice %arg4[%c3_i32, %c0_i32_20, %c0_i32_21] : memref<6x384x512xbf16, #tpu.memory_space<any>> -> memref<1x384x512xbf16, #tpu.memory_space<any>>
    %19 = tpu.memref_squeeze %18 : memref<1x384x512xbf16, #tpu.memory_space<any>> -> memref<384x512xbf16, #tpu.memory_space<any>>
    %c0_i32_22 = arith.constant 0 : i32
    %c0_i32_23 = arith.constant 0 : i32
    %20 = tpu.memref_slice %arg12[%c3_i32_18, %c0_i32_22, %c0_i32_23] : memref<6x384x512xbf16, #tpu.memory_space<vmem>> -> memref<1x384x512xbf16, #tpu.memory_space<vmem>>
    %21 = tpu.memref_squeeze %20 : memref<1x384x512xbf16, #tpu.memory_space<vmem>> -> memref<384x512xbf16, #tpu.memory_space<vmem>>
    %22 = tpu.memref_slice %arg13[%c3_i32_19] : memref<6x!tpu.dma_semaphore, #tpu.memory_space<semaphore_mem>> -> memref<1x!tpu.dma_semaphore, #tpu.memory_space<semaphore_mem>>
    %23 = tpu.memref_squeeze %22 : memref<1x!tpu.dma_semaphore, #tpu.memory_space<semaphore_mem>> -> memref<!tpu.dma_semaphore, #tpu.memory_space<semaphore_mem>>
    tpu.enqueue_dma source(%19 : memref<384x512xbf16, #tpu.memory_space<any>>) target(%21 : memref<384x512xbf16, #tpu.memory_space<vmem>>) target_semaphore(%23 : memref<!tpu.dma_semaphore, #tpu.memory_space<semaphore_mem>>)
    %c4_i32 = arith.constant 4 : i32
    %c4_i32_24 = arith.constant 4 : i32
    %c4_i32_25 = arith.constant 4 : i32
    %c0_i32_26 = arith.constant 0 : i32
    %c0_i32_27 = arith.constant 0 : i32
    %24 = tpu.memref_slice %arg4[%c4_i32, %c0_i32_26, %c0_i32_27] : memref<6x384x512xbf16, #tpu.memory_space<any>> -> memref<1x384x512xbf16, #tpu.memory_space<any>>
    %25 = tpu.memref_squeeze %24 : memref<1x384x512xbf16, #tpu.memory_space<any>> -> memref<384x512xbf16, #tpu.memory_space<any>>
    %c0_i32_28 = arith.constant 0 : i32
    %c0_i32_29 = arith.constant 0 : i32
    %26 = tpu.memref_slice %arg12[%c4_i32_24, %c0_i32_28, %c0_i32_29] : memref<6x384x512xbf16, #tpu.memory_space<vmem>> -> memref<1x384x512xbf16, #tpu.memory_space<vmem>>
    %27 = tpu.memref_squeeze %26 : memref<1x384x512xbf16, #tpu.memory_space<vmem>> -> memref<384x512xbf16, #tpu.memory_space<vmem>>
    %28 = tpu.memref_slice %arg13[%c4_i32_25] : memref<6x!tpu.dma_semaphore, #tpu.memory_space<semaphore_mem>> -> memref<1x!tpu.dma_semaphore, #tpu.memory_space<semaphore_mem>>
    %29 = tpu.memref_squeeze %28 : memref<1x!tpu.dma_semaphore, #tpu.memory_space<semaphore_mem>> -> memref<!tpu.dma_semaphore, #tpu.memory_space<semaphore_mem>>
    tpu.enqueue_dma source(%25 : memref<384x512xbf16, #tpu.memory_space<any>>) target(%27 : memref<384x512xbf16, #tpu.memory_space<vmem>>) target_semaphore(%29 : memref<!tpu.dma_semaphore, #tpu.memory_space<semaphore_mem>>)
    %c5_i32 = arith.constant 5 : i32
    %c5_i32_30 = arith.constant 5 : i32
    %c5_i32_31 = arith.constant 5 : i32
    %c0_i32_32 = arith.constant 0 : i32
    %c0_i32_33 = arith.constant 0 : i32
    %30 = tpu.memref_slice %arg4[%c5_i32, %c0_i32_32, %c0_i32_33] : memref<6x384x512xbf16, #tpu.memory_space<any>> -> memref<1x384x512xbf16, #tpu.memory_space<any>>
    %31 = tpu.memref_squeeze %30 : memref<1x384x512xbf16, #tpu.memory_space<any>> -> memref<384x512xbf16, #tpu.memory_space<any>>
    %c0_i32_34 = arith.constant 0 : i32
    %c0_i32_35 = arith.constant 0 : i32
    %32 = tpu.memref_slice %arg12[%c5_i32_30, %c0_i32_34, %c0_i32_35] : memref<6x384x512xbf16, #tpu.memory_space<vmem>> -> memref<1x384x512xbf16, #tpu.memory_space<vmem>>
    %33 = tpu.memref_squeeze %32 : memref<1x384x512xbf16, #tpu.memory_space<vmem>> -> memref<384x512xbf16, #tpu.memory_space<vmem>>
    %34 = tpu.memref_slice %arg13[%c5_i32_31] : memref<6x!tpu.dma_semaphore, #tpu.memory_space<semaphore_mem>> -> memref<1x!tpu.dma_semaphore, #tpu.memory_space<semaphore_mem>>
    %35 = tpu.memref_squeeze %34 : memref<1x!tpu.dma_semaphore, #tpu.memory_space<semaphore_mem>> -> memref<!tpu.dma_semaphore, #tpu.memory_space<semaphore_mem>>
    tpu.enqueue_dma source(%31 : memref<384x512xbf16, #tpu.memory_space<any>>) target(%33 : memref<384x512xbf16, #tpu.memory_space<vmem>>) target_semaphore(%35 : memref<!tpu.dma_semaphore, #tpu.memory_space<semaphore_mem>>)
    %cst = arith.constant 0.000000e+00 : f32
    %36 = vector.broadcast %cst : f32 to vector<2x8x8x64xf32>
    %c0 = arith.constant 0 : index
    %c0_36 = arith.constant 0 : index
    %c0_37 = arith.constant 0 : index
    %c0_38 = arith.constant 0 : index
    %37 = vector.load %arg9[%c0, %c0_36, %c0_37, %c0_38] : memref<2x8x8x64xf32, #tpu.memory_space<vmem>>, vector<2x8x8x64xf32>
    tpu.vector_store %arg9[%c0, %c0_36, %c0_37, %c0_38], %36 {strides = array<i32>} : memref<2x8x8x64xf32, #tpu.memory_space<vmem>>, vector<2x8x8x64xf32>,
    %c0_39 = arith.constant 0 : index
    %c0_40 = arith.constant 0 : index
    %c0_41 = arith.constant 0 : index
    %c0_42 = arith.constant 0 : index
    %38 = vector.load %arg1[%c0_39, %c0_40, %c0_41, %c0_42] : memref<2x6x6x64xf32, #tpu.memory_space<vmem>>, vector<2x6x6x64xf32>
    %39 = vector.shape_cast %38 : vector<2x6x6x64xf32> to vector<72x64xf32>
    %c0_43 = arith.constant 0 : index
    %c0_44 = arith.constant 0 : index
    %c0_45 = arith.constant 0 : index
    %c0_46 = arith.constant 0 : index
    %40 = vector.load %arg1[%c0_43, %c0_44, %c0_45, %c0_46] : memref<2x6x6x64xf32, #tpu.memory_space<vmem>>, vector<2x6x6x64xf32>
    %c0_47 = arith.constant 0 : index
    %c1 = arith.constant 1 : index
    %c1_48 = arith.constant 1 : index
    %c0_49 = arith.constant 0 : index
    %41 = vector.load %arg9[%c0_47, %c1, %c1_48, %c0_49] : memref<2x8x8x64xf32, #tpu.memory_space<vmem>>, vector<2x6x6x64xf32>
    tpu.vector_store %arg9[%c0_47, %c1, %c1_48, %c0_49], %40 {strides = array<i32>} : memref<2x8x8x64xf32, #tpu.memory_space<vmem>>, vector<2x6x6x64xf32>,
    %c0_50 = arith.constant 0 : index
    %c0_51 = arith.constant 0 : index
    %c0_52 = arith.constant 0 : index
    %c0_53 = arith.constant 0 : index
    %42 = vector.load %arg9[%c0_50, %c0_51, %c0_52, %c0_53] : memref<2x8x8x64xf32, #tpu.memory_space<vmem>>, vector<2x6x6x64xf32>
    %43 = vector.shape_cast %42 : vector<2x6x6x64xf32> to vector<72x64xf32>
    %c0_54 = arith.constant 0 : index
    %c0_55 = arith.constant 0 : index
    %44 = vector.load %arg10[%c0_54, %c0_55] : memref<72x576xf32, #tpu.memory_space<vmem>>, vector<72x64xf32>
    tpu.vector_store %arg10[%c0_54, %c0_55], %43 {strides = array<i32>} : memref<72x576xf32, #tpu.memory_space<vmem>>, vector<72x64xf32>,
    %c0_56 = arith.constant 0 : index
    %c0_57 = arith.constant 0 : index
    %c1_58 = arith.constant 1 : index
    %c0_59 = arith.constant 0 : index
    %45 = vector.load %arg9[%c0_56, %c0_57, %c1_58, %c0_59] : memref<2x8x8x64xf32, #tpu.memory_space<vmem>>, vector<2x6x6x64xf32>
    %46 = vector.shape_cast %45 : vector<2x6x6x64xf32> to vector<72x64xf32>
    %c0_60 = arith.constant 0 : index
    %c64 = arith.constant 64 : index
    %47 = vector.load %arg10[%c0_60, %c64] : memref<72x576xf32, #tpu.memory_space<vmem>>, vector<72x64xf32>
    tpu.vector_store %arg10[%c0_60, %c64], %46 {strides = array<i32>} : memref<72x576xf32, #tpu.memory_space<vmem>>, vector<72x64xf32>,
    %c0_61 = arith.constant 0 : index
    %c0_62 = arith.constant 0 : index
    %c2 = arith.constant 2 : index
    %c0_63 = arith.constant 0 : index
    %48 = vector.load %arg9[%c0_61, %c0_62, %c2, %c0_63] : memref<2x8x8x64xf32, #tpu.memory_space<vmem>>, vector<2x6x6x64xf32>
    %49 = vector.shape_cast %48 : vector<2x6x6x64xf32> to vector<72x64xf32>
    %c0_64 = arith.constant 0 : index
    %c128 = arith.constant 128 : index
    %50 = vector.load %arg10[%c0_64, %c128] : memref<72x576xf32, #tpu.memory_space<vmem>>, vector<72x64xf32>
    tpu.vector_store %arg10[%c0_64, %c128], %49 {strides = array<i32>} : memref<72x576xf32, #tpu.memory_space<vmem>>, vector<72x64xf32>,
    %c0_65 = arith.constant 0 : index
    %c1_66 = arith.constant 1 : index
    %c0_67 = arith.constant 0 : index
    %c0_68 = arith.constant 0 : index
    %51 = vector.load %arg9[%c0_65, %c1_66, %c0_67, %c0_68] : memref<2x8x8x64xf32, #tpu.memory_space<vmem>>, vector<2x6x6x64xf32>
    %52 = vector.shape_cast %51 : vector<2x6x6x64xf32> to vector<72x64xf32>
    %c0_69 = arith.constant 0 : index
    %c192 = arith.constant 192 : index
    %53 = vector.load %arg10[%c0_69, %c192] : memref<72x576xf32, #tpu.memory_space<vmem>>, vector<72x64xf32>
    tpu.vector_store %arg10[%c0_69, %c192], %52 {strides = array<i32>} : memref<72x576xf32, #tpu.memory_space<vmem>>, vector<72x64xf32>,
    %c0_70 = arith.constant 0 : index
    %c1_71 = arith.constant 1 : index
    %c1_72 = arith.constant 1 : index
    %c0_73 = arith.constant 0 : index
    %54 = vector.load %arg9[%c0_70, %c1_71, %c1_72, %c0_73] : memref<2x8x8x64xf32, #tpu.memory_space<vmem>>, vector<2x6x6x64xf32>
    %55 = vector.shape_cast %54 : vector<2x6x6x64xf32> to vector<72x64xf32>
    %c0_74 = arith.constant 0 : index
    %c256 = arith.constant 256 : index
    %56 = vector.load %arg10[%c0_74, %c256] : memref<72x576xf32, #tpu.memory_space<vmem>>, vector<72x64xf32>
    tpu.vector_store %arg10[%c0_74, %c256], %55 {strides = array<i32>} : memref<72x576xf32, #tpu.memory_space<vmem>>, vector<72x64xf32>,
    %c0_75 = arith.constant 0 : index
    %c1_76 = arith.constant 1 : index
    %c2_77 = arith.constant 2 : index
    %c0_78 = arith.constant 0 : index
    %57 = vector.load %arg9[%c0_75, %c1_76, %c2_77, %c0_78] : memref<2x8x8x64xf32, #tpu.memory_space<vmem>>, vector<2x6x6x64xf32>
    %58 = vector.shape_cast %57 : vector<2x6x6x64xf32> to vector<72x64xf32>
    %c0_79 = arith.constant 0 : index
    %c320 = arith.constant 320 : index
    %59 = vector.load %arg10[%c0_79, %c320] : memref<72x576xf32, #tpu.memory_space<vmem>>, vector<72x64xf32>
    tpu.vector_store %arg10[%c0_79, %c320], %58 {strides = array<i32>} : memref<72x576xf32, #tpu.memory_space<vmem>>, vector<72x64xf32>,
    %c0_80 = arith.constant 0 : index
    %c2_81 = arith.constant 2 : index
    %c0_82 = arith.constant 0 : index
    %c0_83 = arith.constant 0 : index
    %60 = vector.load %arg9[%c0_80, %c2_81, %c0_82, %c0_83] : memref<2x8x8x64xf32, #tpu.memory_space<vmem>>, vector<2x6x6x64xf32>
    %61 = vector.shape_cast %60 : vector<2x6x6x64xf32> to vector<72x64xf32>
    %c0_84 = arith.constant 0 : index
    %c384 = arith.constant 384 : index
    %62 = vector.load %arg10[%c0_84, %c384] : memref<72x576xf32, #tpu.memory_space<vmem>>, vector<72x64xf32>
    tpu.vector_store %arg10[%c0_84, %c384], %61 {strides = array<i32>} : memref<72x576xf32, #tpu.memory_space<vmem>>, vector<72x64xf32>,
    %c0_85 = arith.constant 0 : index
    %c2_86 = arith.constant 2 : index
    %c1_87 = arith.constant 1 : index
    %c0_88 = arith.constant 0 : index
    %63 = vector.load %arg9[%c0_85, %c2_86, %c1_87, %c0_88] : memref<2x8x8x64xf32, #tpu.memory_space<vmem>>, vector<2x6x6x64xf32>
    %64 = vector.shape_cast %63 : vector<2x6x6x64xf32> to vector<72x64xf32>
    %c0_89 = arith.constant 0 : index
    %c448 = arith.constant 448 : index
    %65 = vector.load %arg10[%c0_89, %c448] : memref<72x576xf32, #tpu.memory_space<vmem>>, vector<72x64xf32>
    tpu.vector_store %arg10[%c0_89, %c448], %64 {strides = array<i32>} : memref<72x576xf32, #tpu.memory_space<vmem>>, vector<72x64xf32>,
    %c0_90 = arith.constant 0 : index
    %c2_91 = arith.constant 2 : index
    %c2_92 = arith.constant 2 : index
    %c0_93 = arith.constant 0 : index
    %66 = vector.load %arg9[%c0_90, %c2_91, %c2_92, %c0_93] : memref<2x8x8x64xf32, #tpu.memory_space<vmem>>, vector<2x6x6x64xf32>
    %67 = vector.shape_cast %66 : vector<2x6x6x64xf32> to vector<72x64xf32>
    %c0_94 = arith.constant 0 : index
    %c512 = arith.constant 512 : index
    %68 = vector.load %arg10[%c0_94, %c512] : memref<72x576xf32, #tpu.memory_space<vmem>>, vector<72x64xf32>
    tpu.vector_store %arg10[%c0_94, %c512], %67 {strides = array<i32>} : memref<72x576xf32, #tpu.memory_space<vmem>>, vector<72x64xf32>,
    %c0_95 = arith.constant 0 : index
    %c0_96 = arith.constant 0 : index
    %69 = vector.load %arg10[%c0_95, %c0_96] : memref<72x576xf32, #tpu.memory_space<vmem>>, vector<72x576xf32>
    %c0_97 = arith.constant 0 : index
    %c0_98 = arith.constant 0 : index
    %70 = vector.load %arg2[%c0_97, %c0_98] : memref<576x64xf32, #tpu.memory_space<vmem>>, vector<576x64xf32>
    %cst_99 = arith.constant dense<0.000000e+00> : vector<72x64xf32>
    %71 = tpu.matmul %69, %70, %cst_99 {dimension_numbers = #tpu.dot_dimension_numbers<[1], [0], [0], [1], [0, 0, 1, 1], [], []>} : vector<72x576xf32>, vector<576x64xf32>, vector<72x64xf32> -> vector<72x64xf32>
    %cst_100 = arith.constant 0.000000e+00 : f32
    %72 = vector.broadcast %cst_100 : f32 to vector<72x64xf32>
    %73 = arith.maximumf %71, %72 : vector<72x64xf32>
    %74 = vector.shape_cast %73 : vector<72x64xf32> to vector<2x6x6x64xf32>
    %c0_101 = arith.constant 0 : index
    %c1_102 = arith.constant 1 : index
    %c1_103 = arith.constant 1 : index
    %c0_104 = arith.constant 0 : index
    %75 = vector.load %arg9[%c0_101, %c1_102, %c1_103, %c0_104] : memref<2x8x8x64xf32, #tpu.memory_space<vmem>>, vector<2x6x6x64xf32>
    tpu.vector_store %arg9[%c0_101, %c1_102, %c1_103, %c0_104], %74 {strides = array<i32>} : memref<2x8x8x64xf32, #tpu.memory_space<vmem>>, vector<2x6x6x64xf32>,
    %c0_105 = arith.constant 0 : index
    %c0_106 = arith.constant 0 : index
    %c0_107 = arith.constant 0 : index
    %c0_108 = arith.constant 0 : index
    %76 = vector.load %arg9[%c0_105, %c0_106, %c0_107, %c0_108] : memref<2x8x8x64xf32, #tpu.memory_space<vmem>>, vector<2x6x6x64xf32>
    %77 = vector.shape_cast %76 : vector<2x6x6x64xf32> to vector<72x64xf32>
    %c0_109 = arith.constant 0 : index
    %c0_110 = arith.constant 0 : index
    %78 = vector.load %arg10[%c0_109, %c0_110] : memref<72x576xf32, #tpu.memory_space<vmem>>, vector<72x64xf32>
    tpu.vector_store %arg10[%c0_109, %c0_110], %77 {strides = array<i32>} : memref<72x576xf32, #tpu.memory_space<vmem>>, vector<72x64xf32>,
    %c0_111 = arith.constant 0 : index
    %c0_112 = arith.constant 0 : index
    %c1_113 = arith.constant 1 : index
    %c0_114 = arith.constant 0 : index
    %79 = vector.load %arg9[%c0_111, %c0_112, %c1_113, %c0_114] : memref<2x8x8x64xf32, #tpu.memory_space<vmem>>, vector<2x6x6x64xf32>
    %80 = vector.shape_cast %79 : vector<2x6x6x64xf32> to vector<72x64xf32>
    %c0_115 = arith.constant 0 : index
    %c64_116 = arith.constant 64 : index
    %81 = vector.load %arg10[%c0_115, %c64_116] : memref<72x576xf32, #tpu.memory_space<vmem>>, vector<72x64xf32>
    tpu.vector_store %arg10[%c0_115, %c64_116], %80 {strides = array<i32>} : memref<72x576xf32, #tpu.memory_space<vmem>>, vector<72x64xf32>,
    %c0_117 = arith.constant 0 : index
    %c0_118 = arith.constant 0 : index
    %c2_119 = arith.constant 2 : index
    %c0_120 = arith.constant 0 : index
    %82 = vector.load %arg9[%c0_117, %c0_118, %c2_119, %c0_120] : memref<2x8x8x64xf32, #tpu.memory_space<vmem>>, vector<2x6x6x64xf32>
    %83 = vector.shape_cast %82 : vector<2x6x6x64xf32> to vector<72x64xf32>
    %c0_121 = arith.constant 0 : index
    %c128_122 = arith.constant 128 : index
    %84 = vector.load %arg10[%c0_121, %c128_122] : memref<72x576xf32, #tpu.memory_space<vmem>>, vector<72x64xf32>
    tpu.vector_store %arg10[%c0_121, %c128_122], %83 {strides = array<i32>} : memref<72x576xf32, #tpu.memory_space<vmem>>, vector<72x64xf32>,
    %c0_123 = arith.constant 0 : index
    %c1_124 = arith.constant 1 : index
    %c0_125 = arith.constant 0 : index
    %c0_126 = arith.constant 0 : index
    %85 = vector.load %arg9[%c0_123, %c1_124, %c0_125, %c0_126] : memref<2x8x8x64xf32, #tpu.memory_space<vmem>>, vector<2x6x6x64xf32>
    %86 = vector.shape_cast %85 : vector<2x6x6x64xf32> to vector<72x64xf32>
    %c0_127 = arith.constant 0 : index
    %c192_128 = arith.constant 192 : index
    %87 = vector.load %arg10[%c0_127, %c192_128] : memref<72x576xf32, #tpu.memory_space<vmem>>, vector<72x64xf32>
    tpu.vector_store %arg10[%c0_127, %c192_128], %86 {strides = array<i32>} : memref<72x576xf32, #tpu.memory_space<vmem>>, vector<72x64xf32>,
    %c0_129 = arith.constant 0 : index
    %c1_130 = arith.constant 1 : index
    %c1_131 = arith.constant 1 : index
    %c0_132 = arith.constant 0 : index
    %88 = vector.load %arg9[%c0_129, %c1_130, %c1_131, %c0_132] : memref<2x8x8x64xf32, #tpu.memory_space<vmem>>, vector<2x6x6x64xf32>
    %89 = vector.shape_cast %88 : vector<2x6x6x64xf32> to vector<72x64xf32>
    %c0_133 = arith.constant 0 : index
    %c256_134 = arith.constant 256 : index
    %90 = vector.load %arg10[%c0_133, %c256_134] : memref<72x576xf32, #tpu.memory_space<vmem>>, vector<72x64xf32>
    tpu.vector_store %arg10[%c0_133, %c256_134], %89 {strides = array<i32>} : memref<72x576xf32, #tpu.memory_space<vmem>>, vector<72x64xf32>,
    %c0_135 = arith.constant 0 : index
    %c1_136 = arith.constant 1 : index
    %c2_137 = arith.constant 2 : index
    %c0_138 = arith.constant 0 : index
    %91 = vector.load %arg9[%c0_135, %c1_136, %c2_137, %c0_138] : memref<2x8x8x64xf32, #tpu.memory_space<vmem>>, vector<2x6x6x64xf32>
    %92 = vector.shape_cast %91 : vector<2x6x6x64xf32> to vector<72x64xf32>
    %c0_139 = arith.constant 0 : index
    %c320_140 = arith.constant 320 : index
    %93 = vector.load %arg10[%c0_139, %c320_140] : memref<72x576xf32, #tpu.memory_space<vmem>>, vector<72x64xf32>
    tpu.vector_store %arg10[%c0_139, %c320_140], %92 {strides = array<i32>} : memref<72x576xf32, #tpu.memory_space<vmem>>, vector<72x64xf32>,
    %c0_141 = arith.constant 0 : index
    %c2_142 = arith.constant 2 : index
    %c0_143 = arith.constant 0 : index
    %c0_144 = arith.constant 0 : index
    %94 = vector.load %arg9[%c0_141, %c2_142, %c0_143, %c0_144] : memref<2x8x8x64xf32, #tpu.memory_space<vmem>>, vector<2x6x6x64xf32>
    %95 = vector.shape_cast %94 : vector<2x6x6x64xf32> to vector<72x64xf32>
    %c0_145 = arith.constant 0 : index
    %c384_146 = arith.constant 384 : index
    %96 = vector.load %arg10[%c0_145, %c384_146] : memref<72x576xf32, #tpu.memory_space<vmem>>, vector<72x64xf32>
    tpu.vector_store %arg10[%c0_145, %c384_146], %95 {strides = array<i32>} : memref<72x576xf32, #tpu.memory_space<vmem>>, vector<72x64xf32>,
    %c0_147 = arith.constant 0 : index
    %c2_148 = arith.constant 2 : index
    %c1_149 = arith.constant 1 : index
    %c0_150 = arith.constant 0 : index
    %97 = vector.load %arg9[%c0_147, %c2_148, %c1_149, %c0_150] : memref<2x8x8x64xf32, #tpu.memory_space<vmem>>, vector<2x6x6x64xf32>
    %98 = vector.shape_cast %97 : vector<2x6x6x64xf32> to vector<72x64xf32>
    %c0_151 = arith.constant 0 : index
    %c448_152 = arith.constant 448 : index
    %99 = vector.load %arg10[%c0_151, %c448_152] : memref<72x576xf32, #tpu.memory_space<vmem>>, vector<72x64xf32>
    tpu.vector_store %arg10[%c0_151, %c448_152], %98 {strides = array<i32>} : memref<72x576xf32, #tpu.memory_space<vmem>>, vector<72x64xf32>,
    %c0_153 = arith.constant 0 : index
    %c2_154 = arith.constant 2 : index
    %c2_155 = arith.constant 2 : index
    %c0_156 = arith.constant 0 : index
    %100 = vector.load %arg9[%c0_153, %c2_154, %c2_155, %c0_156] : memref<2x8x8x64xf32, #tpu.memory_space<vmem>>, vector<2x6x6x64xf32>
    %101 = vector.shape_cast %100 : vector<2x6x6x64xf32> to vector<72x64xf32>
    %c0_157 = arith.constant 0 : index
    %c512_158 = arith.constant 512 : index
    %102 = vector.load %arg10[%c0_157, %c512_158] : memref<72x576xf32, #tpu.memory_space<vmem>>, vector<72x64xf32>
    tpu.vector_store %arg10[%c0_157, %c512_158], %101 {strides = array<i32>} : memref<72x576xf32, #tpu.memory_space<vmem>>, vector<72x64xf32>,
    %c0_159 = arith.constant 0 : index
    %c0_160 = arith.constant 0 : index
    %103 = vector.load %arg10[%c0_159, %c0_160] : memref<72x576xf32, #tpu.memory_space<vmem>>, vector<72x576xf32>
    %c0_161 = arith.constant 0 : index
    %c0_162 = arith.constant 0 : index
    %104 = vector.load %arg3[%c0_161, %c0_162] : memref<576x64xf32, #tpu.memory_space<vmem>>, vector<576x64xf32>
    %cst_163 = arith.constant dense<0.000000e+00> : vector<72x64xf32>
    %105 = tpu.matmul %103, %104, %cst_163 {dimension_numbers = #tpu.dot_dimension_numbers<[1], [0], [0], [1], [0, 0, 1, 1], [], []>} : vector<72x576xf32>, vector<576x64xf32>, vector<72x64xf32> -> vector<72x64xf32>
    %106 = arith.addf %105, %39 : vector<72x64xf32>
    %cst_164 = arith.constant 0.000000e+00 : f32
    %107 = vector.broadcast %cst_164 : f32 to vector<72x64xf32>
    %108 = arith.maximumf %106, %107 : vector<72x64xf32>
    %109 = vector.shape_cast %108 : vector<72x64xf32> to vector<2x6x6x64xf32>
    %c0_165 = arith.constant 0 : index
    %c0_166 = arith.constant 0 : index
    %c0_167 = arith.constant 0 : index
    %c0_168 = arith.constant 0 : index
    %110 = vector.load %arg11[%c0_165, %c0_166, %c0_167, %c0_168] : memref<2x6x6x64xf32, #tpu.memory_space<vmem>>, vector<2x6x6x64xf32>
    tpu.vector_store %arg11[%c0_165, %c0_166, %c0_167, %c0_168], %109 {strides = array<i32>} : memref<2x6x6x64xf32, #tpu.memory_space<vmem>>, vector<2x6x6x64xf32>,
    %cst_169 = arith.constant 0.000000e+00 : f32
    %111 = vector.broadcast %cst_169 : f32 to vector<2x512xf32>
    %c0_i32_170 = arith.constant 0 : i32
    %c0_i32_171 = arith.constant 0 : i32
    %c0_i32_172 = arith.constant 0 : i32
    %c0_i32_173 = arith.constant 0 : i32
    %c0_i32_174 = arith.constant 0 : i32
    %112 = tpu.memref_slice %arg4[%c0_i32_170, %c0_i32_173, %c0_i32_174] : memref<6x384x512xbf16, #tpu.memory_space<any>> -> memref<1x384x512xbf16, #tpu.memory_space<any>>
    %113 = tpu.memref_squeeze %112 : memref<1x384x512xbf16, #tpu.memory_space<any>> -> memref<384x512xbf16, #tpu.memory_space<any>>
    %c0_i32_175 = arith.constant 0 : i32
    %c0_i32_176 = arith.constant 0 : i32
    %114 = tpu.memref_slice %arg12[%c0_i32_171, %c0_i32_175, %c0_i32_176] : memref<6x384x512xbf16, #tpu.memory_space<vmem>> -> memref<1x384x512xbf16, #tpu.memory_space<vmem>>
    %115 = tpu.memref_squeeze %114 : memref<1x384x512xbf16, #tpu.memory_space<vmem>> -> memref<384x512xbf16, #tpu.memory_space<vmem>>
    %116 = tpu.memref_slice %arg13[%c0_i32_172] : memref<6x!tpu.dma_semaphore, #tpu.memory_space<semaphore_mem>> -> memref<1x!tpu.dma_semaphore, #tpu.memory_space<semaphore_mem>>
    %117 = tpu.memref_squeeze %116 : memref<1x!tpu.dma_semaphore, #tpu.memory_space<semaphore_mem>> -> memref<!tpu.dma_semaphore, #tpu.memory_space<semaphore_mem>>
    tpu.wait_dma2 semaphore(%117 : memref<!tpu.dma_semaphore, #tpu.memory_space<semaphore_mem>>) src(%113 : memref<384x512xbf16, #tpu.memory_space<any>>) dst(%115 : memref<384x512xbf16, #tpu.memory_space<vmem>>)
    %c0_177 = arith.constant 0 : index
    %c0_178 = arith.constant 0 : index
    %c0_179 = arith.constant 0 : index
    %c0_180 = arith.constant 0 : index
    %118 = vector.load %arg11[%c0_177, %c0_178, %c0_179, %c0_180] : memref<2x6x6x64xf32, #tpu.memory_space<vmem>>, vector<2x1x1x64xf32>
    %119 = vector.shape_cast %118 : vector<2x1x1x64xf32> to vector<2x64xf32>
    %120 = arith.truncf %119 : vector<2x64xf32> to vector<2x64xbf16>
    %c0_181 = arith.constant 0 : index
    %c0_182 = arith.constant 0 : index
    %c0_183 = arith.constant 0 : index
    %121 = vector.load %arg12[%c0_181, %c0_182, %c0_183] : memref<6x384x512xbf16, #tpu.memory_space<vmem>>, vector<1x64x512xbf16>
    %122 = vector.shape_cast %121 : vector<1x64x512xbf16> to vector<64x512xbf16>
    %cst_184 = arith.constant dense<0.000000e+00> : vector<2x512xf32>
    %123 = tpu.matmul %120, %122, %cst_184 {dimension_numbers = #tpu.dot_dimension_numbers<[1], [0], [0], [1], [0, 0, 1, 1], [], []>} : vector<2x64xbf16>, vector<64x512xbf16>, vector<2x512xf32> -> vector<2x512xf32>
    %124 = arith.addf %111, %123 : vector<2x512xf32>
    %c0_185 = arith.constant 0 : index
    %c0_186 = arith.constant 0 : index
    %c1_187 = arith.constant 1 : index
    %c0_188 = arith.constant 0 : index
    %125 = vector.load %arg11[%c0_185, %c0_186, %c1_187, %c0_188] : memref<2x6x6x64xf32, #tpu.memory_space<vmem>>, vector<2x1x1x64xf32>
    %126 = vector.shape_cast %125 : vector<2x1x1x64xf32> to vector<2x64xf32>
    %127 = arith.truncf %126 : vector<2x64xf32> to vector<2x64xbf16>
    %c0_189 = arith.constant 0 : index
    %c64_190 = arith.constant 64 : index
    %c0_191 = arith.constant 0 : index
    %128 = vector.load %arg12[%c0_189, %c64_190, %c0_191] : memref<6x384x512xbf16, #tpu.memory_space<vmem>>, vector<1x64x512xbf16>
    %129 = vector.shape_cast %128 : vector<1x64x512xbf16> to vector<64x512xbf16>
    %cst_192 = arith.constant dense<0.000000e+00> : vector<2x512xf32>
    %130 = tpu.matmul %127, %129, %cst_192 {dimension_numbers = #tpu.dot_dimension_numbers<[1], [0], [0], [1], [0, 0, 1, 1], [], []>} : vector<2x64xbf16>, vector<64x512xbf16>, vector<2x512xf32> -> vector<2x512xf32>
    %131 = arith.addf %124, %130 : vector<2x512xf32>
    %c0_193 = arith.constant 0 : index
    %c0_194 = arith.constant 0 : index
    %c2_195 = arith.constant 2 : index
    %c0_196 = arith.constant 0 : index
    %132 = vector.load %arg11[%c0_193, %c0_194, %c2_195, %c0_196] : memref<2x6x6x64xf32, #tpu.memory_space<vmem>>, vector<2x1x1x64xf32>
    %133 = vector.shape_cast %132 : vector<2x1x1x64xf32> to vector<2x64xf32>
    %134 = arith.truncf %133 : vector<2x64xf32> to vector<2x64xbf16>
    %c0_197 = arith.constant 0 : index
    %c128_198 = arith.constant 128 : index
    %c0_199 = arith.constant 0 : index
    %135 = vector.load %arg12[%c0_197, %c128_198, %c0_199] : memref<6x384x512xbf16, #tpu.memory_space<vmem>>, vector<1x64x512xbf16>
    %136 = vector.shape_cast %135 : vector<1x64x512xbf16> to vector<64x512xbf16>
    %cst_200 = arith.constant dense<0.000000e+00> : vector<2x512xf32>
    %137 = tpu.matmul %134, %136, %cst_200 {dimension_numbers = #tpu.dot_dimension_numbers<[1], [0], [0], [1], [0, 0, 1, 1], [], []>} : vector<2x64xbf16>, vector<64x512xbf16>, vector<2x512xf32> -> vector<2x512xf32>
    %138 = arith.addf %131, %137 : vector<2x512xf32>
    %c0_201 = arith.constant 0 : index
    %c0_202 = arith.constant 0 : index
    %c3 = arith.constant 3 : index
    %c0_203 = arith.constant 0 : index
    %139 = vector.load %arg11[%c0_201, %c0_202, %c3, %c0_203] : memref<2x6x6x64xf32, #tpu.memory_space<vmem>>, vector<2x1x1x64xf32>
    %140 = vector.shape_cast %139 : vector<2x1x1x64xf32> to vector<2x64xf32>
    %141 = arith.truncf %140 : vector<2x64xf32> to vector<2x64xbf16>
    %c0_204 = arith.constant 0 : index
    %c192_205 = arith.constant 192 : index
    %c0_206 = arith.constant 0 : index
    %142 = vector.load %arg12[%c0_204, %c192_205, %c0_206] : memref<6x384x512xbf16, #tpu.memory_space<vmem>>, vector<1x64x512xbf16>
    %143 = vector.shape_cast %142 : vector<1x64x512xbf16> to vector<64x512xbf16>
    %cst_207 = arith.constant dense<0.000000e+00> : vector<2x512xf32>
    %144 = tpu.matmul %141, %143, %cst_207 {dimension_numbers = #tpu.dot_dimension_numbers<[1], [0], [0], [1], [0, 0, 1, 1], [], []>} : vector<2x64xbf16>, vector<64x512xbf16>, vector<2x512xf32> -> vector<2x512xf32>
    %145 = arith.addf %138, %144 : vector<2x512xf32>
    %c0_208 = arith.constant 0 : index
    %c0_209 = arith.constant 0 : index
    %c4 = arith.constant 4 : index
    %c0_210 = arith.constant 0 : index
    %146 = vector.load %arg11[%c0_208, %c0_209, %c4, %c0_210] : memref<2x6x6x64xf32, #tpu.memory_space<vmem>>, vector<2x1x1x64xf32>
    %147 = vector.shape_cast %146 : vector<2x1x1x64xf32> to vector<2x64xf32>
    %148 = arith.truncf %147 : vector<2x64xf32> to vector<2x64xbf16>
    %c0_211 = arith.constant 0 : index
    %c256_212 = arith.constant 256 : index
    %c0_213 = arith.constant 0 : index
    %149 = vector.load %arg12[%c0_211, %c256_212, %c0_213] : memref<6x384x512xbf16, #tpu.memory_space<vmem>>, vector<1x64x512xbf16>
    %150 = vector.shape_cast %149 : vector<1x64x512xbf16> to vector<64x512xbf16>
    %cst_214 = arith.constant dense<0.000000e+00> : vector<2x512xf32>
    %151 = tpu.matmul %148, %150, %cst_214 {dimension_numbers = #tpu.dot_dimension_numbers<[1], [0], [0], [1], [0, 0, 1, 1], [], []>} : vector<2x64xbf16>, vector<64x512xbf16>, vector<2x512xf32> -> vector<2x512xf32>
    %152 = arith.addf %145, %151 : vector<2x512xf32>
    %c0_215 = arith.constant 0 : index
    %c0_216 = arith.constant 0 : index
    %c5 = arith.constant 5 : index
    %c0_217 = arith.constant 0 : index
    %153 = vector.load %arg11[%c0_215, %c0_216, %c5, %c0_217] : memref<2x6x6x64xf32, #tpu.memory_space<vmem>>, vector<2x1x1x64xf32>
    %154 = vector.shape_cast %153 : vector<2x1x1x64xf32> to vector<2x64xf32>
    %155 = arith.truncf %154 : vector<2x64xf32> to vector<2x64xbf16>
    %c0_218 = arith.constant 0 : index
    %c320_219 = arith.constant 320 : index
    %c0_220 = arith.constant 0 : index
    %156 = vector.load %arg12[%c0_218, %c320_219, %c0_220] : memref<6x384x512xbf16, #tpu.memory_space<vmem>>, vector<1x64x512xbf16>
    %157 = vector.shape_cast %156 : vector<1x64x512xbf16> to vector<64x512xbf16>
    %cst_221 = arith.constant dense<0.000000e+00> : vector<2x512xf32>
    %158 = tpu.matmul %155, %157, %cst_221 {dimension_numbers = #tpu.dot_dimension_numbers<[1], [0], [0], [1], [0, 0, 1, 1], [], []>} : vector<2x64xbf16>, vector<64x512xbf16>, vector<2x512xf32> -> vector<2x512xf32>
    %159 = arith.addf %152, %158 : vector<2x512xf32>
    %c1_i32_222 = arith.constant 1 : i32
    %c1_i32_223 = arith.constant 1 : i32
    %c1_i32_224 = arith.constant 1 : i32
    %c0_i32_225 = arith.constant 0 : i32
    %c0_i32_226 = arith.constant 0 : i32
    %160 = tpu.memref_slice %arg4[%c1_i32_222, %c0_i32_225, %c0_i32_226] : memref<6x384x512xbf16, #tpu.memory_space<any>> -> memref<1x384x512xbf16, #tpu.memory_space<any>>
    %161 = tpu.memref_squeeze %160 : memref<1x384x512xbf16, #tpu.memory_space<any>> -> memref<384x512xbf16, #tpu.memory_space<any>>
    %c0_i32_227 = arith.constant 0 : i32
    %c0_i32_228 = arith.constant 0 : i32
    %162 = tpu.memref_slice %arg12[%c1_i32_223, %c0_i32_227, %c0_i32_228] : memref<6x384x512xbf16, #tpu.memory_space<vmem>> -> memref<1x384x512xbf16, #tpu.memory_space<vmem>>
    %163 = tpu.memref_squeeze %162 : memref<1x384x512xbf16, #tpu.memory_space<vmem>> -> memref<384x512xbf16, #tpu.memory_space<vmem>>
    %164 = tpu.memref_slice %arg13[%c1_i32_224] : memref<6x!tpu.dma_semaphore, #tpu.memory_space<semaphore_mem>> -> memref<1x!tpu.dma_semaphore, #tpu.memory_space<semaphore_mem>>
    %165 = tpu.memref_squeeze %164 : memref<1x!tpu.dma_semaphore, #tpu.memory_space<semaphore_mem>> -> memref<!tpu.dma_semaphore, #tpu.memory_space<semaphore_mem>>
    tpu.wait_dma2 semaphore(%165 : memref<!tpu.dma_semaphore, #tpu.memory_space<semaphore_mem>>) src(%161 : memref<384x512xbf16, #tpu.memory_space<any>>) dst(%163 : memref<384x512xbf16, #tpu.memory_space<vmem>>)
    %c0_229 = arith.constant 0 : index
    %c1_230 = arith.constant 1 : index
    %c0_231 = arith.constant 0 : index
    %c0_232 = arith.constant 0 : index
    %166 = vector.load %arg11[%c0_229, %c1_230, %c0_231, %c0_232] : memref<2x6x6x64xf32, #tpu.memory_space<vmem>>, vector<2x1x1x64xf32>
    %167 = vector.shape_cast %166 : vector<2x1x1x64xf32> to vector<2x64xf32>
    %168 = arith.truncf %167 : vector<2x64xf32> to vector<2x64xbf16>
    %c1_233 = arith.constant 1 : index
    %c0_234 = arith.constant 0 : index
    %c0_235 = arith.constant 0 : index
    %169 = vector.load %arg12[%c1_233, %c0_234, %c0_235] : memref<6x384x512xbf16, #tpu.memory_space<vmem>>, vector<1x64x512xbf16>
    %170 = vector.shape_cast %169 : vector<1x64x512xbf16> to vector<64x512xbf16>
    %cst_236 = arith.constant dense<0.000000e+00> : vector<2x512xf32>
    %171 = tpu.matmul %168, %170, %cst_236 {dimension_numbers = #tpu.dot_dimension_numbers<[1], [0], [0], [1], [0, 0, 1, 1], [], []>} : vector<2x64xbf16>, vector<64x512xbf16>, vector<2x512xf32> -> vector<2x512xf32>
    %172 = arith.addf %159, %171 : vector<2x512xf32>
    %c0_237 = arith.constant 0 : index
    %c1_238 = arith.constant 1 : index
    %c1_239 = arith.constant 1 : index
    %c0_240 = arith.constant 0 : index
    %173 = vector.load %arg11[%c0_237, %c1_238, %c1_239, %c0_240] : memref<2x6x6x64xf32, #tpu.memory_space<vmem>>, vector<2x1x1x64xf32>
    %174 = vector.shape_cast %173 : vector<2x1x1x64xf32> to vector<2x64xf32>
    %175 = arith.truncf %174 : vector<2x64xf32> to vector<2x64xbf16>
    %c1_241 = arith.constant 1 : index
    %c64_242 = arith.constant 64 : index
    %c0_243 = arith.constant 0 : index
    %176 = vector.load %arg12[%c1_241, %c64_242, %c0_243] : memref<6x384x512xbf16, #tpu.memory_space<vmem>>, vector<1x64x512xbf16>
    %177 = vector.shape_cast %176 : vector<1x64x512xbf16> to vector<64x512xbf16>
    %cst_244 = arith.constant dense<0.000000e+00> : vector<2x512xf32>
    %178 = tpu.matmul %175, %177, %cst_244 {dimension_numbers = #tpu.dot_dimension_numbers<[1], [0], [0], [1], [0, 0, 1, 1], [], []>} : vector<2x64xbf16>, vector<64x512xbf16>, vector<2x512xf32> -> vector<2x512xf32>
    %179 = arith.addf %172, %178 : vector<2x512xf32>
    %c0_245 = arith.constant 0 : index
    %c1_246 = arith.constant 1 : index
    %c2_247 = arith.constant 2 : index
    %c0_248 = arith.constant 0 : index
    %180 = vector.load %arg11[%c0_245, %c1_246, %c2_247, %c0_248] : memref<2x6x6x64xf32, #tpu.memory_space<vmem>>, vector<2x1x1x64xf32>
    %181 = vector.shape_cast %180 : vector<2x1x1x64xf32> to vector<2x64xf32>
    %182 = arith.truncf %181 : vector<2x64xf32> to vector<2x64xbf16>
    %c1_249 = arith.constant 1 : index
    %c128_250 = arith.constant 128 : index
    %c0_251 = arith.constant 0 : index
    %183 = vector.load %arg12[%c1_249, %c128_250, %c0_251] : memref<6x384x512xbf16, #tpu.memory_space<vmem>>, vector<1x64x512xbf16>
    %184 = vector.shape_cast %183 : vector<1x64x512xbf16> to vector<64x512xbf16>
    %cst_252 = arith.constant dense<0.000000e+00> : vector<2x512xf32>
    %185 = tpu.matmul %182, %184, %cst_252 {dimension_numbers = #tpu.dot_dimension_numbers<[1], [0], [0], [1], [0, 0, 1, 1], [], []>} : vector<2x64xbf16>, vector<64x512xbf16>, vector<2x512xf32> -> vector<2x512xf32>
    %186 = arith.addf %179, %185 : vector<2x512xf32>
    %c0_253 = arith.constant 0 : index
    %c1_254 = arith.constant 1 : index
    %c3_255 = arith.constant 3 : index
    %c0_256 = arith.constant 0 : index
    %187 = vector.load %arg11[%c0_253, %c1_254, %c3_255, %c0_256] : memref<2x6x6x64xf32, #tpu.memory_space<vmem>>, vector<2x1x1x64xf32>
    %188 = vector.shape_cast %187 : vector<2x1x1x64xf32> to vector<2x64xf32>
    %189 = arith.truncf %188 : vector<2x64xf32> to vector<2x64xbf16>
    %c1_257 = arith.constant 1 : index
    %c192_258 = arith.constant 192 : index
    %c0_259 = arith.constant 0 : index
    %190 = vector.load %arg12[%c1_257, %c192_258, %c0_259] : memref<6x384x512xbf16, #tpu.memory_space<vmem>>, vector<1x64x512xbf16>
    %191 = vector.shape_cast %190 : vector<1x64x512xbf16> to vector<64x512xbf16>
    %cst_260 = arith.constant dense<0.000000e+00> : vector<2x512xf32>
    %192 = tpu.matmul %189, %191, %cst_260 {dimension_numbers = #tpu.dot_dimension_numbers<[1], [0], [0], [1], [0, 0, 1, 1], [], []>} : vector<2x64xbf16>, vector<64x512xbf16>, vector<2x512xf32> -> vector<2x512xf32>
    %193 = arith.addf %186, %192 : vector<2x512xf32>
    %c0_261 = arith.constant 0 : index
    %c1_262 = arith.constant 1 : index
    %c4_263 = arith.constant 4 : index
    %c0_264 = arith.constant 0 : index
    %194 = vector.load %arg11[%c0_261, %c1_262, %c4_263, %c0_264] : memref<2x6x6x64xf32, #tpu.memory_space<vmem>>, vector<2x1x1x64xf32>
    %195 = vector.shape_cast %194 : vector<2x1x1x64xf32> to vector<2x64xf32>
    %196 = arith.truncf %195 : vector<2x64xf32> to vector<2x64xbf16>
    %c1_265 = arith.constant 1 : index
    %c256_266 = arith.constant 256 : index
    %c0_267 = arith.constant 0 : index
    %197 = vector.load %arg12[%c1_265, %c256_266, %c0_267] : memref<6x384x512xbf16, #tpu.memory_space<vmem>>, vector<1x64x512xbf16>
    %198 = vector.shape_cast %197 : vector<1x64x512xbf16> to vector<64x512xbf16>
    %cst_268 = arith.constant dense<0.000000e+00> : vector<2x512xf32>
    %199 = tpu.matmul %196, %198, %cst_268 {dimension_numbers = #tpu.dot_dimension_numbers<[1], [0], [0], [1], [0, 0, 1, 1], [], []>} : vector<2x64xbf16>, vector<64x512xbf16>, vector<2x512xf32> -> vector<2x512xf32>
    %200 = arith.addf %193, %199 : vector<2x512xf32>
    %c0_269 = arith.constant 0 : index
    %c1_270 = arith.constant 1 : index
    %c5_271 = arith.constant 5 : index
    %c0_272 = arith.constant 0 : index
    %201 = vector.load %arg11[%c0_269, %c1_270, %c5_271, %c0_272] : memref<2x6x6x64xf32, #tpu.memory_space<vmem>>, vector<2x1x1x64xf32>
    %202 = vector.shape_cast %201 : vector<2x1x1x64xf32> to vector<2x64xf32>
    %203 = arith.truncf %202 : vector<2x64xf32> to vector<2x64xbf16>
    %c1_273 = arith.constant 1 : index
    %c320_274 = arith.constant 320 : index
    %c0_275 = arith.constant 0 : index
    %204 = vector.load %arg12[%c1_273, %c320_274, %c0_275] : memref<6x384x512xbf16, #tpu.memory_space<vmem>>, vector<1x64x512xbf16>
    %205 = vector.shape_cast %204 : vector<1x64x512xbf16> to vector<64x512xbf16>
    %cst_276 = arith.constant dense<0.000000e+00> : vector<2x512xf32>
    %206 = tpu.matmul %203, %205, %cst_276 {dimension_numbers = #tpu.dot_dimension_numbers<[1], [0], [0], [1], [0, 0, 1, 1], [], []>} : vector<2x64xbf16>, vector<64x512xbf16>, vector<2x512xf32> -> vector<2x512xf32>
    %207 = arith.addf %200, %206 : vector<2x512xf32>
    %c2_i32_277 = arith.constant 2 : i32
    %c2_i32_278 = arith.constant 2 : i32
    %c2_i32_279 = arith.constant 2 : i32
    %c0_i32_280 = arith.constant 0 : i32
    %c0_i32_281 = arith.constant 0 : i32
    %208 = tpu.memref_slice %arg4[%c2_i32_277, %c0_i32_280, %c0_i32_281] : memref<6x384x512xbf16, #tpu.memory_space<any>> -> memref<1x384x512xbf16, #tpu.memory_space<any>>
    %209 = tpu.memref_squeeze %208 : memref<1x384x512xbf16, #tpu.memory_space<any>> -> memref<384x512xbf16, #tpu.memory_space<any>>
    %c0_i32_282 = arith.constant 0 : i32
    %c0_i32_283 = arith.constant 0 : i32
    %210 = tpu.memref_slice %arg12[%c2_i32_278, %c0_i32_282, %c0_i32_283] : memref<6x384x512xbf16, #tpu.memory_space<vmem>> -> memref<1x384x512xbf16, #tpu.memory_space<vmem>>
    %211 = tpu.memref_squeeze %210 : memref<1x384x512xbf16, #tpu.memory_space<vmem>> -> memref<384x512xbf16, #tpu.memory_space<vmem>>
    %212 = tpu.memref_slice %arg13[%c2_i32_279] : memref<6x!tpu.dma_semaphore, #tpu.memory_space<semaphore_mem>> -> memref<1x!tpu.dma_semaphore, #tpu.memory_space<semaphore_mem>>
    %213 = tpu.memref_squeeze %212 : memref<1x!tpu.dma_semaphore, #tpu.memory_space<semaphore_mem>> -> memref<!tpu.dma_semaphore, #tpu.memory_space<semaphore_mem>>
    tpu.wait_dma2 semaphore(%213 : memref<!tpu.dma_semaphore, #tpu.memory_space<semaphore_mem>>) src(%209 : memref<384x512xbf16, #tpu.memory_space<any>>) dst(%211 : memref<384x512xbf16, #tpu.memory_space<vmem>>)
    %c0_284 = arith.constant 0 : index
    %c2_285 = arith.constant 2 : index
    %c0_286 = arith.constant 0 : index
    %c0_287 = arith.constant 0 : index
    %214 = vector.load %arg11[%c0_284, %c2_285, %c0_286, %c0_287] : memref<2x6x6x64xf32, #tpu.memory_space<vmem>>, vector<2x1x1x64xf32>
    %215 = vector.shape_cast %214 : vector<2x1x1x64xf32> to vector<2x64xf32>
    %216 = arith.truncf %215 : vector<2x64xf32> to vector<2x64xbf16>
    %c2_288 = arith.constant 2 : index
    %c0_289 = arith.constant 0 : index
    %c0_290 = arith.constant 0 : index
    %217 = vector.load %arg12[%c2_288, %c0_289, %c0_290] : memref<6x384x512xbf16, #tpu.memory_space<vmem>>, vector<1x64x512xbf16>
    %218 = vector.shape_cast %217 : vector<1x64x512xbf16> to vector<64x512xbf16>
    %cst_291 = arith.constant dense<0.000000e+00> : vector<2x512xf32>
    %219 = tpu.matmul %216, %218, %cst_291 {dimension_numbers = #tpu.dot_dimension_numbers<[1], [0], [0], [1], [0, 0, 1, 1], [], []>} : vector<2x64xbf16>, vector<64x512xbf16>, vector<2x512xf32> -> vector<2x512xf32>
    %220 = arith.addf %207, %219 : vector<2x512xf32>
    %c0_292 = arith.constant 0 : index
    %c2_293 = arith.constant 2 : index
    %c1_294 = arith.constant 1 : index
    %c0_295 = arith.constant 0 : index
    %221 = vector.load %arg11[%c0_292, %c2_293, %c1_294, %c0_295] : memref<2x6x6x64xf32, #tpu.memory_space<vmem>>, vector<2x1x1x64xf32>
    %222 = vector.shape_cast %221 : vector<2x1x1x64xf32> to vector<2x64xf32>
    %223 = arith.truncf %222 : vector<2x64xf32> to vector<2x64xbf16>
    %c2_296 = arith.constant 2 : index
    %c64_297 = arith.constant 64 : index
    %c0_298 = arith.constant 0 : index
    %224 = vector.load %arg12[%c2_296, %c64_297, %c0_298] : memref<6x384x512xbf16, #tpu.memory_space<vmem>>, vector<1x64x512xbf16>
    %225 = vector.shape_cast %224 : vector<1x64x512xbf16> to vector<64x512xbf16>
    %cst_299 = arith.constant dense<0.000000e+00> : vector<2x512xf32>
    %226 = tpu.matmul %223, %225, %cst_299 {dimension_numbers = #tpu.dot_dimension_numbers<[1], [0], [0], [1], [0, 0, 1, 1], [], []>} : vector<2x64xbf16>, vector<64x512xbf16>, vector<2x512xf32> -> vector<2x512xf32>
    %227 = arith.addf %220, %226 : vector<2x512xf32>
    %c0_300 = arith.constant 0 : index
    %c2_301 = arith.constant 2 : index
    %c2_302 = arith.constant 2 : index
    %c0_303 = arith.constant 0 : index
    %228 = vector.load %arg11[%c0_300, %c2_301, %c2_302, %c0_303] : memref<2x6x6x64xf32, #tpu.memory_space<vmem>>, vector<2x1x1x64xf32>
    %229 = vector.shape_cast %228 : vector<2x1x1x64xf32> to vector<2x64xf32>
    %230 = arith.truncf %229 : vector<2x64xf32> to vector<2x64xbf16>
    %c2_304 = arith.constant 2 : index
    %c128_305 = arith.constant 128 : index
    %c0_306 = arith.constant 0 : index
    %231 = vector.load %arg12[%c2_304, %c128_305, %c0_306] : memref<6x384x512xbf16, #tpu.memory_space<vmem>>, vector<1x64x512xbf16>
    %232 = vector.shape_cast %231 : vector<1x64x512xbf16> to vector<64x512xbf16>
    %cst_307 = arith.constant dense<0.000000e+00> : vector<2x512xf32>
    %233 = tpu.matmul %230, %232, %cst_307 {dimension_numbers = #tpu.dot_dimension_numbers<[1], [0], [0], [1], [0, 0, 1, 1], [], []>} : vector<2x64xbf16>, vector<64x512xbf16>, vector<2x512xf32> -> vector<2x512xf32>
    %234 = arith.addf %227, %233 : vector<2x512xf32>
    %c0_308 = arith.constant 0 : index
    %c2_309 = arith.constant 2 : index
    %c3_310 = arith.constant 3 : index
    %c0_311 = arith.constant 0 : index
    %235 = vector.load %arg11[%c0_308, %c2_309, %c3_310, %c0_311] : memref<2x6x6x64xf32, #tpu.memory_space<vmem>>, vector<2x1x1x64xf32>
    %236 = vector.shape_cast %235 : vector<2x1x1x64xf32> to vector<2x64xf32>
    %237 = arith.truncf %236 : vector<2x64xf32> to vector<2x64xbf16>
    %c2_312 = arith.constant 2 : index
    %c192_313 = arith.constant 192 : index
    %c0_314 = arith.constant 0 : index
    %238 = vector.load %arg12[%c2_312, %c192_313, %c0_314] : memref<6x384x512xbf16, #tpu.memory_space<vmem>>, vector<1x64x512xbf16>
    %239 = vector.shape_cast %238 : vector<1x64x512xbf16> to vector<64x512xbf16>
    %cst_315 = arith.constant dense<0.000000e+00> : vector<2x512xf32>
    %240 = tpu.matmul %237, %239, %cst_315 {dimension_numbers = #tpu.dot_dimension_numbers<[1], [0], [0], [1], [0, 0, 1, 1], [], []>} : vector<2x64xbf16>, vector<64x512xbf16>, vector<2x512xf32> -> vector<2x512xf32>
    %241 = arith.addf %234, %240 : vector<2x512xf32>
    %c0_316 = arith.constant 0 : index
    %c2_317 = arith.constant 2 : index
    %c4_318 = arith.constant 4 : index
    %c0_319 = arith.constant 0 : index
    %242 = vector.load %arg11[%c0_316, %c2_317, %c4_318, %c0_319] : memref<2x6x6x64xf32, #tpu.memory_space<vmem>>, vector<2x1x1x64xf32>
    %243 = vector.shape_cast %242 : vector<2x1x1x64xf32> to vector<2x64xf32>
    %244 = arith.truncf %243 : vector<2x64xf32> to vector<2x64xbf16>
    %c2_320 = arith.constant 2 : index
    %c256_321 = arith.constant 256 : index
    %c0_322 = arith.constant 0 : index
    %245 = vector.load %arg12[%c2_320, %c256_321, %c0_322] : memref<6x384x512xbf16, #tpu.memory_space<vmem>>, vector<1x64x512xbf16>
    %246 = vector.shape_cast %245 : vector<1x64x512xbf16> to vector<64x512xbf16>
    %cst_323 = arith.constant dense<0.000000e+00> : vector<2x512xf32>
    %247 = tpu.matmul %244, %246, %cst_323 {dimension_numbers = #tpu.dot_dimension_numbers<[1], [0], [0], [1], [0, 0, 1, 1], [], []>} : vector<2x64xbf16>, vector<64x512xbf16>, vector<2x512xf32> -> vector<2x512xf32>
    %248 = arith.addf %241, %247 : vector<2x512xf32>
    %c0_324 = arith.constant 0 : index
    %c2_325 = arith.constant 2 : index
    %c5_326 = arith.constant 5 : index
    %c0_327 = arith.constant 0 : index
    %249 = vector.load %arg11[%c0_324, %c2_325, %c5_326, %c0_327] : memref<2x6x6x64xf32, #tpu.memory_space<vmem>>, vector<2x1x1x64xf32>
    %250 = vector.shape_cast %249 : vector<2x1x1x64xf32> to vector<2x64xf32>
    %251 = arith.truncf %250 : vector<2x64xf32> to vector<2x64xbf16>
    %c2_328 = arith.constant 2 : index
    %c320_329 = arith.constant 320 : index
    %c0_330 = arith.constant 0 : index
    %252 = vector.load %arg12[%c2_328, %c320_329, %c0_330] : memref<6x384x512xbf16, #tpu.memory_space<vmem>>, vector<1x64x512xbf16>
    %253 = vector.shape_cast %252 : vector<1x64x512xbf16> to vector<64x512xbf16>
    %cst_331 = arith.constant dense<0.000000e+00> : vector<2x512xf32>
    %254 = tpu.matmul %251, %253, %cst_331 {dimension_numbers = #tpu.dot_dimension_numbers<[1], [0], [0], [1], [0, 0, 1, 1], [], []>} : vector<2x64xbf16>, vector<64x512xbf16>, vector<2x512xf32> -> vector<2x512xf32>
    %255 = arith.addf %248, %254 : vector<2x512xf32>
    %c3_i32_332 = arith.constant 3 : i32
    %c3_i32_333 = arith.constant 3 : i32
    %c3_i32_334 = arith.constant 3 : i32
    %c0_i32_335 = arith.constant 0 : i32
    %c0_i32_336 = arith.constant 0 : i32
    %256 = tpu.memref_slice %arg4[%c3_i32_332, %c0_i32_335, %c0_i32_336] : memref<6x384x512xbf16, #tpu.memory_space<any>> -> memref<1x384x512xbf16, #tpu.memory_space<any>>
    %257 = tpu.memref_squeeze %256 : memref<1x384x512xbf16, #tpu.memory_space<any>> -> memref<384x512xbf16, #tpu.memory_space<any>>
    %c0_i32_337 = arith.constant 0 : i32
    %c0_i32_338 = arith.constant 0 : i32
    %258 = tpu.memref_slice %arg12[%c3_i32_333, %c0_i32_337, %c0_i32_338] : memref<6x384x512xbf16, #tpu.memory_space<vmem>> -> memref<1x384x512xbf16, #tpu.memory_space<vmem>>
    %259 = tpu.memref_squeeze %258 : memref<1x384x512xbf16, #tpu.memory_space<vmem>> -> memref<384x512xbf16, #tpu.memory_space<vmem>>
    %260 = tpu.memref_slice %arg13[%c3_i32_334] : memref<6x!tpu.dma_semaphore, #tpu.memory_space<semaphore_mem>> -> memref<1x!tpu.dma_semaphore, #tpu.memory_space<semaphore_mem>>
    %261 = tpu.memref_squeeze %260 : memref<1x!tpu.dma_semaphore, #tpu.memory_space<semaphore_mem>> -> memref<!tpu.dma_semaphore, #tpu.memory_space<semaphore_mem>>
    tpu.wait_dma2 semaphore(%261 : memref<!tpu.dma_semaphore, #tpu.memory_space<semaphore_mem>>) src(%257 : memref<384x512xbf16, #tpu.memory_space<any>>) dst(%259 : memref<384x512xbf16, #tpu.memory_space<vmem>>)
    %c0_339 = arith.constant 0 : index
    %c3_340 = arith.constant 3 : index
    %c0_341 = arith.constant 0 : index
    %c0_342 = arith.constant 0 : index
    %262 = vector.load %arg11[%c0_339, %c3_340, %c0_341, %c0_342] : memref<2x6x6x64xf32, #tpu.memory_space<vmem>>, vector<2x1x1x64xf32>
    %263 = vector.shape_cast %262 : vector<2x1x1x64xf32> to vector<2x64xf32>
    %264 = arith.truncf %263 : vector<2x64xf32> to vector<2x64xbf16>
    %c3_343 = arith.constant 3 : index
    %c0_344 = arith.constant 0 : index
    %c0_345 = arith.constant 0 : index
    %265 = vector.load %arg12[%c3_343, %c0_344, %c0_345] : memref<6x384x512xbf16, #tpu.memory_space<vmem>>, vector<1x64x512xbf16>
    %266 = vector.shape_cast %265 : vector<1x64x512xbf16> to vector<64x512xbf16>
    %cst_346 = arith.constant dense<0.000000e+00> : vector<2x512xf32>
    %267 = tpu.matmul %264, %266, %cst_346 {dimension_numbers = #tpu.dot_dimension_numbers<[1], [0], [0], [1], [0, 0, 1, 1], [], []>} : vector<2x64xbf16>, vector<64x512xbf16>, vector<2x512xf32> -> vector<2x512xf32>
    %268 = arith.addf %255, %267 : vector<2x512xf32>
    %c0_347 = arith.constant 0 : index
    %c3_348 = arith.constant 3 : index
    %c1_349 = arith.constant 1 : index
    %c0_350 = arith.constant 0 : index
    %269 = vector.load %arg11[%c0_347, %c3_348, %c1_349, %c0_350] : memref<2x6x6x64xf32, #tpu.memory_space<vmem>>, vector<2x1x1x64xf32>
    %270 = vector.shape_cast %269 : vector<2x1x1x64xf32> to vector<2x64xf32>
    %271 = arith.truncf %270 : vector<2x64xf32> to vector<2x64xbf16>
    %c3_351 = arith.constant 3 : index
    %c64_352 = arith.constant 64 : index
    %c0_353 = arith.constant 0 : index
    %272 = vector.load %arg12[%c3_351, %c64_352, %c0_353] : memref<6x384x512xbf16, #tpu.memory_space<vmem>>, vector<1x64x512xbf16>
    %273 = vector.shape_cast %272 : vector<1x64x512xbf16> to vector<64x512xbf16>
    %cst_354 = arith.constant dense<0.000000e+00> : vector<2x512xf32>
    %274 = tpu.matmul %271, %273, %cst_354 {dimension_numbers = #tpu.dot_dimension_numbers<[1], [0], [0], [1], [0, 0, 1, 1], [], []>} : vector<2x64xbf16>, vector<64x512xbf16>, vector<2x512xf32> -> vector<2x512xf32>
    %275 = arith.addf %268, %274 : vector<2x512xf32>
    %c0_355 = arith.constant 0 : index
    %c3_356 = arith.constant 3 : index
    %c2_357 = arith.constant 2 : index
    %c0_358 = arith.constant 0 : index
    %276 = vector.load %arg11[%c0_355, %c3_356, %c2_357, %c0_358] : memref<2x6x6x64xf32, #tpu.memory_space<vmem>>, vector<2x1x1x64xf32>
    %277 = vector.shape_cast %276 : vector<2x1x1x64xf32> to vector<2x64xf32>
    %278 = arith.truncf %277 : vector<2x64xf32> to vector<2x64xbf16>
    %c3_359 = arith.constant 3 : index
    %c128_360 = arith.constant 128 : index
    %c0_361 = arith.constant 0 : index
    %279 = vector.load %arg12[%c3_359, %c128_360, %c0_361] : memref<6x384x512xbf16, #tpu.memory_space<vmem>>, vector<1x64x512xbf16>
    %280 = vector.shape_cast %279 : vector<1x64x512xbf16> to vector<64x512xbf16>
    %cst_362 = arith.constant dense<0.000000e+00> : vector<2x512xf32>
    %281 = tpu.matmul %278, %280, %cst_362 {dimension_numbers = #tpu.dot_dimension_numbers<[1], [0], [0], [1], [0, 0, 1, 1], [], []>} : vector<2x64xbf16>, vector<64x512xbf16>, vector<2x512xf32> -> vector<2x512xf32>
    %282 = arith.addf %275, %281 : vector<2x512xf32>
    %c0_363 = arith.constant 0 : index
    %c3_364 = arith.constant 3 : index
    %c3_365 = arith.constant 3 : index
    %c0_366 = arith.constant 0 : index
    %283 = vector.load %arg11[%c0_363, %c3_364, %c3_365, %c0_366] : memref<2x6x6x64xf32, #tpu.memory_space<vmem>>, vector<2x1x1x64xf32>
    %284 = vector.shape_cast %283 : vector<2x1x1x64xf32> to vector<2x64xf32>
    %285 = arith.truncf %284 : vector<2x64xf32> to vector<2x64xbf16>
    %c3_367 = arith.constant 3 : index
    %c192_368 = arith.constant 192 : index
    %c0_369 = arith.constant 0 : index
    %286 = vector.load %arg12[%c3_367, %c192_368, %c0_369] : memref<6x384x512xbf16, #tpu.memory_space<vmem>>, vector<1x64x512xbf16>
    %287 = vector.shape_cast %286 : vector<1x64x512xbf16> to vector<64x512xbf16>
    %cst_370 = arith.constant dense<0.000000e+00> : vector<2x512xf32>
    %288 = tpu.matmul %285, %287, %cst_370 {dimension_numbers = #tpu.dot_dimension_numbers<[1], [0], [0], [1], [0, 0, 1, 1], [], []>} : vector<2x64xbf16>, vector<64x512xbf16>, vector<2x512xf32> -> vector<2x512xf32>
    %289 = arith.addf %282, %288 : vector<2x512xf32>
    %c0_371 = arith.constant 0 : index
    %c3_372 = arith.constant 3 : index
    %c4_373 = arith.constant 4 : index
    %c0_374 = arith.constant 0 : index
    %290 = vector.load %arg11[%c0_371, %c3_372, %c4_373, %c0_374] : memref<2x6x6x64xf32, #tpu.memory_space<vmem>>, vector<2x1x1x64xf32>
    %291 = vector.shape_cast %290 : vector<2x1x1x64xf32> to vector<2x64xf32>
    %292 = arith.truncf %291 : vector<2x64xf32> to vector<2x64xbf16>
    %c3_375 = arith.constant 3 : index
    %c256_376 = arith.constant 256 : index
    %c0_377 = arith.constant 0 : index
    %293 = vector.load %arg12[%c3_375, %c256_376, %c0_377] : memref<6x384x512xbf16, #tpu.memory_space<vmem>>, vector<1x64x512xbf16>
    %294 = vector.shape_cast %293 : vector<1x64x512xbf16> to vector<64x512xbf16>
    %cst_378 = arith.constant dense<0.000000e+00> : vector<2x512xf32>
    %295 = tpu.matmul %292, %294, %cst_378 {dimension_numbers = #tpu.dot_dimension_numbers<[1], [0], [0], [1], [0, 0, 1, 1], [], []>} : vector<2x64xbf16>, vector<64x512xbf16>, vector<2x512xf32> -> vector<2x512xf32>
    %296 = arith.addf %289, %295 : vector<2x512xf32>
    %c0_379 = arith.constant 0 : index
    %c3_380 = arith.constant 3 : index
    %c5_381 = arith.constant 5 : index
    %c0_382 = arith.constant 0 : index
    %297 = vector.load %arg11[%c0_379, %c3_380, %c5_381, %c0_382] : memref<2x6x6x64xf32, #tpu.memory_space<vmem>>, vector<2x1x1x64xf32>
    %298 = vector.shape_cast %297 : vector<2x1x1x64xf32> to vector<2x64xf32>
    %299 = arith.truncf %298 : vector<2x64xf32> to vector<2x64xbf16>
    %c3_383 = arith.constant 3 : index
    %c320_384 = arith.constant 320 : index
    %c0_385 = arith.constant 0 : index
    %300 = vector.load %arg12[%c3_383, %c320_384, %c0_385] : memref<6x384x512xbf16, #tpu.memory_space<vmem>>, vector<1x64x512xbf16>
    %301 = vector.shape_cast %300 : vector<1x64x512xbf16> to vector<64x512xbf16>
    %cst_386 = arith.constant dense<0.000000e+00> : vector<2x512xf32>
    %302 = tpu.matmul %299, %301, %cst_386 {dimension_numbers = #tpu.dot_dimension_numbers<[1], [0], [0], [1], [0, 0, 1, 1], [], []>} : vector<2x64xbf16>, vector<64x512xbf16>, vector<2x512xf32> -> vector<2x512xf32>
    %303 = arith.addf %296, %302 : vector<2x512xf32>
    %c4_i32_387 = arith.constant 4 : i32
    %c4_i32_388 = arith.constant 4 : i32
    %c4_i32_389 = arith.constant 4 : i32
    %c0_i32_390 = arith.constant 0 : i32
    %c0_i32_391 = arith.constant 0 : i32
    %304 = tpu.memref_slice %arg4[%c4_i32_387, %c0_i32_390, %c0_i32_391] : memref<6x384x512xbf16, #tpu.memory_space<any>> -> memref<1x384x512xbf16, #tpu.memory_space<any>>
    %305 = tpu.memref_squeeze %304 : memref<1x384x512xbf16, #tpu.memory_space<any>> -> memref<384x512xbf16, #tpu.memory_space<any>>
    %c0_i32_392 = arith.constant 0 : i32
    %c0_i32_393 = arith.constant 0 : i32
    %306 = tpu.memref_slice %arg12[%c4_i32_388, %c0_i32_392, %c0_i32_393] : memref<6x384x512xbf16, #tpu.memory_space<vmem>> -> memref<1x384x512xbf16, #tpu.memory_space<vmem>>
    %307 = tpu.memref_squeeze %306 : memref<1x384x512xbf16, #tpu.memory_space<vmem>> -> memref<384x512xbf16, #tpu.memory_space<vmem>>
    %308 = tpu.memref_slice %arg13[%c4_i32_389] : memref<6x!tpu.dma_semaphore, #tpu.memory_space<semaphore_mem>> -> memref<1x!tpu.dma_semaphore, #tpu.memory_space<semaphore_mem>>
    %309 = tpu.memref_squeeze %308 : memref<1x!tpu.dma_semaphore, #tpu.memory_space<semaphore_mem>> -> memref<!tpu.dma_semaphore, #tpu.memory_space<semaphore_mem>>
    tpu.wait_dma2 semaphore(%309 : memref<!tpu.dma_semaphore, #tpu.memory_space<semaphore_mem>>) src(%305 : memref<384x512xbf16, #tpu.memory_space<any>>) dst(%307 : memref<384x512xbf16, #tpu.memory_space<vmem>>)
    %c0_394 = arith.constant 0 : index
    %c4_395 = arith.constant 4 : index
    %c0_396 = arith.constant 0 : index
    %c0_397 = arith.constant 0 : index
    %310 = vector.load %arg11[%c0_394, %c4_395, %c0_396, %c0_397] : memref<2x6x6x64xf32, #tpu.memory_space<vmem>>, vector<2x1x1x64xf32>
    %311 = vector.shape_cast %310 : vector<2x1x1x64xf32> to vector<2x64xf32>
    %312 = arith.truncf %311 : vector<2x64xf32> to vector<2x64xbf16>
    %c4_398 = arith.constant 4 : index
    %c0_399 = arith.constant 0 : index
    %c0_400 = arith.constant 0 : index
    %313 = vector.load %arg12[%c4_398, %c0_399, %c0_400] : memref<6x384x512xbf16, #tpu.memory_space<vmem>>, vector<1x64x512xbf16>
    %314 = vector.shape_cast %313 : vector<1x64x512xbf16> to vector<64x512xbf16>
    %cst_401 = arith.constant dense<0.000000e+00> : vector<2x512xf32>
    %315 = tpu.matmul %312, %314, %cst_401 {dimension_numbers = #tpu.dot_dimension_numbers<[1], [0], [0], [1], [0, 0, 1, 1], [], []>} : vector<2x64xbf16>, vector<64x512xbf16>, vector<2x512xf32> -> vector<2x512xf32>
    %316 = arith.addf %303, %315 : vector<2x512xf32>
    %c0_402 = arith.constant 0 : index
    %c4_403 = arith.constant 4 : index
    %c1_404 = arith.constant 1 : index
    %c0_405 = arith.constant 0 : index
    %317 = vector.load %arg11[%c0_402, %c4_403, %c1_404, %c0_405] : memref<2x6x6x64xf32, #tpu.memory_space<vmem>>, vector<2x1x1x64xf32>
    %318 = vector.shape_cast %317 : vector<2x1x1x64xf32> to vector<2x64xf32>
    %319 = arith.truncf %318 : vector<2x64xf32> to vector<2x64xbf16>
    %c4_406 = arith.constant 4 : index
    %c64_407 = arith.constant 64 : index
    %c0_408 = arith.constant 0 : index
    %320 = vector.load %arg12[%c4_406, %c64_407, %c0_408] : memref<6x384x512xbf16, #tpu.memory_space<vmem>>, vector<1x64x512xbf16>
    %321 = vector.shape_cast %320 : vector<1x64x512xbf16> to vector<64x512xbf16>
    %cst_409 = arith.constant dense<0.000000e+00> : vector<2x512xf32>
    %322 = tpu.matmul %319, %321, %cst_409 {dimension_numbers = #tpu.dot_dimension_numbers<[1], [0], [0], [1], [0, 0, 1, 1], [], []>} : vector<2x64xbf16>, vector<64x512xbf16>, vector<2x512xf32> -> vector<2x512xf32>
    %323 = arith.addf %316, %322 : vector<2x512xf32>
    %c0_410 = arith.constant 0 : index
    %c4_411 = arith.constant 4 : index
    %c2_412 = arith.constant 2 : index
    %c0_413 = arith.constant 0 : index
    %324 = vector.load %arg11[%c0_410, %c4_411, %c2_412, %c0_413] : memref<2x6x6x64xf32, #tpu.memory_space<vmem>>, vector<2x1x1x64xf32>
    %325 = vector.shape_cast %324 : vector<2x1x1x64xf32> to vector<2x64xf32>
    %326 = arith.truncf %325 : vector<2x64xf32> to vector<2x64xbf16>
    %c4_414 = arith.constant 4 : index
    %c128_415 = arith.constant 128 : index
    %c0_416 = arith.constant 0 : index
    %327 = vector.load %arg12[%c4_414, %c128_415, %c0_416] : memref<6x384x512xbf16, #tpu.memory_space<vmem>>, vector<1x64x512xbf16>
    %328 = vector.shape_cast %327 : vector<1x64x512xbf16> to vector<64x512xbf16>
    %cst_417 = arith.constant dense<0.000000e+00> : vector<2x512xf32>
    %329 = tpu.matmul %326, %328, %cst_417 {dimension_numbers = #tpu.dot_dimension_numbers<[1], [0], [0], [1], [0, 0, 1, 1], [], []>} : vector<2x64xbf16>, vector<64x512xbf16>, vector<2x512xf32> -> vector<2x512xf32>
    %330 = arith.addf %323, %329 : vector<2x512xf32>
    %c0_418 = arith.constant 0 : index
    %c4_419 = arith.constant 4 : index
    %c3_420 = arith.constant 3 : index
    %c0_421 = arith.constant 0 : index
    %331 = vector.load %arg11[%c0_418, %c4_419, %c3_420, %c0_421] : memref<2x6x6x64xf32, #tpu.memory_space<vmem>>, vector<2x1x1x64xf32>
    %332 = vector.shape_cast %331 : vector<2x1x1x64xf32> to vector<2x64xf32>
    %333 = arith.truncf %332 : vector<2x64xf32> to vector<2x64xbf16>
    %c4_422 = arith.constant 4 : index
    %c192_423 = arith.constant 192 : index
    %c0_424 = arith.constant 0 : index
    %334 = vector.load %arg12[%c4_422, %c192_423, %c0_424] : memref<6x384x512xbf16, #tpu.memory_space<vmem>>, vector<1x64x512xbf16>
    %335 = vector.shape_cast %334 : vector<1x64x512xbf16> to vector<64x512xbf16>
    %cst_425 = arith.constant dense<0.000000e+00> : vector<2x512xf32>
    %336 = tpu.matmul %333, %335, %cst_425 {dimension_numbers = #tpu.dot_dimension_numbers<[1], [0], [0], [1], [0, 0, 1, 1], [], []>} : vector<2x64xbf16>, vector<64x512xbf16>, vector<2x512xf32> -> vector<2x512xf32>
    %337 = arith.addf %330, %336 : vector<2x512xf32>
    %c0_426 = arith.constant 0 : index
    %c4_427 = arith.constant 4 : index
    %c4_428 = arith.constant 4 : index
    %c0_429 = arith.constant 0 : index
    %338 = vector.load %arg11[%c0_426, %c4_427, %c4_428, %c0_429] : memref<2x6x6x64xf32, #tpu.memory_space<vmem>>, vector<2x1x1x64xf32>
    %339 = vector.shape_cast %338 : vector<2x1x1x64xf32> to vector<2x64xf32>
    %340 = arith.truncf %339 : vector<2x64xf32> to vector<2x64xbf16>
    %c4_430 = arith.constant 4 : index
    %c256_431 = arith.constant 256 : index
    %c0_432 = arith.constant 0 : index
    %341 = vector.load %arg12[%c4_430, %c256_431, %c0_432] : memref<6x384x512xbf16, #tpu.memory_space<vmem>>, vector<1x64x512xbf16>
    %342 = vector.shape_cast %341 : vector<1x64x512xbf16> to vector<64x512xbf16>
    %cst_433 = arith.constant dense<0.000000e+00> : vector<2x512xf32>
    %343 = tpu.matmul %340, %342, %cst_433 {dimension_numbers = #tpu.dot_dimension_numbers<[1], [0], [0], [1], [0, 0, 1, 1], [], []>} : vector<2x64xbf16>, vector<64x512xbf16>, vector<2x512xf32> -> vector<2x512xf32>
    %344 = arith.addf %337, %343 : vector<2x512xf32>
    %c0_434 = arith.constant 0 : index
    %c4_435 = arith.constant 4 : index
    %c5_436 = arith.constant 5 : index
    %c0_437 = arith.constant 0 : index
    %345 = vector.load %arg11[%c0_434, %c4_435, %c5_436, %c0_437] : memref<2x6x6x64xf32, #tpu.memory_space<vmem>>, vector<2x1x1x64xf32>
    %346 = vector.shape_cast %345 : vector<2x1x1x64xf32> to vector<2x64xf32>
    %347 = arith.truncf %346 : vector<2x64xf32> to vector<2x64xbf16>
    %c4_438 = arith.constant 4 : index
    %c320_439 = arith.constant 320 : index
    %c0_440 = arith.constant 0 : index
    %348 = vector.load %arg12[%c4_438, %c320_439, %c0_440] : memref<6x384x512xbf16, #tpu.memory_space<vmem>>, vector<1x64x512xbf16>
    %349 = vector.shape_cast %348 : vector<1x64x512xbf16> to vector<64x512xbf16>
    %cst_441 = arith.constant dense<0.000000e+00> : vector<2x512xf32>
    %350 = tpu.matmul %347, %349, %cst_441 {dimension_numbers = #tpu.dot_dimension_numbers<[1], [0], [0], [1], [0, 0, 1, 1], [], []>} : vector<2x64xbf16>, vector<64x512xbf16>, vector<2x512xf32> -> vector<2x512xf32>
    %351 = arith.addf %344, %350 : vector<2x512xf32>
    %c5_i32_442 = arith.constant 5 : i32
    %c5_i32_443 = arith.constant 5 : i32
    %c5_i32_444 = arith.constant 5 : i32
    %c0_i32_445 = arith.constant 0 : i32
    %c0_i32_446 = arith.constant 0 : i32
    %352 = tpu.memref_slice %arg4[%c5_i32_442, %c0_i32_445, %c0_i32_446] : memref<6x384x512xbf16, #tpu.memory_space<any>> -> memref<1x384x512xbf16, #tpu.memory_space<any>>
    %353 = tpu.memref_squeeze %352 : memref<1x384x512xbf16, #tpu.memory_space<any>> -> memref<384x512xbf16, #tpu.memory_space<any>>
    %c0_i32_447 = arith.constant 0 : i32
    %c0_i32_448 = arith.constant 0 : i32
    %354 = tpu.memref_slice %arg12[%c5_i32_443, %c0_i32_447, %c0_i32_448] : memref<6x384x512xbf16, #tpu.memory_space<vmem>> -> memref<1x384x512xbf16, #tpu.memory_space<vmem>>
    %355 = tpu.memref_squeeze %354 : memref<1x384x512xbf16, #tpu.memory_space<vmem>> -> memref<384x512xbf16, #tpu.memory_space<vmem>>
    %356 = tpu.memref_slice %arg13[%c5_i32_444] : memref<6x!tpu.dma_semaphore, #tpu.memory_space<semaphore_mem>> -> memref<1x!tpu.dma_semaphore, #tpu.memory_space<semaphore_mem>>
    %357 = tpu.memref_squeeze %356 : memref<1x!tpu.dma_semaphore, #tpu.memory_space<semaphore_mem>> -> memref<!tpu.dma_semaphore, #tpu.memory_space<semaphore_mem>>
    tpu.wait_dma2 semaphore(%357 : memref<!tpu.dma_semaphore, #tpu.memory_space<semaphore_mem>>) src(%353 : memref<384x512xbf16, #tpu.memory_space<any>>) dst(%355 : memref<384x512xbf16, #tpu.memory_space<vmem>>)
    %c0_449 = arith.constant 0 : index
    %c5_450 = arith.constant 5 : index
    %c0_451 = arith.constant 0 : index
    %c0_452 = arith.constant 0 : index
    %358 = vector.load %arg11[%c0_449, %c5_450, %c0_451, %c0_452] : memref<2x6x6x64xf32, #tpu.memory_space<vmem>>, vector<2x1x1x64xf32>
    %359 = vector.shape_cast %358 : vector<2x1x1x64xf32> to vector<2x64xf32>
    %360 = arith.truncf %359 : vector<2x64xf32> to vector<2x64xbf16>
    %c5_453 = arith.constant 5 : index
    %c0_454 = arith.constant 0 : index
    %c0_455 = arith.constant 0 : index
    %361 = vector.load %arg12[%c5_453, %c0_454, %c0_455] : memref<6x384x512xbf16, #tpu.memory_space<vmem>>, vector<1x64x512xbf16>
    %362 = vector.shape_cast %361 : vector<1x64x512xbf16> to vector<64x512xbf16>
    %cst_456 = arith.constant dense<0.000000e+00> : vector<2x512xf32>
    %363 = tpu.matmul %360, %362, %cst_456 {dimension_numbers = #tpu.dot_dimension_numbers<[1], [0], [0], [1], [0, 0, 1, 1], [], []>} : vector<2x64xbf16>, vector<64x512xbf16>, vector<2x512xf32> -> vector<2x512xf32>
    %364 = arith.addf %351, %363 : vector<2x512xf32>
    %c0_457 = arith.constant 0 : index
    %c5_458 = arith.constant 5 : index
    %c1_459 = arith.constant 1 : index
    %c0_460 = arith.constant 0 : index
    %365 = vector.load %arg11[%c0_457, %c5_458, %c1_459, %c0_460] : memref<2x6x6x64xf32, #tpu.memory_space<vmem>>, vector<2x1x1x64xf32>
    %366 = vector.shape_cast %365 : vector<2x1x1x64xf32> to vector<2x64xf32>
    %367 = arith.truncf %366 : vector<2x64xf32> to vector<2x64xbf16>
    %c5_461 = arith.constant 5 : index
    %c64_462 = arith.constant 64 : index
    %c0_463 = arith.constant 0 : index
    %368 = vector.load %arg12[%c5_461, %c64_462, %c0_463] : memref<6x384x512xbf16, #tpu.memory_space<vmem>>, vector<1x64x512xbf16>
    %369 = vector.shape_cast %368 : vector<1x64x512xbf16> to vector<64x512xbf16>
    %cst_464 = arith.constant dense<0.000000e+00> : vector<2x512xf32>
    %370 = tpu.matmul %367, %369, %cst_464 {dimension_numbers = #tpu.dot_dimension_numbers<[1], [0], [0], [1], [0, 0, 1, 1], [], []>} : vector<2x64xbf16>, vector<64x512xbf16>, vector<2x512xf32> -> vector<2x512xf32>
    %371 = arith.addf %364, %370 : vector<2x512xf32>
    %c0_465 = arith.constant 0 : index
    %c5_466 = arith.constant 5 : index
    %c2_467 = arith.constant 2 : index
    %c0_468 = arith.constant 0 : index
    %372 = vector.load %arg11[%c0_465, %c5_466, %c2_467, %c0_468] : memref<2x6x6x64xf32, #tpu.memory_space<vmem>>, vector<2x1x1x64xf32>
    %373 = vector.shape_cast %372 : vector<2x1x1x64xf32> to vector<2x64xf32>
    %374 = arith.truncf %373 : vector<2x64xf32> to vector<2x64xbf16>
    %c5_469 = arith.constant 5 : index
    %c128_470 = arith.constant 128 : index
    %c0_471 = arith.constant 0 : index
    %375 = vector.load %arg12[%c5_469, %c128_470, %c0_471] : memref<6x384x512xbf16, #tpu.memory_space<vmem>>, vector<1x64x512xbf16>
    %376 = vector.shape_cast %375 : vector<1x64x512xbf16> to vector<64x512xbf16>
    %cst_472 = arith.constant dense<0.000000e+00> : vector<2x512xf32>
    %377 = tpu.matmul %374, %376, %cst_472 {dimension_numbers = #tpu.dot_dimension_numbers<[1], [0], [0], [1], [0, 0, 1, 1], [], []>} : vector<2x64xbf16>, vector<64x512xbf16>, vector<2x512xf32> -> vector<2x512xf32>
    %378 = arith.addf %371, %377 : vector<2x512xf32>
    %c0_473 = arith.constant 0 : index
    %c5_474 = arith.constant 5 : index
    %c3_475 = arith.constant 3 : index
    %c0_476 = arith.constant 0 : index
    %379 = vector.load %arg11[%c0_473, %c5_474, %c3_475, %c0_476] : memref<2x6x6x64xf32, #tpu.memory_space<vmem>>, vector<2x1x1x64xf32>
    %380 = vector.shape_cast %379 : vector<2x1x1x64xf32> to vector<2x64xf32>
    %381 = arith.truncf %380 : vector<2x64xf32> to vector<2x64xbf16>
    %c5_477 = arith.constant 5 : index
    %c192_478 = arith.constant 192 : index
    %c0_479 = arith.constant 0 : index
    %382 = vector.load %arg12[%c5_477, %c192_478, %c0_479] : memref<6x384x512xbf16, #tpu.memory_space<vmem>>, vector<1x64x512xbf16>
    %383 = vector.shape_cast %382 : vector<1x64x512xbf16> to vector<64x512xbf16>
    %cst_480 = arith.constant dense<0.000000e+00> : vector<2x512xf32>
    %384 = tpu.matmul %381, %383, %cst_480 {dimension_numbers = #tpu.dot_dimension_numbers<[1], [0], [0], [1], [0, 0, 1, 1], [], []>} : vector<2x64xbf16>, vector<64x512xbf16>, vector<2x512xf32> -> vector<2x512xf32>
    %385 = arith.addf %378, %384 : vector<2x512xf32>
    %c0_481 = arith.constant 0 : index
    %c5_482 = arith.constant 5 : index
    %c4_483 = arith.constant 4 : index
    %c0_484 = arith.constant 0 : index
    %386 = vector.load %arg11[%c0_481, %c5_482, %c4_483, %c0_484] : memref<2x6x6x64xf32, #tpu.memory_space<vmem>>, vector<2x1x1x64xf32>
    %387 = vector.shape_cast %386 : vector<2x1x1x64xf32> to vector<2x64xf32>
    %388 = arith.truncf %387 : vector<2x64xf32> to vector<2x64xbf16>
    %c5_485 = arith.constant 5 : index
    %c256_486 = arith.constant 256 : index
    %c0_487 = arith.constant 0 : index
    %389 = vector.load %arg12[%c5_485, %c256_486, %c0_487] : memref<6x384x512xbf16, #tpu.memory_space<vmem>>, vector<1x64x512xbf16>
    %390 = vector.shape_cast %389 : vector<1x64x512xbf16> to vector<64x512xbf16>
    %cst_488 = arith.constant dense<0.000000e+00> : vector<2x512xf32>
    %391 = tpu.matmul %388, %390, %cst_488 {dimension_numbers = #tpu.dot_dimension_numbers<[1], [0], [0], [1], [0, 0, 1, 1], [], []>} : vector<2x64xbf16>, vector<64x512xbf16>, vector<2x512xf32> -> vector<2x512xf32>
    %392 = arith.addf %385, %391 : vector<2x512xf32>
    %c0_489 = arith.constant 0 : index
    %c5_490 = arith.constant 5 : index
    %c5_491 = arith.constant 5 : index
    %c0_492 = arith.constant 0 : index
    %393 = vector.load %arg11[%c0_489, %c5_490, %c5_491, %c0_492] : memref<2x6x6x64xf32, #tpu.memory_space<vmem>>, vector<2x1x1x64xf32>
    %394 = vector.shape_cast %393 : vector<2x1x1x64xf32> to vector<2x64xf32>
    %395 = arith.truncf %394 : vector<2x64xf32> to vector<2x64xbf16>
    %c5_493 = arith.constant 5 : index
    %c320_494 = arith.constant 320 : index
    %c0_495 = arith.constant 0 : index
    %396 = vector.load %arg12[%c5_493, %c320_494, %c0_495] : memref<6x384x512xbf16, #tpu.memory_space<vmem>>, vector<1x64x512xbf16>
    %397 = vector.shape_cast %396 : vector<1x64x512xbf16> to vector<64x512xbf16>
    %cst_496 = arith.constant dense<0.000000e+00> : vector<2x512xf32>
    %398 = tpu.matmul %395, %397, %cst_496 {dimension_numbers = #tpu.dot_dimension_numbers<[1], [0], [0], [1], [0, 0, 1, 1], [], []>} : vector<2x64xbf16>, vector<64x512xbf16>, vector<2x512xf32> -> vector<2x512xf32>
    %399 = arith.addf %392, %398 : vector<2x512xf32>
    %c0_497 = arith.constant 0 : index
    %c0_498 = arith.constant 0 : index
    %400 = vector.load %arg5[%c0_497, %c0_498] : memref<1x512xf32, #tpu.memory_space<vmem>>, vector<1x512xf32>
    %401 = vector.broadcast %400 : vector<1x512xf32> to vector<2x512xf32>
    %402 = arith.addf %399, %401 : vector<2x512xf32>
    %cst_499 = arith.constant 0.000000e+00 : f32
    %403 = vector.broadcast %cst_499 : f32 to vector<2x512xf32>
    %404 = arith.maximumf %402, %403 : vector<2x512xf32>
    %c0_500 = arith.constant 0 : index
    %c0_501 = arith.constant 0 : index
    %405 = vector.load %arg6[%c0_500, %c0_501] : memref<512x16xf32, #tpu.memory_space<vmem>>, vector<512x16xf32>
    %cst_502 = arith.constant dense<0.000000e+00> : vector<2x16xf32>
    %406 = tpu.matmul %404, %405, %cst_502 {dimension_numbers = #tpu.dot_dimension_numbers<[1], [0], [0], [1], [0, 0, 1, 1], [], []>} : vector<2x512xf32>, vector<512x16xf32>, vector<2x16xf32> -> vector<2x16xf32>
    %c0_503 = arith.constant 0 : index
    %c0_504 = arith.constant 0 : index
    %407 = vector.load %arg7[%c0_503, %c0_504] : memref<1x16xf32, #tpu.memory_space<vmem>>, vector<1x16xf32>
    %408 = vector.broadcast %407 : vector<1x16xf32> to vector<2x16xf32>
    %409 = arith.addf %406, %408 : vector<2x16xf32>
    %c0_505 = arith.constant 0 : index
    %c0_506 = arith.constant 0 : index
    %410 = vector.load %arg8[%c0_505, %c0_506] : memref<2x16xf32, #tpu.memory_space<vmem>>, vector<2x16xf32>
    tpu.vector_store %arg8[%c0_505, %c0_506], %409 {strides = array<i32>} : memref<2x16xf32, #tpu.memory_space<vmem>>, vector<2x16xf32>,
    return
  }
  func.func @transform_0(%arg0: i32) -> (i32, i32, i32, i32) {
    %c0_i32 = arith.constant 0 : i32
    %c0_i32_0 = arith.constant 0 : i32
    %c0_i32_1 = arith.constant 0 : i32
    %c0_i32_2 = arith.constant 0 : i32
    %c0_i32_3 = arith.constant 0 : i32
    return %c0_i32, %c0_i32_0, %c0_i32_1, %c0_i32_2 : i32, i32, i32, i32
  }
  func.func @transform_1(%arg0: i32) -> (i32, i32) {
    %c0_i32 = arith.constant 0 : i32
    %c0_i32_0 = arith.constant 0 : i32
    %c0_i32_1 = arith.constant 0 : i32
    return %c0_i32, %c0_i32_0 : i32, i32
  }
  func.func @transform_2(%arg0: i32) -> (i32, i32) {
    %c0_i32 = arith.constant 0 : i32
    %c0_i32_0 = arith.constant 0 : i32
    %c0_i32_1 = arith.constant 0 : i32
    return %c0_i32, %c0_i32_0 : i32, i32
  }
  func.func @transform_4(%arg0: i32) -> (i32, i32) {
    %c0_i32 = arith.constant 0 : i32
    %c0_i32_0 = arith.constant 0 : i32
    %c0_i32_1 = arith.constant 0 : i32
    return %c0_i32, %c0_i32_0 : i32, i32
  }
  func.func @transform_5(%arg0: i32) -> (i32, i32) {
    %c0_i32 = arith.constant 0 : i32
    %c0_i32_0 = arith.constant 0 : i32
    %c0_i32_1 = arith.constant 0 : i32
    return %c0_i32, %c0_i32_0 : i32, i32
  }
  func.func @transform_6(%arg0: i32) -> (i32, i32) {
    %c0_i32 = arith.constant 0 : i32
    %c0_i32_0 = arith.constant 0 : i32
    %c0_i32_1 = arith.constant 0 : i32
    return %c0_i32, %c0_i32_0 : i32, i32
  }
  func.func @transform_7(%arg0: i32) -> (i32, i32) {
    %c0_i32 = arith.constant 0 : i32
    %c0_i32_0 = arith.constant 0 : i32
    %c0_i32_1 = arith.constant 0 : i32
    return %c0_i32, %c0_i32_0 : i32, i32
  }
}

</mosaic_0001>

<bundles_post_ra>
// kernel: tiny_value_forward.1
= control target key start
LH: loop header
LB: loop body
LE: loop exit
PB: predicated region body
PF: predicated region fallthrough
CT: control target
= control target key end

     0   :  { %12 = vsyncpa [#allocation8], 0  ;;  %s21930_s0 = inlined_call_operand.vmem [shape: f32[2,6,6,64], index: 0, kind: input, shape index: {}]   ;;  %s21931_s1 = inlined_call_operand.vmem [shape: f32[576,64], index: 1, kind: input, shape index: {}]   ;;  %s21932_s2 = inlined_call_operand.vmem [shape: f32[576,64], index: 2, kind: input, shape index: {}]   ;;  %s21933_s3 = inlined_call_operand.hbm [shape: bf16[6,384,512], index: 3, kind: input, shape index: {}]   ;;  %s21934_s4 = inlined_call_operand.hbm [shape: f32[1,512], index: 4, kind: input, shape index: {}]   ;;  %s21935_s5 = inlined_call_operand.vmem [shape: f32[512,16], index: 5, kind: input, shape index: {}]   ;;  %s21936_s6 = inlined_call_operand.hbm [shape: f32[1,16], index: 6, kind: input, shape index: {}]   ;;  %s21937_s7 = inlined_call_operand.hbm [shape: f32[2,16], index: 7, kind: output, shape index: {}]  }
   0x1   :  { %13 = vsyncpa [#allocation11], 0 }
   0x2   :  { %14 = vsyncpa [#allocation9], 0  ;;  %s19075_s24 = smov [#allocation7]   ;;  %s19076_s26 = smov [#allocation10]  }
   0x3   :  { %s27_s25 = sshll.u32 %s19075_s24, 4  ;;  %s39_s27 = sshll.u32 %s19076_s26, 4  ;;  %s28_s25 = int_to_ptr.vmem [resolvable:$true] %s27_s25  ;;  %s40_s27 = int_to_ptr.vmem [resolvable:$true] %s39_s27 }
   0x4   :  { %s18870_s28 = scalar_lea.vmem %s28_s25, 64  ;;  %p18875_p1 = scmp.lt.s32.totalorder %s28_s25, %s28_s25 }
   0x5   :  { %p18871_p0 = scmp.ne.s32.totalorder %s28_s25, %s18870_s28  ;;  %p18876_p2 = scmp.lt.s32.totalorder %s18870_s28, %s18870_s28 }
   0x7   :  { %p18877_p3 = por %p18876_p2, %p18875_p1 }
   0x9   :  { %p18878_p4 = pnand %p18877_p3, %p18871_p0 }
   0xb   :  { %18881 = shalt.err (!%p18878_p4)
}
   0xc   :  { %30 = dma.hbm_to_vmem [thread:$0]  %s21934_s4, 64, %s28_s25, [#allocation8]  }
   0xd   :  { %s18890_s8 = scalar_lea.vmem %s40_s27, 16  ;;  %s18894_s9 = scalar_lea.vmem %s40_s27, 32 }
   0xe   :  { %p18891_p5 = scmp.ne.s32.totalorder %s40_s27, %s18890_s8  ;;  %p18895_p6 = scmp.lt.s32.totalorder %s40_s27, %s40_s27 }
   0xf   :  { %p18896_p7 = scmp.lt.s32.totalorder %s18894_s9, %s18890_s8 }
  0x11   :  { %p18897_p8 = por %p18896_p7, %p18895_p6 }
  0x13   :  { %p18898_p9 = pnand %p18897_p8, %p18891_p5 }
  0x15   :  { %18901 = shalt.err (!%p18898_p9)
}
  0x16   :  { %42 = dma.hbm_to_vmem [thread:$0]  %s21936_s6, 16, %s40_s27, [#allocation11]  }
  0x17   :  { %19057 = dma.done.wait [#allocation8], 64  }
  0x18   :  { %19058 = vsyncadd [#allocation8], 4294967232 }
  0x19   :  { %19059 = dma.done.wait [#allocation11], 16  }
  0x1a   :  { %19060 = vsyncadd [#allocation11], 4294967280  ;;  %vm131_vm0 = vcmask 523264   ;;  %v176_v0 = vlaneseq  ;;  %v19077_v1 = vmov 0.0   ;;  %v19078_v2 = vmov 1983009808  }
  0x1b   :  { %132 = vst.msk [vmem:[#allocation2] sm:$0xff] %vm131_vm0, %v19077_v1  ;;  %133 = vst.msk [vmem:[#allocation2 + $0x8] sm:$0xff] %vm131_vm0, %v19077_v1  ;;  %v174_v3 = vunpack.c.l.s4 %v19078_v2  ;;  %vm365_vm1 = vcmask 521216   ;;  %v19175_v7 = vld [vmem:[%s21930_s0] sm:$0x3f]  ;;  %v4011_v30 = vld [vmem:[%s21931_s1 + $0xf8] sm:$0xff] }
  0x1c   :  { %134 = vst.msk [vmem:[#allocation2 + $0x10] sm:$0xff] %vm131_vm0, %v19077_v1  ;;  %135 = vst.msk [vmem:[#allocation2 + $0x18] sm:$0xff] %vm131_vm0, %v19077_v1  ;;  %v19167_v4 = vshrl.u32 %v176_v0, 7  ;;  %v19180_v8 = vld [vmem:[%s21930_s0 + $0x8] sm:$0x3f]  ;;  %v3995_v31 = vld [vmem:[%s21931_s1 + $0x78] sm:$0xff]  ;;  %17415 = vmatprep.subr.mxu0 %v4011_v30 }
  0x1d   :  { %136 = vst.msk [vmem:[#allocation2 + $0x20] sm:$0xff] %vm131_vm0, %v19077_v1  ;;  %137 = vst.msk [vmem:[#allocation2 + $0x28] sm:$0xff] %vm131_vm0, %v19077_v1  ;;  %v175_v5 = vunpack.c.0.s8 %v174_v3  ;;  %v19185_v9 = vld [vmem:[%s21930_s0 + $0x10] sm:$0x3f]  ;;  %v19196_v11 = vld [vmem:[%s21930_s0 + $0x18] sm:$0x3f]  ;;  %17416 = vmatpush3.msra.mxu0 %v3995_v31 }
  0x1e   :  { %138 = vst.msk [vmem:[#allocation2 + $0x30] sm:$0xff] %vm131_vm0, %v19077_v1  ;;  %139 = vst.msk [vmem:[#allocation2 + $0x38] sm:$0xff] %vm131_vm0, %v19077_v1  ;;  %v19201_v12 = vld [vmem:[%s21930_s0 + $0x20] sm:$0x3f]  ;;  %v19209_v14 = vld [vmem:[%s21930_s0 + $0x28] sm:$0x3f] }
  0x1f   :  { %140 = vst.msk [vmem:[#allocation2 + $0x40] sm:$0xff] %vm131_vm0, %v19077_v1  ;;  %141 = vst.msk [vmem:[#allocation2 + $0x48] sm:$0xff] %vm131_vm0, %v19077_v1  ;;  %v19170_v6 = vsub.s32 %v175_v5, %v19167_v4  ;;  %v19216_v15 = vld [vmem:[%s21930_s0 + $0x30] sm:$0x3f]  ;;  %v19226_v19 = vld [vmem:[%s21930_s0 + $0x38] sm:$0x3f] }
  0x20   :  { %142 = vst.msk [vmem:[#allocation2 + $0x50] sm:$0xff] %vm131_vm0, %v19077_v1  ;;  %143 = vst.msk [vmem:[#allocation2 + $0x58] sm:$0xff] %vm131_vm0, %v19077_v1  ;;  %v19231_v21 = vld [vmem:[%s21930_s0 + $0x40] sm:$0x3f]  ;;  %v19236_v22 = vld [vmem:[%s21930_s0 + $0x48] sm:$0x3f] }
  0x21   :  { %144 = vst.msk [vmem:[#allocation2 + $0x60] sm:$0xff] %vm131_vm0, %v19077_v1  ;;  %145 = vst.msk [vmem:[#allocation2 + $0x68] sm:$0xff] %vm131_vm0, %v19077_v1  ;;  %v19247_v24 = vld [vmem:[%s21930_s0 + $0x50] sm:$0x3f]  ;;  %v19252_v25 = vld [vmem:[%s21930_s0 + $0x58] sm:$0x3f] }
  0x22   :  { %146 = vst.msk [vmem:[#allocation2 + $0x70] sm:$0xff] %vm131_vm0, %v19077_v1  ;;  %147 = vst.msk [vmem:[#allocation2 + $0x78] sm:$0xff] %vm131_vm0, %v19077_v1  ;;  %v765_v10 = vld [vmem:[#allocation2 + $0x1] sm:$0x3f]  ;;  %v4010_v36 = vld [vmem:[%s21931_s1 + $0xf0] sm:$0xff]  ;;  %s19079_s24 = smov 64  }
  0x23   :  { %366 = vst.msk [vmem:[#allocation2 + $0x9] sm:$0x3f] %vm365_vm1, %v19175_v7  ;;  %367 = vst.msk [vmem:[#allocation2 + $0x11] sm:$0x3f] %vm365_vm1, %v19180_v8  ;;  %v796_v13 = vrot.slane %v765_v10, %v19170_v6  ;;  %v789_v17 = vcombine.high %v765_v10, %v765_v10  ;;  %v3994_v37 = vld [vmem:[%s21931_s1 + $0x70] sm:$0xff]  ;;  %v4009_v42 = vld [vmem:[%s21931_s1 + $0xe8] sm:$0xff]  ;;  %17417 = vmatprep.subr.mxu0 %v4010_v36 }
  0x24   :  { %368 = vst.msk [vmem:[#allocation2 + $0x19] sm:$0x3f] %vm365_vm1, %v19185_v9  ;;  %369 = vst.msk [vmem:[#allocation2 + $0x21] sm:$0x3f] %vm365_vm1, %v19196_v11  ;;  %v3993_v43 = vld [vmem:[%s21931_s1 + $0x68] sm:$0xff]  ;;  %17418 = vmatpush3.msra.mxu0 %v3994_v37  ;;  %v4008_v57 = vld [vmem:[%s21931_s1 + $0xe0] sm:$0xff] }
  0x25   :  { %370 = vst.msk [vmem:[#allocation2 + $0x29] sm:$0x3f] %vm365_vm1, %v19201_v12  ;;  %371 = vst.msk [vmem:[#allocation2 + $0x31] sm:$0x3f] %vm365_vm1, %v19209_v14  ;;  %v804_v23 = vcombine.high %v796_v13, %v796_v13  ;;  %v3148_v26 = vld [vmem:[#allocation2 + $0x39] sm:$0x3f]  ;;  %v803_v38 = vrot.slane %v789_v17, %v19170_v6  ;;  %17419 = vmatprep.subr.mxu0 %v4009_v42 }
  0x26   :  { %v771_v16 = vld [vmem:[#allocation2 + $0x41] sm:$0x3f]  ;;  %372 = vst.msk [vmem:[#allocation2 + $0x49] sm:$0x3f] %vm365_vm1, %v19216_v15  ;;  %373 = vst.msk [vmem:[#allocation2 + $0x51] sm:$0x3f] %vm365_vm1, %v19226_v19  ;;  %v3247_v28 = vcombine.high %v3148_v26, %v3148_v26  ;;  %v19265_v33 = vrot.slane %v3148_v26, %v19170_v6  ;;  %17420 = vmatpush3.msra.mxu0 %v3993_v43 }
  0x27   :  { %v892_v18 = vrot.slane %v771_v16, %v19170_v6  ;;  %v885_v20 = vcombine.high %v771_v16, %v771_v16  ;;  %374 = vst.msk [vmem:[#allocation2 + $0x59] sm:$0x3f] %vm365_vm1, %v19231_v21  ;;  %375 = vst.msk [vmem:[#allocation2 + $0x61] sm:$0x3f] %vm365_vm1, %v19236_v22  ;;  %v981_v32 = vcombine.low %v796_v13, %v804_v23  ;;  %v3992_v62 = vld [vmem:[%s21931_s1 + $0x60] sm:$0xff]  ;;  %17421 = vmatprep.subr.mxu0 %v4008_v57  ;;  %vm1161_vm2 = vcmask 1048064  }
  0x28   :  { %376 = vst.msk [vmem:[#allocation2 + $0x69] sm:$0x3f] %vm365_vm1, %v19247_v24  ;;  %377 = vst.msk [vmem:[#allocation2 + $0x71] sm:$0x3f] %vm365_vm1, %v19252_v25  ;;  %v19283_v41 = vrot.slane %v3247_v28, %v19170_v6  ;;  %v3262_v48 = vcombine.high %v19265_v33, %v19265_v33  ;;  %17422 = vmatpush3.msra.mxu0 %v3992_v62  ;;  %vm19080_vm3 = vmmov 0   ;;  %s61_s15 = scalar_lea.hbm %s21933_s3, 12288 }
  0x29   :  { %v900_v27 = vcombine.high %v892_v18, %v892_v18  ;;  %v3154_v29 = vld [vmem:[#allocation2 + $0x79] sm:$0x3f]  ;;  %v19280_v40 = vrot.slane %v885_v20, %v19170_v6  ;;  %v989_v45 = vrot.slane %v981_v32, %v19170_v6  ;;  %s19081_s16 = smov [#allocation5]   ;;  %s19082_s18 = smov [#allocation5 + $0x300]  }
  0x2a   :  { %v3343_v34 = vcombine.high %v3154_v29, %v3154_v29  ;;  %v19268_v35 = vrot.slane %v3154_v29, %v19170_v6  ;;  %v766_v44 = vld [vmem:[#allocation2 + $0x9] sm:$0x3f]  ;;  %v1559_v46 = vld [vmem:[#allocation2 + $0x10] sm:$0x3f]  ;;  %s57_s17 = sshll.u32 %s19081_s16, 4  ;;  %s71_s19 = sshll.u32 %s19082_s18, 4  ;;  %s21264_s17 = int_to_ptr.vmem [resolvable:$true] %s57_s17  ;;  %s72_s19 = int_to_ptr.vmem [resolvable:$true] %s71_s19 }
  0x2b   :  { %v19277_v39 = vcombine.low %v892_v18, %v900_v27  ;;  %v1560_v47 = vld [vmem:[#allocation2 + $0x18] sm:$0x3f]  ;;  %v812_v51 = vrot.slane %v766_v44, %v19170_v6  ;;  %v1598_v52 = vcombine.high %v1559_v46, %v1559_v46  ;;  %v1605_v53 = vrot.slane %v1559_v46, %v19170_v6  ;;  %v1558_v55 = vld [vmem:[#allocation2 + $0x8] sm:$0x3f]  ;;  %v767_v56 = vld [vmem:[#allocation2 + $0x11] sm:$0x3f]  ;;  %p18915_p11 = scmp.lt.s32.totalorder %s21264_s17, %s21264_s17 }
  0x2c   :  { %v19295_v49 = vrot.slane %v3343_v34, %v19170_v6  ;;  %v3358_v50 = vcombine.high %v19268_v35, %v19268_v35  ;;  %v1621_v54 = vrot.slane %v1560_v47, %v19170_v6  ;;  %v1582_v58 = vcombine.high %v1558_v55, %v1558_v55  ;;  %v1561_v30 = vld [vmem:[#allocation2 + $0x20] sm:$0x3f]  ;;  %v768_v37 = vld [vmem:[#allocation2 + $0x19] sm:$0x3f]  ;;  %s18910_s20 = scalar_lea.vmem %s21264_s17, 12288  ;;  %s21269_s21 = scalar_lea.vmem %s21264_s17, 73728 }
  0x2d   :  { %v1589_v59 = vrot.slane %v1558_v55, %v19170_v6  ;;  %v805_v60 = vcombine.high %v766_v44, %v766_v44  ;;  %v828_v61 = vrot.slane %v767_v56, %v19170_v6  ;;  %v820_v63 = vcombine.high %v812_v51, %v812_v51  ;;  %p18911_p10 = scmp.ne.s32.totalorder %s21264_s17, %s18910_s20  ;;  %p18916_p12 = scmp.lt.s32.totalorder %s21269_s21, %s18910_s20 }
  0x2e   :  { %v982_v0 = vcombine.low %v803_v38, %v812_v51  ;;  %v1612_v2 = vrot.slane %v1598_v52, %v19170_v6  ;;  %v1613_v3 = vcombine.high %v1605_v53, %v1605_v53  ;;  %v1629_v5 = vcombine.high %v1621_v54, %v1621_v54  ;;  %v1562_v52 = vld [vmem:[#allocation2 + $0x28] sm:$0x3f] }
  0x2f   :  { %v1596_v10 = vrot.slane %v1582_v58, %v19170_v6  ;;  %v1597_v13 = vcombine.high %v1589_v59, %v1589_v59  ;;  %v819_v16 = vrot.slane %v805_v60, %v19170_v6  ;;  %v836_v20 = vcombine.high %v828_v61, %v828_v61  ;;  %v1563_v58 = vld [vmem:[#allocation2 + $0x30] sm:$0x3f]  ;;  %p18917_p13 = por %p18916_p12, %p18915_p11 }
  0x30   :  { %v996_v17 = vrot.slane %v982_v0, %v19170_v6  ;;  %v1791_v18 = vcombine.low %v1613_v3, %v1612_v2  ;;  %v1614_v23 = vcombine.high %v1560_v47, %v1560_v47  ;;  %v1792_v26 = vcombine.low %v1621_v54, %v1629_v5  ;;  %v770_v5 = vld [vmem:[#allocation2 + $0x29] sm:$0x3f] }
  0x31   :  { %v1774_v27 = vcombine.low %v1589_v59, %v1597_v13  ;;  %v1775_v28 = vcombine.low %v1596_v10, %v1605_v53  ;;  %v998_v29 = vcombine.low %v820_v63, %v819_v16  ;;  %v999_v34 = vcombine.low %v828_v61, %v836_v20  ;;  %v769_v63 = vld [vmem:[#allocation2 + $0x21] sm:$0x3f]  ;;  %p18918_p0 = pnand %p18917_p13, %p18911_p10 }
  0x32   :  { %v997_v31 = vcombine.low %v989_v45, %v996_v17  ;;  %v1799_v32 = vrot.slane %v1791_v18, %v19170_v6  ;;  %v1628_v36 = vrot.slane %v1614_v23, %v19170_v6  ;;  %v1806_v38 = vrot.slane %v1792_v26, %v19170_v6 }
  0x33   :  { %v1782_v42 = vrot.slane %v1774_v27, %v19170_v6  ;;  %v1789_v43 = vrot.slane %v1775_v28, %v19170_v6  ;;  %v1006_v44 = vrot.slane %v998_v29, %v19170_v6  ;;  %v1013_v46 = vrot.slane %v999_v34, %v19170_v6  ;;  %v4007_v27 = vld [vmem:[%s21931_s1 + $0xd8] sm:$0xff]  ;;  %v4006_v34 = vld [vmem:[%s21931_s1 + $0xd0] sm:$0xff] }
  0x34   :  { %1134 = vrot.lane.b32.xlu0 %v997_v31, %s19079_s24  ;;  %v1630_v45 = vcombine.high %v1561_v30, %v1561_v30  ;;  %v1637_v47 = vrot.slane %v1561_v30, %v19170_v6  ;;  %v821_v51 = vcombine.high %v767_v56, %v767_v56  ;;  %v1807_v53 = vcombine.low %v1799_v32, %v1806_v38  ;;  %v3991_v32 = vld [vmem:[%s21931_s1 + $0x58] sm:$0xff] }
  0x35   :  { %v1790_v54 = vcombine.low %v1782_v42, %v1789_v43  ;;  %v837_v55 = vcombine.high %v768_v37, %v768_v37  ;;  %v844_v57 = vrot.slane %v768_v37, %v19170_v6  ;;  %v1014_v59 = vcombine.low %v1006_v44, %v1013_v46  ;;  %17423 = vmatprep.subr.mxu0 %v4007_v27  ;;  %v1564_v43 = vld [vmem:[#allocation2 + $0x48] sm:$0x3f]  ;;  %v1566_v27 = vld [vmem:[#allocation2 + $0x58] sm:$0x3f] }
  0x36   :  { %v1644_v60 = vrot.slane %v1630_v45, %v19170_v6  ;;  %v1645_v61 = vcombine.high %v1637_v47, %v1637_v47  ;;  %v1808_v62 = vcombine.low %v1628_v36, %v1637_v47  ;;  %1929 = vrot.lane.b32.xlu1 %v1807_v53, %s19079_s24  ;;  %v835_v0 = vrot.slane %v821_v51, %v19170_v6 }
  0x37   :  { %v851_v2 = vrot.slane %v837_v55, %v19170_v6  ;;  %v852_v56 = vcombine.high %v844_v57, %v844_v57  ;;  %v1646_v3 = vcombine.high %v1562_v52, %v1562_v52  ;;  %v1653_v16 = vrot.slane %v1562_v52, %v19170_v6  ;;  %17424 = vmatpush3.msra.mxu0 %v3991_v32  ;;  %v3990_v55 = vld [vmem:[%s21931_s1 + $0x50] sm:$0xff] }
  0x38   :  { %1927 = vrot.lane.b32.xlu0 %v1790_v54, %s19079_s24  ;;  %v1809_v10 = vcombine.low %v1645_v61, %v1644_v60  ;;  %v1816_v13 = vrot.slane %v1808_v62, %v19170_v6  ;;  %v1669_v17 = vrot.slane %v1563_v58, %v19170_v6  ;;  %v1015_v18 = vcombine.low %v835_v0, %v844_v57  ;;  %v1565_v61 = vld [vmem:[#allocation2 + $0x50] sm:$0x3f]  ;;  %v4005_v62 = vld [vmem:[%s21931_s1 + $0xc8] sm:$0xff] }
  0x39   :  { %v1016_v20 = vcombine.low %v852_v56, %v851_v2  ;;  %v1660_v23 = vrot.slane %v1646_v3, %v19170_v6  ;;  %v853_v26 = vcombine.high %v769_v63, %v769_v63  ;;  %v1661_v29 = vcombine.high %v1653_v16, %v1653_v16  ;;  %17425 = vmatprep.subr.mxu0 %v4006_v34  ;;  %v772_v3 = vld [vmem:[#allocation2 + $0x49] sm:$0x3f] }
  0x3a   :  { %v1823_v28 = vrot.slane %v1809_v10, %v19170_v6  ;;  %v860_v30 = vrot.slane %v769_v63, %v19170_v6  ;;  %v876_v31 = vrot.slane %v770_v5, %v19170_v6  ;;  %1136 = vrot.lane.b32.xlu1 %v1014_v59, %s19079_s24  ;;  %v1023_v36 = vrot.slane %v1015_v18, %v19170_v6  ;;  %v3989_v18 = vld [vmem:[%s21931_s1 + $0x48] sm:$0xff] }
  0x3b   :  { %v1030_v37 = vrot.slane %v1016_v20, %v19170_v6  ;;  %v1826_v38 = vcombine.low %v1660_v23, %v1669_v17  ;;  %v867_v42 = vrot.slane %v853_v26, %v19170_v6  ;;  %v1825_v46 = vcombine.low %v1653_v16, %v1661_v29  ;;  %17426 = vmatpush3.msra.mxu0 %v3990_v55  ;;  %v773_v55 = vld [vmem:[#allocation2 + $0x51] sm:$0x3f] }
  0x3c   :  { %v1824_v44 = vcombine.low %v1816_v13, %v1823_v28  ;;  %v868_v45 = vcombine.high %v860_v30, %v860_v30  ;;  %v1662_v47 = vcombine.high %v1563_v58, %v1563_v58  ;;  %v1677_v54 = vcombine.high %v1669_v17, %v1669_v17  ;;  %17427 = vmatprep.subr.mxu0 %v4005_v62 }
  0x3d   :  { %v1031_v51 = vcombine.low %v1023_v36, %v1030_v37  ;;  %v1840_v52 = vrot.slane %v1826_v38, %v19170_v6  ;;  %v1033_v53 = vcombine.low %v867_v42, %v876_v31  ;;  %v1833_v57 = vrot.slane %v1825_v46, %v19170_v6  ;;  %17428 = vmatpush3.msra.mxu0 %v3989_v18  ;;  %v3988_v38 = vld [vmem:[%s21931_s1 + $0x40] sm:$0xff] }
  0x3e   :  { %1931 = vrot.lane.b32.xlu0 %v1824_v44, %s19079_s24  ;;  %v1032_v59 = vcombine.low %v860_v30, %v868_v45  ;;  %v1676_v60 = vrot.slane %v1662_v47, %v19170_v6  ;;  %v1685_v58 = vrot.slane %v1564_v43, %v19170_v6  ;;  %v869_v0 = vcombine.high %v770_v5, %v770_v5  ;;  %v4003_v45 = vld [vmem:[%s21931_s1 + $0xb8] sm:$0xff] }
  0x3f   :  { %1138 = vrot.lane.b32.xlu1 %v1031_v51, %s19079_s24  ;;  %v1047_v63 = vrot.slane %v1033_v53, %v19170_v6  ;;  %v884_v2 = vcombine.high %v876_v31, %v876_v31  ;;  %v1064_v56 = vrot.slane %v19277_v39, %v19170_v6  ;;  %v1841_v10 = vcombine.low %v1833_v57, %v1840_v52  ;;  %v4004_v31 = vld [vmem:[%s21931_s1 + $0xc0] sm:$0xff] }
  0x40   :  { %v1040_v13 = vrot.slane %v1032_v59, %v19170_v6  ;;  %v1693_v16 = vcombine.high %v1685_v58, %v1685_v58  ;;  %v1842_v17 = vcombine.low %v1677_v54, %v1676_v60  ;;  %v883_v20 = vrot.slane %v869_v0, %v19170_v6  ;;  %v1567_v53 = vld [vmem:[#allocation2 + $0x60] sm:$0x3f]  ;;  %17429 = vmatprep.subr.mxu0 %v4004_v31 }
  0x41   :  { %v1678_v23 = vcombine.high %v1564_v43, %v1564_v43  ;;  %v1694_v26 = vcombine.high %v1565_v61, %v1565_v61  ;;  %v1701_v5 = vrot.slane %v1565_v61, %v19170_v6  ;;  %v901_v30 = vcombine.high %v772_v3, %v772_v3  ;;  %v774_v61 = vld [vmem:[#allocation2 + $0x59] sm:$0x3f]  ;;  %17430 = vmatpush3.msra.mxu0 %v3988_v38 }
  0x42   :  { %1933 = vrot.lane.b32.xlu0 %v1841_v10, %s19079_s24  ;;  %v1048_v39 = vcombine.low %v1040_v13, %v1047_v63  ;;  %v1843_v28 = vcombine.low %v1685_v58, %v1693_v16  ;;  %v1850_v29 = vrot.slane %v1842_v17, %v19170_v6  ;;  %v1049_v32 = vcombine.low %v884_v2, %v883_v20  ;;  %v19399_v17 = vld [vmem:[#allocation2 + $0x68] sm:$0x3f] }
  0x43   :  { %v1692_v34 = vrot.slane %v1678_v23, %v19170_v6  ;;  %v1708_v36 = vrot.slane %v1694_v26, %v19170_v6  ;;  %v1709_v37 = vcombine.high %v1701_v5, %v1701_v5  ;;  %v908_v43 = vrot.slane %v772_v3, %v19170_v6  ;;  %17431 = vmatprep.subr.mxu0 %v4003_v45  ;;  %v3987_v3 = vld [vmem:[%s21931_s1 + $0x38] sm:$0xff] }
  0x44   :  { %1140 = vrot.lane.b32.xlu1 %v1048_v39, %s19079_s24  ;;  %v1857_v42 = vrot.slane %v1843_v28, %v19170_v6  ;;  %v915_v44 = vrot.slane %v901_v30, %v19170_v6  ;;  %v1710_v46 = vcombine.high %v1566_v27, %v1566_v27  ;;  %v1057_v47 = vrot.slane %v1049_v32, %v19170_v6 }
  0x45   :  { %v1859_v51 = vcombine.low %v1692_v34, %v1701_v5  ;;  %v1860_v52 = vcombine.low %v1709_v37, %v1708_v36  ;;  %v1717_v54 = vrot.slane %v1566_v27, %v19170_v6  ;;  %v916_v59 = vcombine.high %v908_v43, %v908_v43  ;;  %17432 = vmatpush3.msra.mxu0 %v3987_v3  ;;  %v19415_v36 = vld [vmem:[#allocation2 + $0x61] sm:$0x3f] }
  0x46   :  { %v1858_v57 = vcombine.low %v1850_v29, %v1857_v42  ;;  %v1066_v60 = vcombine.low %v19280_v40, %v908_v43  ;;  %v1724_v58 = vrot.slane %v1710_v46, %v19170_v6  ;;  %v1065_v62 = vcombine.low %v1057_v47, %v1064_v56  ;;  %v4002_v56 = vld [vmem:[%s21931_s1 + $0xb0] sm:$0xff]  ;;  %v4001_v46 = vld [vmem:[%s21931_s1 + $0xa8] sm:$0xff] }
  0x47   :  { %v1867_v63 = vrot.slane %v1859_v51, %v19170_v6  ;;  %v1874_v0 = vrot.slane %v1860_v52, %v19170_v6  ;;  %v1725_v2 = vcombine.high %v1717_v54, %v1717_v54  ;;  %v1067_v10 = vcombine.low %v916_v59, %v915_v44  ;;  %v3986_v29 = vld [vmem:[%s21931_s1 + $0x30] sm:$0xff]  ;;  %17433 = vmatprep.subr.mxu0 %v4002_v56 }
  0x48   :  { %1935 = vrot.lane.b32.xlu0 %v1858_v57, %s19079_s24  ;;  %v1074_v40 = vrot.slane %v1066_v60, %v19170_v6  ;;  %v1733_v13 = vrot.slane %v1567_v53, %v19170_v6  ;;  %v917_v16 = vcombine.high %v773_v55, %v773_v55  ;;  %1142 = vrot.lane.b32.xlu1 %v1065_v62, %s19079_s24  ;;  %v3143_v44 = vld [vmem:[#allocation2 + $0x11] sm:$0x3f]  ;;  %v3985_v60 = vld [vmem:[%s21931_s1 + $0x28] sm:$0xff] }
  0x49   :  { %v1875_v18 = vcombine.low %v1867_v63, %v1874_v0  ;;  %v1876_v20 = vcombine.low %v1717_v54, %v1725_v2  ;;  %v924_v23 = vrot.slane %v773_v55, %v19170_v6  ;;  %v940_v26 = vrot.slane %v774_v61, %v19170_v6  ;;  %17434 = vmatpush3.msra.mxu0 %v3986_v29  ;;  %v2350_v0 = vld [vmem:[#allocation2 + $0xa] sm:$0x3f]  ;;  %v4000_v2 = vld [vmem:[%s21931_s1 + $0xa0] sm:$0xff]  ;;  %v1569_v29 = vld [vmem:[#allocation2 + $0x70] sm:$0x3f] }
  0x4a   :  { %v1081_v5 = vrot.slane %v1067_v10, %v19170_v6  ;;  %v1877_v27 = vcombine.low %v1724_v58, %v1733_v13  ;;  %v931_v39 = vrot.slane %v917_v16, %v19170_v6  ;;  %v1726_v28 = vcombine.high %v1567_v53, %v1567_v53  ;;  %v19423_v53 = vld [vmem:[#allocation2 + $0x19] sm:$0x3f]  ;;  %17435 = vmatprep.subr.mxu0 %v4001_v46  ;;  %v19444_v16 = vld [vmem:[#allocation2 + $0x12] sm:$0x3f] }
  0x4b   :  { %v1884_v30 = vrot.slane %v1876_v20, %v19170_v6  ;;  %v932_v31 = vcombine.high %v924_v23, %v924_v23  ;;  %v1741_v32 = vcombine.high %v1733_v13, %v1733_v13  ;;  %v1749_v34 = vrot.slane %v19399_v17, %v19170_v6  ;;  %17436 = vmatpush3.msra.mxu0 %v3985_v60  ;;  %v3983_v46 = vld [vmem:[%s21931_s1 + $0x18] sm:$0xff] }
  0x4c   :  { %1937 = vrot.lane.b32.xlu0 %v1875_v18, %s19079_s24  ;;  %v1082_v37 = vcombine.low %v1074_v40, %v1081_v5  ;;  %v1891_v38 = vrot.slane %v1877_v27, %v19170_v6  ;;  %v1084_v42 = vcombine.low %v931_v39, %v940_v26  ;;  %v1740_v43 = vrot.slane %v1726_v28, %v19170_v6 }
  0x4d   :  { %v1083_v45 = vcombine.low %v924_v23, %v932_v31  ;;  %v1757_v47 = vcombine.high %v1749_v34, %v1749_v34  ;;  %v933_v51 = vcombine.high %v774_v61, %v774_v61  ;;  %v948_v52 = vcombine.high %v940_v26, %v940_v26  ;;  %v3984_v26 = vld [vmem:[%s21931_s1 + $0x20] sm:$0xff]  ;;  %17437 = vmatprep.subr.mxu0 %v4000_v2 }
  0x4e   :  { %1144 = vrot.lane.b32.xlu1 %v1082_v37, %s19079_s24  ;;  %v1892_v54 = vcombine.low %v1884_v30, %v1891_v38  ;;  %v1098_v55 = vrot.slane %v1084_v42, %v19170_v6  ;;  %v1893_v57 = vcombine.low %v1741_v32, %v1740_v43  ;;  %v956_v59 = vrot.slane %v19415_v36, %v19170_v6  ;;  %v3999_v37 = vld [vmem:[%s21931_s1 + $0x98] sm:$0xff] }
  0x4f   :  { %v1091_v58 = vrot.slane %v1083_v45, %v19170_v6  ;;  %v1894_v61 = vcombine.low %v1749_v34, %v1757_v47  ;;  %v947_v62 = vrot.slane %v933_v51, %v19170_v6  ;;  %v3167_v63 = vcombine.high %v3143_v44, %v3143_v44  ;;  %17438 = vmatpush3.msra.mxu0 %v3984_v26 }
  0x50   :  { %1939 = vrot.lane.b32.xlu0 %v1892_v54, %s19079_s24  ;;  %v1901_v3 = vrot.slane %v1893_v57, %v19170_v6  ;;  %v964_v10 = vcombine.high %v956_v59, %v956_v59  ;;  %v3174_v40 = vrot.slane %v3143_v44, %v19170_v6  ;;  %v19442_v13 = vrot.slane %v19423_v53, %v19170_v6  ;;  %v776_v54 = vld [vmem:[#allocation2 + $0x69] sm:$0x3f] }
  0x51   :  { %v1099_v56 = vcombine.low %v1091_v58, %v1098_v55  ;;  %v1908_v18 = vrot.slane %v1894_v61, %v19170_v6  ;;  %v1100_v20 = vcombine.low %v948_v52, %v947_v62  ;;  %v3181_v23 = vrot.slane %v3167_v63, %v19170_v6  ;;  %17439 = vmatprep.subr.mxu0 %v3999_v37  ;;  %v3998_v58 = vld [vmem:[%s21931_s1 + $0x90] sm:$0xff] }
  0x52   :  { %v1101_v5 = vcombine.low %v956_v59, %v964_v10  ;;  %v3182_v27 = vcombine.high %v3174_v40, %v3174_v40  ;;  %v2374_v39 = vcombine.high %v2350_v0, %v2350_v0  ;;  %v2381_v28 = vrot.slane %v2350_v0, %v19170_v6  ;;  %17440 = vmatpush3.msra.mxu0 %v3983_v46 }
  0x53   :  { %1146 = vrot.lane.b32.xlu1 %v1099_v56, %s19079_s24  ;;  %v1909_v30 = vcombine.low %v1901_v3, %v1908_v18  ;;  %v1108_v31 = vrot.slane %v1100_v20, %v19170_v6  ;;  %v3360_v32 = vcombine.low %v3181_v23, %v19442_v13  ;;  %v19457_v34 = vrot.slane %v19444_v16, %v19170_v6 }
  0x54   :  { %v1115_v38 = vrot.slane %v1101_v5, %v19170_v6  ;;  %v3359_v42 = vcombine.low %v3174_v40, %v3182_v27  ;;  %v2388_v43 = vrot.slane %v2374_v39, %v19170_v6  ;;  %v2389_v44 = vcombine.high %v2381_v28, %v2381_v28  ;;  %v3982_v40 = vld [vmem:[%s21931_s1 + $0x10] sm:$0xff]  ;;  %17441 = vmatprep.subr.mxu0 %v3998_v58 }
  0x55   :  { %1941 = vrot.lane.b32.xlu0 %v1909_v30, %s19079_s24  ;;  %v3374_v45 = vrot.slane %v3360_v32, %v19170_v6  ;;  %v1742_v47 = vcombine.high %v19399_v17, %v19399_v17  ;;  %v1758_v51 = vcombine.high %v1569_v29, %v1569_v29  ;;  %v1765_v52 = vrot.slane %v1569_v29, %v19170_v6  ;;  %v3997_v29 = vld [vmem:[%s21931_s1 + $0x88] sm:$0xff] }
  0x56   :  { %v1116_v55 = vcombine.low %v1108_v31, %v1115_v38  ;;  %v3367_v57 = vrot.slane %v3359_v42, %v19170_v6  ;;  %v2566_v59 = vcombine.low %v2381_v28, %v2389_v44  ;;  %v2567_v60 = vcombine.low %v2388_v43, %v19457_v34  ;;  %v2352_v28 = vld [vmem:[#allocation2 + $0x1a] sm:$0x3f]  ;;  %17442 = vmatpush3.msra.mxu0 %v3982_v40  ;;  %v3981_v38 = vld [vmem:[%s21931_s1 + $0x8] sm:$0xff] }
  0x57   :  { %v1756_v61 = vrot.slane %v1742_v47, %v19170_v6  ;;  %v1772_v62 = vrot.slane %v1758_v51, %v19170_v6  ;;  %v1773_v17 = vcombine.high %v1765_v52, %v1765_v52  ;;  %v949_v63 = vcombine.high %v19415_v36, %v19415_v36  ;;  %v3145_v36 = vld [vmem:[#allocation2 + $0x21] sm:$0x3f]  ;;  %v3146_v44 = vld [vmem:[#allocation2 + $0x29] sm:$0x3f]  ;;  %17443 = vmatprep.subr.mxu0 %v3997_v29 }
  0x58   :  { %1148 = vrot.lane.b32.xlu1 %v1116_v55, %s19079_s24  ;;  %v3375_v0 = vcombine.low %v3367_v57, %v3374_v45  ;;  %v2574_v2 = vrot.slane %v2566_v59, %v19170_v6  ;;  %v2581_v3 = vrot.slane %v2567_v60, %v19170_v6  ;;  %v965_v10 = vcombine.high %v776_v54, %v776_v54 }
  0x59   :  { %v1910_v56 = vcombine.low %v1756_v61, %v1765_v52  ;;  %v1911_v18 = vcombine.low %v1773_v17, %v1772_v62  ;;  %v963_v20 = vrot.slane %v949_v63, %v19170_v6  ;;  %v972_v23 = vrot.slane %v776_v54, %v19170_v6  ;;  %v4043_v52 = vld [vmem:[%s21931_s1 + $0x1f8] sm:$0xff]  ;;  %17444 = vmatpush3.msra.mxu0 %v3981_v38 }
  0x5a   :  { %3512 = vrot.lane.b32.xlu0 %v3375_v0, %s19079_s24  ;;  %v2582_v26 = vcombine.low %v2574_v2, %v2581_v3  ;;  %v979_v5 = vrot.slane %v965_v10, %v19170_v6  ;;  %v3183_v27 = vcombine.high %v19423_v53, %v19423_v53  ;;  %v3198_v39 = vcombine.high %v19442_v13, %v19442_v13  ;;  %v4027_v62 = vld [vmem:[%s21931_s1 + $0x178] sm:$0xff]  ;;  %v2353_v3 = vld [vmem:[#allocation2 + $0x22] sm:$0x3f] }
  0x5b   :  { %v1918_v30 = vrot.slane %v1910_v56, %v19170_v6  ;;  %v1925_v31 = vrot.slane %v1911_v18, %v19170_v6  ;;  %v980_v32 = vcombine.high %v972_v23, %v972_v23  ;;  %v1117_v37 = vcombine.low %v963_v20, %v972_v23  ;;  %17474 = vmatprep.subr.mxu1 %v4043_v52  ;;  %v3147_v20 = vld [vmem:[#allocation2 + $0x31] sm:$0x3f]  ;;  %v3980_v23 = vld [vmem:[%s21931_s1] sm:$0xff] }
  0x5c   :  { %2719 = vrot.lane.b32.xlu1 %v2582_v26, %s19079_s24  ;;  %v3197_v53 = vrot.slane %v3183_v27, %v19170_v6  ;;  %v3206_v13 = vrot.slane %v3145_v36, %v19170_v6  ;;  %v2390_v42 = vcombine.high %v19444_v16, %v19444_v16  ;;  %v2405_v43 = vcombine.high %v19457_v34, %v19457_v34  ;;  %v3996_v34 = vld [vmem:[%s21931_s1 + $0x80] sm:$0xff] }
  0x5d   :  { %v1926_v46 = vcombine.low %v1918_v30, %v1925_v31  ;;  %v1118_v45 = vcombine.low %v980_v32, %v979_v5  ;;  %v1125_v47 = vrot.slane %v1117_v37, %v19170_v6  ;;  %v2413_v51 = vrot.slane %v2352_v28, %v19170_v6  ;;  %17445 = vmatprep.subr.mxu0 %v3996_v34  ;;  %v2354_v37 = vld [vmem:[#allocation2 + $0x2a] sm:$0x3f] }
  0x5e   :  { %v3214_v54 = vcombine.high %v3206_v13, %v3206_v13  ;;  %v3376_v55 = vcombine.low %v3198_v39, %v3197_v53  ;;  %v2404_v57 = vrot.slane %v2390_v42, %v19170_v6  ;;  %v3199_v16 = vcombine.high %v3145_v36, %v3145_v36  ;;  %17475 = vmatpush3.msra.mxu1 %v4027_v62  ;;  %v4042_v39 = vld [vmem:[%s21931_s1 + $0x1f0] sm:$0xff] }
  0x5f   :  { %1943 = vrot.lane.b32.xlu0 %v1926_v46, %s19079_s24  ;;  %v1132_v59 = vrot.slane %v1118_v45, %v19170_v6  ;;  %v2421_v60 = vcombine.high %v2413_v51, %v2413_v51  ;;  %v3215_v58 = vcombine.high %v3146_v44, %v3146_v44  ;;  %v3222_v61 = vrot.slane %v3146_v44, %v19170_v6  ;;  %v2355_v42 = vld [vmem:[#allocation2 + $0x32] sm:$0x3f] }
  0x60   :  { %v3377_v17 = vcombine.low %v3206_v13, %v3214_v54  ;;  %v3384_v63 = vrot.slane %v3376_v55, %v19170_v6  ;;  %v2583_v0 = vcombine.low %v2405_v43, %v2404_v57  ;;  %v3213_v2 = vrot.slane %v3199_v16, %v19170_v6  ;;  %17446 = vmatpush3.msra.mxu0 %v3980_v23  ;;  %v3149_v57 = vld [vmem:[#allocation2 + $0x51] sm:$0x3f]  ;;  %v4041_v16 = vld [vmem:[%s21931_s1 + $0x1e8] sm:$0xff] }
  0x61   :  { %v1133_v10 = vcombine.low %v1125_v47, %v1132_v59  ;;  %v2584_v40 = vcombine.low %v2413_v51, %v2421_v60  ;;  %v3229_v56 = vrot.slane %v3215_v58, %v19170_v6  ;;  %v3230_v18 = vcombine.high %v3222_v61, %v3222_v61  ;;  %17476 = vmatprep.subr.mxu1 %v4042_v39  ;;  %v4026_v47 = vld [vmem:[%s21931_s1 + $0x170] sm:$0xff]  ;;  %v2356_v23 = vld [vmem:[#allocation2 + $0x4a] sm:$0x3f] }
  0x62   :  { %v3391_v36 = vrot.slane %v3377_v17, %v19170_v6  ;;  %v2591_v26 = vrot.slane %v2583_v0, %v19170_v6  ;;  %v3393_v5 = vcombine.low %v3213_v2, %v3222_v61  ;;  %v2406_v27 = vcombine.high %v2352_v28, %v2352_v28  ;;  %17477 = vmatpush3.msra.mxu1 %v4026_v47  ;;  %v4025_v0 = vld [vmem:[%s21931_s1 + $0x168] sm:$0xff] }
  0x63   :  { %1150 = vrot.lane.b32.xlu1 %v1133_v10, %s19079_s24  ;;  %v2598_v29 = vrot.slane %v2584_v40, %v19170_v6  ;;  %v3394_v30 = vcombine.low %v3230_v18, %v3229_v56  ;;  %v2422_v31 = vcombine.high %v2353_v3, %v2353_v3  ;;  %v2429_v32 = vrot.slane %v2353_v3, %v19170_v6 }
  0x64   :  { %v3392_v38 = vcombine.low %v3384_v63, %v3391_v36  ;;  %v3401_v53 = vrot.slane %v3393_v5, %v19170_v6  ;;  %v2420_v13 = vrot.slane %v2406_v27, %v19170_v6  ;;  %v3231_v28 = vcombine.high %v3147_v20, %v3147_v20  ;;  %17478 = vmatprep.subr.mxu1 %v4041_v16 }
  0x65   :  { %v2599_v43 = vcombine.low %v2591_v26, %v2598_v29  ;;  %v3408_v44 = vrot.slane %v3394_v30, %v19170_v6  ;;  %v2436_v46 = vrot.slane %v2422_v31, %v19170_v6  ;;  %v2437_v45 = vcombine.high %v2429_v32, %v2429_v32  ;;  %v3150_v29 = vld [vmem:[#allocation2 + $0x59] sm:$0x3f]  ;;  %17479 = vmatpush3.msra.mxu1 %v4025_v0 }
  0x66   :  { %3514 = vrot.lane.b32.xlu0 %v3392_v38, %s19079_s24  ;;  %v2600_v51 = vcombine.low %v2420_v13, %v2429_v32  ;;  %v3238_v52 = vrot.slane %v3147_v20, %v19170_v6  ;;  %v3245_v54 = vrot.slane %v3231_v28, %v19170_v6  ;;  %v2438_v55 = vcombine.high %v2354_v37, %v2354_v37  ;;  %v4024_v32 = vld [vmem:[%s21931_s1 + $0x160] sm:$0xff] }
  0x67   :  { %2721 = vrot.lane.b32.xlu1 %v2599_v43, %s19079_s24  ;;  %v3409_v34 = vcombine.low %v3401_v53, %v3408_v44  ;;  %v2601_v59 = vcombine.low %v2437_v45, %v2436_v46  ;;  %v2445_v60 = vrot.slane %v2354_v37, %v19170_v6  ;;  %v2461_v58 = vrot.slane %v2355_v42, %v19170_v6  ;;  %v2357_v46 = vld [vmem:[#allocation2 + $0x52] sm:$0x3f] }
  0x68   :  { %v2608_v61 = vrot.slane %v2600_v51, %v19170_v6  ;;  %v3246_v62 = vcombine.high %v3238_v52, %v3238_v52  ;;  %v3411_v17 = vcombine.low %v3245_v54, %v19265_v33  ;;  %v2452_v63 = vrot.slane %v2438_v55, %v19170_v6  ;;  %v4040_v33 = vld [vmem:[%s21931_s1 + $0x1e0] sm:$0xff]  ;;  %17755 = vmatprep.subr.mxu0 %v19077_v1  ;;  %v4039_v55 = vld [vmem:[%s21931_s1 + $0x1d8] sm:$0xff] }
  0x69   :  { %v2615_v2 = vrot.slane %v2601_v59, %v19170_v6  ;;  %v2453_v3 = vcombine.high %v2445_v60, %v2445_v60  ;;  %v3270_v10 = vrot.slane %v3149_v57, %v19170_v6  ;;  %v3427_v40 = vcombine.low %v3262_v48, %v19283_v41  ;;  %17480 = vmatprep.subr.mxu1 %v4040_v33  ;;  %v3151_v54 = vld [vmem:[#allocation2 + $0x61] sm:$0x3f] }
  0x6a   :  { %3516 = vrot.lane.b32.xlu0 %v3409_v34, %s19079_s24  ;;  %v3410_v56 = vcombine.low %v3238_v52, %v3246_v62  ;;  %v3425_v18 = vrot.slane %v3411_v17, %v19170_v6  ;;  %v2618_v20 = vcombine.low %v2452_v63, %v2461_v58  ;;  %v2454_v36 = vcombine.high %v2355_v42, %v2355_v42  ;;  %v2359_v33 = vld [vmem:[#allocation2 + $0x62] sm:$0x3f] }
  0x6b   :  { %v2616_v26 = vcombine.low %v2608_v61, %v2615_v2  ;;  %v2617_v5 = vcombine.low %v2445_v60, %v2453_v3  ;;  %v3278_v27 = vcombine.high %v3270_v10, %v3270_v10  ;;  %v3435_v39 = vrot.slane %v3427_v40, %v19170_v6  ;;  %17481 = vmatpush3.msra.mxu1 %v4024_v32  ;;  %v4023_v60 = vld [vmem:[%s21931_s1 + $0x158] sm:$0xff]  ;;  %v3152_v3 = vld [vmem:[#allocation2 + $0x69] sm:$0x3f] }
  0x6c   :  { %v3418_v41 = vrot.slane %v3410_v56, %v19170_v6  ;;  %v2632_v48 = vrot.slane %v2618_v20, %v19170_v6  ;;  %v2468_v30 = vrot.slane %v2454_v36, %v19170_v6  ;;  %v2469_v31 = vcombine.high %v2461_v58, %v2461_v58  ;;  %v2358_v40 = vld [vmem:[#allocation2 + $0x5a] sm:$0x3f]  ;;  %17482 = vmatprep.subr.mxu1 %v4039_v55  ;;  %v4038_v56 = vld [vmem:[%s21931_s1 + $0x1d0] sm:$0xff]  ;;  %v4036_v55 = vld [vmem:[%s21931_s1 + $0x1c0] sm:$0xff] }
  0x6d   :  { %2723 = vrot.lane.b32.xlu1 %v2616_v26, %s19079_s24  ;;  %v2625_v37 = vrot.slane %v2617_v5, %v19170_v6  ;;  %v3428_v38 = vcombine.low %v3270_v10, %v3278_v27  ;;  %v2477_v53 = vrot.slane %v2356_v23, %v19170_v6  ;;  %v3263_v13 = vcombine.high %v3149_v57, %v3149_v57  ;;  %v4022_v26 = vld [vmem:[%s21931_s1 + $0x150] sm:$0xff] }
  0x6e   :  { %v3426_v28 = vcombine.low %v3418_v41, %v3425_v18  ;;  %v2634_v42 = vcombine.low %v2469_v31, %v2468_v30  ;;  %v3279_v43 = vcombine.high %v3150_v29, %v3150_v29  ;;  %v3286_v44 = vrot.slane %v3150_v29, %v19170_v6  ;;  %17483 = vmatpush3.msra.mxu1 %v4023_v60  ;;  %v2360_v60 = vld [vmem:[#allocation2 + $0x6a] sm:$0x3f] }
  0x6f   :  { %v2633_v45 = vcombine.low %v2625_v37, %v2632_v48  ;;  %v3442_v47 = vrot.slane %v3428_v38, %v19170_v6  ;;  %v2485_v51 = vcombine.high %v2477_v53, %v2477_v53  ;;  %v3277_v52 = vrot.slane %v3263_v13, %v19170_v6  ;;  %17484 = vmatprep.subr.mxu1 %v4038_v56  ;;  %v3153_v13 = vld [vmem:[#allocation2 + $0x71] sm:$0x3f] }
  0x70   :  { %3518 = vrot.lane.b32.xlu0 %v3426_v28, %s19079_s24  ;;  %v2642_v57 = vrot.slane %v2634_v42, %v19170_v6  ;;  %v3293_v16 = vrot.slane %v3279_v43, %v19170_v6  ;;  %v3294_v34 = vcombine.high %v3286_v44, %v3286_v44  ;;  %v2470_v59 = vcombine.high %v2356_v23, %v2356_v23  ;;  %v4037_v28 = vld [vmem:[%s21931_s1 + $0x1c8] sm:$0xff] }
  0x71   :  { %2725 = vrot.lane.b32.xlu1 %v2633_v45, %s19079_s24  ;;  %v3443_v58 = vcombine.low %v3435_v39, %v3442_v47  ;;  %v2635_v61 = vcombine.low %v2477_v53, %v2485_v51  ;;  %v3444_v62 = vcombine.low %v3277_v52, %v3286_v44  ;;  %v2486_v17 = vcombine.high %v2357_v46, %v2357_v46  ;;  %v4021_v45 = vld [vmem:[%s21931_s1 + $0x148] sm:$0xff] }
  0x72   :  { %v3445_v63 = vcombine.low %v3294_v34, %v3293_v16  ;;  %v2484_v0 = vrot.slane %v2470_v59, %v19170_v6  ;;  %v2493_v2 = vrot.slane %v2357_v46, %v19170_v6  ;;  %v3295_v10 = vcombine.high %v3151_v54, %v3151_v54  ;;  %17485 = vmatpush3.msra.mxu1 %v4022_v26 }
  0x73   :  { %v2649_v18 = vrot.slane %v2635_v61, %v19170_v6  ;;  %v3452_v20 = vrot.slane %v3444_v62, %v19170_v6  ;;  %v2500_v23 = vrot.slane %v2486_v17, %v19170_v6  ;;  %v3302_v36 = vrot.slane %v3151_v54, %v19170_v6  ;;  %17486 = vmatprep.subr.mxu1 %v4037_v28 }
  0x74   :  { %3520 = vrot.lane.b32.xlu0 %v3443_v58, %s19079_s24  ;;  %v3459_v5 = vrot.slane %v3445_v63, %v19170_v6  ;;  %v2501_v27 = vcombine.high %v2493_v2, %v2493_v2  ;;  %v2651_v39 = vcombine.low %v2484_v0, %v2493_v2  ;;  %v3309_v29 = vrot.slane %v3295_v10, %v19170_v6  ;;  %v4020_v10 = vld [vmem:[%s21931_s1 + $0x140] sm:$0xff] }
  0x75   :  { %v2650_v41 = vcombine.low %v2642_v57, %v2649_v18  ;;  %v3310_v48 = vcombine.high %v3302_v36, %v3302_v36  ;;  %v3318_v30 = vrot.slane %v3152_v3, %v19170_v6  ;;  %v2502_v31 = vcombine.high %v2358_v40, %v2358_v40  ;;  %17487 = vmatpush3.msra.mxu1 %v4021_v45 }
  0x76   :  { %v3460_v32 = vcombine.low %v3452_v20, %v3459_v5  ;;  %v2652_v37 = vcombine.low %v2501_v27, %v2500_v23  ;;  %v2659_v38 = vrot.slane %v2651_v39, %v19170_v6  ;;  %v2509_v53 = vrot.slane %v2358_v40, %v19170_v6  ;;  %17488 = vmatprep.subr.mxu1 %v4036_v55  ;;  %v4035_v23 = vld [vmem:[%s21931_s1 + $0x1b8] sm:$0xff]  ;;  %v2361_v27 = vld [vmem:[#allocation2 + $0x72] sm:$0x3f] }
  0x77   :  { %2727 = vrot.lane.b32.xlu1 %v2650_v41, %s19079_s24  ;;  %v3461_v42 = vcombine.low %v3302_v36, %v3310_v48  ;;  %v3462_v43 = vcombine.low %v3309_v29, %v3318_v30  ;;  %v2516_v44 = vrot.slane %v2502_v31, %v19170_v6  ;;  %v2525_v46 = vrot.slane %v2359_v33, %v19170_v6  ;;  %v378_v31 = vld [vmem:[#allocation2] sm:$0x3f] }
  0x78   :  { %3522 = vrot.lane.b32.xlu0 %v3460_v32, %s19079_s24  ;;  %v2666_v47 = vrot.slane %v2652_v37, %v19170_v6  ;;  %v2517_v51 = vcombine.high %v2509_v53, %v2509_v53  ;;  %v3311_v52 = vcombine.high %v3152_v3, %v3152_v3  ;;  %v3326_v54 = vcombine.high %v3318_v30, %v3318_v30  ;;  %v19649_v30 = vld [vmem:[#allocation2 + $0x8] sm:$0x3f]  ;;  %v4019_v32 = vld [vmem:[%s21931_s1 + $0x138] sm:$0xff] }
  0x79   :  { %v3469_v57 = vrot.slane %v3461_v42, %v19170_v6  ;;  %v3476_v16 = vrot.slane %v3462_v43, %v19170_v6  ;;  %v2669_v34 = vcombine.low %v2516_v44, %v2525_v46  ;;  %v3334_v59 = vrot.slane %v3153_v13, %v19170_v6  ;;  %17489 = vmatpush3.msra.mxu1 %v4020_v10  ;;  %v1172_v44 = vld [vmem:[#allocation2 + $0xa] sm:$0x3f] }
  0x7a   :  { %v2667_v58 = vcombine.low %v2659_v38, %v2666_v47  ;;  %v2668_v61 = vcombine.low %v2509_v53, %v2517_v51  ;;  %v3325_v62 = vrot.slane %v3311_v52, %v19170_v6  ;;  %v2518_v17 = vcombine.high %v2359_v33, %v2359_v33  ;;  %17490 = vmatprep.subr.mxu1 %v4035_v23  ;;  %v4034_v53 = vld [vmem:[%s21931_s1 + $0x1b0] sm:$0xff] }
  0x7b   :  { %v3477_v63 = vcombine.low %v3469_v57, %v3476_v16  ;;  %v2683_v0 = vrot.slane %v2669_v34, %v19170_v6  ;;  %v3342_v2 = vcombine.high %v3334_v59, %v3334_v59  ;;  %v2533_v3 = vcombine.high %v2525_v46, %v2525_v46  ;;  %17491 = vmatpush3.msra.mxu1 %v4019_v32  ;;  %v4018_v52 = vld [vmem:[%s21931_s1 + $0x130] sm:$0xff] }
  0x7c   :  { %2729 = vrot.lane.b32.xlu1 %v2667_v58, %s19079_s24  ;;  %v2676_v40 = vrot.slane %v2668_v61, %v19170_v6  ;;  %v3478_v56 = vcombine.low %v3326_v54, %v3325_v62  ;;  %v2532_v18 = vrot.slane %v2518_v17, %v19170_v6  ;;  %v2541_v20 = vrot.slane %v2360_v60, %v19170_v6  ;;  %v19681_v58 = vld [vmem:[#allocation2 + $0x12] sm:$0x3f]  ;;  %v1171_v62 = vld [vmem:[#allocation2 + $0x2] sm:$0x3f] }
  0x7d   :  { %3524 = vrot.lane.b32.xlu0 %v3477_v63, %s19079_s24  ;;  %v3479_v36 = vcombine.low %v3334_v59, %v3342_v2  ;;  %v3327_v26 = vcombine.high %v3153_v13, %v3153_v13  ;;  %v3496_v5 = vcombine.low %v3358_v50, %v19295_v49  ;;  %v2534_v39 = vcombine.high %v2360_v60, %v2360_v60 }
  0x7e   :  { %v2684_v29 = vcombine.low %v2676_v40, %v2683_v0  ;;  %v3486_v33 = vrot.slane %v3478_v56, %v19170_v6  ;;  %v2549_v41 = vcombine.high %v2541_v20, %v2541_v20  ;;  %v2685_v48 = vcombine.low %v2533_v3, %v2532_v18  ;;  %17492 = vmatprep.subr.mxu1 %v4034_v53  ;;  %v19685_v3 = vld [vmem:[#allocation2 + $0x10] sm:$0x3f] }
  0x7f   :  { %v3493_v37 = vrot.slane %v3479_v36, %v19170_v6  ;;  %v3341_v38 = vrot.slane %v3327_v26, %v19170_v6  ;;  %v3510_v49 = vrot.slane %v3496_v5, %v19170_v6  ;;  %v2548_v50 = vrot.slane %v2534_v39, %v19170_v6  ;;  %17493 = vmatpush3.msra.mxu1 %v4018_v52 }
  0x80   :  { %2731 = vrot.lane.b32.xlu1 %v2684_v29, %s19079_s24  ;;  %v2686_v13 = vcombine.low %v2541_v20, %v2549_v41  ;;  %v2693_v28 = vrot.slane %v2685_v48, %v19170_v6  ;;  %v2550_v42 = vcombine.high %v2361_v27, %v2361_v27  ;;  %v2557_v43 = vrot.slane %v2361_v27, %v19170_v6  ;;  %v4017_v20 = vld [vmem:[%s21931_s1 + $0x128] sm:$0xff]  ;;  %v4032_v27 = vld [vmem:[%s21931_s1 + $0x1a0] sm:$0xff] }
  0x81   :  { %v3494_v46 = vcombine.low %v3486_v33, %v3493_v37  ;;  %v3495_v45 = vcombine.low %v3341_v38, %v19268_v35  ;;  %v19667_v47 = vrot.slane %v19649_v30, %v19170_v6  ;;  %v402_v51 = vcombine.high %v378_v31, %v378_v31  ;;  %v4033_v35 = vld [vmem:[%s21931_s1 + $0x1a8] sm:$0xff]  ;;  %v4016_v38 = vld [vmem:[%s21931_s1 + $0x120] sm:$0xff] }
  0x82   :  { %v2700_v54 = vrot.slane %v2686_v13, %v19170_v6  ;;  %v2564_v55 = vrot.slane %v2550_v42, %v19170_v6  ;;  %v2565_v57 = vcombine.high %v2557_v43, %v2557_v43  ;;  %v2702_v16 = vcombine.low %v2548_v50, %v2557_v43  ;;  %17494 = vmatprep.subr.mxu1 %v4033_v35  ;;  %v4031_v42 = vld [vmem:[%s21931_s1 + $0x198] sm:$0xff] }
  0x83   :  { %3526 = vrot.lane.b32.xlu0 %v3494_v46, %s19079_s24  ;;  %v3503_v34 = vrot.slane %v3495_v45, %v19170_v6  ;;  %v409_v59 = vrot.slane %v378_v31, %v19170_v6  ;;  %v416_v60 = vrot.slane %v402_v51, %v19170_v6  ;;  %v1211_v61 = vcombine.high %v1172_v44, %v1172_v44  ;;  %v4015_v51 = vld [vmem:[%s21931_s1 + $0x118] sm:$0xff] }
  0x84   :  { %v2701_v17 = vcombine.low %v2693_v28, %v2700_v54  ;;  %v2703_v63 = vcombine.low %v2565_v57, %v2564_v55  ;;  %v2710_v0 = vrot.slane %v2702_v16, %v19170_v6  ;;  %v1218_v2 = vrot.slane %v1172_v44, %v19170_v6  ;;  %17495 = vmatpush3.msra.mxu1 %v4017_v20  ;;  %v1174_v28 = vld [vmem:[#allocation2 + $0x1a] sm:$0x3f]  ;;  %v4030_v57 = vld [vmem:[%s21931_s1 + $0x190] sm:$0xff] }
  0x85   :  { %v3511_v10 = vcombine.low %v3503_v34, %v3510_v49  ;;  %v417_v40 = vcombine.high %v409_v59, %v409_v59  ;;  %v595_v56 = vcombine.low %v416_v60, %v19667_v47  ;;  %v1225_v18 = vrot.slane %v1211_v61, %v19170_v6  ;;  %17496 = vmatprep.subr.mxu1 %v4032_v27  ;;  %v4014_v60 = vld [vmem:[%s21931_s1 + $0x110] sm:$0xff] }
  0x86   :  { %2733 = vrot.lane.b32.xlu1 %v2701_v17, %s19079_s24  ;;  %v2717_v23 = vrot.slane %v2703_v63, %v19170_v6  ;;  %v1226_v36 = vcombine.high %v1218_v2, %v1218_v2  ;;  %v1234_v26 = vrot.slane %v19681_v58, %v19170_v6  ;;  %v1195_v5 = vcombine.high %v1171_v62, %v1171_v62 }
  0x87   :  { %3528 = vrot.lane.b32.xlu0 %v3511_v10, %s19079_s24  ;;  %v594_v39 = vcombine.low %v409_v59, %v417_v40  ;;  %v609_v29 = vrot.slane %v595_v56, %v19170_v6  ;;  %v1202_v33 = vrot.slane %v1171_v62, %v19170_v6  ;;  %v441_v41 = vrot.slane %v19685_v3, %v19170_v6  ;;  %v381_v59 = vld [vmem:[#allocation2 + $0x18] sm:$0x3f] }
  0x88   :  { %v2718_v48 = vcombine.low %v2710_v0, %v2717_v23  ;;  %v1242_v31 = vcombine.high %v1234_v26, %v1234_v26  ;;  %v1404_v32 = vcombine.low %v1226_v36, %v1225_v18  ;;  %v1209_v37 = vrot.slane %v1195_v5, %v19170_v6  ;;  %17497 = vmatpush3.msra.mxu1 %v4016_v38  ;;  %v1175_v0 = vld [vmem:[#allocation2 + $0x22] sm:$0x3f]  ;;  %v4013_v18 = vld [vmem:[%s21931_s1 + $0x108] sm:$0xff] }
  0x89   :  { %v602_v49 = vrot.slane %v594_v39, %v19170_v6  ;;  %v1210_v50 = vcombine.high %v1202_v33, %v1202_v33  ;;  %v449_v53 = vcombine.high %v441_v41, %v441_v41  ;;  %v418_v13 = vcombine.high %v19649_v30, %v19649_v30  ;;  %17498 = vmatprep.subr.mxu1 %v4031_v42  ;;  %v4028_v5 = vld [vmem:[%s21931_s1 + $0x180] sm:$0xff] }
  0x8a   :  { %2735 = vrot.lane.b32.xlu1 %v2718_v48, %s19079_s24  ;;  %v1405_v43 = vcombine.low %v1234_v26, %v1242_v31  ;;  %v1412_v44 = vrot.slane %v1404_v32, %v19170_v6  ;;  %v1388_v46 = vcombine.low %v1209_v37, %v1218_v2  ;;  %v433_v45 = vcombine.high %v19667_v47, %v19667_v47  ;;  %v4012_v48 = vld [vmem:[%s21931_s1 + $0x100] sm:$0xff] }
  0x8b   :  { %v610_v30 = vcombine.low %v602_v49, %v609_v29  ;;  %v1387_v52 = vcombine.low %v1202_v33, %v1210_v50  ;;  %v612_v54 = vcombine.low %v441_v41, %v449_v53  ;;  %v432_v55 = vrot.slane %v418_v13, %v19170_v6  ;;  %17499 = vmatpush3.msra.mxu1 %v4015_v51  ;;  %v1176_v29 = vld [vmem:[#allocation2 + $0x2a] sm:$0x3f]  ;;  %v382_v41 = vld [vmem:[#allocation2 + $0x20] sm:$0x3f] }
  0x8c   :  { %v1419_v16 = vrot.slane %v1405_v43, %v19170_v6  ;;  %v1402_v35 = vrot.slane %v1388_v46, %v19170_v6  ;;  %v1227_v47 = vcombine.high %v19681_v58, %v19681_v58  ;;  %v1243_v34 = vcombine.high %v1174_v28, %v1174_v28  ;;  %v4029_v58 = vld [vmem:[%s21931_s1 + $0x188] sm:$0xff]  ;;  %17500 = vmatprep.subr.mxu1 %v4030_v57 }
  0x8d   :  { %756 = vst.msk [vmem:[#allocation3] sm:$0xff] %vm131_vm0, %v610_v30  ;;  %v1395_v61 = vrot.slane %v1387_v52, %v19170_v6  ;;  %v626_v62 = vrot.slane %v612_v54, %v19170_v6  ;;  %v611_v17 = vcombine.low %v433_v45, %v432_v55  ;;  %v1250_v63 = vrot.slane %v1174_v28, %v19170_v6  ;;  %v383_v49 = vld [vmem:[#allocation2 + $0x28] sm:$0x3f]  ;;  %v1177_v54 = vld [vmem:[#allocation2 + $0x42] sm:$0x3f] }
  0x8e   :  { %v1420_v2 = vcombine.low %v1412_v44, %v1419_v16  ;;  %v1241_v10 = vrot.slane %v1227_v47, %v19170_v6  ;;  %v1257_v40 = vrot.slane %v1243_v34, %v19170_v6  ;;  %v434_v56 = vcombine.high %v19685_v3, %v19685_v3  ;;  %17501 = vmatpush3.msra.mxu1 %v4014_v60 }
  0x8f   :  { %v1403_v20 = vcombine.low %v1395_v61, %v1402_v35  ;;  %v619_v23 = vrot.slane %v611_v17, %v19170_v6  ;;  %v1258_v36 = vcombine.high %v1250_v63, %v1250_v63  ;;  %v450_v26 = vcombine.high %v381_v59, %v381_v59  ;;  %17502 = vmatprep.subr.mxu1 %v4029_v58 }
  0x90   :  { %1550 = vst.msk [vmem:[#allocation3 + $0x30] sm:$0xff] %vm131_vm0, %v1420_v2  ;;  %v1421_v27 = vcombine.low %v1241_v10, %v1250_v63  ;;  %v448_v3 = vrot.slane %v434_v56, %v19170_v6  ;;  %v457_v39 = vrot.slane %v381_v59, %v19170_v6  ;;  %v1259_v33 = vcombine.high %v1175_v0, %v1175_v0  ;;  %v1178_v56 = vld [vmem:[#allocation2 + $0x4a] sm:$0x3f] }
  0x91   :  { %1549 = vst.msk [vmem:[#allocation3 + $0x8] sm:$0xff] %vm131_vm0, %v1403_v20  ;;  %v627_v31 = vcombine.low %v619_v23, %v626_v62  ;;  %v1422_v32 = vcombine.low %v1258_v36, %v1257_v40  ;;  %v464_v37 = vrot.slane %v450_v26, %v19170_v6  ;;  %v1266_v38 = vrot.slane %v1175_v0, %v19170_v6  ;;  %v384_v0 = vld [vmem:[#allocation2 + $0x40] sm:$0x3f] }
  0x92   :  { %17503 = vmatpush3.msra.mxu1 %v4013_v18  ;;  %v1429_v50 = vrot.slane %v1421_v27, %v19170_v6  ;;  %v465_v53 = vcombine.high %v457_v39, %v457_v39  ;;  %v628_v13 = vcombine.low %v448_v3, %v457_v39  ;;  %v1273_v28 = vrot.slane %v1259_v33, %v19170_v6 }
  0x93   :  { %17504 = vmatprep.subr.mxu1 %v4028_v5  ;;  %757 = vst.msk [vmem:[#allocation3 + $0x28] sm:$0xff] %vm131_vm0, %v627_v31  ;;  %v1436_v42 = vrot.slane %v1422_v32, %v19170_v6  ;;  %v1274_v43 = vcombine.high %v1266_v38, %v1266_v38  ;;  %v1282_v44 = vrot.slane %v1176_v29, %v19170_v6 }
  0x94   :  { %v466_v46 = vcombine.high %v382_v41, %v382_v41  ;;  %17505 = vmatpush3.msra.mxu1 %v4012_v48  ;;  %v629_v45 = vcombine.low %v465_v53, %v464_v37  ;;  %v636_v51 = vrot.slane %v628_v13, %v19170_v6  ;;  %v473_v30 = vrot.slane %v382_v41, %v19170_v6  ;;  %v385_v48 = vld [vmem:[#allocation2 + $0x48] sm:$0x3f] }
  0x95   :  { %v489_v52 = vrot.slane %v383_v49, %v19170_v6  ;;  %v1437_v55 = vcombine.low %v1429_v50, %v1436_v42  ;;  %v1438_v57 = vcombine.low %v1266_v38, %v1274_v43  ;;  %v1439_v16 = vcombine.low %v1273_v28, %v1282_v44  ;;  %v1179_v28 = vld [vmem:[#allocation2 + $0x52] sm:$0x3f] }
  0x96   :  { %v480_v35 = vrot.slane %v466_v46, %v19170_v6  ;;  %v643_v47 = vrot.slane %v629_v45, %v19170_v6  ;;  %v481_v34 = vcombine.high %v473_v30, %v473_v30  ;;  %v1275_v59 = vcombine.high %v1176_v29, %v1176_v29 }
  0x97   :  { %v1290_v60 = vcombine.high %v1282_v44, %v1282_v44  ;;  %1551 = vst.msk [vmem:[#allocation3 + $0x58] sm:$0xff] %vm131_vm0, %v1437_v55  ;;  %v1446_v61 = vrot.slane %v1438_v57, %v19170_v6  ;;  %v1453_v62 = vrot.slane %v1439_v16, %v19170_v6  ;;  %v1298_v63 = vrot.slane %v1177_v54, %v19170_v6 }
  0x98   :  { %v646_v17 = vcombine.low %v480_v35, %v489_v52  ;;  %v644_v58 = vcombine.low %v636_v51, %v643_v47  ;;  %v645_v2 = vcombine.low %v473_v30, %v481_v34  ;;  %v1289_v10 = vrot.slane %v1275_v59, %v19170_v6  ;;  %v386_v47 = vld [vmem:[#allocation2 + $0x50] sm:$0x3f] }
  0x99   :  { %v482_v40 = vcombine.high %v383_v49, %v383_v49  ;;  %v1454_v18 = vcombine.low %v1446_v61, %v1453_v62  ;;  %v1306_v23 = vcombine.high %v1298_v63, %v1298_v63  ;;  %v497_v36 = vcombine.high %v489_v52, %v489_v52  ;;  %v387_v62 = vld [vmem:[#allocation2 + $0x58] sm:$0x3f] }
  0x9a   :  { %v660_v20 = vrot.slane %v646_v17, %v19170_v6  ;;  %758 = vst.msk [vmem:[#allocation3 + $0x50] sm:$0xff] %vm131_vm0, %v644_v58  ;;  %v653_v26 = vrot.slane %v645_v2, %v19170_v6  ;;  %v1455_v5 = vcombine.low %v1290_v60, %v1289_v10  ;;  %v505_v3 = vrot.slane %v384_v0, %v19170_v6 }
  0x9b   :  { %v496_v27 = vrot.slane %v482_v40, %v19170_v6  ;;  %1552 = vst.msk [vmem:[#allocation3 + $0x80] sm:$0xff] %vm131_vm0, %v1454_v18  ;;  %v1456_v39 = vcombine.low %v1298_v63, %v1306_v23  ;;  %v1291_v29 = vcombine.high %v1177_v54, %v1177_v54  ;;  %v1307_v33 = vcombine.high %v1178_v56, %v1178_v56  ;;  %v1180_v54 = vld [vmem:[#allocation2 + $0x5a] sm:$0x3f]  ;;  %v19797_v18 = vld [vmem:[#allocation2 + $0x62] sm:$0x3f] }
  0x9c   :  { %v1314_v41 = vrot.slane %v1178_v56, %v19170_v6  ;;  %v661_v31 = vcombine.low %v653_v26, %v660_v20  ;;  %v1463_v32 = vrot.slane %v1455_v5, %v19170_v6  ;;  %v513_v37 = vcombine.high %v505_v3, %v505_v3 }
  0x9d   :  { %v662_v38 = vcombine.low %v497_v36, %v496_v27  ;;  %v1470_v49 = vrot.slane %v1456_v39, %v19170_v6  ;;  %v1305_v50 = vrot.slane %v1291_v29, %v19170_v6  ;;  %v1321_v53 = vrot.slane %v1307_v33, %v19170_v6 }
  0x9e   :  { %v1322_v13 = vcombine.high %v1314_v41, %v1314_v41  ;;  %759 = vst.msk [vmem:[#allocation3 + $0x78] sm:$0xff] %vm131_vm0, %v661_v31  ;;  %v663_v42 = vcombine.low %v505_v3, %v513_v37  ;;  %v498_v44 = vcombine.high %v384_v0, %v384_v0  ;;  %v514_v46 = vcombine.high %v385_v48, %v385_v48 }
  0x9f   :  { %v670_v43 = vrot.slane %v662_v38, %v19170_v6  ;;  %v1471_v45 = vcombine.low %v1463_v32, %v1470_v49  ;;  %v1472_v51 = vcombine.low %v1305_v50, %v1314_v41  ;;  %v521_v52 = vrot.slane %v385_v48, %v19170_v6  ;;  %v19809_v32 = vld [vmem:[#allocation2 + $0x60] sm:$0x3f] }
  0xa0   :  { %v1473_v30 = vcombine.low %v1322_v13, %v1321_v53  ;;  %v677_v55 = vrot.slane %v663_v42, %v19170_v6  ;;  %v512_v57 = vrot.slane %v498_v44, %v19170_v6  ;;  %v528_v16 = vrot.slane %v514_v46, %v19170_v6  ;;  %v2756_v53 = vld [vmem:[#allocation2 + $0x10] sm:$0x3f]  ;;  %v19814_v44 = vld [vmem:[#allocation2 + $0x18] sm:$0x3f] }
  0xa1   :  { %v1323_v35 = vcombine.high %v1179_v28, %v1179_v28  ;;  %1553 = vst.msk [vmem:[#allocation3 + $0xa8] sm:$0xff] %vm131_vm0, %v1471_v45  ;;  %v1480_v34 = vrot.slane %v1472_v51, %v19170_v6  ;;  %v529_v60 = vcombine.high %v521_v52, %v521_v52  ;;  %v1330_v61 = vrot.slane %v1179_v28, %v19170_v6 }
  0xa2   :  { %v1487_v59 = vrot.slane %v1473_v30, %v19170_v6  ;;  %v678_v17 = vcombine.low %v670_v43, %v677_v55  ;;  %v679_v63 = vcombine.low %v512_v57, %v521_v52  ;;  %v1346_v58 = vrot.slane %v1180_v54, %v19170_v6 }
  0xa3   :  { %v1337_v0 = vrot.slane %v1323_v35, %v19170_v6  ;;  %v680_v10 = vcombine.low %v529_v60, %v528_v16  ;;  %v1338_v40 = vcombine.high %v1330_v61, %v1330_v61  ;;  %v530_v56 = vcombine.high %v386_v47, %v386_v47 }
  0xa4   :  { %v1488_v2 = vcombine.low %v1480_v34, %v1487_v59  ;;  %760 = vst.msk [vmem:[#allocation3 + $0xa0] sm:$0xff] %vm131_vm0, %v678_v17  ;;  %v687_v20 = vrot.slane %v679_v63, %v19170_v6  ;;  %v537_v36 = vrot.slane %v386_v47, %v19170_v6  ;;  %v553_v26 = vrot.slane %v387_v62, %v19170_v6  ;;  %v1963_v47 = vld [vmem:[#allocation2 + $0x9] sm:$0x3f] }
  0xa5   :  { %v1490_v23 = vcombine.low %v1337_v0, %v1346_v58  ;;  %v694_v5 = vrot.slane %v680_v10, %v19170_v6  ;;  %v1489_v27 = vcombine.low %v1330_v61, %v1338_v40  ;;  %v544_v3 = vrot.slane %v530_v56, %v19170_v6 }
  0xa6   :  { %1554 = vst.msk [vmem:[#allocation3 + $0xd0] sm:$0xff] %vm131_vm0, %v1488_v2  ;;  %v1339_v39 = vcombine.high %v1180_v54, %v1180_v54  ;;  %v1135_v29 = vpop.permute.xlu0 %1134  ;;  %v545_v41 = vcombine.high %v537_v36, %v537_v36  ;;  %v1354_v48 = vcombine.high %v1346_v58, %v1346_v58  ;;  %v1362_v31 = vrot.slane %v19797_v18, %v19170_v6 }
  0xa7   :  { %v1504_v33 = vrot.slane %v1490_v23, %v19170_v6  ;;  %1162 = vst.msk [vmem:[#allocation3] sm:$0xff] %vm1161_vm2, %v1135_v29  ;;  %v695_v37 = vcombine.low %v687_v20, %v694_v5  ;;  %v1497_v38 = vrot.slane %v1489_v27, %v19170_v6  ;;  %v697_v49 = vcombine.low %v544_v3, %v553_v26  ;;  %v1182_v23 = vld [vmem:[#allocation2 + $0x6a] sm:$0x3f] }
  0xa8   :  { %v1353_v50 = vrot.slane %v1339_v39, %v19170_v6  ;;  %v696_v13 = vcombine.low %v537_v36, %v545_v41  ;;  %v1370_v28 = vcombine.high %v1362_v31, %v1362_v31  ;;  %v546_v42 = vcombine.high %v387_v62, %v387_v62  ;;  %v1930_v46 = vpop.permute.xlu1 %1929  ;;  %v19831_v62 = vld [vmem:[#allocation2 + $0x11] sm:$0x3f] }
  0xa9   :  { %v561_v43 = vcombine.high %v553_v26, %v553_v26  ;;  %761 = vst.msk [vmem:[#allocation3 + $0xc8] sm:$0xff] %vm131_vm0, %v695_v37  ;;  %v1505_v45 = vcombine.low %v1497_v38, %v1504_v33  ;;  %v711_v51 = vrot.slane %v697_v49, %v19170_v6  ;;  %v569_v52 = vrot.slane %v19809_v32, %v19170_v6  ;;  %v389_v49 = vld [vmem:[#allocation2 + $0x68] sm:$0x3f] }
  0xaa   :  { %v1506_v30 = vcombine.low %v1354_v48, %v1353_v50  ;;  %1955 = vst.msk [vmem:[#allocation3 + $0x30] sm:$0xff] %vm1161_vm2, %v1930_v46  ;;  %v1928_v54 = vpop.permute.xlu0 %1927  ;;  %v704_v55 = vrot.slane %v696_v13, %v19170_v6  ;;  %v1507_v57 = vcombine.low %v1362_v31, %v1370_v28  ;;  %v560_v16 = vrot.slane %v546_v42, %v19170_v6 }
  0xab   :  { %v2780_v35 = vcombine.high %v2756_v53, %v2756_v53  ;;  %1954 = vst.msk [vmem:[#allocation3 + $0x8] sm:$0xff] %vm1161_vm2, %v1928_v54  ;;  %v577_v59 = vcombine.high %v569_v52, %v569_v52  ;;  %v2787_v60 = vrot.slane %v2756_v53, %v19170_v6  ;;  %v19829_v61 = vrot.slane %v19814_v44, %v19170_v6 }
  0xac   :  { %1555 = vst.msk [vmem:[#allocation3 + $0xf8] sm:$0xff] %vm131_vm0, %v1505_v45  ;;  %v1514_v34 = vrot.slane %v1506_v30, %v19170_v6  ;;  %v712_v17 = vcombine.low %v704_v55, %v711_v51  ;;  %v1521_v63 = vrot.slane %v1507_v57, %v19170_v6  ;;  %v713_v0 = vcombine.low %v561_v43, %v560_v16  ;;  %v1137_v2 = vpop.permute.xlu1 %1136 }
  0xad   :  { %v2794_v58 = vrot.slane %v2780_v35, %v19170_v6  ;;  %v714_v10 = vcombine.low %v569_v52, %v577_v59  ;;  %v2795_v40 = vcombine.high %v2787_v60, %v2787_v60  ;;  %v1987_v56 = vcombine.high %v1963_v47, %v1963_v47  ;;  %1163 = vst.msk [vmem:[#allocation3 + $0x28] sm:$0xff] %vm1161_vm2, %v1137_v2 }
  0xae   :  { %v1994_v20 = vrot.slane %v1963_v47, %v19170_v6  ;;  %762 = vst.msk [vmem:[#allocation3 + $0xf0] sm:$0xff] %vm131_vm0, %v712_v17  ;;  %v1522_v36 = vcombine.low %v1514_v34, %v1521_v63  ;;  %v721_v26 = vrot.slane %v713_v0, %v19170_v6  ;;  %v19842_v27 = vrot.slane %v19831_v62, %v19170_v6  ;;  %v3935_v52 = vld [vmem:[#allocation3] sm:$0xff]  ;;  %v4050_v34 = vld [vmem:[%s21931_s1 + $0x230] sm:$0xff] }
  0xaf   :  { %v2973_v5 = vcombine.low %v2794_v58, %v19829_v61  ;;  %v728_v3 = vrot.slane %v714_v10, %v19170_v6  ;;  %v2972_v39 = vcombine.low %v2787_v60, %v2795_v40  ;;  %v2001_v29 = vrot.slane %v1987_v56, %v19170_v6  ;;  %v19870_v63 = vld [vmem:[#allocation2 + $0x20] sm:$0x3f]  ;;  %v4049_v40 = vld [vmem:[%s21931_s1 + $0x228] sm:$0xff] }
  0xb0   :  { %v2002_v33 = vcombine.high %v1994_v20, %v1994_v20  ;;  %v1932_v41 = vpop.permute.xlu0 %1931  ;;  %1556 = vst.msk [vmem:[#allocation3 + $0x120] sm:$0xff] %vm131_vm0, %v1522_v36  ;;  %v1355_v31 = vcombine.high %v19797_v18, %v19797_v18  ;;  %v1371_v37 = vcombine.high %v1182_v23, %v1182_v23  ;;  %v1378_v38 = vrot.slane %v1182_v23, %v19170_v6  ;;  %v4051_v18 = vld [vmem:[%s21931_s1 + $0x238] sm:$0xff] }
  0xb1   :  { %v2987_v48 = vrot.slane %v2973_v5, %v19170_v6  ;;  %1956 = vst.msk [vmem:[#allocation3 + $0x58] sm:$0xff] %vm1161_vm2, %v1932_v41  ;;  %v1139_v50 = vpop.permute.xlu1 %1138  ;;  %v729_v53 = vcombine.low %v721_v26, %v728_v3  ;;  %v2980_v13 = vrot.slane %v2972_v39, %v19170_v6  ;;  %v2180_v42 = vcombine.low %v2001_v29, %v19842_v27  ;;  %v3941_v47 = vld [vmem:[#allocation3 + $0x30] sm:$0xff]  ;;  %v19890_v39 = vld [vmem:[#allocation2 + $0x19] sm:$0x3f]  ;;  %v4048_v41 = vld [vmem:[%s21931_s1 + $0x220] sm:$0xff] }
  0xb2   :  { %v2179_v28 = vcombine.low %v1994_v20, %v2002_v33  ;;  %1164 = vst.msk [vmem:[#allocation3 + $0x50] sm:$0xff] %vm1161_vm2, %v1139_v50  ;;  %v3936_v43 = vld [vmem:[#allocation3 + $0x8] sm:$0xff]  ;;  %v1369_v46 = vrot.slane %v1355_v31, %v19170_v6  ;;  %v1385_v45 = vrot.slane %v1371_v37, %v19170_v6  ;;  %v1386_v51 = vcombine.high %v1378_v38, %v1378_v38 }
  0xb3   :  { %v562_v30 = vcombine.high %v19809_v32, %v19809_v32  ;;  %4143 = vmatprep.mubr.f32.mxu0 %v3936_v43  ;;  %763 = vst.msk [vmem:[#allocation3 + $0x118] sm:$0xff] %vm131_vm0, %v729_v53  ;;  %v2988_v54 = vcombine.low %v2980_v13, %v2987_v48  ;;  %v2194_v57 = vrot.slane %v2180_v42, %v19170_v6  ;;  %v2759_v37 = vld [vmem:[#allocation2 + $0x28] sm:$0x3f]  ;;  %v4047_v53 = vld [vmem:[%s21931_s1 + $0x218] sm:$0xff] }
  0xb4   :  { %v2187_v55 = vrot.slane %v2179_v28, %v19170_v6  ;;  %v578_v16 = vcombine.high %v389_v49, %v389_v49  ;;  %v1934_v35 = vpop.permute.xlu0 %1933  ;;  %4144 = vmatmul.mubr.f32.vlgmr.msra.gmra.mxu0 %v3935_v52  ;;  %v1523_v59 = vcombine.low %v1369_v46, %v1378_v38  ;;  %v1524_v60 = vcombine.low %v1386_v51, %v1385_v45  ;;  %v3940_v26 = vld [vmem:[#allocation3 + $0x28] sm:$0xff] }
  0xb5   :  { %v576_v32 = vrot.slane %v562_v30, %v19170_v6  ;;  %v585_v17 = vrot.slane %v389_v49, %v19170_v6  ;;  %1957 = vst.msk [vmem:[#allocation3 + $0x80] sm:$0xff] %vm1161_vm2, %v1934_v35  ;;  %4148 = vmatprep.mubr.f32.mxu0 %v3941_v47  ;;  %17756 = vmatpush3.msra.mxu0 %v4051_v18  ;;  %v1966_v35 = vld [vmem:[#allocation2 + $0x21] sm:$0x3f] }
  0xb6   :  { %3134 = vst.msk [vmem:[#allocation3 + $0x18] sm:$0xff] %vm131_vm0, %v2988_v54  ;;  %v2195_v0 = vcombine.low %v2187_v55, %v2194_v57  ;;  %v592_v58 = vrot.slane %v578_v16, %v19170_v6  ;;  %v2796_v2 = vcombine.high %v19814_v44, %v19814_v44  ;;  %v1141_v10 = vpop.permute.xlu1 %1140  ;;  %17757 = vmatprep.subr.mxu0 %v19077_v1  ;;  %v4046_v55 = vld [vmem:[%s21931_s1 + $0x210] sm:$0xff] }
  0xb7   :  { %v1531_v56 = vrot.slane %v1523_v59, %v19170_v6  ;;  %v1538_v20 = vrot.slane %v1524_v60, %v19170_v6  ;;  %v593_v23 = vcombine.high %v585_v17, %v585_v17  ;;  %v730_v36 = vcombine.low %v576_v32, %v585_v17  ;;  %1165 = vst.msk [vmem:[#allocation3 + $0x78] sm:$0xff] %vm1161_vm2, %v1141_v10 }
  0xb8   :  { %17758 = vmatpush3.msra.mxu0 %v4050_v34  ;;  %2341 = vst.msk [vmem:[#allocation3 + $0x10] sm:$0xff] %vm131_vm0, %v2195_v0  ;;  %v2810_v44 = vrot.slane %v2796_v2, %v19170_v6  ;;  %v2811_v5 = vcombine.high %v19829_v61, %v19829_v61  ;;  %v2819_v3 = vrot.slane %v19870_v63, %v19170_v6  ;;  %v3946_v33 = vld [vmem:[#allocation3 + $0x58] sm:$0xff]  ;;  %v2760_v2 = vld [vmem:[#allocation2 + $0x30] sm:$0x3f] }
  0xb9   :  { %v2003_v29 = vcombine.high %v19831_v62, %v19831_v62  ;;  %4149 = vmatmul.mubr.f32.gmra.mxu0 %v3940_v26  ;;  %17759 = vmatprep.subr.mxu0 %v19077_v1  ;;  %v1539_v48 = vcombine.low %v1531_v56, %v1538_v20  ;;  %v731_v31 = vcombine.low %v593_v23, %v592_v58  ;;  %v3945_v46 = vld [vmem:[#allocation3 + $0x50] sm:$0xff] }
  0xba   :  { %v738_v61 = vrot.slane %v730_v36, %v19170_v6  ;;  %4153 = vmatprep.mubr.f32.mxu0 %v3946_v33  ;;  %17760 = vmatpush3.msra.mxu0 %v4049_v40  ;;  %v2827_v38 = vcombine.high %v2819_v3, %v2819_v3  ;;  %v2989_v49 = vcombine.low %v2811_v5, %v2810_v44  ;;  %v1936_v62 = vpop.permute.xlu0 %1935  ;;  %v1143_v18 = vpop.permute.xlu1 %1142 }
  0xbb   :  { %v2017_v50 = vrot.slane %v2003_v29, %v19170_v6  ;;  %17761 = vmatprep.subr.mxu0 %v19077_v1  ;;  %1557 = vst.msk [vmem:[#allocation3 + $0x148] sm:$0xff] %vm131_vm0, %v1539_v48  ;;  %v745_v13 = vrot.slane %v731_v31, %v19170_v6  ;;  %v2018_v28 = vcombine.high %v19842_v27, %v19842_v27  ;;  %v1967_v31 = vld [vmem:[#allocation2 + $0x29] sm:$0x3f] }
  0xbc   :  { %v2026_v42 = vrot.slane %v19890_v39, %v19170_v6  ;;  %v2812_v43 = vcombine.high %v19870_v63, %v19870_v63  ;;  %1958 = vst.msk [vmem:[#allocation3 + $0xa8] sm:$0xff] %vm1161_vm2, %v1936_v62  ;;  %17762 = vmatpush3.msra.mxu0 %v4048_v41  ;;  %v2990_v45 = vcombine.low %v2819_v3, %v2827_v38  ;;  %1166 = vst.msk [vmem:[#allocation3 + $0xa0] sm:$0xff] %vm1161_vm2, %v1143_v18  ;;  %v3951_v27 = vld [vmem:[#allocation3 + $0x80] sm:$0xff]  ;;  %v4045_v63 = vld [vmem:[%s21931_s1 + $0x208] sm:$0xff] }
  0xbd   :  { %v2997_v51 = vrot.slane %v2989_v49, %v19170_v6  ;;  %v2828_v30 = vcombine.high %v2759_v37, %v2759_v37  ;;  %v2835_v52 = vrot.slane %v2759_v37, %v19170_v6  ;;  %4154 = vmatmul.mubr.f32.gmra.mxu0 %v3945_v46  ;;  %17763 = vmatprep.subr.mxu0 %v19077_v1  ;;  %v19936_v3 = vld [vmem:[#allocation2 + $0x38] sm:$0x3f]  ;;  %v3548_v18 = vld [vmem:[#allocation2 + $0x12] sm:$0x3f] }
  0xbe   :  { %v746_v54 = vcombine.low %v738_v61, %v745_v13  ;;  %v2034_v57 = vcombine.high %v2026_v42, %v2026_v42  ;;  %v2196_v16 = vcombine.low %v2018_v28, %v2017_v50  ;;  %4158 = vmatprep.mubr.f32.mxu0 %v3951_v27  ;;  %17764 = vmatpush3.msra.mxu0 %v4047_v53  ;;  %v1938_v60 = vpop.permute.xlu0 %1937  ;;  %v3950_v10 = vld [vmem:[#allocation3 + $0x78] sm:$0xff]  ;;  %v19948_v53 = vld [vmem:[#allocation2 + $0x31] sm:$0x3f] }
  0xbf   :  { %v3004_v47 = vrot.slane %v2990_v45, %v19170_v6  ;;  %v2826_v34 = vrot.slane %v2812_v43, %v19170_v6  ;;  %v2842_v59 = vrot.slane %v2828_v30, %v19170_v6  ;;  %17765 = vmatprep.subr.mxu0 %v19077_v1  ;;  %v2843_v0 = vcombine.high %v2835_v52, %v2835_v52 }
  0xc0   :  { %764 = vst.msk [vmem:[#allocation3 + $0x140] sm:$0xff] %vm131_vm0, %v746_v54  ;;  %v2197_v32 = vcombine.low %v2026_v42, %v2034_v57  ;;  %v2204_v17 = vrot.slane %v2196_v16, %v19170_v6  ;;  %v2019_v58 = vcombine.high %v19890_v39, %v19890_v39  ;;  %17766 = vmatpush3.msra.mxu0 %v4046_v55  ;;  %v1145_v36 = vpop.permute.xlu1 %1144  ;;  %v4044_v39 = vld [vmem:[%s21931_s1 + $0x200] sm:$0xff] }
  0xc1   :  { %1959 = vst.msk [vmem:[#allocation3 + $0xd0] sm:$0xff] %vm1161_vm2, %v1938_v60  ;;  %v3005_v40 = vcombine.low %v2997_v51, %v3004_v47  ;;  %v3006_v56 = vcombine.low %v2826_v34, %v2835_v52  ;;  %v2035_v20 = vcombine.high %v1966_v35, %v1966_v35  ;;  %v2042_v23 = vrot.slane %v1966_v35, %v19170_v6  ;;  %v19958_v52 = vld [vmem:[#allocation2 + $0x1a] sm:$0x3f] }
  0xc2   :  { %4159 = vmatmul.mubr.f32.gmra.mxu0 %v3950_v10  ;;  %v2211_v26 = vrot.slane %v2197_v32, %v19170_v6  ;;  %17767 = vmatprep.subr.mxu0 %v19077_v1  ;;  %v3007_v44 = vcombine.low %v2843_v0, %v2842_v59  ;;  %v2033_v5 = vrot.slane %v2019_v58, %v19170_v6  ;;  %v1940_v61 = vpop.permute.xlu0 %1939  ;;  %v19971_v32 = vld [vmem:[#allocation2 + $0x50] sm:$0x3f] }
  0xc3   :  { %1167 = vst.msk [vmem:[#allocation3 + $0xc8] sm:$0xff] %vm1161_vm2, %v1145_v36  ;;  %17768 = vmatpush3.msra.mxu0 %v4045_v63  ;;  %v3014_v29 = vrot.slane %v3006_v56, %v19170_v6  ;;  %v2049_v33 = vrot.slane %v2035_v20, %v19170_v6  ;;  %v2050_v41 = vcombine.high %v2042_v23, %v2042_v23  ;;  %v3956_v37 = vld [vmem:[#allocation3 + $0xa8] sm:$0xff]  ;;  %1960 = vst.msk [vmem:[#allocation3 + $0xf8] sm:$0xff] %vm1161_vm2, %v1940_v61  ;;  %v3955_v13 = vld [vmem:[#allocation3 + $0xa0] sm:$0xff] }
  0xc4   :  { %3135 = vst.msk [vmem:[#allocation3 + $0x40] sm:$0xff] %vm131_vm0, %v3005_v40  ;;  %v2844_v48 = vcombine.high %v2760_v2, %v2760_v2  ;;  %v2212_v38 = vcombine.low %v2204_v17, %v2211_v26  ;;  %v3021_v49 = vrot.slane %v3007_v44, %v19170_v6  ;;  %v2213_v50 = vcombine.low %v2033_v5, %v2042_v23 }
  0xc5   :  { %17769 = vmatprep.subr.mxu0 %v19077_v1  ;;  %v2851_v62 = vrot.slane %v2760_v2, %v19170_v6  ;;  %4163 = vmatprep.mubr.f32.mxu0 %v3956_v37  ;;  %v2214_v28 = vcombine.low %v2050_v41, %v2049_v33  ;;  %v19954_v43 = vrot.slane %v19936_v3, %v19170_v6  ;;  %v1147_v27 = vpop.permute.xlu1 %1146 }
  0xc6   :  { %v2858_v42 = vrot.slane %v2844_v48, %v19170_v6  ;;  %17770 = vmatpush3.msra.mxu0 %v4044_v39  ;;  %2342 = vst.msk [vmem:[#allocation3 + $0x38] sm:$0xff] %vm131_vm0, %v2212_v38  ;;  %v3022_v46 = vcombine.low %v3014_v29, %v3021_v49  ;;  %v2221_v45 = vrot.slane %v2213_v50, %v19170_v6  ;;  %v19989_v39 = vld [vmem:[#allocation2 + $0x49] sm:$0x3f] }
  0xc7   :  { %4164 = vmatmul.mubr.f32.gmra.mxu0 %v3955_v13  ;;  %v2859_v51 = vcombine.high %v2851_v62, %v2851_v62  ;;  %v2051_v30 = vcombine.high %v1967_v31, %v1967_v31  ;;  %v2228_v54 = vrot.slane %v2214_v28, %v19170_v6  ;;  %v2058_v57 = vrot.slane %v1967_v31, %v19170_v6  ;;  %v1942_v17 = vpop.permute.xlu0 %1941 }
  0xc8   :  { %v3024_v55 = vcombine.low %v2858_v42, %v19954_v43  ;;  %v19965_v16 = vrot.slane %v19948_v53, %v19170_v6  ;;  %1168 = vst.msk [vmem:[#allocation3 + $0xf0] sm:$0xff] %vm1161_vm2, %v1147_v27  ;;  %v3961_v35 = vld [vmem:[#allocation3 + $0xd0] sm:$0xff]  ;;  %v3572_v59 = vcombine.high %v3548_v18, %v3548_v18  ;;  %v3579_v60 = vrot.slane %v3548_v18, %v19170_v6 }
  0xc9   :  { %3136 = vst.msk [vmem:[#allocation3 + $0x68] sm:$0xff] %vm131_vm0, %v3022_v46  ;;  %v3023_v47 = vcombine.low %v2851_v62, %v2859_v51  ;;  %v2065_v34 = vrot.slane %v2051_v30, %v19170_v6  ;;  %4168 = vmatprep.mubr.f32.mxu0 %v3961_v35  ;;  %v2229_v63 = vcombine.low %v2221_v45, %v2228_v54  ;;  %v2763_v30 = vld [vmem:[#allocation2 + $0x58] sm:$0x3f] }
  0xca   :  { %v3038_v0 = vrot.slane %v3024_v55, %v19170_v6  ;;  %v2066_v58 = vcombine.high %v2058_v57, %v2058_v57  ;;  %v19976_v2 = vrot.slane %v19958_v52, %v19170_v6  ;;  %1961 = vst.msk [vmem:[#allocation3 + $0x120] sm:$0xff] %vm1161_vm2, %v1942_v17  ;;  %v3960_v10 = vld [vmem:[#allocation3 + $0xc8] sm:$0xff]  ;;  %v3586_v20 = vrot.slane %v3572_v59, %v19170_v6  ;;  %v1149_v29 = vpop.permute.xlu1 %1148  ;;  %v3966_v33 = vld [vmem:[#allocation3 + $0xf8] sm:$0xff] }
  0xcb   :  { %v3031_v40 = vrot.slane %v3023_v47, %v19170_v6  ;;  %v2231_v56 = vcombine.low %v2065_v34, %v19965_v16  ;;  %v3587_v23 = vcombine.high %v3579_v60, %v3579_v60  ;;  %4169 = vmatmul.mubr.f32.gmra.mxu0 %v3960_v10  ;;  %2343 = vst.msk [vmem:[#allocation3 + $0x60] sm:$0xff] %vm131_vm0, %v2229_v63 }
  0xcc   :  { %v2230_v36 = vcombine.low %v2058_v57, %v2066_v58  ;;  %v2860_v26 = vcombine.high %v19936_v3, %v19936_v3  ;;  %v2875_v44 = vcombine.high %v19954_v43, %v19954_v43  ;;  %v2883_v5 = vrot.slane %v19971_v32, %v19170_v6  ;;  %1169 = vst.msk [vmem:[#allocation3 + $0x118] sm:$0xff] %vm1161_vm2, %v1149_v29  ;;  %v3513_v50 = vpop.permute.xlu0 %3512  ;;  %v20005_v43 = vld [vmem:[#allocation2 + $0x22] sm:$0x3f]  ;;  %v1970_v58 = vld [vmem:[#allocation2 + $0x51] sm:$0x3f] }
  0xcd   :  { %v3039_v41 = vcombine.low %v3031_v40, %v3038_v0  ;;  %v2245_v48 = vrot.slane %v2231_v56, %v19170_v6  ;;  %v3764_v31 = vcombine.low %v3579_v60, %v3587_v23  ;;  %v3765_v61 = vcombine.low %v3586_v20, %v19976_v2  ;;  %4173 = vmatprep.mubr.f32.mxu0 %v3966_v33 }
  0xce   :  { %v2238_v3 = vrot.slane %v2230_v36, %v19170_v6  ;;  %v2874_v37 = vrot.slane %v2860_v26, %v19170_v6  ;;  %v2891_v38 = vcombine.high %v2883_v5, %v2883_v5  ;;  %v2067_v49 = vcombine.high %v19948_v53, %v19948_v53  ;;  %3539 = vst.msk [vmem:[#allocation3 + $0x18] sm:$0xff] %vm1161_vm2, %v3513_v50  ;;  %v2720_v27 = vpop.permute.xlu1 %2719 }
  0xcf   :  { %3137 = vst.msk [vmem:[#allocation3 + $0x90] sm:$0xff] %vm131_vm0, %v3039_v41  ;;  %v3772_v62 = vrot.slane %v3764_v31, %v19170_v6  ;;  %v3779_v13 = vrot.slane %v3765_v61, %v19170_v6  ;;  %v2082_v28 = vcombine.high %v19965_v16, %v19965_v16  ;;  %v2090_v42 = vrot.slane %v19989_v39, %v19170_v6  ;;  %v3965_v18 = vld [vmem:[#allocation3 + $0xf0] sm:$0xff] }
  0xd0   :  { %v2246_v46 = vcombine.low %v2238_v3, %v2245_v48  ;;  %v3040_v53 = vcombine.low %v2875_v44, %v2874_v37  ;;  %v3041_v45 = vcombine.low %v2883_v5, %v2891_v38  ;;  %v2081_v51 = vrot.slane %v2067_v49, %v19170_v6  ;;  %4174 = vmatmul.mubr.f32.gmra.mxu0 %v3965_v18  ;;  %v2764_v48 = vld [vmem:[#allocation2 + $0x60] sm:$0x3f]  ;;  %v20034_v49 = vld [vmem:[#allocation2 + $0x68] sm:$0x3f] }
  0xd1   :  { %v3780_v54 = vcombine.low %v3772_v62, %v3779_v13  ;;  %v2098_v55 = vcombine.high %v2090_v42, %v2090_v42  ;;  %v3588_v57 = vcombine.high %v19958_v52, %v19958_v52  ;;  %v3603_v16 = vcombine.high %v19976_v2, %v19976_v2  ;;  %2746 = vst.msk [vmem:[#allocation3 + $0x10] sm:$0xff] %vm1161_vm2, %v2720_v27  ;;  %v3971_v35 = vld [vmem:[#allocation3 + $0x120] sm:$0xff]  ;;  %v1944_v2 = vpop.permute.xlu0 %1943 }
  0xd2   :  { %2344 = vst.msk [vmem:[#allocation3 + $0x88] sm:$0xff] %vm131_vm0, %v2246_v46  ;;  %v3048_v47 = vrot.slane %v3040_v53, %v19170_v6  ;;  %v3055_v34 = vrot.slane %v3041_v45, %v19170_v6  ;;  %v2247_v59 = vcombine.low %v2082_v28, %v2081_v51  ;;  %v3611_v60 = vrot.slane %v20005_v43, %v19170_v6  ;;  %v3551_v51 = vld [vmem:[#allocation2 + $0x2a] sm:$0x3f] }
  0xd3   :  { %4178 = vmatprep.mubr.f32.mxu0 %v3971_v35  ;;  %3926 = vst.msk [vmem:[#allocation3 + $0x20] sm:$0xff] %vm131_vm0, %v3780_v54  ;;  %v2248_v52 = vcombine.low %v2090_v42, %v2098_v55  ;;  %v3602_v17 = vrot.slane %v3588_v57, %v19170_v6  ;;  %v2876_v63 = vcombine.high %v19971_v32, %v19971_v32  ;;  %v3970_v23 = vld [vmem:[#allocation3 + $0x118] sm:$0xff] }
  0xd4   :  { %v2892_v0 = vcombine.high %v2763_v30, %v2763_v30  ;;  %v3056_v10 = vcombine.low %v3048_v47, %v3055_v34  ;;  %v2255_v40 = vrot.slane %v2247_v59, %v19170_v6  ;;  %v3619_v56 = vcombine.high %v3611_v60, %v3611_v60  ;;  %1962 = vst.msk [vmem:[#allocation3 + $0x148] sm:$0xff] %vm1161_vm2, %v1944_v2  ;;  %v1971_v59 = vld [vmem:[#allocation2 + $0x59] sm:$0x3f] }
  0xd5   :  { %v2899_v20 = vrot.slane %v2763_v30, %v19170_v6  ;;  %v2262_v36 = vrot.slane %v2248_v52, %v19170_v6  ;;  %v3781_v26 = vcombine.low %v3603_v16, %v3602_v17  ;;  %v2890_v44 = vrot.slane %v2876_v63, %v19170_v6  ;;  %4179 = vmatmul.mubr.f32.gmra.mxu0 %v3970_v23  ;;  %v3938_v31 = vld [vmem:[#allocation3 + $0x18] sm:$0xff]  ;;  %v1151_v50 = vpop.permute.xlu1 %1150 }
  0xd6   :  { %v2906_v5 = vrot.slane %v2892_v0, %v19170_v6  ;;  %3138 = vst.msk [vmem:[#allocation3 + $0xb8] sm:$0xff] %vm131_vm0, %v3056_v10  ;;  %v3782_v32 = vcombine.low %v3611_v60, %v3619_v56  ;;  %v2083_v33 = vcombine.high %v19989_v39, %v19989_v39  ;;  %v2099_v41 = vcombine.high %v1970_v58, %v1970_v58  ;;  %v20059_v56 = vld [vmem:[#allocation2 + $0x61] sm:$0x3f] }
  0xd7   :  { %v2907_v29 = vcombine.high %v2899_v20, %v2899_v20  ;;  %v2263_v61 = vcombine.low %v2255_v40, %v2262_v36  ;;  %v3789_v3 = vrot.slane %v3781_v26, %v19170_v6  ;;  %v3057_v37 = vcombine.low %v2890_v44, %v2899_v20  ;;  %4253 = vmatprep.mubr.f32.mxu1 %v3938_v31 }
  0xd8   :  { %v2106_v38 = vrot.slane %v1970_v58, %v19170_v6  ;;  %v3796_v62 = vrot.slane %v3782_v32, %v19170_v6  ;;  %v2097_v28 = vrot.slane %v2083_v33, %v19170_v6  ;;  %v2113_v39 = vrot.slane %v2099_v41, %v19170_v6  ;;  %1170 = vst.msk [vmem:[#allocation3 + $0x140] sm:$0xff] %vm1161_vm2, %v1151_v50  ;;  %v3937_v42 = vld [vmem:[#allocation3 + $0x10] sm:$0xff]  ;;  %v3515_v57 = vpop.permute.xlu0 %3514  ;;  %v20074_v50 = vld [vmem:[#allocation2 + $0x3a] sm:$0x3f] }
  0xd9   :  { %v3058_v13 = vcombine.low %v2907_v29, %v2906_v5  ;;  %2345 = vst.msk [vmem:[#allocation3 + $0xb0] sm:$0xff] %vm131_vm0, %v2263_v61  ;;  %v3065_v18 = vrot.slane %v3057_v37, %v19170_v6  ;;  %v2908_v53 = vcombine.high %v2764_v48, %v2764_v48  ;;  %v2915_v45 = vrot.slane %v2764_v48, %v19170_v6  ;;  %v2722_v60 = vpop.permute.xlu1 %2721  ;;  %v20066_v41 = vld [vmem:[#allocation2 + $0x70] sm:$0x3f] }
  0xda   :  { %v2114_v46 = vcombine.high %v2106_v38, %v2106_v38  ;;  %4254 = vmatmul.mubr.f32.vlgmr.msra.gmra.mxu1 %v3937_v42  ;;  %v3797_v30 = vcombine.low %v3789_v3, %v3796_v62  ;;  %v2264_v54 = vcombine.low %v2097_v28, %v2106_v38  ;;  %v20046_v55 = vrot.slane %v20034_v49, %v19170_v6  ;;  %v3552_v38 = vld [vmem:[#allocation2 + $0x32] sm:$0x3f] }
  0xdb   :  { %v3072_v27 = vrot.slane %v3058_v13, %v19170_v6  ;;  %v2922_v35 = vrot.slane %v2908_v53, %v19170_v6  ;;  %v2923_v47 = vcombine.high %v2915_v45, %v2915_v45  ;;  %v3604_v34 = vcombine.high %v20005_v43, %v20005_v43  ;;  %3540 = vst.msk [vmem:[#allocation3 + $0x40] sm:$0xff] %vm1161_vm2, %v3515_v57  ;;  %v3976_v52 = vld [vmem:[#allocation3 + $0x148] sm:$0xff] }
  0xdc   :  { %v2265_v16 = vcombine.low %v2114_v46, %v2113_v39  ;;  %3927 = vst.msk [vmem:[#allocation3 + $0x48] sm:$0xff] %vm131_vm0, %v3797_v30  ;;  %v2272_v63 = vrot.slane %v2264_v54, %v19170_v6  ;;  %v3620_v0 = vcombine.high %v3551_v51, %v3551_v51  ;;  %v3627_v58 = vrot.slane %v3551_v51, %v19170_v6  ;;  %v3517_v44 = vpop.permute.xlu0 %3516 }
  0xdd   :  { %v3073_v17 = vcombine.low %v3065_v18, %v3072_v27  ;;  %2747 = vst.msk [vmem:[#allocation3 + $0x38] sm:$0xff] %vm1161_vm2, %v2722_v60  ;;  %4183 = vmatprep.mubr.f32.mxu0 %v3976_v52  ;;  %v3074_v10 = vcombine.low %v2915_v45, %v2923_v47  ;;  %v3075_v43 = vcombine.low %v2922_v35, %v20046_v55  ;;  %3541 = vst.msk [vmem:[#allocation3 + $0x68] sm:$0xff] %vm1161_vm2, %v3517_v44  ;;  %v3939_v18 = vld [vmem:[#allocation3 + $0x20] sm:$0xff] }
  0xde   :  { %v2279_v2 = vrot.slane %v2265_v16, %v19170_v6  ;;  %v3618_v40 = vrot.slane %v3604_v34, %v19170_v6  ;;  %v3634_v20 = vrot.slane %v3620_v0, %v19170_v6  ;;  %v3635_v23 = vcombine.high %v3627_v58, %v3627_v58  ;;  %v2767_v0 = vld [vmem:[#allocation2 + $0x78] sm:$0x3f] }
  0xdf   :  { %3139 = vst.msk [vmem:[#allocation3 + $0xe0] sm:$0xff] %vm131_vm0, %v3073_v17  ;;  %v2115_v36 = vcombine.high %v1971_v59, %v1971_v59  ;;  %v2122_v26 = vrot.slane %v1971_v59, %v19170_v6  ;;  %v3082_v32 = vrot.slane %v3074_v10, %v19170_v6  ;;  %v3089_v29 = vrot.slane %v3075_v43, %v19170_v6  ;;  %v3975_v48 = vld [vmem:[#allocation3 + $0x140] sm:$0xff]  ;;  %v2724_v42 = vpop.permute.xlu1 %2723  ;;  %v20098_v59 = vld [vmem:[#allocation2 + $0x69] sm:$0x3f] }
  0xe0   :  { %v2280_v5 = vcombine.low %v2272_v63, %v2279_v2  ;;  %v3798_v33 = vcombine.low %v3618_v40, %v3627_v58  ;;  %v3799_v31 = vcombine.low %v3635_v23, %v3634_v20  ;;  %v20072_v37 = vrot.slane %v20059_v56, %v19170_v6  ;;  %4184 = vmatmul.mubr.f32.gmra.mxu0 %v3975_v48 }
  0xe1   :  { %v2129_v61 = vrot.slane %v2115_v36, %v19170_v6  ;;  %v2130_v3 = vcombine.high %v2122_v26, %v2122_v26  ;;  %v3090_v62 = vcombine.low %v3082_v32, %v3089_v29  ;;  %v2924_v28 = vcombine.high %v20034_v49, %v20034_v49  ;;  %17771 = vmatprep.mubr.msk.f32.mxu0 %vm19080_vm3, %v19077_v1 }
  0xe2   :  { %2346 = vst.msk [vmem:[#allocation3 + $0xd8] sm:$0xff] %vm131_vm0, %v2280_v5  ;;  %v3806_v13 = vrot.slane %v3798_v33, %v19170_v6  ;;  %v2939_v39 = vcombine.high %v20046_v55, %v20046_v55  ;;  %v3813_v46 = vrot.slane %v3799_v31, %v19170_v6  ;;  %v2947_v51 = vrot.slane %v20066_v41, %v19170_v6  ;;  %v3943_v49 = vld [vmem:[#allocation3 + $0x40] sm:$0xff]  ;;  %v3519_v60 = vpop.permute.xlu0 %3518 }
  0xe3   :  { %v2281_v53 = vcombine.low %v2122_v26, %v2130_v3  ;;  %v2282_v45 = vcombine.low %v2129_v61, %v20072_v37  ;;  %2748 = vst.msk [vmem:[#allocation3 + $0x60] sm:$0xff] %vm1161_vm2, %v2724_v42  ;;  %v2938_v30 = vrot.slane %v2924_v28, %v19170_v6  ;;  %v3636_v27 = vcombine.high %v3552_v38, %v3552_v38  ;;  %v2726_v58 = vpop.permute.xlu1 %2725  ;;  %v3944_v2 = vld [vmem:[#allocation3 + $0x48] sm:$0xff] }
  0xe4   :  { %3140 = vst.msk [vmem:[#allocation3 + $0x108] sm:$0xff] %vm131_vm0, %v3090_v62  ;;  %v3643_v54 = vrot.slane %v3552_v38, %v19170_v6  ;;  %v20094_v55 = vrot.slane %v20074_v50, %v19170_v6  ;;  %4258 = vmatprep.mubr.f32.mxu1 %v3943_v49  ;;  %v3942_v57 = vld [vmem:[#allocation3 + $0x38] sm:$0xff]  ;;  %v3814_v16 = vcombine.low %v3806_v13, %v3813_v46  ;;  %v3948_v23 = vld [vmem:[#allocation3 + $0x68] sm:$0xff]  ;;  %v20124_v38 = vld [vmem:[#allocation2 + $0x52] sm:$0x3f] }
  0xe5   :  { %v2289_v35 = vrot.slane %v2281_v53, %v19170_v6  ;;  %v2296_v47 = vrot.slane %v2282_v45, %v19170_v6  ;;  %v2955_v34 = vcombine.high %v2947_v51, %v2947_v51  ;;  %4259 = vmatmul.mubr.f32.gmra.mxu1 %v3942_v57  ;;  %17772 = vmatmul.mubr.msk.f32.vlgmr.msra.gmra.mxu0 %vm131_vm0, %v3939_v18  ;;  %v1974_v45 = vld [vmem:[#allocation2 + $0x71] sm:$0x3f] }
  0xe6   :  { %v3091_v52 = vcombine.low %v2939_v39, %v2938_v30  ;;  %v3650_v17 = vrot.slane %v3636_v27, %v19170_v6  ;;  %v3651_v63 = vcombine.high %v3643_v54, %v3643_v54  ;;  %3542 = vst.msk [vmem:[#allocation3 + $0x90] sm:$0xff] %vm1161_vm2, %v3519_v60  ;;  %17774 = vmatprep.mubr.msk.f32.mxu0 %vm19080_vm3, %v19077_v1  ;;  %2749 = vst.msk [vmem:[#allocation3 + $0x88] sm:$0xff] %vm1161_vm2, %v2726_v58  ;;  %v3521_v48 = vpop.permute.xlu0 %3520 }
  0xe7   :  { %3928 = vst.msk [vmem:[#allocation3 + $0x70] sm:$0xff] %vm131_vm0, %v3814_v16  ;;  %v2297_v10 = vcombine.low %v2289_v35, %v2296_v47  ;;  %v3092_v43 = vcombine.low %v2947_v51, %v2955_v34  ;;  %v2131_v40 = vcombine.high %v20059_v56, %v20059_v56  ;;  %v2146_v20 = vcombine.high %v20072_v37, %v20072_v37 }
  0xe8   :  { %v3099_v36 = vrot.slane %v3091_v52, %v19170_v6  ;;  %v3815_v26 = vcombine.low %v3643_v54, %v3651_v63  ;;  %v3816_v44 = vcombine.low %v3650_v17, %v20094_v55  ;;  %v2154_v5 = vrot.slane %v20098_v59, %v19170_v6  ;;  %4263 = vmatprep.mubr.f32.mxu1 %v3948_v23  ;;  %v3556_v23 = vld [vmem:[#allocation2 + $0x62] sm:$0x3f] }
  0xe9   :  { %2347 = vst.msk [vmem:[#allocation3 + $0x100] sm:$0xff] %vm131_vm0, %v2297_v10  ;;  %v3106_v32 = vrot.slane %v3092_v43, %v19170_v6  ;;  %v2145_v56 = vrot.slane %v2131_v40, %v19170_v6  ;;  %v2940_v29 = vcombine.high %v20066_v41, %v20066_v41  ;;  %v2956_v33 = vcombine.high %v2767_v0, %v2767_v0  ;;  %v2728_v51 = vpop.permute.xlu1 %2727 }
  0xea   :  { %17775 = vmatmul.mubr.msk.f32.gmra.mxu0 %vm131_vm0, %v3944_v2  ;;  %v3823_v31 = vrot.slane %v3815_v26, %v19170_v6  ;;  %v3830_v61 = vrot.slane %v3816_v44, %v19170_v6  ;;  %v2162_v3 = vcombine.high %v2154_v5, %v2154_v5  ;;  %v2963_v37 = vrot.slane %v2767_v0, %v19170_v6  ;;  %v3947_v62 = vld [vmem:[#allocation3 + $0x60] sm:$0xff]  ;;  %v3523_v57 = vpop.permute.xlu0 %3522  ;;  %v3555_v0 = vld [vmem:[#allocation2 + $0x5a] sm:$0x3f] }
  0xeb   :  { %3543 = vst.msk [vmem:[#allocation3 + $0xb8] sm:$0xff] %vm1161_vm2, %v3521_v48  ;;  %17777 = vmatprep.mubr.msk.f32.mxu0 %vm19080_vm3, %v19077_v1  ;;  %v3107_v41 = vcombine.low %v3099_v36, %v3106_v32  ;;  %v2298_v13 = vcombine.low %v2146_v20, %v2145_v56  ;;  %v2954_v28 = vrot.slane %v2940_v29, %v19170_v6  ;;  %2750 = vst.msk [vmem:[#allocation3 + $0xb0] sm:$0xff] %vm1161_vm2, %v2728_v51 }
  0xec   :  { %v2970_v39 = vrot.slane %v2956_v33, %v19170_v6  ;;  %4264 = vmatmul.mubr.f32.gmra.mxu1 %v3947_v62  ;;  %v3831_v42 = vcombine.low %v3823_v31, %v3830_v61  ;;  %v2299_v18 = vcombine.low %v2154_v5, %v2162_v3  ;;  %v2971_v46 = vcombine.high %v2963_v37, %v2963_v37 }
  0xed   :  { %v3652_v53 = vcombine.high %v20074_v50, %v20074_v50  ;;  %3141 = vst.msk [vmem:[#allocation3 + $0x130] sm:$0xff] %vm131_vm0, %v3107_v41  ;;  %v2306_v49 = vrot.slane %v2298_v13, %v19170_v6  ;;  %v3108_v30 = vcombine.low %v2954_v28, %v2963_v37  ;;  %v3667_v27 = vcombine.high %v20094_v55, %v20094_v55  ;;  %v3953_v16 = vld [vmem:[#allocation3 + $0x90] sm:$0xff]  ;;  %v3952_v55 = vld [vmem:[#allocation3 + $0x88] sm:$0xff] }
  0xee   :  { %v3675_v54 = vrot.slane %v20124_v38, %v19170_v6  ;;  %v3949_v35 = vld [vmem:[#allocation3 + $0x70] sm:$0xff]  ;;  %3929 = vst.msk [vmem:[#allocation3 + $0x98] sm:$0xff] %vm131_vm0, %v3831_v42  ;;  %v2313_v50 = vrot.slane %v2299_v18, %v19170_v6  ;;  %v3109_v47 = vcombine.low %v2971_v46, %v2970_v39  ;;  %v2147_v60 = vcombine.high %v20098_v59, %v20098_v59  ;;  %v2730_v36 = vpop.permute.xlu1 %2729 }
  0xef   :  { %v3666_v34 = vrot.slane %v3652_v53, %v19170_v6  ;;  %3544 = vst.msk [vmem:[#allocation3 + $0xe0] sm:$0xff] %vm1161_vm2, %v3523_v57  ;;  %4268 = vmatprep.mubr.f32.mxu1 %v3953_v16  ;;  %17778 = vmatmul.mubr.msk.f32.gmra.mxu0 %vm131_vm0, %v3949_v35  ;;  %v3116_v52 = vrot.slane %v3108_v30, %v19170_v6  ;;  %2751 = vst.msk [vmem:[#allocation3 + $0xd8] sm:$0xff] %vm1161_vm2, %v2730_v36  ;;  %v3525_v29 = vpop.permute.xlu0 %3524  ;;  %v3558_v53 = vld [vmem:[#allocation2 + $0x72] sm:$0x3f] }
  0xf0   :  { %v3683_v17 = vcombine.high %v3675_v54, %v3675_v54  ;;  %v2163_v63 = vcombine.high %v1974_v45, %v1974_v45  ;;  %4269 = vmatmul.mubr.f32.gmra.mxu1 %v3952_v55  ;;  %17780 = vmatprep.mubr.msk.f32.mxu0 %vm19080_vm3, %v19077_v1  ;;  %v2314_v58 = vcombine.low %v2306_v49, %v2313_v50 }
  0xf1   :  { %v3123_v2 = vrot.slane %v3109_v47, %v19170_v6  ;;  %v3832_v10 = vcombine.low %v3667_v27, %v3666_v34  ;;  %v2161_v43 = vrot.slane %v2147_v60, %v19170_v6  ;;  %v2170_v40 = vrot.slane %v1974_v45, %v19170_v6  ;;  %3545 = vst.msk [vmem:[#allocation3 + $0x108] sm:$0xff] %vm1161_vm2, %v3525_v29  ;;  %v3559_v60 = vld [vmem:[#allocation2 + $0x7a] sm:$0x3f] }
  0xf2   :  { %v3833_v59 = vcombine.low %v3675_v54, %v3683_v17  ;;  %v2177_v20 = vrot.slane %v2163_v63, %v19170_v6  ;;  %v3958_v26 = vld [vmem:[#allocation3 + $0xb8] sm:$0xff]  ;;  %2348 = vst.msk [vmem:[#allocation3 + $0x128] sm:$0xff] %vm131_vm0, %v2314_v58  ;;  %v3668_v32 = vcombine.high %v20124_v38, %v20124_v38  ;;  %v3684_v56 = vcombine.high %v3555_v0, %v3555_v0  ;;  %v3557_v38 = vld [vmem:[#allocation2 + $0x6a] sm:$0x3f]  ;;  %v3957_v13 = vld [vmem:[#allocation3 + $0xb0] sm:$0xff]  ;;  %v2732_v45 = vpop.permute.xlu1 %2731 }
  0xf3   :  { %v3124_v44 = vcombine.low %v3116_v52, %v3123_v2  ;;  %v3840_v5 = vrot.slane %v3832_v10, %v19170_v6  ;;  %4273 = vmatprep.mubr.f32.mxu1 %v3958_v26  ;;  %v2178_v48 = vcombine.high %v2170_v40, %v2170_v40  ;;  %v2315_v31 = vcombine.low %v2161_v43, %v2170_v40 }
  0xf4   :  { %v3847_v33 = vrot.slane %v3833_v59, %v19170_v6  ;;  %v3691_v61 = vrot.slane %v3555_v0, %v19170_v6  ;;  %v3682_v3 = vrot.slane %v3668_v32, %v19170_v6  ;;  %v3698_v37 = vrot.slane %v3684_v56, %v19170_v6  ;;  %4274 = vmatmul.mubr.f32.gmra.mxu1 %v3957_v13 }
  0xf5   :  { %3142 = vst.msk [vmem:[#allocation3 + $0x158] sm:$0xff] %vm131_vm0, %v3124_v44  ;;  %v3700_v62 = vcombine.high %v3556_v23, %v3556_v23  ;;  %v3707_v41 = vrot.slane %v3556_v23, %v19170_v6  ;;  %v3954_v28 = vld [vmem:[#allocation3 + $0x98] sm:$0xff]  ;;  %v2316_v42 = vcombine.low %v2178_v48, %v2177_v20  ;;  %v2323_v18 = vrot.slane %v2315_v31, %v19170_v6  ;;  %v3527_v55 = vpop.permute.xlu0 %3526 }
  0xf6   :  { %v3848_v39 = vcombine.low %v3840_v5, %v3847_v33  ;;  %v3699_v46 = vcombine.high %v3691_v61, %v3691_v61  ;;  %17781 = vmatmul.mubr.msk.f32.gmra.mxu0 %vm131_vm0, %v3954_v28  ;;  %v3963_v51 = vld [vmem:[#allocation3 + $0xe0] sm:$0xff]  ;;  %v3849_v49 = vcombine.low %v3682_v3, %v3691_v61  ;;  %2752 = vst.msk [vmem:[#allocation3 + $0x100] sm:$0xff] %vm1161_vm2, %v2732_v45  ;;  %3546 = vst.msk [vmem:[#allocation3 + $0x130] sm:$0xff] %vm1161_vm2, %v3527_v55  ;;  %v3962_v58 = vld [vmem:[#allocation3 + $0xd8] sm:$0xff] }
  0xf7   :  { %v3714_v30 = vrot.slane %v3700_v62, %v19170_v6  ;;  %v3715_v27 = vcombine.high %v3707_v41, %v3707_v41  ;;  %4278 = vmatprep.mubr.f32.mxu1 %v3963_v51  ;;  %17783 = vmatprep.mubr.msk.f32.mxu0 %vm19080_vm3, %v19077_v1  ;;  %v2330_v54 = vrot.slane %v2316_v42, %v19170_v6 }
  0xf8   :  { %3930 = vst.msk [vmem:[#allocation3 + $0xc0] sm:$0xff] %vm131_vm0, %v3848_v39  ;;  %v3850_v57 = vcombine.low %v3699_v46, %v3698_v37  ;;  %v3723_v16 = vrot.slane %v3557_v38, %v19170_v6  ;;  %v3857_v35 = vrot.slane %v3849_v49, %v19170_v6  ;;  %v3716_v47 = vcombine.high %v3557_v38, %v3557_v38  ;;  %v3968_v40 = vld [vmem:[#allocation3 + $0x108] sm:$0xff]  ;;  %v2734_v44 = vpop.permute.xlu1 %2733 }
  0xf9   :  { %v3866_v50 = vcombine.low %v3707_v41, %v3715_v27  ;;  %v3739_v34 = vrot.slane %v3558_v53, %v19170_v6  ;;  %v2331_v52 = vcombine.low %v2323_v18, %v2330_v54  ;;  %v3732_v43 = vcombine.high %v3558_v53, %v3558_v53  ;;  %4279 = vmatmul.mubr.f32.gmra.mxu1 %v3962_v58  ;;  %v3529_v29 = vpop.permute.xlu0 %3528 }
  0xfa   :  { %v3864_v17 = vrot.slane %v3850_v57, %v19170_v6  ;;  %v3867_v63 = vcombine.low %v3714_v30, %v3723_v16  ;;  %v3731_v0 = vcombine.high %v3723_v16, %v3723_v16  ;;  %v3730_v10 = vrot.slane %v3716_v47, %v19170_v6  ;;  %4283 = vmatprep.mubr.f32.mxu1 %v3968_v40  ;;  %v5189_v40 = vld [vmem:[#allocation2 + $0x41] sm:$0x3f] }
  0xfb   :  { %v3874_v2 = vrot.slane %v3866_v50, %v19170_v6  ;;  %v3747_v59 = vcombine.high %v3739_v34, %v3739_v34  ;;  %2349 = vst.msk [vmem:[#allocation3 + $0x150] sm:$0xff] %vm131_vm0, %v2331_v52  ;;  %v3748_v36 = vcombine.high %v3559_v60, %v3559_v60  ;;  %v3755_v26 = vrot.slane %v3559_v60, %v19170_v6 }
  0xfc   :  { %v3865_v20 = vcombine.low %v3857_v35, %v3864_v17  ;;  %v3881_v23 = vrot.slane %v3867_v63, %v19170_v6  ;;  %v3883_v5 = vcombine.low %v3731_v0, %v3730_v10  ;;  %v3746_v56 = vrot.slane %v3732_v43, %v19170_v6  ;;  %2753 = vst.msk [vmem:[#allocation3 + $0x128] sm:$0xff] %vm1161_vm2, %v2734_v44  ;;  %v2736_v13 = vpop.permute.xlu1 %2735  ;;  %v5183_v43 = vld [vmem:[#allocation2 + $0x1] sm:$0x3f] }
  0xfd   :  { %v3884_v32 = vcombine.low %v3739_v34, %v3747_v59  ;;  %v3762_v48 = vrot.slane %v3748_v36, %v19170_v6  ;;  %v3763_v31 = vcombine.high %v3755_v26, %v3755_v26  ;;  %3547 = vst.msk [vmem:[#allocation3 + $0x158] sm:$0xff] %vm1161_vm2, %v3529_v29  ;;  %v3967_v3 = vld [vmem:[#allocation3 + $0x100] sm:$0xff]  ;;  %2754 = vst.msk [vmem:[#allocation3 + $0x150] sm:$0xff] %vm1161_vm2, %v2736_v13  ;;  %v3973_v42 = vld [vmem:[#allocation3 + $0x130] sm:$0xff] }
  0xfe   :  { %3931 = vst.msk [vmem:[#allocation3 + $0xe8] sm:$0xff] %vm131_vm0, %v3865_v20  ;;  %v3882_v33 = vcombine.low %v3874_v2, %v3881_v23  ;;  %v3891_v37 = vrot.slane %v3883_v5, %v19170_v6  ;;  %v3900_v62 = vcombine.low %v3746_v56, %v3755_v26  ;;  %4284 = vmatmul.mubr.f32.gmra.mxu1 %v3967_v3  ;;  %v4796_v20 = vld [vmem:[#allocation2] sm:$0x3f] }
  0xff   :  { %v3959_v61 = vld [vmem:[#allocation3 + $0xc0] sm:$0xff]  ;;  %v3898_v38 = vrot.slane %v3884_v32, %v19170_v6  ;;  %v3901_v41 = vcombine.low %v3763_v31, %v3762_v48  ;;  %4288 = vmatprep.mubr.f32.mxu1 %v3973_v42  ;;  %v5214_v26 = vrot.slane %v5183_v43, %v19170_v6  ;;  %v5310_v44 = vrot.slane %v5189_v40, %v19170_v6  ;;  %v7564_v48 = vld [vmem:[#allocation2 + $0x39] sm:$0x3f] }
 0x100   :  { %17784 = vmatmul.mubr.msk.f32.gmra.mxu0 %vm131_vm0, %v3959_v61  ;;  %3932 = vst.msk [vmem:[#allocation3 + $0x110] sm:$0xff] %vm131_vm0, %v3882_v33  ;;  %v3908_v39 = vrot.slane %v3900_v62, %v19170_v6  ;;  %v4827_v5 = vrot.slane %v4796_v20, %v19170_v6  ;;  %v7663_v61 = vcombine.high %v7564_v48, %v7564_v48 }
 0x101   :  { %17786 = vmatprep.mubr.msk.f32.mxu0 %vm19080_vm3, %v19077_v1  ;;  %v3899_v28 = vcombine.low %v3891_v37, %v3898_v38  ;;  %v3915_v18 = vrot.slane %v3901_v41, %v19170_v6  ;;  %v5222_v29 = vcombine.high %v5214_v26, %v5214_v26  ;;  %v5318_v33 = vcombine.high %v5310_v44, %v5310_v44 }
 0x102   :  { %v4835_v37 = vcombine.high %v4827_v5, %v4827_v5  ;;  %v5207_v62 = vcombine.high %v5183_v43, %v5183_v43  ;;  %v20222_v41 = vrot.slane %v7564_v48, %v19170_v6  ;;  %v7570_v43 = vld [vmem:[#allocation2 + $0x79] sm:$0x3f] }
 0x103   :  { %3933 = vst.msk [vmem:[#allocation3 + $0x138] sm:$0xff] %vm131_vm0, %v3899_v28  ;;  %v3916_v46 = vcombine.low %v3908_v39, %v3915_v18  ;;  %v3972_v45 = vld [vmem:[#allocation3 + $0x128] sm:$0xff]  ;;  %v20224_v39 = vcombine.low %v5214_v26, %v5222_v29  ;;  %v20226_v42 = vcombine.low %v5310_v44, %v5318_v33  ;;  %v5303_v18 = vcombine.high %v5189_v40, %v5189_v40  ;;  %v20246_v29 = vld [vmem:[#allocation2 + $0x2] sm:$0x3f] }
 0x104   :  { %4289 = vmatmul.mubr.f32.gmra.mxu1 %v3972_v45  ;;  %v3978_v51 = vld [vmem:[#allocation3 + $0x158] sm:$0xff]  ;;  %v3977_v30 = vld [vmem:[#allocation3 + $0x150] sm:$0xff]  ;;  %v7678_v45 = vcombine.high %v20222_v41, %v20222_v41  ;;  %v7759_v48 = vcombine.high %v7570_v43, %v7570_v43 }
 0x105   :  { %v3964_v53 = vld [vmem:[#allocation3 + $0xe8] sm:$0xff]  ;;  %3934 = vst.msk [vmem:[#allocation3 + $0x160] sm:$0xff] %vm131_vm0, %v3916_v46  ;;  %4293 = vmatprep.mubr.f32.mxu1 %v3978_v51  ;;  %v5407_v26 = vrot.slane %v20224_v39, %v19170_v6  ;;  %v5482_v44 = vrot.slane %v20226_v42, %v19170_v6 }
 0x106   :  { %17787 = vmatmul.mubr.msk.f32.gmra.mxu0 %vm131_vm0, %v3964_v53  ;;  %v7677_v53 = vrot.slane %v7663_v61, %v19170_v6 }
 0x107   :  { %17789 = vmatprep.mubr.msk.f32.mxu0 %vm19080_vm3, %v19077_v1  ;;  %v3969_v49 = vld [vmem:[#allocation3 + $0x110] sm:$0xff] }
 0x108   :  { %4294 = vmatmul.mubr.f32.gmra.mxu1 %v3977_v30  ;;  %v4820_v30 = vcombine.high %v4796_v20, %v4796_v20 }
 0x10a   :  { %17790 = vmatmul.mubr.msk.f32.gmra.mxu0 %vm131_vm0, %v3969_v49  ;;  %v3974_v27 = vld [vmem:[#allocation3 + $0x138] sm:$0xff] }
 0x10b   :  { %17792 = vmatprep.mubr.msk.f32.mxu0 %vm19080_vm3, %v19077_v1 }
 0x10c   :  { %v3979_v54 = vld [vmem:[#allocation3 + $0x160] sm:$0xff] }
 0x10e   :  { %17793 = vmatmul.mubr.msk.f32.gmra.mxu0 %vm131_vm0, %v3974_v27  ;;  %v20231_v27 = vcombine.low %v4827_v5, %v4835_v37  ;;  %v20244_v5 = vcombine.low %v7678_v45, %v7677_v53 }
 0x10f   :  { %17795 = vmatprep.mubr.msk.f32.mxu0 %vm19080_vm3, %v19077_v1 }
 0x112   :  { %17796 = vmatmul.mubr.msk.f32.gmra.mxu0 %vm131_vm0, %v3979_v54 }
 0x174   :  { %v17447_v57 = vpop.f32.mrf.mxu0 }
 0x176   :  { %v17448_v16 = vpop.f32.mrf.mxu0 }
 0x177   :  { %v17449_v31 = vadd.f32 %v17448_v16, %v17447_v57 }
 0x179   :  { %v17450_v35 = vpop.f32.mrf.mxu0 }
 0x17b   :  { %v17451_v50 = vpop.f32.mrf.mxu0 }
 0x17c   :  { %v17452_v54 = vadd.f32 %v17451_v50, %v17450_v35 }
 0x17d   :  { %v17453_v47 = vpop.f32.mrf.mxu0 }
 0x17f   :  { %v17454_v34 = vpop.f32.mrf.mxu0 }
 0x182   :  { %v17456_v60 = vpop.f32.mrf.mxu0 }
 0x184   :  { %v17457_v55 = vpop.f32.mrf.mxu0 }
 0x185   :  { %v20248_v33 = vadd.f32 %v17457_v55, %v17456_v60 }
 0x187   :  { %v17459_v52 = vpop.f32.mrf.mxu0 }
 0x189   :  { %v17460_v17 = vpop.f32.mrf.mxu0 }
 0x18a   :  { %v20255_v37 = vadd.f32 %v17460_v17, %v17459_v52 }
 0x18b   :  { %v20210_v63 = vpop.f32.mrf.mxu0 }
 0x18d   :  { %v17463_v0 = vpop.f32.mrf.mxu0 }
 0x190   :  { %v17465_v58 = vpop.f32.mrf.mxu0 }
 0x192   :  { %v17466_v2 = vpop.f32.mrf.mxu0 }
 0x193   :  { %v20261_v60 = vadd.f32 %v17466_v2, %v17465_v58  ;;  %v8411_v58 = vld [vmem:[%s21932_s2 + $0x78] sm:$0xff]  ;;  %v8426_v2 = vld [vmem:[%s21932_s2 + $0xf0] sm:$0xff] }
 0x195   :  { %v20212_v10 = vpop.f32.mrf.mxu0 }
 0x197   :  { %v17469_v23 = vpop.f32.mrf.mxu0 }
 0x198   :  { %v20271_v52 = vadd.f32 %v17469_v23, %v20212_v10 }
 0x19a   :  { %v17506_v59 = vpop.f32.mrf.mxu1 }
 0x19c   :  { %v17507_v36 = vpop.f32.mrf.mxu1 }
 0x19d   :  { %v17508_v32 = vadd.f32 %v17507_v36, %v17506_v59  ;;  %v20234_v59 = vrot.slane %v5207_v62, %v19170_v6  ;;  %v17455_v36 = vadd.f32 %v17454_v34, %v17453_v47 }
 0x19f   :  { %v4256_v38 = vadd.f32 %v17508_v32, %v17449_v31  ;;  %v20241_v32 = vrot.slane %v5303_v18, %v19170_v6  ;;  %v20251_v31 = vrot.slane %v4820_v30, %v19170_v6  ;;  %v20264_v18 = vrot.slane %v7570_v43, %v19170_v6 }
 0x1a0   :  { %v20217_v56 = vpop.f32.mrf.mxu0  ;;  %v7773_v30 = vrot.slane %v7759_v48, %v19170_v6 }
 0x1a1   :  { %v7774_v48 = vcombine.high %v20264_v18, %v20264_v18 }
 0x1a2   :  { %v20219_v3 = vpop.f32.mrf.mxu0 }
 0x1a5   :  { %v17509_v13 = vpop.f32.mrf.mxu1  ;;  %v4365_v28 = vpop.f32.mrf.mxu0 }
 0x1a6   :  { %v4366_v46 = vadd.f32 %v4365_v28, %v4256_v38  ;;  %v20259_v28 = vadd.f32 %v17463_v0, %v20210_v63  ;;  %v7851_v63 = vrot.slane %v20244_v5, %v19170_v6  ;;  %v8427_v0 = vld [vmem:[%s21932_s2 + $0xf8] sm:$0xff] }
 0x1a7   :  { %v17510_v51 = vpop.f32.mrf.mxu1  ;;  %v17773_v49 = vpop.f32.mrf.mxu0  ;;  %17550 = vmatprep.subr.mxu1 %v8427_v0 }
 0x1a8   :  { %v4409_v57 = vmax.f32 %v4366_v46, 0.0  ;;  %v17511_v16 = vadd.f32 %v17510_v51, %v17509_v13  ;;  %v20268_v46 = vrot.slane %v20246_v29, %v19170_v6  ;;  %17551 = vmatpush3.msra.mxu1 %v8411_v58  ;;  %v8424_v58 = vld [vmem:[%s21932_s2 + $0xe0] sm:$0xff] }
 0x1a9   :  { %17552 = vmatprep.subr.mxu1 %v8426_v2  ;;  %v8457_v2 = vld [vmem:[%s21932_s2 + $0x1e8] sm:$0xff] }
 0x1aa   :  { %v4370_v40 = vpop.f32.mrf.mxu0  ;;  %v4427_v20 = vcombine.high %v4409_v57, %v4409_v57  ;;  %v4434_v35 = vrot.slane %v4409_v57, %v19170_v6  ;;  %v4261_v50 = vadd.f32 %v17511_v16, %v17452_v54  ;;  %v8410_v54 = vld [vmem:[%s21932_s2 + $0x70] sm:$0xff]  ;;  %v8459_v57 = vld [vmem:[%s21932_s2 + $0x1f8] sm:$0xff] }
 0x1ab   :  { %17609 = vmatprep.subr.mxu0 %v8459_v57  ;;  %17553 = vmatpush3.msra.mxu1 %v8410_v54  ;;  %v5612_v54 = vcombine.high %v20246_v29, %v20246_v29  ;;  %v20339_v29 = vadd.f32 %v20219_v3, %v20217_v56  ;;  %v8422_v3 = vld [vmem:[%s21932_s2 + $0xd0] sm:$0xff] }
 0x1ac   :  { %v17512_v47 = vpop.f32.mrf.mxu1  ;;  %v17776_v34 = vpop.f32.mrf.mxu0  ;;  %v4441_v38 = vrot.slane %v4427_v20, %v19170_v6  ;;  %v4442_v62 = vcombine.high %v4434_v35, %v4434_v35  ;;  %v4371_v13 = vadd.f32 %v4370_v40, %v4261_v50  ;;  %v8443_v50 = vld [vmem:[%s21932_s2 + $0x178] sm:$0xff] }
 0x1ad   :  { %17610 = vmatpush3.msra.mxu0 %v8443_v50 }
 0x1ae   :  { %v17513_v55 = vpop.f32.mrf.mxu1  ;;  %v4580_v17 = vcombine.low %v4434_v35, %v4442_v62  ;;  %v4410_v53 = vmax.f32 %v4371_v13, 0.0  ;;  %v4594_v10 = vrot.slane %v4441_v38, %v19170_v6  ;;  %v4443_v23 = vcombine.high %v4441_v38, %v4441_v38  ;;  %v8425_v35 = vld [vmem:[%s21932_s2 + $0xe8] sm:$0xff]  ;;  %v8458_v62 = vld [vmem:[%s21932_s2 + $0x1f0] sm:$0xff] }
 0x1af   :  { %v4375_v45 = vpop.f32.mrf.mxu0  ;;  %v17514_v51 = vadd.f32 %v17513_v55, %v17512_v47  ;;  %v8409_v38 = vld [vmem:[%s21932_s2 + $0x68] sm:$0xff]  ;;  %v8442_v13 = vld [vmem:[%s21932_s2 + $0x170] sm:$0xff]  ;;  %17554 = vmatprep.subr.mxu1 %v8425_v35  ;;  %17611 = vmatprep.subr.mxu0 %v8458_v62  ;;  %v8440_v62 = vld [vmem:[%s21932_s2 + $0x160] sm:$0xff] }
 0x1b0   :  { %v17515_v49 = vpop.f32.mrf.mxu1  ;;  %v4587_v16 = vrot.slane %v4580_v17, %v19170_v6  ;;  %v4444_v43 = vcombine.high %v4410_v53, %v4410_v53  ;;  %v4451_v40 = vrot.slane %v4410_v53, %v19170_v6  ;;  %17555 = vmatpush3.msra.mxu1 %v8409_v38  ;;  %17612 = vmatpush3.msra.mxu0 %v8442_v13  ;;  %v8407_v38 = vld [vmem:[%s21932_s2 + $0x58] sm:$0xff] }
 0x1b1   :  { %v17779_v20 = vpop.f32.mrf.mxu0  ;;  %v4266_v34 = vadd.f32 %v17514_v51, %v17455_v36  ;;  %v5627_v36 = vcombine.high %v20268_v46, %v20268_v46  ;;  %17556 = vmatprep.subr.mxu1 %v8424_v58  ;;  %17613 = vmatprep.subr.mxu0 %v8457_v2  ;;  %v8439_v2 = vld [vmem:[%s21932_s2 + $0x158] sm:$0xff] }
 0x1b2   :  { %v17516_v47 = vpop.f32.mrf.mxu1  ;;  %v4595_v55 = vcombine.low %v4587_v16, %v4594_v10  ;;  %v4458_v17 = vrot.slane %v4444_v43, %v19170_v6  ;;  %v4459_v53 = vcombine.high %v4451_v40, %v4451_v40  ;;  %v4596_v0 = vcombine.low %v4443_v23, %v4451_v40  ;;  %v8408_v10 = vld [vmem:[%s21932_s2 + $0x60] sm:$0xff]  ;;  %v8441_v23 = vld [vmem:[%s21932_s2 + $0x168] sm:$0xff] }
 0x1b3   :  { %v17517_v51 = vadd.f32 %v17516_v47, %v17515_v49  ;;  %v4376_v57 = vadd.f32 %v4375_v45, %v4266_v34  ;;  %v8423_v49 = vld [vmem:[%s21932_s2 + $0xd8] sm:$0xff]  ;;  %v8456_v40 = vld [vmem:[%s21932_s2 + $0x1e0] sm:$0xff]  ;;  %v20342_v34 = vcombine.low %v7774_v48, %v7773_v30  ;;  %17557 = vmatpush3.msra.mxu1 %v8408_v10  ;;  %17614 = vmatpush3.msra.mxu0 %v8441_v23 }
 0x1b4   :  { %4784 = vst.msk [vmem:[#allocation2 + $0x9] sm:$0x3f] %vm365_vm1, %v4595_v55  ;;  %v4460_v16 = vcombine.high %v4458_v17, %v4458_v17  ;;  %v4603_v43 = vrot.slane %v4596_v0, %v19170_v6  ;;  %v4610_v45 = vrot.slane %v4459_v53, %v19170_v6  ;;  %v17518_v35 = vpop.f32.mrf.mxu1  ;;  %v20357_v30 = vcombine.low %v20268_v46, %v5627_v36 }
 0x1b5   :  { %v4411_v20 = vmax.f32 %v4376_v57, 0.0  ;;  %v4271_v50 = vadd.f32 %v17517_v51, %v20248_v33  ;;  %v8455_v33 = vld [vmem:[%s21932_s2 + $0x1d8] sm:$0xff]  ;;  %17558 = vmatprep.subr.mxu1 %v8423_v49  ;;  %17615 = vmatprep.subr.mxu0 %v8456_v40  ;;  %v8421_v51 = vld [vmem:[%s21932_s2 + $0xc8] sm:$0xff]  ;;  %v20372_v57 = vrot.slane %v5612_v54, %v19170_v6  ;;  %v8420_v54 = vld [vmem:[%s21932_s2 + $0xc0] sm:$0xff] }
 0x1b6   :  { %v4380_v47 = vpop.f32.mrf.mxu0  ;;  %v4611_v13 = vcombine.low %v4603_v43, %v4610_v45  ;;  %v4612_v56 = vcombine.low %v4458_v17, %v4460_v16  ;;  %v17519_v53 = vpop.f32.mrf.mxu1  ;;  %v8406_v17 = vld [vmem:[%s21932_s2 + $0x50] sm:$0xff]  ;;  %17559 = vmatpush3.msra.mxu1 %v8407_v38  ;;  %17616 = vmatpush3.msra.mxu0 %v8440_v62  ;;  %v8405_v45 = vld [vmem:[%s21932_s2 + $0x48] sm:$0xff] }
 0x1b7   :  { %v4461_v48 = vcombine.high %v4411_v20, %v4411_v20  ;;  %v4468_v55 = vrot.slane %v4411_v20, %v19170_v6  ;;  %v4381_v0 = vadd.f32 %v4380_v47, %v4271_v50  ;;  %v17520_v36 = vadd.f32 %v17519_v53, %v17518_v35  ;;  %17560 = vmatprep.subr.mxu1 %v8422_v3 }
 0x1b8   :  { %v17782_v58 = vpop.f32.mrf.mxu0  ;;  %4785 = vst.msk [vmem:[#allocation2 + $0x11] sm:$0x3f] %vm365_vm1, %v4611_v13  ;;  %v4619_v46 = vrot.slane %v4612_v56, %v19170_v6  ;;  %17617 = vmatprep.subr.mxu0 %v8455_v33  ;;  %17561 = vmatpush3.msra.mxu1 %v8406_v17 }
 0x1b9   :  { %v4475_v10 = vrot.slane %v4461_v48, %v19170_v6  ;;  %v4476_v23 = vcombine.high %v4468_v55, %v4468_v55  ;;  %v4626_v16 = vrot.slane %v4468_v55, %v19170_v6  ;;  %v4412_v43 = vmax.f32 %v4381_v0, 0.0  ;;  %v17521_v49 = vpop.f32.mrf.mxu1  ;;  %17618 = vmatpush3.msra.mxu0 %v8439_v2  ;;  %17562 = vmatprep.subr.mxu1 %v8421_v51  ;;  %v8404_v0 = vld [vmem:[%s21932_s2 + $0x40] sm:$0xff] }
 0x1ba   :  { %v4276_v40 = vadd.f32 %v17520_v36, %v20255_v37  ;;  %v8454_v37 = vld [vmem:[%s21932_s2 + $0x1d0] sm:$0xff]  ;;  %17563 = vmatpush3.msra.mxu1 %v8405_v45 }
 0x1bb   :  { %v4477_v50 = vcombine.high %v4475_v10, %v4475_v10  ;;  %v4627_v47 = vcombine.low %v4619_v46, %v4626_v16  ;;  %v4628_v38 = vcombine.low %v4476_v23, %v4475_v10  ;;  %v4478_v62 = vcombine.high %v4412_v43, %v4412_v43  ;;  %v20387_v13 = vld [vmem:[#allocation2 + $0x9] sm:$0x3f]  ;;  %v17522_v33 = vpop.f32.mrf.mxu1  ;;  %17564 = vmatprep.subr.mxu1 %v8420_v54  ;;  %v8438_v36 = vld [vmem:[%s21932_s2 + $0x150] sm:$0xff] }
 0x1bc   :  { %v6767_v56 = vld [vmem:[#allocation2 + $0xa] sm:$0x3f]  ;;  %v4485_v3 = vrot.slane %v4412_v43, %v19170_v6  ;;  %v20395_v48 = vrot.slane %v20387_v13, %v19170_v6  ;;  %v17523_v46 = vadd.f32 %v17522_v33, %v17521_v49  ;;  %17619 = vmatprep.subr.mxu0 %v8454_v37  ;;  %v8419_v49 = vld [vmem:[%s21932_s2 + $0xb8] sm:$0xff]  ;;  %17565 = vmatpush3.msra.mxu1 %v8404_v0 }
 0x1bd   :  { %v6791_v55 = vcombine.high %v6767_v56, %v6767_v56  ;;  %v6798_v53 = vrot.slane %v6767_v56, %v19170_v6  ;;  %v4635_v58 = vrot.slane %v4628_v38, %v19170_v6  ;;  %v4642_v17 = vrot.slane %v4477_v50, %v19170_v6  ;;  %4786 = vst.msk [vmem:[#allocation2 + $0x19] sm:$0x3f] %vm365_vm1, %v4627_v47  ;;  %v5975_v50 = vld [vmem:[#allocation2 + $0x8] sm:$0x3f] }
 0x1be   :  { %v4492_v2 = vrot.slane %v4478_v62, %v19170_v6  ;;  %v4493_v51 = vcombine.high %v4485_v3, %v4485_v3  ;;  %v17524_v23 = vpop.f32.mrf.mxu1  ;;  %v5400_v16 = vcombine.low %v20234_v59, %v20395_v48  ;;  %v8453_v54 = vld [vmem:[%s21932_s2 + $0x1c8] sm:$0xff]  ;;  %v8403_v59 = vld [vmem:[%s21932_s2 + $0x38] sm:$0xff]  ;;  %v4281_v20 = vadd.f32 %v17523_v46, %v20259_v28  ;;  %17620 = vmatpush3.msra.mxu0 %v8438_v36 }
 0x1bf   :  { %v6805_v43 = vrot.slane %v6791_v55, %v19170_v6  ;;  %v6806_v45 = vcombine.high %v6798_v53, %v6798_v53  ;;  %v4643_v47 = vcombine.low %v4635_v58, %v4642_v17  ;;  %v20418_v33 = vld [vmem:[#allocation2 + $0x12] sm:$0x3f]  ;;  %17566 = vmatprep.subr.mxu1 %v8419_v49  ;;  %17621 = vmatprep.subr.mxu0 %v8453_v54 }
 0x1c0   :  { %v4385_v10 = vpop.f32.mrf.mxu0  ;;  %v4658_v38 = vrot.slane %v4492_v2, %v19170_v6  ;;  %v4494_v56 = vcombine.high %v4492_v2, %v4492_v2  ;;  %v4644_v37 = vcombine.low %v4485_v3, %v4493_v51  ;;  %v17525_v35 = vpop.f32.mrf.mxu1  ;;  %v5414_v61 = vrot.slane %v5400_v16, %v19170_v6  ;;  %17567 = vmatpush3.msra.mxu1 %v8403_v59  ;;  %v7559_v39 = vld [vmem:[#allocation2 + $0x11] sm:$0x3f] }
 0x1c1   :  { %v4386_v62 = vadd.f32 %v4385_v10, %v4276_v40  ;;  %v20427_v58 = vrot.slane %v20418_v33, %v19170_v6  ;;  %v8437_v40 = vld [vmem:[%s21932_s2 + $0x148] sm:$0xff]  ;;  %4787 = vst.msk [vmem:[#allocation2 + $0x21] sm:$0x3f] %vm365_vm1, %v4643_v47  ;;  %v17526_v17 = vadd.f32 %v17525_v35, %v17524_v23  ;;  %v6983_v3 = vcombine.low %v6798_v53, %v6806_v45  ;;  %v8418_v10 = vld [vmem:[%s21932_s2 + $0xb0] sm:$0xff] }
 0x1c2   :  { %v17785_v55 = vpop.f32.mrf.mxu0  ;;  %v5999_v2 = vcombine.high %v5975_v50, %v5975_v50  ;;  %v4651_v28 = vrot.slane %v4644_v37, %v19170_v6  ;;  %v5415_v46 = vcombine.low %v5407_v26, %v5414_v61  ;;  %v6006_v51 = vrot.slane %v5975_v50, %v19170_v6  ;;  %v20445_v45 = vld [vmem:[#allocation2 + $0x10] sm:$0x3f]  ;;  %17622 = vmatpush3.msra.mxu0 %v8437_v40  ;;  %v8452_v26 = vld [vmem:[%s21932_s2 + $0x1c0] sm:$0xff] }
 0x1c3   :  { %v4413_v0 = vmax.f32 %v4386_v62, 0.0  ;;  %v6984_v36 = vcombine.low %v6805_v43, %v20427_v58  ;;  %v4286_v23 = vadd.f32 %v17526_v17, %v20261_v60  ;;  %v6991_v16 = vrot.slane %v6983_v3, %v19170_v6  ;;  %v8402_v47 = vld [vmem:[%s21932_s2 + $0x30] sm:$0xff]  ;;  %v8436_v62 = vld [vmem:[%s21932_s2 + $0x140] sm:$0xff]  ;;  %17568 = vmatprep.subr.mxu1 %v8418_v10  ;;  %17623 = vmatprep.subr.mxu0 %v8452_v26 }
 0x1c4   :  { %v4659_v61 = vcombine.low %v4651_v28, %v4658_v38  ;;  %v17527_v50 = vpop.f32.mrf.mxu1  ;;  %5552 = vrot.lane.b32.xlu1 %v5415_v46, %s19079_s24  ;;  %v6013_v54 = vrot.slane %v5999_v2, %v19170_v6  ;;  %v6014_v60 = vcombine.high %v6006_v51, %v6006_v51  ;;  %v20463_v3 = vrot.slane %v20445_v45, %v19170_v6  ;;  %v8417_v46 = vld [vmem:[%s21932_s2 + $0xa8] sm:$0xff] }
 0x1c5   :  { %v4495_v35 = vcombine.high %v4413_v0, %v4413_v0  ;;  %v4502_v53 = vrot.slane %v4413_v0, %v19170_v6  ;;  %v6998_v49 = vrot.slane %v6984_v36, %v19170_v6  ;;  %v7583_v28 = vcombine.high %v7559_v39, %v7559_v39  ;;  %17569 = vmatpush3.msra.mxu1 %v8402_v47 }
 0x1c6   :  { %v4390_v43 = vpop.f32.mrf.mxu0  ;;  %4788 = vst.msk [vmem:[#allocation2 + $0x29] sm:$0x3f] %vm365_vm1, %v4659_v61  ;;  %v17528_v0 = vpop.f32.mrf.mxu1  ;;  %v6191_v2 = vcombine.low %v6006_v51, %v6014_v60  ;;  %17624 = vmatpush3.msra.mxu0 %v8436_v62  ;;  %v6192_v26 = vcombine.low %v6013_v54, %v20463_v3  ;;  %17570 = vmatprep.subr.mxu1 %v8417_v46  ;;  %v8416_v54 = vld [vmem:[%s21932_s2 + $0xa0] sm:$0xff] }
 0x1c7   :  { %v4509_v59 = vrot.slane %v4495_v35, %v19170_v6  ;;  %v4510_v38 = vcombine.high %v4502_v53, %v4502_v53  ;;  %v4660_v37 = vcombine.low %v4494_v56, %v4502_v53  ;;  %v4391_v55 = vadd.f32 %v4390_v43, %v4281_v20  ;;  %v8451_v35 = vld [vmem:[%s21932_s2 + $0x1b8] sm:$0xff] }
 0x1c8   :  { %v17788_v40 = vpop.f32.mrf.mxu0  ;;  %v6999_v17 = vcombine.low %v6991_v16, %v6998_v49  ;;  %v17529_v53 = vadd.f32 %v17528_v0, %v17527_v50  ;;  %v17530_v16 = vpop.f32.mrf.mxu1  ;;  %v6199_v61 = vrot.slane %v6191_v2, %v19170_v6  ;;  %v7590_v43 = vrot.slane %v7559_v39, %v19170_v6  ;;  %v8401_v49 = vld [vmem:[%s21932_s2 + $0x28] sm:$0xff]  ;;  %v8435_v50 = vld [vmem:[%s21932_s2 + $0x138] sm:$0xff]  ;;  %17625 = vmatprep.subr.mxu0 %v8451_v35 }
 0x1c9   :  { %v4511_v36 = vcombine.high %v4509_v59, %v4509_v59  ;;  %v4667_v20 = vrot.slane %v4660_v37, %v19170_v6  ;;  %v4674_v56 = vrot.slane %v4510_v38, %v19170_v6  ;;  %v4414_v10 = vmax.f32 %v4391_v55, 0.0  ;;  %17571 = vmatpush3.msra.mxu1 %v8401_v49  ;;  %17626 = vmatpush3.msra.mxu0 %v8435_v50 }
 0x1ca   :  { %v4395_v51 = vpop.f32.mrf.mxu0  ;;  %7136 = vrot.lane.b32.xlu1 %v6999_v17, %s19079_s24  ;;  %v17531_v55 = vpop.f32.mrf.mxu1  ;;  %v4291_v40 = vadd.f32 %v17529_v53, %v20271_v52  ;;  %v6206_v0 = vrot.slane %v6192_v26, %v19170_v6  ;;  %v8450_v17 = vld [vmem:[%s21932_s2 + $0x1b0] sm:$0xff]  ;;  %v20499_v52 = vld [vmem:[#allocation2 + $0x19] sm:$0x3f]  ;;  %v7598_v35 = vcombine.high %v7590_v43, %v7590_v43  ;;  %17572 = vmatprep.subr.mxu1 %v8416_v54  ;;  %v8400_v53 = vld [vmem:[%s21932_s2 + $0x20] sm:$0xff] }
 0x1cb   :  { %v4675_v60 = vcombine.low %v4667_v20, %v4674_v56  ;;  %v4676_v47 = vcombine.low %v4509_v59, %v4511_v36  ;;  %v4512_v62 = vcombine.high %v4414_v10, %v4414_v10  ;;  %v4519_v38 = vrot.slane %v4414_v10, %v19170_v6  ;;  %17627 = vmatprep.subr.mxu0 %v8450_v17 }
 0x1cc   :  { %v4396_v37 = vadd.f32 %v4395_v51, %v4286_v23  ;;  %v17791_v39 = vpop.f32.mrf.mxu0  ;;  %v20490_v59 = vrot.slane %v7583_v28, %v19170_v6  ;;  %v17532_v28 = vadd.f32 %v17531_v55, %v17530_v16  ;;  %v6207_v10 = vcombine.low %v6199_v61, %v6206_v0  ;;  %v8434_v51 = vld [vmem:[%s21932_s2 + $0x130] sm:$0xff]  ;;  %v8415_v16 = vld [vmem:[%s21932_s2 + $0x98] sm:$0xff]  ;;  %17573 = vmatpush3.msra.mxu1 %v8400_v53 }
 0x1cd   :  { %4789 = vst.msk [vmem:[#allocation2 + $0x31] sm:$0x3f] %vm365_vm1, %v4675_v60  ;;  %v4526_v2 = vrot.slane %v4512_v62, %v19170_v6  ;;  %v4527_v46 = vcombine.high %v4519_v38, %v4519_v38  ;;  %v4683_v23 = vrot.slane %v4676_v47, %v19170_v6  ;;  %v4690_v36 = vrot.slane %v4519_v38, %v19170_v6 }
 0x1ce   :  { %v4415_v20 = vmax.f32 %v4396_v37, 0.0  ;;  %v4400_v56 = vpop.f32.mrf.mxu0  ;;  %v4296_v50 = vadd.f32 %v17532_v28, %v20339_v29  ;;  %6344 = vrot.lane.b32.xlu0 %v6207_v10, %s19079_s24  ;;  %v20515_v54 = vrot.slane %v20499_v52, %v19170_v6  ;;  %v8449_v37 = vld [vmem:[%s21932_s2 + $0x1a8] sm:$0xff]  ;;  %v7775_v0 = vcombine.low %v7590_v43, %v7598_v35  ;;  %17628 = vmatpush3.msra.mxu0 %v8434_v51  ;;  %v8399_v29 = vld [vmem:[%s21932_s2 + $0x18] sm:$0xff] }
 0x1cf   :  { %v4528_v26 = vcombine.high %v4526_v2, %v4526_v2  ;;  %v4691_v60 = vcombine.low %v4683_v23, %v4690_v36  ;;  %v4692_v47 = vcombine.low %v4527_v46, %v4526_v2  ;;  %v4401_v62 = vadd.f32 %v4400_v56, %v4291_v40  ;;  %17574 = vmatprep.subr.mxu1 %v8415_v16  ;;  %v8433_v43 = vld [vmem:[%s21932_s2 + $0x128] sm:$0xff] }
 0x1d0   :  { %v4529_v61 = vcombine.high %v4415_v20, %v4415_v20  ;;  %v4536_v49 = vrot.slane %v4415_v20, %v19170_v6  ;;  %v17794_v38 = vpop.f32.mrf.mxu0  ;;  %v7776_v23 = vcombine.low %v20490_v59, %v20515_v54  ;;  %v5223_v36 = vcombine.high %v20387_v13, %v20387_v13  ;;  %v8414_v20 = vld [vmem:[%s21932_s2 + $0x90] sm:$0xff]  ;;  %17629 = vmatprep.subr.mxu0 %v8449_v37  ;;  %v8448_v59 = vld [vmem:[%s21932_s2 + $0x1a0] sm:$0xff] }
 0x1d1   :  { %v4699_v39 = vrot.slane %v4692_v47, %v19170_v6  ;;  %v4706_v55 = vrot.slane %v4528_v26, %v19170_v6  ;;  %4790 = vst.msk [vmem:[#allocation2 + $0x49] sm:$0x3f] %vm365_vm1, %v4691_v60  ;;  %v4416_v40 = vmax.f32 %v4401_v62, 0.0  ;;  %v7783_v60 = vrot.slane %v7775_v0, %v19170_v6  ;;  %17575 = vmatpush3.msra.mxu1 %v8399_v29  ;;  %v20546_v38 = vld [vmem:[#allocation2 + $0x11] sm:$0x3f]  ;;  %v8413_v0 = vld [vmem:[%s21932_s2 + $0x88] sm:$0xff] }
 0x1d2   :  { %v4543_v17 = vrot.slane %v4529_v61, %v19170_v6  ;;  %v4544_v2 = vcombine.high %v4536_v49, %v4536_v49  ;;  %v4405_v46 = vpop.f32.mrf.mxu0  ;;  %v7790_v61 = vrot.slane %v7776_v23, %v19170_v6  ;;  %17630 = vmatpush3.msra.mxu0 %v8433_v43  ;;  %17576 = vmatprep.subr.mxu1 %v8414_v20 }
 0x1d3   :  { %v4707_v28 = vcombine.low %v4699_v39, %v4706_v55  ;;  %v4546_v56 = vcombine.high %v4416_v40, %v4416_v40  ;;  %v4553_v10 = vrot.slane %v4416_v40, %v19170_v6  ;;  %v4406_v35 = vadd.f32 %v4405_v46, %v4296_v50  ;;  %v8432_v50 = vld [vmem:[%s21932_s2 + $0x120] sm:$0xff]  ;;  %17631 = vmatprep.subr.mxu0 %v8448_v59  ;;  %v5977_v59 = vld [vmem:[#allocation2 + $0x18] sm:$0x3f] }
 0x1d4   :  { %v4708_v13 = vcombine.low %v4536_v49, %v4544_v2  ;;  %v4722_v53 = vrot.slane %v4543_v17, %v19170_v6  ;;  %v4545_v51 = vcombine.high %v4543_v17, %v4543_v17  ;;  %v17797_v26 = vpop.f32.mrf.mxu0  ;;  %v8398_v49 = vld [vmem:[%s21932_s2 + $0x10] sm:$0xff]  ;;  %v5237_v55 = vrot.slane %v5223_v36, %v19170_v6  ;;  %17632 = vmatpush3.msra.mxu0 %v8432_v50  ;;  %v5186_v50 = vld [vmem:[#allocation2 + $0x19] sm:$0x3f] }
 0x1d5   :  { %4791 = vst.msk [vmem:[#allocation2 + $0x51] sm:$0x3f] %vm365_vm1, %v4707_v28  ;;  %v4560_v47 = vrot.slane %v4546_v56, %v19170_v6  ;;  %v4561_v62 = vcombine.high %v4553_v10, %v4553_v10  ;;  %v4417_v16 = vmax.f32 %v4406_v35, 0.0  ;;  %v5238_v40 = vcombine.high %v20395_v48, %v20395_v48  ;;  %17577 = vmatpush3.msra.mxu1 %v8398_v49  ;;  %v8447_v48 = vld [vmem:[%s21932_s2 + $0x198] sm:$0xff] }
 0x1d6   :  { %v4715_v37 = vrot.slane %v4708_v13, %v19170_v6  ;;  %v4724_v39 = vcombine.low %v4545_v51, %v4553_v10  ;;  %v7791_v20 = vcombine.low %v7783_v60, %v7790_v61  ;;  %v5246_v36 = vrot.slane %v20546_v38, %v19170_v6  ;;  %17578 = vmatprep.subr.mxu1 %v8413_v0  ;;  %v8397_v13 = vld [vmem:[%s21932_s2 + $0x8] sm:$0xff] }
 0x1d7   :  { %v4562_v29 = vcombine.high %v4560_v47, %v4560_v47  ;;  %v4738_v17 = vrot.slane %v4561_v62, %v19170_v6  ;;  %v4563_v2 = vcombine.high %v4417_v16, %v4417_v16  ;;  %v4570_v46 = vrot.slane %v4417_v16, %v19170_v6  ;;  %17633 = vmatprep.subr.mxu0 %v8447_v48  ;;  %v5978_v48 = vld [vmem:[#allocation2 + $0x20] sm:$0x3f] }
 0x1d8   :  { %v4723_v23 = vcombine.low %v4715_v37, %v4722_v53  ;;  %v4731_v43 = vrot.slane %v4724_v39, %v19170_v6  ;;  %7928 = vrot.lane.b32.xlu0 %v7791_v20, %s19079_s24  ;;  %v5254_v51 = vcombine.high %v5246_v36, %v5246_v36  ;;  %v5416_v26 = vcombine.low %v5238_v40, %v5237_v55  ;;  %v8412_v37 = vld [vmem:[%s21932_s2 + $0x80] sm:$0xff] }
 0x1d9   :  { %v4740_v28 = vcombine.low %v4560_v47, %v4562_v29  ;;  %v4577_v56 = vrot.slane %v4563_v2, %v19170_v6  ;;  %v4578_v10 = vcombine.high %v4570_v46, %v4570_v46  ;;  %v4754_v35 = vrot.slane %v4570_v46, %v19170_v6  ;;  %v8431_v47 = vld [vmem:[%s21932_s2 + $0x118] sm:$0xff]  ;;  %17579 = vmatpush3.msra.mxu1 %v8397_v13  ;;  %v8396_v46 = vld [vmem:[%s21932_s2] sm:$0xff] }
 0x1da   :  { %4792 = vst.msk [vmem:[#allocation2 + $0x59] sm:$0x3f] %vm365_vm1, %v4723_v23  ;;  %v4739_v53 = vcombine.low %v4731_v43, %v4738_v17  ;;  %v6015_v60 = vcombine.high %v20445_v45, %v20445_v45  ;;  %v6030_v49 = vcombine.high %v20463_v3, %v20463_v3  ;;  %v5417_v45 = vcombine.low %v5246_v36, %v5254_v51  ;;  %v8446_v3 = vld [vmem:[%s21932_s2 + $0x190] sm:$0xff]  ;;  %v5187_v13 = vld [vmem:[#allocation2 + $0x21] sm:$0x3f] }
 0x1db   :  { %v4579_v62 = vcombine.high %v4577_v56, %v4577_v56  ;;  %v4747_v16 = vrot.slane %v4740_v28, %v19170_v6  ;;  %v4756_v61 = vcombine.low %v4578_v10, %v4577_v56  ;;  %v5424_v39 = vrot.slane %v5416_v26, %v19170_v6  ;;  %17634 = vmatpush3.msra.mxu0 %v8431_v47  ;;  %v8430_v28 = vld [vmem:[%s21932_s2 + $0x110] sm:$0xff]  ;;  %v5188_v47 = vld [vmem:[#allocation2 + $0x29] sm:$0x3f] }
 0x1dc   :  { %4793 = vst.msk [vmem:[#allocation2 + $0x61] sm:$0x3f] %vm365_vm1, %v4739_v53  ;;  %v6029_v55 = vrot.slane %v6015_v60, %v19170_v6  ;;  %v6038_v40 = vrot.slane %v5977_v59, %v19170_v6  ;;  %v5239_v2 = vcombine.high %v20546_v38, %v20546_v38  ;;  %v5431_v23 = vrot.slane %v5417_v45, %v19170_v6 }
 0x1dd   :  { %v4755_v0 = vcombine.low %v4747_v16, %v4754_v35  ;;  %v4763_v29 = vrot.slane %v4756_v61, %v19170_v6  ;;  %v4770_v17 = vrot.slane %v4579_v62, %v19170_v6  ;;  %v5255_v36 = vcombine.high %v5186_v50, %v5186_v50  ;;  %17580 = vmatprep.subr.mxu1 %v8412_v37  ;;  %v8445_v62 = vld [vmem:[%s21932_s2 + $0x188] sm:$0xff] }
 0x1de   :  { %v6046_v43 = vcombine.high %v6038_v40, %v6038_v40  ;;  %v6208_v20 = vcombine.low %v6030_v49, %v6029_v55  ;;  %v5253_v38 = vrot.slane %v5239_v2, %v19170_v6  ;;  %v5262_v10 = vrot.slane %v5186_v50, %v19170_v6  ;;  %17635 = vmatprep.subr.mxu0 %v8446_v3  ;;  %v8429_v50 = vld [vmem:[%s21932_s2 + $0x108] sm:$0xff]  ;;  %v8444_v3 = vld [vmem:[%s21932_s2 + $0x180] sm:$0xff] }
 0x1df   :  { %v4771_v56 = vcombine.low %v4763_v29, %v4770_v17  ;;  %4794 = vst.msk [vmem:[#allocation2 + $0x69] sm:$0x3f] %vm365_vm1, %v4755_v0  ;;  %v6031_v35 = vcombine.high %v5977_v59, %v5977_v59  ;;  %v5432_v53 = vcombine.low %v5424_v39, %v5431_v23  ;;  %v5269_v60 = vrot.slane %v5255_v36, %v19170_v6 }
 0x1e0   :  { %v6209_v51 = vcombine.low %v6038_v40, %v6046_v43  ;;  %v6216_v26 = vrot.slane %v6208_v20, %v19170_v6  ;;  %17581 = vmatpush3.msra.mxu1 %v8396_v46  ;;  %v5270_v16 = vcombine.high %v5262_v10, %v5262_v10  ;;  %v5433_v61 = vcombine.low %v5253_v38, %v5262_v10  ;;  %v5979_v40 = vld [vmem:[#allocation2 + $0x28] sm:$0x3f]  ;;  %v5980_v46 = vld [vmem:[#allocation2 + $0x30] sm:$0x3f] }
 0x1e1   :  { %4795 = vst.msk [vmem:[#allocation2 + $0x71] sm:$0x3f] %vm365_vm1, %v4771_v56  ;;  %v6045_v59 = vrot.slane %v6031_v35, %v19170_v6  ;;  %v6047_v49 = vcombine.high %v5978_v48, %v5978_v48  ;;  %17636 = vmatpush3.msra.mxu0 %v8430_v28  ;;  %5554 = vrot.lane.b32.xlu1 %v5432_v53, %s19079_s24 }
 0x1e2   :  { %v6223_v37 = vrot.slane %v6209_v51, %v19170_v6  ;;  %v6054_v45 = vrot.slane %v5978_v48, %v19170_v6  ;;  %v5271_v39 = vcombine.high %v5187_v13, %v5187_v13  ;;  %v5278_v55 = vrot.slane %v5187_v13, %v19170_v6  ;;  %17637 = vmatprep.subr.mxu0 %v8445_v62  ;;  %v8428_v48 = vld [vmem:[%s21932_s2 + $0x100] sm:$0xff] }
 0x1e3   :  { %v5434_v0 = vcombine.low %v5270_v16, %v5269_v60  ;;  %v5441_v29 = vrot.slane %v5433_v61, %v19170_v6  ;;  %v6061_v17 = vrot.slane %v6047_v49, %v19170_v6  ;;  %v5294_v2 = vrot.slane %v5188_v47, %v19170_v6  ;;  %17638 = vmatpush3.msra.mxu0 %v8429_v50  ;;  %v5981_v61 = vld [vmem:[#allocation2 + $0x48] sm:$0x3f] }
 0x1e4   :  { %v6224_v23 = vcombine.low %v6216_v26, %v6223_v37  ;;  %v6062_v43 = vcombine.high %v6054_v45, %v6054_v45  ;;  %v6225_v20 = vcombine.low %v6045_v59, %v6054_v45  ;;  %v5285_v36 = vrot.slane %v5271_v39, %v19170_v6  ;;  %17639 = vmatprep.subr.mxu0 %v8444_v3  ;;  %v5190_v3 = vld [vmem:[#allocation2 + $0x49] sm:$0x3f] }
 0x1e5   :  { %v5448_v28 = vrot.slane %v5434_v0, %v19170_v6  ;;  %v5286_v56 = vcombine.high %v5278_v55, %v5278_v55  ;;  %v6063_v38 = vcombine.high %v5979_v40, %v5979_v40  ;;  %v6070_v10 = vrot.slane %v5979_v40, %v19170_v6  ;;  %17640 = vmatpush3.msra.mxu0 %v8428_v48 }
 0x1e6   :  { %6346 = vrot.lane.b32.xlu0 %v6224_v23, %s19079_s24  ;;  %v6226_v35 = vcombine.low %v6062_v43, %v6061_v17  ;;  %v6233_v13 = vrot.slane %v6225_v20, %v19170_v6  ;;  %v5451_v53 = vcombine.low %v5285_v36, %v5294_v2  ;;  %v6086_v51 = vrot.slane %v5980_v46, %v19170_v6  ;;  %v5982_v43 = vld [vmem:[#allocation2 + $0x50] sm:$0x3f] }
 0x1e7   :  { %v5449_v26 = vcombine.low %v5441_v29, %v5448_v28  ;;  %v5450_v60 = vcombine.low %v5278_v55, %v5286_v56  ;;  %v6077_v62 = vrot.slane %v6063_v38, %v19170_v6  ;;  %v6078_v16 = vcombine.high %v6070_v10, %v6070_v10  ;;  %17798 = vmatprep.subr.mxu1 %v19077_v1 }
 0x1e8   :  { %v6240_v59 = vrot.slane %v6226_v35, %v19170_v6  ;;  %v5465_v49 = vrot.slane %v5451_v53, %v19170_v6  ;;  %v5287_v50 = vcombine.high %v5188_v47, %v5188_v47  ;;  %v5302_v37 = vcombine.high %v5294_v2, %v5294_v2 }
 0x1e9   :  { %5556 = vrot.lane.b32.xlu1 %v5449_v26, %s19079_s24  ;;  %v5458_v45 = vrot.slane %v5450_v60, %v19170_v6  ;;  %v6242_v39 = vcombine.low %v6070_v10, %v6078_v16  ;;  %v6243_v40 = vcombine.low %v6077_v62, %v6086_v51  ;;  %v6079_v55 = vcombine.high %v5980_v46, %v5980_v46  ;;  %v5191_v62 = vld [vmem:[#allocation2 + $0x51] sm:$0x3f] }
 0x1ea   :  { %v6241_v0 = vcombine.low %v6233_v13, %v6240_v59  ;;  %v5301_v29 = vrot.slane %v5287_v50, %v19170_v6  ;;  %v6094_v17 = vcombine.high %v6086_v51, %v6086_v51  ;;  %v6102_v23 = vrot.slane %v5981_v61, %v19170_v6 }
 0x1eb   :  { %v5466_v20 = vcombine.low %v5458_v45, %v5465_v49  ;;  %v6250_v47 = vrot.slane %v6242_v39, %v19170_v6  ;;  %v6257_v2 = vrot.slane %v6243_v40, %v19170_v6  ;;  %v6093_v36 = vrot.slane %v6079_v55, %v19170_v6  ;;  %v5983_v55 = vld [vmem:[#allocation2 + $0x58] sm:$0x3f] }
 0x1ec   :  { %6348 = vrot.lane.b32.xlu0 %v6241_v0, %s19079_s24  ;;  %v5467_v48 = vcombine.low %v5302_v37, %v5301_v29  ;;  %v6110_v28 = vcombine.high %v6102_v23, %v6102_v23  ;;  %v5319_v46 = vcombine.high %v5190_v3, %v5190_v3  ;;  %v5326_v56 = vrot.slane %v5190_v3, %v19170_v6  ;;  %v5192_v37 = vld [vmem:[#allocation2 + $0x59] sm:$0x3f] }
 0x1ed   :  { %5558 = vrot.lane.b32.xlu1 %v5466_v20, %s19079_s24  ;;  %v6258_v38 = vcombine.low %v6250_v47, %v6257_v2  ;;  %v6259_v10 = vcombine.low %v6094_v17, %v6093_v36  ;;  %v6095_v35 = vcombine.high %v5981_v61, %v5981_v61  ;;  %v6111_v13 = vcombine.high %v5982_v43, %v5982_v43  ;;  %v5984_v17 = vld [vmem:[#allocation2 + $0x60] sm:$0x3f] }
 0x1ee   :  { %v5475_v53 = vrot.slane %v5467_v48, %v19170_v6  ;;  %v6260_v51 = vcombine.low %v6102_v23, %v6110_v28  ;;  %v5333_v26 = vrot.slane %v5319_v46, %v19170_v6  ;;  %v5334_v60 = vcombine.high %v5326_v56, %v5326_v56  ;;  %v5193_v48 = vld [vmem:[#allocation2 + $0x61] sm:$0x3f] }
 0x1ef   :  { %v6267_v16 = vrot.slane %v6259_v10, %v19170_v6  ;;  %v5484_v59 = vcombine.low %v20241_v32, %v5326_v56  ;;  %v6109_v49 = vrot.slane %v6095_v35, %v19170_v6  ;;  %v6118_v50 = vrot.slane %v5982_v43, %v19170_v6 }
 0x1f0   :  { %6350 = vrot.lane.b32.xlu0 %v6258_v38, %s19079_s24  ;;  %v5483_v61 = vcombine.low %v5475_v53, %v5482_v44  ;;  %v6274_v45 = vrot.slane %v6260_v51, %v19170_v6  ;;  %v5485_v39 = vcombine.low %v5334_v60, %v5333_v26  ;;  %v6125_v40 = vrot.slane %v6111_v13, %v19170_v6 }
 0x1f1   :  { %v5492_v3 = vrot.slane %v5484_v59, %v19170_v6  ;;  %v6126_v32 = vcombine.high %v6118_v50, %v6118_v50  ;;  %v6276_v0 = vcombine.low %v6109_v49, %v6118_v50  ;;  %v5335_v29 = vcombine.high %v5191_v62, %v5191_v62 }
 0x1f2   :  { %5560 = vrot.lane.b32.xlu1 %v5483_v61, %s19079_s24  ;;  %v6275_v23 = vcombine.low %v6267_v16, %v6274_v45  ;;  %v5499_v43 = vrot.slane %v5485_v39, %v19170_v6  ;;  %v5342_v42 = vrot.slane %v5191_v62, %v19170_v6  ;;  %v5358_v44 = vrot.slane %v5192_v37, %v19170_v6  ;;  %v5985_v16 = vld [vmem:[#allocation2 + $0x68] sm:$0x3f] }
 0x1f3   :  { %v6277_v20 = vcombine.low %v6126_v32, %v6125_v40  ;;  %v6284_v47 = vrot.slane %v6276_v0, %v19170_v6  ;;  %v5349_v2 = vrot.slane %v5335_v29, %v19170_v6  ;;  %v6127_v36 = vcombine.high %v5983_v55, %v5983_v55 }
 0x1f4   :  { %6352 = vrot.lane.b32.xlu0 %v6275_v23, %s19079_s24  ;;  %v5500_v28 = vcombine.low %v5492_v3, %v5499_v43  ;;  %v5350_v46 = vcombine.high %v5342_v42, %v5342_v42  ;;  %v6134_v56 = vrot.slane %v5983_v55, %v19170_v6  ;;  %v6150_v38 = vrot.slane %v5984_v17, %v19170_v6 }
 0x1f5   :  { %v6291_v10 = vrot.slane %v6277_v20, %v19170_v6  ;;  %v5502_v35 = vcombine.low %v5349_v2, %v5358_v44  ;;  %v6141_v13 = vrot.slane %v6127_v36, %v19170_v6  ;;  %v5351_v53 = vcombine.high %v5192_v37, %v5192_v37  ;;  %v5194_v37 = vld [vmem:[#allocation2 + $0x69] sm:$0x3f]  ;;  %v5986_v36 = vld [vmem:[#allocation2 + $0x70] sm:$0x3f] }
 0x1f6   :  { %5562 = vrot.lane.b32.xlu1 %v5500_v28, %s19079_s24  ;;  %v5501_v51 = vcombine.low %v5342_v42, %v5350_v46  ;;  %v6142_v26 = vcombine.high %v6134_v56, %v6134_v56  ;;  %v5366_v60 = vcombine.high %v5358_v44, %v5358_v44  ;;  %v5374_v62 = vrot.slane %v5193_v48, %v19170_v6 }
 0x1f7   :  { %v6292_v59 = vcombine.low %v6284_v47, %v6291_v10  ;;  %v5516_v49 = vrot.slane %v5502_v35, %v19170_v6  ;;  %v6294_v50 = vcombine.low %v6141_v13, %v6150_v38  ;;  %v5365_v61 = vrot.slane %v5351_v53, %v19170_v6 }
 0x1f8   :  { %v5509_v45 = vrot.slane %v5501_v51, %v19170_v6  ;;  %v6293_v39 = vcombine.low %v6134_v56, %v6142_v26  ;;  %v5382_v40 = vcombine.high %v5374_v62, %v5374_v62  ;;  %v6143_v55 = vcombine.high %v5984_v17, %v5984_v17 }
 0x1f9   :  { %6354 = vrot.lane.b32.xlu0 %v6292_v59, %s19079_s24  ;;  %v6308_v3 = vrot.slane %v6294_v50, %v19170_v6  ;;  %v5518_v32 = vcombine.low %v5366_v60, %v5365_v61  ;;  %v6158_v0 = vcombine.high %v6150_v38, %v6150_v38  ;;  %v6166_v29 = vrot.slane %v5985_v16, %v19170_v6  ;;  %v6769_v61 = vld [vmem:[#allocation2 + $0x1a] sm:$0x3f] }
 0x1fa   :  { %v5517_v23 = vcombine.low %v5509_v45, %v5516_v49  ;;  %v6301_v43 = vrot.slane %v6293_v39, %v19170_v6  ;;  %v5519_v42 = vcombine.low %v5374_v62, %v5382_v40  ;;  %v6157_v44 = vrot.slane %v6143_v55, %v19170_v6  ;;  %v7561_v55 = vld [vmem:[#allocation2 + $0x21] sm:$0x3f] }
 0x1fb   :  { %v5526_v20 = vrot.slane %v5518_v32, %v19170_v6  ;;  %v6174_v47 = vcombine.high %v6166_v29, %v6166_v29  ;;  %v5367_v2 = vcombine.high %v5193_v48, %v5193_v48  ;;  %v5383_v17 = vcombine.high %v5194_v37, %v5194_v37 }
 0x1fc   :  { %5564 = vrot.lane.b32.xlu1 %v5517_v23, %s19079_s24  ;;  %v6309_v28 = vcombine.low %v6301_v43, %v6308_v3  ;;  %v5533_v46 = vrot.slane %v5519_v42, %v19170_v6  ;;  %v6310_v56 = vcombine.low %v6158_v0, %v6157_v44  ;;  %v5390_v38 = vrot.slane %v5194_v37, %v19170_v6  ;;  %v6770_v44 = vld [vmem:[#allocation2 + $0x22] sm:$0x3f] }
 0x1fd   :  { %v6311_v10 = vcombine.low %v6166_v29, %v6174_v47  ;;  %v5381_v35 = vrot.slane %v5367_v2, %v19170_v6  ;;  %v5397_v13 = vrot.slane %v5383_v17, %v19170_v6  ;;  %v6159_v53 = vcombine.high %v5985_v16, %v5985_v16 }
 0x1fe   :  { %6356 = vrot.lane.b32.xlu0 %v6309_v28, %s19079_s24  ;;  %v5534_v51 = vcombine.low %v5526_v20, %v5533_v46  ;;  %v6318_v48 = vrot.slane %v6310_v56, %v19170_v6  ;;  %v5398_v26 = vcombine.high %v5390_v38, %v5390_v38  ;;  %v6175_v60 = vcombine.high %v5986_v36, %v5986_v36 }
 0x1ff   :  { %v6325_v62 = vrot.slane %v6311_v10, %v19170_v6  ;;  %v5535_v59 = vcombine.low %v5381_v35, %v5390_v38  ;;  %v6173_v49 = vrot.slane %v6159_v53, %v19170_v6  ;;  %v6182_v50 = vrot.slane %v5986_v36, %v19170_v6  ;;  %v7562_v53 = vld [vmem:[#allocation2 + $0x29] sm:$0x3f] }
 0x200   :  { %5566 = vrot.lane.b32.xlu1 %v5534_v51, %s19079_s24  ;;  %v5536_v45 = vcombine.low %v5398_v26, %v5397_v13  ;;  %v6189_v16 = vrot.slane %v6175_v60, %v19170_v6  ;;  %v6807_v39 = vcombine.high %v20418_v33, %v20418_v33  ;;  %v6822_v40 = vcombine.high %v20427_v58, %v20427_v58 }
 0x201   :  { %v6326_v37 = vcombine.low %v6318_v48, %v6325_v62  ;;  %v5543_v3 = vrot.slane %v5535_v59, %v19170_v6  ;;  %v6190_v32 = vcombine.high %v6182_v50, %v6182_v50  ;;  %v6327_v0 = vcombine.low %v6173_v49, %v6182_v50  ;;  %v6771_v62 = vld [vmem:[#allocation2 + $0x2a] sm:$0x3f] }
 0x202   :  { %v5550_v29 = vrot.slane %v5536_v45, %v19170_v6  ;;  %v6821_v23 = vrot.slane %v6807_v39, %v19170_v6  ;;  %v6830_v43 = vrot.slane %v6769_v61, %v19170_v6  ;;  %v7599_v42 = vcombine.high %v20499_v52, %v20499_v52 }
 0x203   :  { %6358 = vrot.lane.b32.xlu0 %v6326_v37, %s19079_s24  ;;  %v6328_v33 = vcombine.low %v6190_v32, %v6189_v16  ;;  %v6335_v58 = vrot.slane %v6327_v0, %v19170_v6  ;;  %v7614_v20 = vcombine.high %v20515_v54, %v20515_v54  ;;  %v7622_v47 = vrot.slane %v7561_v55, %v19170_v6  ;;  %v6772_v0 = vld [vmem:[#allocation2 + $0x32] sm:$0x3f] }
 0x204   :  { %v5551_v2 = vcombine.low %v5543_v3, %v5550_v29  ;;  %v6838_v17 = vcombine.high %v6830_v43, %v6830_v43  ;;  %v7000_v36 = vcombine.low %v6822_v40, %v6821_v23  ;;  %v7613_v28 = vrot.slane %v7599_v42, %v19170_v6  ;;  %v7563_v23 = vld [vmem:[#allocation2 + $0x31] sm:$0x3f] }
 0x205   :  { %v6342_v46 = vrot.slane %v6328_v33, %v19170_v6  ;;  %v7630_v56 = vcombine.high %v7622_v47, %v7622_v47  ;;  %v6823_v52 = vcombine.high %v6769_v61, %v6769_v61  ;;  %v6839_v38 = vcombine.high %v6770_v44, %v6770_v44 }
 0x206   :  { %5568 = vrot.lane.b32.xlu1 %v5551_v2, %s19079_s24  ;;  %v7001_v10 = vcombine.low %v6830_v43, %v6838_v17  ;;  %v7008_v35 = vrot.slane %v7000_v36, %v19170_v6  ;;  %v7792_v13 = vcombine.low %v7614_v20, %v7613_v28  ;;  %v6846_v54 = vrot.slane %v6770_v44, %v19170_v6 }
 0x207   :  { %v6343_v51 = vcombine.low %v6335_v58, %v6342_v46  ;;  %v7793_v48 = vcombine.low %v7622_v47, %v7630_v56  ;;  %v6837_v26 = vrot.slane %v6823_v52, %v19170_v6  ;;  %v6853_v60 = vrot.slane %v6839_v38, %v19170_v6  ;;  %v6773_v46 = vld [vmem:[#allocation2 + $0x4a] sm:$0x3f] }
 0x208   :  { %v7015_v59 = vrot.slane %v7001_v10, %v19170_v6  ;;  %v7800_v49 = vrot.slane %v7792_v13, %v19170_v6  ;;  %v6854_v50 = vcombine.high %v6846_v54, %v6846_v54  ;;  %v7615_v61 = vcombine.high %v7561_v55, %v7561_v55 }
 0x209   :  { %6360 = vrot.lane.b32.xlu0 %v6343_v51, %s19079_s24  ;;  %v7807_v45 = vrot.slane %v7793_v48, %v19170_v6  ;;  %v7017_v16 = vcombine.low %v6837_v26, %v6846_v54  ;;  %v7631_v39 = vcombine.high %v7562_v53, %v7562_v53  ;;  %v7638_v40 = vrot.slane %v7562_v53, %v19170_v6  ;;  %v7565_v51 = vld [vmem:[#allocation2 + $0x51] sm:$0x3f] }
 0x20a   :  { %v7016_v37 = vcombine.low %v7008_v35, %v7015_v59  ;;  %v7018_v3 = vcombine.low %v6854_v50, %v6853_v60  ;;  %v7629_v32 = vrot.slane %v7615_v61, %v19170_v6  ;;  %v6855_v29 = vcombine.high %v6771_v62, %v6771_v62  ;;  %v6774_v59 = vld [vmem:[#allocation2 + $0x52] sm:$0x3f] }
 0x20b   :  { %v7808_v43 = vcombine.low %v7800_v49, %v7807_v45  ;;  %v7025_v42 = vrot.slane %v7017_v16, %v19170_v6  ;;  %v7645_v55 = vrot.slane %v7631_v39, %v19170_v6  ;;  %v7646_v44 = vcombine.high %v7638_v40, %v7638_v40 }
 0x20c   :  { %7138 = vrot.lane.b32.xlu1 %v7016_v37, %s19079_s24  ;;  %v7032_v33 = vrot.slane %v7018_v3, %v19170_v6  ;;  %v7809_v58 = vcombine.low %v7629_v32, %v7638_v40  ;;  %v6862_v20 = vrot.slane %v6771_v62, %v19170_v6  ;;  %v6869_v47 = vrot.slane %v6855_v29, %v19170_v6 }
 0x20d   :  { %7930 = vrot.lane.b32.xlu0 %v7808_v43, %s19079_s24  ;;  %v7810_v2 = vcombine.low %v7646_v44, %v7645_v55  ;;  %v6878_v17 = vrot.slane %v6772_v0, %v19170_v6  ;;  %v7647_v36 = vcombine.high %v7563_v23, %v7563_v23  ;;  %v7654_v28 = vrot.slane %v7563_v23, %v19170_v6  ;;  %v7566_v23 = vld [vmem:[#allocation2 + $0x59] sm:$0x3f] }
 0x20e   :  { %v7033_v56 = vcombine.low %v7025_v42, %v7032_v33  ;;  %v7817_v52 = vrot.slane %v7809_v58, %v19170_v6  ;;  %v6870_v38 = vcombine.high %v6862_v20, %v6862_v20  ;;  %v6871_v10 = vcombine.high %v6772_v0, %v6772_v0  ;;  %v6775_v44 = vld [vmem:[#allocation2 + $0x5a] sm:$0x3f] }
 0x20f   :  { %v7824_v35 = vrot.slane %v7810_v2, %v19170_v6  ;;  %v7035_v13 = vcombine.low %v6869_v47, %v6878_v17  ;;  %v7661_v54 = vrot.slane %v7647_v36, %v19170_v6  ;;  %v7662_v53 = vcombine.high %v7654_v28, %v7654_v28 }
 0x210   :  { %7140 = vrot.lane.b32.xlu1 %v7033_v56, %s19079_s24  ;;  %v7034_v48 = vcombine.low %v6862_v20, %v6870_v38  ;;  %v6885_v26 = vrot.slane %v6871_v10, %v19170_v6  ;;  %v6886_v60 = vcombine.high %v6878_v17, %v6878_v17  ;;  %v6894_v62 = vrot.slane %v6773_v46, %v19170_v6  ;;  %v6776_v38 = vld [vmem:[#allocation2 + $0x62] sm:$0x3f] }
 0x211   :  { %v7825_v49 = vcombine.low %v7817_v52, %v7824_v35  ;;  %v7049_v50 = vrot.slane %v7035_v13, %v19170_v6  ;;  %v7826_v61 = vcombine.low %v7654_v28, %v7662_v53  ;;  %v7827_v45 = vcombine.low %v7661_v54, %v20222_v41 }
 0x212   :  { %v7042_v16 = vrot.slane %v7034_v48, %v19170_v6  ;;  %v6902_v39 = vcombine.high %v6894_v62, %v6894_v62  ;;  %v7051_v40 = vcombine.low %v6886_v60, %v6885_v26  ;;  %v7686_v37 = vrot.slane %v7565_v51, %v19170_v6  ;;  %v7567_v48 = vld [vmem:[#allocation2 + $0x61] sm:$0x3f] }
 0x213   :  { %7932 = vrot.lane.b32.xlu0 %v7825_v49, %s19079_s24  ;;  %v7834_v3 = vrot.slane %v7826_v61, %v19170_v6  ;;  %v7841_v32 = vrot.slane %v7827_v45, %v19170_v6  ;;  %v6887_v0 = vcombine.high %v6773_v46, %v6773_v46  ;;  %v6903_v29 = vcombine.high %v6774_v59, %v6774_v59 }
 0x214   :  { %v7050_v43 = vcombine.low %v7042_v16, %v7049_v50  ;;  %v7052_v42 = vcombine.low %v6894_v62, %v6902_v39  ;;  %v7059_v55 = vrot.slane %v7051_v40, %v19170_v6  ;;  %v7694_v41 = vcombine.high %v7686_v37, %v7686_v37 }
 0x215   :  { %v7842_v33 = vcombine.low %v7834_v3, %v7841_v32  ;;  %v6901_v58 = vrot.slane %v6887_v0, %v19170_v6  ;;  %v6910_v20 = vrot.slane %v6774_v59, %v19170_v6  ;;  %v6917_v47 = vrot.slane %v6903_v29, %v19170_v6  ;;  %v7568_v59 = vld [vmem:[#allocation2 + $0x69] sm:$0x3f] }
 0x216   :  { %7142 = vrot.lane.b32.xlu1 %v7050_v43, %s19079_s24  ;;  %v7066_v2 = vrot.slane %v7052_v42, %v19170_v6  ;;  %v7844_v17 = vcombine.low %v7686_v37, %v7694_v41  ;;  %v7679_v36 = vcombine.high %v7565_v51, %v7565_v51  ;;  %v7695_v28 = vcombine.high %v7566_v23, %v7566_v23 }
 0x217   :  { %7934 = vrot.lane.b32.xlu0 %v7842_v33, %s19079_s24  ;;  %v6918_v46 = vcombine.high %v6910_v20, %v6910_v20  ;;  %v7068_v56 = vcombine.low %v6901_v58, %v6910_v20  ;;  %v7702_v52 = vrot.slane %v7566_v23, %v19170_v6  ;;  %v6919_v10 = vcombine.high %v6775_v44, %v6775_v44  ;;  %v7569_v58 = vld [vmem:[#allocation2 + $0x71] sm:$0x3f] }
 0x218   :  { %v7067_v35 = vcombine.low %v7059_v55, %v7066_v2  ;;  %v7858_v13 = vrot.slane %v7844_v17, %v19170_v6  ;;  %v7693_v54 = vrot.slane %v7679_v36, %v19170_v6  ;;  %v7709_v53 = vrot.slane %v7695_v28, %v19170_v6 }
 0x219   :  { %v7069_v26 = vcombine.low %v6918_v46, %v6917_v47  ;;  %v7076_v51 = vrot.slane %v7068_v56, %v19170_v6  ;;  %v7710_v60 = vcombine.high %v7702_v52, %v7702_v52  ;;  %v6926_v62 = vrot.slane %v6775_v44, %v19170_v6 }
 0x21a   :  { %7144 = vrot.lane.b32.xlu1 %v7067_v35, %s19079_s24  ;;  %v7859_v49 = vcombine.low %v7851_v63, %v7858_v13  ;;  %v7860_v50 = vcombine.low %v7693_v54, %v7702_v52  ;;  %v6933_v61 = vrot.slane %v6919_v10, %v19170_v6  ;;  %v6942_v45 = vrot.slane %v6776_v38, %v19170_v6  ;;  %v6777_v63 = vld [vmem:[#allocation2 + $0x6a] sm:$0x3f]  ;;  %v6778_v52 = vld [vmem:[#allocation2 + $0x72] sm:$0x3f] }
 0x21b   :  { %v7083_v16 = vrot.slane %v7069_v26, %v19170_v6  ;;  %v7861_v39 = vcombine.low %v7710_v60, %v7709_v53  ;;  %v6934_v40 = vcombine.high %v6926_v62, %v6926_v62  ;;  %v7711_v37 = vcombine.high %v7567_v48, %v7567_v48 }
 0x21c   :  { %7936 = vrot.lane.b32.xlu0 %v7859_v49, %s19079_s24  ;;  %v7868_v3 = vrot.slane %v7860_v50, %v19170_v6  ;;  %v7086_v32 = vcombine.low %v6933_v61, %v6942_v45  ;;  %v7718_v0 = vrot.slane %v7567_v48, %v19170_v6  ;;  %v7734_v5 = vrot.slane %v7568_v59, %v19170_v6  ;;  %v20786_v49 = vld [vmem:[#allocation2 + $0x8] sm:$0x3f] }
 0x21d   :  { %v7084_v29 = vcombine.low %v7076_v51, %v7083_v16  ;;  %v7875_v23 = vrot.slane %v7861_v39, %v19170_v6  ;;  %v7085_v43 = vcombine.low %v6926_v62, %v6934_v40  ;;  %v7725_v42 = vrot.slane %v7711_v37, %v19170_v6  ;;  %v6380_v39 = vld [vmem:[#allocation2 + $0x9] sm:$0x3f] }
 0x21e   :  { %v7100_v55 = vrot.slane %v7086_v32, %v19170_v6  ;;  %v7726_v41 = vcombine.high %v7718_v0, %v7718_v0  ;;  %v6935_v44 = vcombine.high %v6776_v38, %v6776_v38  ;;  %v6950_v33 = vcombine.high %v6942_v45, %v6942_v45 }
 0x21f   :  { %7146 = vrot.lane.b32.xlu1 %v7084_v29, %s19079_s24  ;;  %v7876_v20 = vcombine.low %v7868_v3, %v7875_v23  ;;  %v7093_v47 = vrot.slane %v7085_v43, %v19170_v6  ;;  %v7878_v2 = vcombine.low %v7725_v42, %v7734_v5  ;;  %v6958_v17 = vrot.slane %v6777_v63, %v19170_v6  ;;  %v20796_v23 = vld [vmem:[#allocation2 + $0x11] sm:$0x3f] }
 0x220   :  { %v7877_v36 = vcombine.low %v7718_v0, %v7726_v41  ;;  %v6949_v28 = vrot.slane %v6935_v44, %v19170_v6  ;;  %v7727_v46 = vcombine.high %v7568_v59, %v7568_v59  ;;  %v7742_v56 = vcombine.high %v7734_v5, %v7734_v5  ;;  %v5589_v44 = vld [vmem:[#allocation2 + $0xa] sm:$0x3f] }
 0x221   :  { %7938 = vrot.lane.b32.xlu0 %v7876_v20, %s19079_s24  ;;  %v7101_v10 = vcombine.low %v7093_v47, %v7100_v55  ;;  %v7892_v38 = vrot.slane %v7878_v2, %v19170_v6  ;;  %v6966_v35 = vcombine.high %v6958_v17, %v6958_v17  ;;  %v7750_v13 = vrot.slane %v7569_v58, %v19170_v6 }
 0x222   :  { %v7885_v54 = vrot.slane %v7877_v36, %v19170_v6  ;;  %v7102_v53 = vcombine.low %v6950_v33, %v6949_v28  ;;  %v7741_v48 = vrot.slane %v7727_v46, %v19170_v6  ;;  %v6951_v26 = vcombine.high %v6777_v63, %v6777_v63 }
 0x223   :  { %7148 = vrot.lane.b32.xlu1 %v7101_v10, %s19079_s24  ;;  %v7103_v51 = vcombine.low %v6958_v17, %v6966_v35  ;;  %v7758_v60 = vcombine.high %v7750_v13, %v7750_v13  ;;  %v6967_v62 = vcombine.high %v6778_v52, %v6778_v52  ;;  %v6974_v59 = vrot.slane %v6778_v52, %v19170_v6 }
 0x224   :  { %v7893_v50 = vcombine.low %v7885_v54, %v7892_v38  ;;  %v7110_v61 = vrot.slane %v7102_v53, %v19170_v6  ;;  %v7894_v45 = vcombine.low %v7742_v56, %v7741_v48  ;;  %v6965_v16 = vrot.slane %v6951_v26, %v19170_v6  ;;  %v20813_v38 = vld [vmem:[#allocation2 + $0x18] sm:$0x3f] }
 0x225   :  { %v7117_v40 = vrot.slane %v7103_v51, %v19170_v6  ;;  %v7895_v37 = vcombine.low %v7750_v13, %v7758_v60  ;;  %v6981_v3 = vrot.slane %v6967_v62, %v19170_v6  ;;  %v6982_v32 = vcombine.high %v6974_v59, %v6974_v59  ;;  %v4798_v62 = vld [vmem:[#allocation2 + $0x10] sm:$0x3f] }
 0x226   :  { %7940 = vrot.lane.b32.xlu0 %v7893_v50, %s19079_s24  ;;  %v7902_v0 = vrot.slane %v7894_v45, %v19170_v6  ;;  %v7119_v5 = vcombine.low %v6965_v16, %v6974_v59  ;;  %v7743_v63 = vcombine.high %v7569_v58, %v7569_v58  ;;  %v4843_v29 = vrot.slane %v20786_v49, %v19170_v6  ;;  %v7172_v58 = vld [vmem:[#allocation2 + $0x10] sm:$0x3f] }
 0x227   :  { %v7118_v43 = vcombine.low %v7110_v61, %v7117_v40  ;;  %v7909_v42 = vrot.slane %v7895_v37, %v19170_v6  ;;  %v7120_v55 = vcombine.low %v6982_v32, %v6981_v3  ;;  %v6404_v41 = vcombine.high %v6380_v39, %v6380_v39 }
 0x228   :  { %v7127_v33 = vrot.slane %v7119_v5, %v19170_v6  ;;  %v7757_v20 = vrot.slane %v7743_v63, %v19170_v6  ;;  %v5013_v47 = vcombine.low %v20251_v31, %v4843_v29  ;;  %v6411_v2 = vrot.slane %v6380_v39, %v19170_v6  ;;  %v5590_v5 = vld [vmem:[#allocation2 + $0x12] sm:$0x3f]  ;;  %v4799_v63 = vld [vmem:[#allocation2 + $0x18] sm:$0x3f] }
 0x229   :  { %7150 = vrot.lane.b32.xlu1 %v7118_v43, %s19079_s24  ;;  %v7910_v17 = vcombine.low %v7902_v0, %v7909_v42  ;;  %v7134_v36 = vrot.slane %v7120_v55, %v19170_v6  ;;  %v6418_v28 = vrot.slane %v6404_v41, %v19170_v6  ;;  %v20808_v46 = vrot.slane %v20796_v23, %v19170_v6 }
 0x22a   :  { %v7911_v56 = vcombine.low %v7757_v20, %v20264_v18  ;;  %v5027_v52 = vrot.slane %v5013_v47, %v19170_v6  ;;  %v6419_v10 = vcombine.high %v6411_v2, %v6411_v2  ;;  %v5635_v31 = vrot.slane %v5589_v44, %v19170_v6 }
 0x22b   :  { %7942 = vrot.lane.b32.xlu0 %v7910_v17, %s19079_s24  ;;  %v7135_v35 = vcombine.low %v7127_v33, %v7134_v36  ;;  %v6597_v13 = vcombine.low %v6418_v28, %v20808_v46  ;;  %v7196_v54 = vcombine.high %v7172_v58, %v7172_v58  ;;  %v7203_v53 = vrot.slane %v7172_v58, %v19170_v6  ;;  %v5591_v17 = vld [vmem:[#allocation2 + $0x1a] sm:$0x3f] }
 0x22c   :  { %v7919_v48 = vrot.slane %v7911_v56, %v19170_v6  ;;  %v21938_v18 = vrot.slane %v20231_v27, %v19170_v6  ;;  %v6596_v51 = vcombine.low %v6411_v2, %v6419_v10  ;;  %v5805_v60 = vcombine.low %v20372_v57, %v5635_v31 }
 0x22d   :  { %7152 = vrot.lane.b32.xlu1 %v7135_v35, %s19079_s24  ;;  %v6611_v59 = vrot.slane %v6597_v13, %v19170_v6  ;;  %v7210_v50 = vrot.slane %v7196_v54, %v19170_v6  ;;  %v7211_v61 = vcombine.high %v7203_v53, %v7203_v53  ;;  %v20828_v45 = vrot.slane %v20813_v38, %v19170_v6 }
 0x22e   :  { %v5028_v26 = vcombine.low %v21938_v18, %v5027_v52  ;;  %v21939_v16 = vrot.slane %v20342_v34, %v19170_v6  ;;  %v6604_v57 = vrot.slane %v6596_v51, %v19170_v6  ;;  %v5819_v39 = vrot.slane %v5805_v60, %v19170_v6  ;;  %v4800_v18 = vld [vmem:[#allocation2 + $0x20] sm:$0x3f] }
 0x22f   :  { %v4836_v40 = vcombine.high %v20786_v49, %v20786_v49  ;;  %v7388_v37 = vcombine.low %v7203_v53, %v7211_v61  ;;  %v7389_v3 = vcombine.low %v7210_v50, %v20828_v45  ;;  %v4851_v32 = vcombine.high %v4843_v29, %v4843_v29 }
 0x230   :  { %v7927_v27 = vcombine.low %v7919_v48, %v21939_v16  ;;  %5174 = vst.msk [vmem:[#allocation3] sm:$0xff] %vm131_vm0, %v5028_v26  ;;  %v4859_v0 = vrot.slane %v4798_v62, %v19170_v6  ;;  %v6612_v34 = vcombine.low %v6604_v57, %v6611_v59  ;;  %v21940_v43 = vrot.slane %v20357_v30, %v19170_v6  ;;  %v4801_v59 = vld [vmem:[#allocation2 + $0x28] sm:$0x3f] }
 0x231   :  { %v4850_v55 = vrot.slane %v4836_v40, %v19170_v6  ;;  %v5628_v41 = vcombine.high %v5589_v44, %v5589_v44  ;;  %v7396_v49 = vrot.slane %v7388_v37, %v19170_v6  ;;  %v7403_v33 = vrot.slane %v7389_v3, %v19170_v6 }
 0x232   :  { %7944 = vrot.lane.b32.xlu0 %v7927_v27, %s19079_s24  ;;  %v5820_v42 = vcombine.low %v21940_v43, %v5819_v39  ;;  %v4867_v20 = vcombine.high %v4859_v0, %v4859_v0  ;;  %v5643_v29 = vcombine.high %v5635_v31, %v5635_v31  ;;  %6758 = vst.msk [vmem:[#allocation3 + $0x10] sm:$0xff] %vm131_vm0, %v6612_v34  ;;  %v5593_v43 = vld [vmem:[#allocation2 + $0x2a] sm:$0x3f] }
 0x233   :  { %v5029_v47 = vcombine.low %v4851_v32, %v4850_v55  ;;  %v5642_v2 = vrot.slane %v5628_v41, %v19170_v6  ;;  %v5651_v58 = vrot.slane %v5590_v5, %v19170_v6  ;;  %v4868_v30 = vcombine.high %v4799_v63, %v4799_v63  ;;  %v5592_v32 = vld [vmem:[#allocation2 + $0x22] sm:$0x3f] }
 0x234   :  { %5966 = vst.msk [vmem:[#allocation3 + $0x8] sm:$0xff] %vm131_vm0, %v5820_v42  ;;  %v7404_v36 = vcombine.low %v7396_v49, %v7403_v33  ;;  %v5030_v28 = vcombine.low %v4859_v0, %v4867_v20  ;;  %v4875_v44 = vrot.slane %v4799_v63, %v19170_v6  ;;  %v4852_v56 = vcombine.high %v4798_v62, %v4798_v62 }
 0x235   :  { %v5037_v52 = vrot.slane %v5029_v47, %v19170_v6  ;;  %v5821_v10 = vcombine.low %v5643_v29, %v5642_v2  ;;  %v5659_v31 = vcombine.high %v5651_v58, %v5651_v58  ;;  %v4882_v35 = vrot.slane %v4868_v30, %v19170_v6  ;;  %v4802_v2 = vld [vmem:[#allocation2 + $0x40] sm:$0x3f] }
 0x236   :  { %7550 = vst.msk [vmem:[#allocation3 + $0x18] sm:$0xff] %vm131_vm0, %v7404_v36  ;;  %v5044_v13 = vrot.slane %v5030_v28, %v19170_v6  ;;  %v4883_v54 = vcombine.high %v4875_v44, %v4875_v44  ;;  %v4866_v53 = vrot.slane %v4852_v56, %v19170_v6  ;;  %v5660_v48 = vcombine.high %v5591_v17, %v5591_v17  ;;  %v5553_v57 = vpop.permute.xlu1 %5552 }
 0x237   :  { %v5829_v26 = vrot.slane %v5821_v10, %v19170_v6  ;;  %v5822_v51 = vcombine.low %v5651_v58, %v5659_v31  ;;  %v5667_v60 = vrot.slane %v5591_v17, %v19170_v6  ;;  %v5644_v62 = vcombine.high %v5590_v5, %v5590_v5  ;;  %5579 = vst.msk [vmem:[#allocation3] sm:$0xff] %vm1161_vm2, %v5553_v57  ;;  %v5594_v31 = vld [vmem:[#allocation2 + $0x42] sm:$0x3f] }
 0x238   :  { %v5045_v50 = vcombine.low %v5037_v52, %v5044_v13  ;;  %v5047_v61 = vcombine.low %v4883_v54, %v4882_v35  ;;  %v5046_v16 = vcombine.low %v4866_v53, %v4875_v44  ;;  %v5674_v27 = vrot.slane %v5660_v48, %v19170_v6 }
 0x239   :  { %v5836_v39 = vrot.slane %v5822_v51, %v19170_v6  ;;  %v5675_v40 = vcombine.high %v5667_v60, %v5667_v60  ;;  %v5658_v37 = vrot.slane %v5644_v62, %v19170_v6  ;;  %v4884_v3 = vcombine.high %v4800_v18, %v4800_v18 }
 0x23a   :  { %5175 = vst.msk [vmem:[#allocation3 + $0x28] sm:$0xff] %vm131_vm0, %v5045_v50  ;;  %v5061_v0 = vrot.slane %v5047_v61, %v19170_v6  ;;  %v5054_v5 = vrot.slane %v5046_v16, %v19170_v6  ;;  %v4891_v63 = vrot.slane %v4800_v18, %v19170_v6  ;;  %v4907_v34 = vrot.slane %v4801_v59, %v19170_v6  ;;  %v4803_v61 = vld [vmem:[#allocation2 + $0x48] sm:$0x3f] }
 0x23b   :  { %v5837_v42 = vcombine.low %v5829_v26, %v5836_v39  ;;  %v5839_v55 = vcombine.low %v5675_v40, %v5674_v27  ;;  %v5838_v41 = vcombine.low %v5658_v37, %v5667_v60  ;;  %v4898_v49 = vrot.slane %v4884_v3, %v19170_v6 }
 0x23c   :  { %v5062_v33 = vcombine.low %v5054_v5, %v5061_v0  ;;  %v4899_v20 = vcombine.high %v4891_v63, %v4891_v63  ;;  %v5676_v29 = vcombine.high %v5592_v32, %v5592_v32  ;;  %v5683_v47 = vrot.slane %v5592_v32, %v19170_v6  ;;  %v7137_v58 = vpop.permute.xlu1 %7136  ;;  %v5595_v5 = vld [vmem:[#allocation2 + $0x4a] sm:$0x3f] }
 0x23d   :  { %5967 = vst.msk [vmem:[#allocation3 + $0x30] sm:$0xff] %vm131_vm0, %v5837_v42  ;;  %v5853_v30 = vrot.slane %v5839_v55, %v19170_v6  ;;  %v5846_v17 = vrot.slane %v5838_v41, %v19170_v6  ;;  %v5064_v36 = vcombine.low %v4898_v49, %v4907_v34  ;;  %v5699_v28 = vrot.slane %v5593_v43, %v19170_v6 }
 0x23e   :  { %7163 = vst.msk [vmem:[#allocation3 + $0x10] sm:$0xff] %vm1161_vm2, %v7137_v58  ;;  %v5063_v44 = vcombine.low %v4891_v63, %v4899_v20  ;;  %v5690_v56 = vrot.slane %v5676_v29, %v19170_v6  ;;  %v5691_v52 = vcombine.high %v5683_v47, %v5683_v47  ;;  %v4900_v10 = vcombine.high %v4801_v59, %v4801_v59  ;;  %v4804_v58 = vld [vmem:[#allocation2 + $0x50] sm:$0x3f] }
 0x23f   :  { %5176 = vst.msk [vmem:[#allocation3 + $0x50] sm:$0xff] %vm131_vm0, %v5062_v33  ;;  %v5854_v35 = vcombine.low %v5846_v17, %v5853_v30  ;;  %v5078_v13 = vrot.slane %v5064_v36, %v19170_v6  ;;  %v4915_v54 = vcombine.high %v4907_v34, %v4907_v34  ;;  %v4923_v53 = vrot.slane %v4802_v2, %v19170_v6 }
 0x240   :  { %v5071_v48 = vrot.slane %v5063_v44, %v19170_v6  ;;  %v5855_v18 = vcombine.low %v5683_v47, %v5691_v52  ;;  %v5856_v26 = vcombine.low %v5690_v56, %v5699_v28  ;;  %v4914_v51 = vrot.slane %v4900_v10, %v19170_v6  ;;  %v6345_v40 = vpop.permute.xlu0 %6344  ;;  %v4805_v44 = vld [vmem:[#allocation2 + $0x58] sm:$0x3f] }
 0x241   :  { %5968 = vst.msk [vmem:[#allocation3 + $0x58] sm:$0xff] %vm131_vm0, %v5854_v35  ;;  %v4931_v60 = vcombine.high %v4923_v53, %v4923_v53  ;;  %v5692_v62 = vcombine.high %v5593_v43, %v5593_v43  ;;  %v5707_v50 = vcombine.high %v5699_v28, %v5699_v28  ;;  %v5715_v59 = vrot.slane %v5594_v31, %v19170_v6 }
 0x242   :  { %v5079_v16 = vcombine.low %v5071_v48, %v5078_v13  ;;  %v5863_v27 = vrot.slane %v5855_v18, %v19170_v6  ;;  %v5870_v57 = vrot.slane %v5856_v26, %v19170_v6  ;;  %v5080_v39 = vcombine.low %v4915_v54, %v4914_v51  ;;  %6371 = vst.msk [vmem:[#allocation3 + $0x8] sm:$0xff] %vm1161_vm2, %v6345_v40  ;;  %v5596_v13 = vld [vmem:[#allocation2 + $0x52] sm:$0x3f]  ;;  %v5597_v18 = vld [vmem:[#allocation2 + $0x5a] sm:$0x3f]  ;;  %v8351_v40 = vld [vmem:[#allocation3] sm:$0xff] }
 0x243   :  { %v5081_v37 = vcombine.low %v4923_v53, %v4931_v60  ;;  %v5706_v3 = vrot.slane %v5692_v62, %v19170_v6  ;;  %v5723_v32 = vcombine.high %v5715_v59, %v5715_v59  ;;  %v4916_v0 = vcombine.high %v4802_v2, %v4802_v2 }
 0x244   :  { %5177 = vst.msk [vmem:[#allocation3 + $0x78] sm:$0xff] %vm131_vm0, %v5079_v16  ;;  %v5871_v63 = vcombine.low %v5863_v27, %v5870_v57  ;;  %v5088_v34 = vrot.slane %v5080_v39, %v19170_v6  ;;  %v4932_v43 = vcombine.high %v4803_v61, %v4803_v61  ;;  %v4939_v42 = vrot.slane %v4803_v61, %v19170_v6  ;;  %v20910_v39 = vld [vmem:[#allocation2 + $0x60] sm:$0x3f] }
 0x245   :  { %v5095_v55 = vrot.slane %v5081_v37, %v19170_v6  ;;  %v5872_v41 = vcombine.low %v5707_v50, %v5706_v3  ;;  %v5873_v49 = vcombine.low %v5715_v59, %v5723_v32  ;;  %v4930_v33 = vrot.slane %v4916_v0, %v19170_v6  ;;  %v8467_v59 = vld [vmem:[%s21932_s2 + $0x238] sm:$0xff] }
 0x246   :  { %5969 = vst.msk [vmem:[#allocation3 + $0x80] sm:$0xff] %vm131_vm0, %v5871_v63  ;;  %v4946_v20 = vrot.slane %v4932_v43, %v19170_v6  ;;  %v4947_v29 = vcombine.high %v4939_v42, %v4939_v42  ;;  %v5708_v47 = vcombine.high %v5594_v31, %v5594_v31  ;;  %v5724_v2 = vcombine.high %v5595_v5, %v5595_v5  ;;  %v8466_v63 = vld [vmem:[%s21932_s2 + $0x230] sm:$0xff] }
 0x247   :  { %v5096_v30 = vcombine.low %v5088_v34, %v5095_v55  ;;  %v5880_v17 = vrot.slane %v5872_v41, %v19170_v6  ;;  %v5887_v36 = vrot.slane %v5873_v49, %v19170_v6  ;;  %v5097_v28 = vcombine.low %v4930_v33, %v4939_v42 }
 0x248   :  { %v5098_v56 = vcombine.low %v4947_v29, %v4946_v20  ;;  %v5722_v52 = vrot.slane %v5708_v47, %v19170_v6  ;;  %v5731_v10 = vrot.slane %v5595_v5, %v19170_v6  ;;  %v5738_v35 = vrot.slane %v5724_v2, %v19170_v6  ;;  %v8465_v2 = vld [vmem:[%s21932_s2 + $0x228] sm:$0xff] }
 0x249   :  { %5178 = vst.msk [vmem:[#allocation3 + $0xa0] sm:$0xff] %vm131_vm0, %v5096_v30  ;;  %v5888_v31 = vcombine.low %v5880_v17, %v5887_v36  ;;  %v5105_v54 = vrot.slane %v5097_v28, %v19170_v6  ;;  %v4948_v53 = vcombine.high %v4804_v58, %v4804_v58  ;;  %v4955_v48 = vrot.slane %v4804_v58, %v19170_v6  ;;  %v8352_v50 = vld [vmem:[#allocation3 + $0x8] sm:$0xff]  ;;  %v5598_v17 = vld [vmem:[#allocation2 + $0x62] sm:$0x3f] }
 0x24a   :  { %v5112_v26 = vrot.slane %v5098_v56, %v19170_v6  ;;  %v5739_v51 = vcombine.high %v5731_v10, %v5731_v10  ;;  %v5889_v60 = vcombine.low %v5722_v52, %v5731_v10  ;;  %v4971_v62 = vrot.slane %v4805_v44, %v19170_v6  ;;  %8721 = vmatprep.mubr.f32.mxu1 %v8352_v50  ;;  %v7929_v5 = vpop.permute.xlu0 %7928  ;;  %v4807_v52 = vld [vmem:[#allocation2 + $0x68] sm:$0x3f] }
 0x24b   :  { %5970 = vst.msk [vmem:[#allocation3 + $0xa8] sm:$0xff] %vm131_vm0, %v5888_v31  ;;  %v4962_v61 = vrot.slane %v4948_v53, %v19170_v6  ;;  %v4963_v16 = vcombine.high %v4955_v48, %v4955_v48  ;;  %v5740_v27 = vcombine.high %v5596_v13, %v5596_v13  ;;  %v5747_v57 = vrot.slane %v5596_v13, %v19170_v6  ;;  %v8464_v31 = vld [vmem:[%s21932_s2 + $0x220] sm:$0xff] }
 0x24c   :  { %v5113_v37 = vcombine.low %v5105_v54, %v5112_v26  ;;  %v5890_v3 = vcombine.low %v5739_v51, %v5738_v35  ;;  %v5897_v32 = vrot.slane %v5889_v60, %v19170_v6  ;;  %v5763_v0 = vrot.slane %v5597_v18, %v19170_v6  ;;  %8722 = vmatmul.mubr.f32.vlgmr.msra.gmra.mxu1 %v8351_v40  ;;  %v5599_v40 = vld [vmem:[#allocation2 + $0x6a] sm:$0x3f] }
 0x24d   :  { %v5114_v34 = vcombine.low %v4955_v48, %v4963_v16  ;;  %v5115_v43 = vcombine.low %v4962_v61, %v4971_v62  ;;  %v5754_v42 = vrot.slane %v5740_v27, %v19170_v6  ;;  %v5755_v55 = vcombine.high %v5747_v57, %v5747_v57  ;;  %7955 = vst.msk [vmem:[#allocation3 + $0x18] sm:$0xff] %vm1161_vm2, %v7929_v5 }
 0x24e   :  { %17799 = vmatpush3.msra.mxu1 %v8467_v59  ;;  %5179 = vst.msk [vmem:[#allocation3 + $0xc8] sm:$0xff] %vm131_vm0, %v5113_v37  ;;  %v5904_v41 = vrot.slane %v5890_v3, %v19170_v6  ;;  %v4964_v49 = vcombine.high %v4805_v44, %v4805_v44  ;;  %v4979_v33 = vcombine.high %v4971_v62, %v4971_v62  ;;  %v8463_v59 = vld [vmem:[%s21932_s2 + $0x218] sm:$0xff] }
 0x24f   :  { %v4987_v20 = vrot.slane %v20910_v39, %v19170_v6  ;;  %17800 = vmatprep.subr.mxu1 %v19077_v1  ;;  %v5122_v29 = vrot.slane %v5114_v34, %v19170_v6  ;;  %v5129_v47 = vrot.slane %v5115_v43, %v19170_v6  ;;  %v5906_v58 = vcombine.low %v5747_v57, %v5755_v55  ;;  %v6382_v55 = vld [vmem:[#allocation2 + $0x19] sm:$0x3f] }
 0x250   :  { %v5907_v30 = vcombine.low %v5754_v42, %v5763_v0  ;;  %17801 = vmatpush3.msra.mxu1 %v8466_v63  ;;  %v5905_v36 = vcombine.low %v5897_v32, %v5904_v41  ;;  %v4978_v28 = vrot.slane %v4964_v49, %v19170_v6  ;;  %v5756_v56 = vcombine.high %v5597_v18, %v5597_v18  ;;  %v8353_v63 = vld [vmem:[#allocation3 + $0x10] sm:$0xff] }
 0x251   :  { %v4995_v44 = vcombine.high %v4987_v20, %v4987_v20  ;;  %17802 = vmatprep.subr.mxu1 %v19077_v1  ;;  %v5130_v10 = vcombine.low %v5122_v29, %v5129_v47  ;;  %v5914_v35 = vrot.slane %v5906_v58, %v19170_v6  ;;  %v5771_v54 = vcombine.high %v5763_v0, %v5763_v0  ;;  %v8462_v41 = vld [vmem:[%s21932_s2 + $0x210] sm:$0xff] }
 0x252   :  { %v5921_v13 = vrot.slane %v5907_v30, %v19170_v6  ;;  %5971 = vst.msk [vmem:[#allocation3 + $0xd0] sm:$0xff] %vm131_vm0, %v5905_v36  ;;  %17803 = vmatpush3.msra.mxu1 %v8465_v2  ;;  %v5131_v53 = vcombine.low %v4979_v33, %v4978_v28  ;;  %v5770_v18 = vrot.slane %v5756_v56, %v19170_v6 }
 0x253   :  { %v5132_v48 = vcombine.low %v4987_v20, %v4995_v44  ;;  %v5779_v26 = vrot.slane %v5598_v17, %v19170_v6  ;;  %5180 = vst.msk [vmem:[#allocation3 + $0xf0] sm:$0xff] %vm131_vm0, %v5130_v10  ;;  %17804 = vmatprep.subr.mxu1 %v19077_v1  ;;  %v4980_v60 = vcombine.high %v20910_v39, %v20910_v39  ;;  %v5555_v37 = vpop.permute.xlu1 %5554 }
 0x254   :  { %v5922_v51 = vcombine.low %v5914_v35, %v5921_v13  ;;  %v4996_v62 = vcombine.high %v4807_v52, %v4807_v52  ;;  %v5003_v50 = vrot.slane %v4807_v52, %v19170_v6  ;;  %v5139_v61 = vrot.slane %v5131_v53, %v19170_v6  ;;  %17805 = vmatpush3.msra.mxu1 %v8464_v31  ;;  %v8354_v3 = vld [vmem:[#allocation3 + $0x18] sm:$0xff]  ;;  %v6383_v31 = vld [vmem:[#allocation2 + $0x21] sm:$0x3f] }
 0x255   :  { %v5146_v16 = vrot.slane %v5132_v48, %v19170_v6  ;;  %v5787_v27 = vcombine.high %v5779_v26, %v5779_v26  ;;  %v5923_v57 = vcombine.low %v5771_v54, %v5770_v18  ;;  %v4994_v39 = vrot.slane %v4980_v60, %v19170_v6  ;;  %17806 = vmatprep.subr.mxu1 %v19077_v1  ;;  %v8460_v54 = vld [vmem:[%s21932_s2 + $0x200] sm:$0xff] }
 0x256   :  { %5972 = vst.msk [vmem:[#allocation3 + $0xf8] sm:$0xff] %vm131_vm0, %v5922_v51  ;;  %v5010_v32 = vrot.slane %v4996_v62, %v19170_v6  ;;  %v5011_v0 = vcombine.high %v5003_v50, %v5003_v50  ;;  %v5772_v5 = vcombine.high %v5598_v17, %v5598_v17  ;;  %8831 = vmatprep.mubr.f32.mxu0 %v8354_v3  ;;  %v8461_v17 = vld [vmem:[%s21932_s2 + $0x208] sm:$0xff] }
 0x257   :  { %5580 = vst.msk [vmem:[#allocation3 + $0x28] sm:$0xff] %vm1161_vm2, %v5555_v37  ;;  %v5147_v34 = vcombine.low %v5139_v61, %v5146_v16  ;;  %v5924_v43 = vcombine.low %v5779_v26, %v5787_v27  ;;  %v5931_v42 = vrot.slane %v5923_v57, %v19170_v6  ;;  %17807 = vmatpush3.msra.mxu1 %v8463_v59  ;;  %v7175_v3 = vld [vmem:[#allocation2 + $0x28] sm:$0x3f] }
 0x258   :  { %8832 = vmatmul.mubr.f32.vlgmr.msra.gmra.mxu0 %v8353_v63  ;;  %v5148_v49 = vcombine.low %v4994_v39, %v5003_v50  ;;  %v5149_v33 = vcombine.low %v5011_v0, %v5010_v32  ;;  %v5786_v20 = vrot.slane %v5772_v5, %v19170_v6  ;;  %v5788_v29 = vcombine.high %v5599_v40, %v5599_v40  ;;  %v6347_v36 = vpop.permute.xlu0 %6346 }
 0x259   :  { %5181 = vst.msk [vmem:[#allocation3 + $0x118] sm:$0xff] %vm131_vm0, %v5147_v34  ;;  %v5938_v47 = vrot.slane %v5924_v43, %v19170_v6  ;;  %v5795_v2 = vrot.slane %v5599_v40, %v19170_v6  ;;  %v6420_v58 = vcombine.high %v20796_v23, %v20796_v23  ;;  %v6435_v30 = vcombine.high %v20808_v46, %v20808_v46  ;;  %v7174_v23 = vld [vmem:[#allocation2 + $0x20] sm:$0x3f] }
 0x25a   :  { %17808 = vmatprep.subr.mxu1 %v19077_v1  ;;  %v5156_v28 = vrot.slane %v5148_v49, %v19170_v6  ;;  %v5163_v44 = vrot.slane %v5149_v33, %v19170_v6  ;;  %v5802_v56 = vrot.slane %v5788_v29, %v19170_v6  ;;  %v6443_v52 = vrot.slane %v6382_v55, %v19170_v6  ;;  %v6384_v49 = vld [vmem:[#allocation2 + $0x29] sm:$0x3f] }
 0x25b   :  { %17809 = vmatpush3.msra.mxu1 %v8462_v41  ;;  %6372 = vst.msk [vmem:[#allocation3 + $0x30] sm:$0xff] %vm1161_vm2, %v6347_v36  ;;  %v5939_v46 = vcombine.low %v5931_v42, %v5938_v47  ;;  %v5803_v10 = vcombine.high %v5795_v2, %v5795_v2  ;;  %v5940_v35 = vcombine.low %v5786_v20, %v5795_v2  ;;  %v5557_v51 = vpop.permute.xlu1 %5556 }
 0x25c   :  { %v6434_v13 = vrot.slane %v6420_v58, %v19170_v6  ;;  %17810 = vmatprep.subr.mxu1 %v19077_v1  ;;  %v5164_v53 = vcombine.low %v5156_v28, %v5163_v44  ;;  %v6451_v48 = vcombine.high %v6443_v52, %v6443_v52  ;;  %v7212_v18 = vcombine.high %v20813_v38, %v20813_v38  ;;  %v6385_v44 = vld [vmem:[#allocation2 + $0x31] sm:$0x3f] }
 0x25d   :  { %v7227_v26 = vcombine.high %v20828_v45, %v20828_v45  ;;  %17811 = vmatpush3.msra.mxu1 %v8461_v17  ;;  %5973 = vst.msk [vmem:[#allocation3 + $0x120] sm:$0xff] %vm131_vm0, %v5939_v46  ;;  %v5941_v60 = vcombine.low %v5803_v10, %v5802_v56  ;;  %v5948_v62 = vrot.slane %v5940_v35, %v19170_v6  ;;  %v7176_v56 = vld [vmem:[#allocation2 + $0x30] sm:$0x3f] }
 0x25e   :  { %v6613_v50 = vcombine.low %v6435_v30, %v6434_v13  ;;  %v7235_v59 = vrot.slane %v7174_v23, %v19170_v6  ;;  %17812 = vmatprep.subr.mxu1 %v19077_v1  ;;  %5581 = vst.msk [vmem:[#allocation3 + $0x50] sm:$0xff] %vm1161_vm2, %v5557_v51  ;;  %v6614_v38 = vcombine.low %v6443_v52, %v6451_v48  ;;  %v6349_v39 = vpop.permute.xlu0 %6348  ;;  %v8356_v58 = vld [vmem:[#allocation3 + $0x28] sm:$0xff]  ;;  %v21010_v48 = vld [vmem:[#allocation2 + $0x38] sm:$0x3f] }
 0x25f   :  { %5182 = vst.msk [vmem:[#allocation3 + $0x140] sm:$0xff] %vm131_vm0, %v5164_v53  ;;  %v7226_v61 = vrot.slane %v7212_v18, %v19170_v6  ;;  %v6436_v45 = vcombine.high %v6382_v55, %v6382_v55  ;;  %v6452_v16 = vcombine.high %v6383_v31, %v6383_v31  ;;  %17813 = vmatpush3.msra.mxu1 %v8460_v54  ;;  %v5559_v34 = vpop.permute.xlu1 %5558 }
 0x260   :  { %v5955_v27 = vrot.slane %v5941_v60, %v19170_v6  ;;  %v6621_v57 = vrot.slane %v6613_v50, %v19170_v6  ;;  %v7243_v40 = vcombine.high %v7235_v59, %v7235_v59  ;;  %v6459_v37 = vrot.slane %v6383_v31, %v19170_v6  ;;  %6373 = vst.msk [vmem:[#allocation3 + $0x58] sm:$0xff] %vm1161_vm2, %v6349_v39  ;;  %v7964_v39 = vld [vmem:[#allocation2 + $0x12] sm:$0x3f] }
 0x261   :  { %v6628_v32 = vrot.slane %v6614_v38, %v19170_v6  ;;  %v7405_v0 = vcombine.low %v7227_v26, %v7226_v61  ;;  %v6450_v5 = vrot.slane %v6436_v45, %v19170_v6  ;;  %v6466_v63 = vrot.slane %v6452_v16, %v19170_v6  ;;  %5582 = vst.msk [vmem:[#allocation3 + $0x78] sm:$0xff] %vm1161_vm2, %v5559_v34  ;;  %v21018_v45 = vld [vmem:[#allocation2 + $0x49] sm:$0x3f] }
 0x262   :  { %v5956_v43 = vcombine.low %v5948_v62, %v5955_v27  ;;  %v7406_v42 = vcombine.low %v7235_v59, %v7243_v40  ;;  %v6467_v55 = vcombine.high %v6459_v37, %v6459_v37  ;;  %v7228_v41 = vcombine.high %v7174_v23, %v7174_v23  ;;  %v8357_v33 = vld [vmem:[#allocation3 + $0x30] sm:$0xff]  ;;  %v6351_v52 = vpop.permute.xlu0 %6350 }
 0x263   :  { %v6629_v20 = vcombine.low %v6621_v57, %v6628_v32  ;;  %v7413_v29 = vrot.slane %v7405_v0, %v19170_v6  ;;  %v6630_v47 = vcombine.low %v6450_v5, %v6459_v37  ;;  %v7244_v2 = vcombine.high %v7175_v3, %v7175_v3  ;;  %8726 = vmatprep.mubr.f32.mxu1 %v8357_v33  ;;  %v21033_v33 = vld [vmem:[#allocation2 + $0x1a] sm:$0x3f] }
 0x264   :  { %5974 = vst.msk [vmem:[#allocation3 + $0x148] sm:$0xff] %vm131_vm0, %v5956_v43  ;;  %v7420_v30 = vrot.slane %v7406_v42, %v19170_v6  ;;  %v6631_v17 = vcombine.low %v6467_v55, %v6466_v63  ;;  %v7242_v36 = vrot.slane %v7228_v41, %v19170_v6  ;;  %v7251_v28 = vrot.slane %v7175_v3, %v19170_v6  ;;  %v5561_v18 = vpop.permute.xlu1 %5560 }
 0x265   :  { %8727 = vmatmul.mubr.f32.gmra.mxu1 %v8356_v58  ;;  %6759 = vst.msk [vmem:[#allocation3 + $0x38] sm:$0xff] %vm131_vm0, %v6629_v20  ;;  %v6638_v23 = vrot.slane %v6630_v47, %v19170_v6  ;;  %v7258_v46 = vrot.slane %v7244_v2, %v19170_v6  ;;  %v6468_v10 = vcombine.high %v6384_v49, %v6384_v49  ;;  %v8361_v32 = vld [vmem:[#allocation3 + $0x50] sm:$0xff] }
 0x266   :  { %v6475_v35 = vrot.slane %v6384_v49, %v19170_v6  ;;  %6374 = vst.msk [vmem:[#allocation3 + $0x80] sm:$0xff] %vm1161_vm2, %v6351_v52  ;;  %v7421_v13 = vcombine.low %v7413_v29, %v7420_v30  ;;  %v6645_v31 = vrot.slane %v6631_v17, %v19170_v6  ;;  %v7259_v54 = vcombine.high %v7251_v28, %v7251_v28  ;;  %v6353_v16 = vpop.permute.xlu0 %6352 }
 0x267   :  { %v7422_v53 = vcombine.low %v7242_v36, %v7251_v28  ;;  %v6482_v26 = vrot.slane %v6468_v10, %v19170_v6  ;;  %v6491_v60 = vrot.slane %v6385_v44, %v19170_v6  ;;  %v7260_v62 = vcombine.high %v7176_v56, %v7176_v56  ;;  %5583 = vst.msk [vmem:[#allocation3 + $0xa0] sm:$0xff] %vm1161_vm2, %v5561_v18  ;;  %v8362_v27 = vld [vmem:[#allocation3 + $0x58] sm:$0xff]  ;;  %v6387_v18 = vld [vmem:[#allocation2 + $0x51] sm:$0x3f] }
 0x268   :  { %v6483_v51 = vcombine.high %v6475_v35, %v6475_v35  ;;  %7551 = vst.msk [vmem:[#allocation3 + $0x40] sm:$0xff] %vm131_vm0, %v7421_v13  ;;  %v6646_v50 = vcombine.low %v6638_v23, %v6645_v31  ;;  %v7423_v59 = vcombine.low %v7259_v54, %v7258_v46  ;;  %v7267_v61 = vrot.slane %v7176_v56, %v19170_v6  ;;  %v5563_v43 = vpop.permute.xlu1 %5562  ;;  %v8366_v52 = vld [vmem:[#allocation3 + $0x78] sm:$0xff] }
 0x269   :  { %v7430_v38 = vrot.slane %v7422_v53, %v19170_v6  ;;  %v6648_v40 = vcombine.low %v6482_v26, %v6491_v60  ;;  %v7274_v37 = vrot.slane %v7260_v62, %v19170_v6  ;;  %v21023_v3 = vrot.slane %v21010_v48, %v19170_v6  ;;  %6375 = vst.msk [vmem:[#allocation3 + $0xa8] sm:$0xff] %vm1161_vm2, %v6353_v16 }
 0x26a   :  { %v6647_v57 = vcombine.low %v6475_v35, %v6483_v51  ;;  %8731 = vmatprep.mubr.f32.mxu1 %v8362_v27  ;;  %6760 = vst.msk [vmem:[#allocation3 + $0x60] sm:$0xff] %vm131_vm0, %v6646_v50  ;;  %v7437_v0 = vrot.slane %v7423_v59, %v19170_v6  ;;  %v7275_v5 = vcombine.high %v7267_v61, %v7267_v61 }
 0x26b   :  { %v6484_v63 = vcombine.high %v6385_v44, %v6385_v44  ;;  %v6499_v34 = vcombine.high %v6491_v60, %v6491_v60  ;;  %8732 = vmatmul.mubr.f32.gmra.mxu1 %v8361_v32  ;;  %v6662_v55 = vrot.slane %v6648_v40, %v19170_v6  ;;  %v7440_v41 = vcombine.low %v7274_v37, %v21023_v3  ;;  %v21039_v44 = vld [vmem:[#allocation2 + $0x50] sm:$0x3f]  ;;  %v6355_v56 = vpop.permute.xlu0 %6354 }
 0x26c   :  { %v6655_v42 = vrot.slane %v6647_v57, %v19170_v6  ;;  %v6507_v49 = vrot.slane %v21018_v45, %v19170_v6  ;;  %5584 = vst.msk [vmem:[#allocation3 + $0xc8] sm:$0xff] %vm1161_vm2, %v5563_v43  ;;  %v7438_v20 = vcombine.low %v7430_v38, %v7437_v0  ;;  %v7439_v29 = vcombine.low %v7267_v61, %v7275_v5 }
 0x26d   :  { %v6498_v47 = vrot.slane %v6484_v63, %v19170_v6  ;;  %v7988_v2 = vcombine.high %v7964_v39, %v7964_v39  ;;  %v8367_v58 = vld [vmem:[#allocation3 + $0x80] sm:$0xff]  ;;  %v7454_v17 = vrot.slane %v7440_v41, %v19170_v6  ;;  %v7995_v28 = vrot.slane %v7964_v39, %v19170_v6  ;;  %6376 = vst.msk [vmem:[#allocation3 + $0xd0] sm:$0xff] %vm1161_vm2, %v6355_v56  ;;  %v7179_v41 = vld [vmem:[#allocation2 + $0x58] sm:$0x3f] }
 0x26e   :  { %v6663_v30 = vcombine.low %v6655_v42, %v6662_v55  ;;  %v6515_v36 = vcombine.high %v6507_v49, %v6507_v49  ;;  %8736 = vmatprep.mubr.f32.mxu1 %v8367_v58  ;;  %7552 = vst.msk [vmem:[#allocation3 + $0x68] sm:$0xff] %vm131_vm0, %v7438_v20  ;;  %v7447_v23 = vrot.slane %v7439_v29, %v19170_v6  ;;  %v5565_v50 = vpop.permute.xlu1 %5564  ;;  %v8371_v27 = vld [vmem:[#allocation3 + $0xa0] sm:$0xff] }
 0x26f   :  { %v6664_v46 = vcombine.low %v6499_v34, %v6498_v47  ;;  %v8002_v10 = vrot.slane %v7988_v2, %v19170_v6  ;;  %v21046_v35 = vrot.slane %v21033_v33, %v19170_v6  ;;  %8737 = vmatmul.mubr.f32.gmra.mxu1 %v8366_v52  ;;  %v8003_v31 = vcombine.high %v7995_v28, %v7995_v28  ;;  %v21068_v63 = vld [vmem:[#allocation2 + $0x22] sm:$0x3f] }
 0x270   :  { %6761 = vst.msk [vmem:[#allocation3 + $0x88] sm:$0xff] %vm131_vm0, %v6663_v30  ;;  %v6665_v13 = vcombine.low %v6507_v49, %v6515_v36  ;;  %v7276_v54 = vcombine.high %v21010_v48, %v21010_v48  ;;  %v7291_v53 = vcombine.high %v21023_v3, %v21023_v3  ;;  %v7455_v26 = vcombine.low %v7447_v23, %v7454_v17  ;;  %v8372_v59 = vld [vmem:[#allocation3 + $0xa8] sm:$0xff]  ;;  %v6357_v39 = vpop.permute.xlu0 %6356 }
 0x271   :  { %v6672_v51 = vrot.slane %v6664_v46, %v19170_v6  ;;  %v8181_v60 = vcombine.low %v8002_v10, %v21046_v35  ;;  %v7299_v62 = vrot.slane %v21039_v44, %v19170_v6  ;;  %v8180_v61 = vcombine.low %v7995_v28, %v8003_v31  ;;  %5585 = vst.msk [vmem:[#allocation3 + $0xf0] sm:$0xff] %vm1161_vm2, %v5565_v50  ;;  %v6388_v28 = vld [vmem:[#allocation2 + $0x59] sm:$0x3f] }
 0x272   :  { %v6679_v38 = vrot.slane %v6665_v13, %v19170_v6  ;;  %v7290_v16 = vrot.slane %v7276_v54, %v19170_v6  ;;  %v6500_v48 = vcombine.high %v21018_v45, %v21018_v45  ;;  %8741 = vmatprep.mubr.f32.mxu1 %v8372_v59  ;;  %7553 = vst.msk [vmem:[#allocation3 + $0x90] sm:$0xff] %vm131_vm0, %v7455_v26  ;;  %v5567_v49 = vpop.permute.xlu1 %5566 }
 0x273   :  { %v8195_v57 = vrot.slane %v8181_v60, %v19170_v6  ;;  %v7307_v40 = vcombine.high %v7299_v62, %v7299_v62  ;;  %v6516_v37 = vcombine.high %v6387_v18, %v6387_v18  ;;  %v6523_v3 = vrot.slane %v6387_v18, %v19170_v6  ;;  %8742 = vmatmul.mubr.f32.gmra.mxu1 %v8371_v27  ;;  %v8376_v56 = vld [vmem:[#allocation3 + $0xc8] sm:$0xff]  ;;  %v21089_v18 = vld [vmem:[#allocation2 + $0x61] sm:$0x3f] }
 0x274   :  { %v6680_v32 = vcombine.low %v6672_v51, %v6679_v38  ;;  %v8188_v0 = vrot.slane %v8180_v61, %v19170_v6  ;;  %v7456_v5 = vcombine.low %v7291_v53, %v7290_v16  ;;  %v6514_v45 = vrot.slane %v6500_v48, %v19170_v6  ;;  %6377 = vst.msk [vmem:[#allocation3 + $0xf8] sm:$0xff] %vm1161_vm2, %v6357_v39  ;;  %v8377_v58 = vld [vmem:[#allocation3 + $0xd0] sm:$0xff] }
 0x275   :  { %v7457_v34 = vcombine.low %v7299_v62, %v7307_v40  ;;  %v6530_v43 = vrot.slane %v6516_v37, %v19170_v6  ;;  %v6531_v42 = vcombine.high %v6523_v3, %v6523_v3  ;;  %v8004_v55 = vcombine.high %v21033_v33, %v21033_v33  ;;  %5586 = vst.msk [vmem:[#allocation3 + $0x118] sm:$0xff] %vm1161_vm2, %v5567_v49  ;;  %v7967_v62 = vld [vmem:[#allocation2 + $0x2a] sm:$0x3f] }
 0x276   :  { %6762 = vst.msk [vmem:[#allocation3 + $0xb0] sm:$0xff] %vm131_vm0, %v6680_v32  ;;  %v8196_v20 = vcombine.low %v8188_v0, %v8195_v57  ;;  %v7464_v29 = vrot.slane %v7456_v5, %v19170_v6  ;;  %v6681_v47 = vcombine.low %v6514_v45, %v6523_v3  ;;  %v8019_v2 = vcombine.high %v21046_v35, %v21046_v35  ;;  %v6359_v35 = vpop.permute.xlu0 %6358  ;;  %v7180_v45 = vld [vmem:[#allocation2 + $0x60] sm:$0x3f] }
 0x277   :  { %v7471_v30 = vrot.slane %v7457_v34, %v19170_v6  ;;  %v6682_v17 = vcombine.low %v6531_v42, %v6530_v43  ;;  %v8018_v36 = vrot.slane %v8004_v55, %v19170_v6  ;;  %v8027_v33 = vrot.slane %v21068_v63, %v19170_v6  ;;  %8746 = vmatprep.mubr.f32.mxu1 %v8377_v58 }
 0x278   :  { %8342 = vst.msk [vmem:[#allocation3 + $0x20] sm:$0xff] %vm131_vm0, %v8196_v20  ;;  %v6689_v52 = vrot.slane %v6681_v47, %v19170_v6  ;;  %v7292_v23 = vcombine.high %v21039_v44, %v21039_v44  ;;  %v7308_v46 = vcombine.high %v7179_v41, %v7179_v41  ;;  %v7315_v10 = vrot.slane %v7179_v41, %v19170_v6  ;;  %v5569_v16 = vpop.permute.xlu1 %5568  ;;  %v8381_v3 = vld [vmem:[#allocation3 + $0xf0] sm:$0xff]  ;;  %v21111_v41 = vld [vmem:[#allocation2 + $0x68] sm:$0x3f] }
 0x279   :  { %8747 = vmatmul.mubr.f32.gmra.mxu1 %v8376_v56  ;;  %v7472_v13 = vcombine.low %v7464_v29, %v7471_v30  ;;  %v6696_v31 = vrot.slane %v6682_v17, %v19170_v6  ;;  %v8035_v54 = vcombine.high %v8027_v33, %v8027_v33  ;;  %v8197_v53 = vcombine.low %v8019_v2, %v8018_v36  ;;  %v21117_v36 = vld [vmem:[#allocation2 + $0x69] sm:$0x3f] }
 0x27a   :  { %6378 = vst.msk [vmem:[#allocation3 + $0x120] sm:$0xff] %vm1161_vm2, %v6359_v35  ;;  %v7306_v26 = vrot.slane %v7292_v23, %v19170_v6  ;;  %v7322_v51 = vrot.slane %v7308_v46, %v19170_v6  ;;  %v7323_v60 = vcombine.high %v7315_v10, %v7315_v10  ;;  %v6532_v44 = vcombine.high %v6388_v28, %v6388_v28  ;;  %v7968_v46 = vld [vmem:[#allocation2 + $0x32] sm:$0x3f] }
 0x27b   :  { %7554 = vst.msk [vmem:[#allocation3 + $0xb8] sm:$0xff] %vm131_vm0, %v7472_v13  ;;  %v6697_v50 = vcombine.low %v6689_v52, %v6696_v31  ;;  %v8198_v59 = vcombine.low %v8027_v33, %v8035_v54  ;;  %v8205_v38 = vrot.slane %v8197_v53, %v19170_v6  ;;  %v6539_v61 = vrot.slane %v6388_v28, %v19170_v6  ;;  %v8382_v48 = vld [vmem:[#allocation3 + $0xf8] sm:$0xff]  ;;  %v6361_v49 = vpop.permute.xlu0 %6360 }
 0x27c   :  { %v7473_v27 = vcombine.low %v7306_v26, %v7315_v10  ;;  %v7474_v57 = vcombine.low %v7323_v60, %v7322_v51  ;;  %v6546_v40 = vrot.slane %v6532_v44, %v19170_v6  ;;  %v21100_v37 = vrot.slane %v21089_v18, %v19170_v6  ;;  %5587 = vst.msk [vmem:[#allocation3 + $0x140] sm:$0xff] %vm1161_vm2, %v5569_v16  ;;  %v8386_v35 = vld [vmem:[#allocation3 + $0x118] sm:$0xff] }
 0x27d   :  { %8751 = vmatprep.mubr.f32.mxu1 %v8382_v48  ;;  %6763 = vst.msk [vmem:[#allocation3 + $0xd8] sm:$0xff] %vm131_vm0, %v6697_v50  ;;  %v8212_v39 = vrot.slane %v8198_v59, %v19170_v6  ;;  %v6547_v32 = vcombine.high %v6539_v61, %v6539_v61  ;;  %v8020_v0 = vcombine.high %v21068_v63, %v21068_v63  ;;  %v21132_v26 = vld [vmem:[#allocation2 + $0x3a] sm:$0x3f] }
 0x27e   :  { %v8036_v5 = vcombine.high %v7967_v62, %v7967_v62  ;;  %8752 = vmatmul.mubr.f32.gmra.mxu1 %v8381_v3  ;;  %v7481_v34 = vrot.slane %v7473_v27, %v19170_v6  ;;  %v7488_v43 = vrot.slane %v7474_v57, %v19170_v6  ;;  %v6699_v42 = vcombine.low %v6546_v40, %v21100_v37  ;;  %v7139_v10 = vpop.permute.xlu1 %7138  ;;  %v21148_v40 = vld [vmem:[#allocation2 + $0x70] sm:$0x3f] }
 0x27f   :  { %v8043_v55 = vrot.slane %v7967_v62, %v19170_v6  ;;  %v8213_v20 = vcombine.low %v8205_v38, %v8212_v39  ;;  %v6698_v29 = vcombine.low %v6539_v61, %v6547_v32  ;;  %v8034_v47 = vrot.slane %v8020_v0, %v19170_v6  ;;  %6379 = vst.msk [vmem:[#allocation3 + $0x148] sm:$0xff] %vm1161_vm2, %v6361_v49  ;;  %v7931_v51 = vpop.permute.xlu0 %7930 }
 0x280   :  { %v8050_v63 = vrot.slane %v8036_v5, %v19170_v6  ;;  %v7489_v2 = vcombine.low %v7481_v34, %v7488_v43  ;;  %v6713_v58 = vrot.slane %v6699_v42, %v19170_v6  ;;  %v7324_v17 = vcombine.high %v7180_v45, %v7180_v45  ;;  %7164 = vst.msk [vmem:[#allocation3 + $0x38] sm:$0xff] %vm1161_vm2, %v7139_v10 }
 0x281   :  { %v8051_v30 = vcombine.high %v8043_v55, %v8043_v55  ;;  %v8387_v33 = vld [vmem:[#allocation3 + $0x120] sm:$0xff]  ;;  %8343 = vst.msk [vmem:[#allocation3 + $0x48] sm:$0xff] %vm131_vm0, %v8213_v20  ;;  %v6706_v28 = vrot.slane %v6698_v29, %v19170_v6  ;;  %v8214_v56 = vcombine.low %v8034_v47, %v8043_v55  ;;  %v7331_v52 = vrot.slane %v7180_v45, %v19170_v6  ;;  %v6391_v55 = vld [vmem:[#allocation2 + $0x71] sm:$0x3f] }
 0x282   :  { %v21124_v23 = vrot.slane %v21111_v41, %v19170_v6  ;;  %8756 = vmatprep.mubr.f32.mxu1 %v8387_v33  ;;  %7555 = vst.msk [vmem:[#allocation3 + $0xe0] sm:$0xff] %vm131_vm0, %v7489_v2  ;;  %v7338_v31 = vrot.slane %v7324_v17, %v19170_v6  ;;  %v6548_v54 = vcombine.high %v21089_v18, %v21089_v18 }
 0x283   :  { %v8215_v13 = vcombine.low %v8051_v30, %v8050_v63  ;;  %v6563_v53 = vcombine.high %v21100_v37, %v21100_v37  ;;  %8757 = vmatmul.mubr.f32.gmra.mxu1 %v8386_v35  ;;  %v6714_v60 = vcombine.low %v6706_v28, %v6713_v58  ;;  %v8222_v44 = vrot.slane %v8214_v56, %v19170_v6  ;;  %v7141_v37 = vpop.permute.xlu1 %7140  ;;  %v8391_v49 = vld [vmem:[#allocation3 + $0x140] sm:$0xff] }
 0x284   :  { %v7339_v62 = vcombine.high %v7331_v52, %v7331_v52  ;;  %v6571_v50 = vrot.slane %v21117_v36, %v19170_v6  ;;  %7956 = vst.msk [vmem:[#allocation3 + $0x40] sm:$0xff] %vm1161_vm2, %v7931_v51  ;;  %v7491_v59 = vcombine.low %v7338_v31, %v21124_v23  ;;  %v6562_v38 = vrot.slane %v6548_v54, %v19170_v6  ;;  %v7970_v31 = vld [vmem:[#allocation2 + $0x52] sm:$0x3f]  ;;  %v8355_v51 = vld [vmem:[#allocation3 + $0x20] sm:$0xff] }
 0x285   :  { %v8229_v18 = vrot.slane %v8215_v13, %v19170_v6  ;;  %v8052_v61 = vcombine.high %v7968_v46, %v7968_v46  ;;  %6764 = vst.msk [vmem:[#allocation3 + $0x100] sm:$0xff] %vm131_vm0, %v6714_v60  ;;  %v8059_v27 = vrot.slane %v7968_v46, %v19170_v6  ;;  %v21146_v57 = vrot.slane %v21132_v26, %v19170_v6  ;;  %v7933_v2 = vpop.permute.xlu0 %7932 }
 0x286   :  { %v7490_v16 = vcombine.low %v7331_v52, %v7339_v62  ;;  %v6579_v48 = vcombine.high %v6571_v50, %v6571_v50  ;;  %v7505_v39 = vrot.slane %v7491_v59, %v19170_v6  ;;  %v6715_v32 = vcombine.low %v6563_v53, %v6562_v38  ;;  %7165 = vst.msk [vmem:[#allocation3 + $0x60] sm:$0xff] %vm1161_vm2, %v7141_v37  ;;  %v8392_v5 = vld [vmem:[#allocation3 + $0x148] sm:$0xff] }
 0x287   :  { %v8230_v3 = vcombine.low %v8222_v44, %v8229_v18  ;;  %v8066_v0 = vrot.slane %v8052_v61, %v19170_v6  ;;  %v8067_v43 = vcombine.high %v8059_v27, %v8059_v27  ;;  %v7340_v42 = vcombine.high %v21111_v41, %v21111_v41  ;;  %8761 = vmatprep.mubr.f32.mxu1 %v8392_v5  ;;  %v8358_v53 = vld [vmem:[#allocation3 + $0x38] sm:$0xff] }
 0x288   :  { %v7498_v45 = vrot.slane %v7490_v16, %v19170_v6  ;;  %v6716_v34 = vcombine.low %v6571_v50, %v6579_v48  ;;  %v6723_v20 = vrot.slane %v6715_v32, %v19170_v6  ;;  %v7355_v47 = vcombine.high %v21124_v23, %v21124_v23  ;;  %8762 = vmatmul.mubr.f32.gmra.mxu1 %v8391_v49  ;;  %v7143_v54 = vpop.permute.xlu1 %7142  ;;  %v7183_v50 = vld [vmem:[#allocation2 + $0x78] sm:$0x3f]  ;;  %v8360_v5 = vld [vmem:[#allocation3 + $0x48] sm:$0xff] }
 0x289   :  { %8344 = vst.msk [vmem:[#allocation3 + $0x70] sm:$0xff] %vm131_vm0, %v8230_v3  ;;  %v8232_v29 = vcombine.low %v8066_v0, %v21146_v57  ;;  %v7363_v63 = vrot.slane %v21148_v40, %v19170_v6  ;;  %v8231_v30 = vcombine.low %v8059_v27, %v8067_v43  ;;  %v7354_v17 = vrot.slane %v7340_v42, %v19170_v6  ;;  %v7935_v18 = vpop.permute.xlu0 %7934 }
 0x28a   :  { %v7506_v58 = vcombine.low %v7498_v45, %v7505_v39  ;;  %v6730_v41 = vrot.slane %v6716_v34, %v19170_v6  ;;  %7957 = vst.msk [vmem:[#allocation3 + $0x68] sm:$0xff] %vm1161_vm2, %v7933_v2  ;;  %17814 = vmatprep.mubr.msk.f32.mxu1 %vm19080_vm3, %v19077_v1  ;;  %v6564_v56 = vcombine.high %v21117_v36, %v21117_v36  ;;  %7166 = vst.msk [vmem:[#allocation3 + $0x88] sm:$0xff] %vm1161_vm2, %v7143_v54 }
 0x28b   :  { %v8246_v33 = vrot.slane %v8232_v29, %v19170_v6  ;;  %v7371_v28 = vcombine.high %v7363_v63, %v7363_v63  ;;  %v6580_v52 = vcombine.high %v6391_v55, %v6391_v55  ;;  %v8359_v23 = vld [vmem:[#allocation3 + $0x40] sm:$0xff]  ;;  %v8239_v10 = vrot.slane %v8231_v30, %v19170_v6  ;;  %7958 = vst.msk [vmem:[#allocation3 + $0x90] sm:$0xff] %vm1161_vm2, %v7935_v18 }
 0x28c   :  { %7556 = vst.msk [vmem:[#allocation3 + $0x108] sm:$0xff] %vm131_vm0, %v7506_v58  ;;  %v6731_v46 = vcombine.low %v6723_v20, %v6730_v41  ;;  %v7507_v35 = vcombine.low %v7355_v47, %v7354_v17  ;;  %v6587_v13 = vrot.slane %v6391_v55, %v19170_v6  ;;  %8836 = vmatprep.mubr.f32.mxu0 %v8359_v23  ;;  %v7145_v0 = vpop.permute.xlu1 %7144  ;;  %v7971_v55 = vld [vmem:[#allocation2 + $0x5a] sm:$0x3f]  ;;  %v7972_v47 = vld [vmem:[#allocation2 + $0x62] sm:$0x3f] }
 0x28d   :  { %v7508_v60 = vcombine.low %v7363_v63, %v7371_v28  ;;  %v6578_v44 = vrot.slane %v6564_v56, %v19170_v6  ;;  %v6594_v36 = vrot.slane %v6580_v52, %v19170_v6  ;;  %v8068_v62 = vcombine.high %v21132_v26, %v21132_v26  ;;  %8837 = vmatmul.mubr.f32.gmra.mxu0 %v8358_v53  ;;  %v8363_v2 = vld [vmem:[#allocation3 + $0x60] sm:$0xff] }
 0x28e   :  { %17815 = vmatmul.mubr.msk.f32.vlgmr.msra.gmra.mxu1 %vm131_vm0, %v8355_v51  ;;  %6765 = vst.msk [vmem:[#allocation3 + $0x128] sm:$0xff] %vm131_vm0, %v6731_v46  ;;  %v8247_v59 = vcombine.low %v8239_v10, %v8246_v33  ;;  %v7515_v38 = vrot.slane %v7507_v35, %v19170_v6  ;;  %v6595_v61 = vcombine.high %v6587_v13, %v6587_v13  ;;  %v7937_v63 = vpop.permute.xlu0 %7936  ;;  %v7973_v35 = vld [vmem:[#allocation2 + $0x6a] sm:$0x3f] }
 0x28f   :  { %17817 = vmatprep.mubr.msk.f32.mxu1 %vm19080_vm3, %v19077_v1  ;;  %v7522_v26 = vrot.slane %v7508_v60, %v19170_v6  ;;  %v6732_v16 = vcombine.low %v6578_v44, %v6587_v13  ;;  %v8082_v48 = vrot.slane %v8068_v62, %v19170_v6  ;;  %v8083_v27 = vcombine.high %v21146_v57, %v21146_v57 }
 0x290   :  { %8345 = vst.msk [vmem:[#allocation3 + $0x98] sm:$0xff] %vm131_vm0, %v8247_v59  ;;  %v6733_v37 = vcombine.low %v6595_v61, %v6594_v36  ;;  %v8091_v3 = vrot.slane %v7970_v31, %v19170_v6  ;;  %v7356_v39 = vcombine.high %v21148_v40, %v21148_v40  ;;  %v7372_v32 = vcombine.high %v7183_v50, %v7183_v50  ;;  %v8365_v52 = vld [vmem:[#allocation3 + $0x70] sm:$0xff] }
 0x291   :  { %v7523_v45 = vcombine.low %v7515_v38, %v7522_v26  ;;  %v6740_v34 = vrot.slane %v6732_v16, %v19170_v6  ;;  %v8248_v43 = vcombine.low %v8083_v27, %v8082_v48  ;;  %v7379_v42 = vrot.slane %v7183_v50, %v19170_v6  ;;  %7167 = vst.msk [vmem:[#allocation3 + $0xb0] sm:$0xff] %vm1161_vm2, %v7145_v0  ;;  %v8364_v57 = vld [vmem:[#allocation3 + $0x68] sm:$0xff]  ;;  %v7147_v54 = vpop.permute.xlu1 %7146  ;;  %v7974_v59 = vld [vmem:[#allocation2 + $0x72] sm:$0x3f]  ;;  %v7975_v27 = vld [vmem:[#allocation2 + $0x7a] sm:$0x3f] }
 0x292   :  { %17818 = vmatmul.mubr.msk.f32.gmra.mxu1 %vm131_vm0, %v8360_v5  ;;  %v6747_v49 = vrot.slane %v6733_v37, %v19170_v6  ;;  %v8099_v20 = vcombine.high %v8091_v3, %v8091_v3  ;;  %v7370_v40 = vrot.slane %v7356_v39, %v19170_v6  ;;  %v7386_v29 = vrot.slane %v7372_v32, %v19170_v6  ;;  %v8369_v53 = vld [vmem:[#allocation3 + $0x90] sm:$0xff]  ;;  %v8368_v36 = vld [vmem:[#allocation3 + $0x88] sm:$0xff] }
 0x293   :  { %8841 = vmatprep.mubr.f32.mxu0 %v8364_v57  ;;  %17820 = vmatprep.mubr.msk.f32.mxu1 %vm19080_vm3, %v19077_v1  ;;  %7557 = vst.msk [vmem:[#allocation3 + $0x130] sm:$0xff] %vm131_vm0, %v7523_v45  ;;  %v8256_v58 = vrot.slane %v8248_v43, %v19170_v6  ;;  %v7387_v41 = vcombine.high %v7379_v42, %v7379_v42  ;;  %v7939_v38 = vpop.permute.xlu0 %7938 }
 0x294   :  { %v8084_v30 = vcombine.high %v7970_v31, %v7970_v31  ;;  %7959 = vst.msk [vmem:[#allocation3 + $0xb8] sm:$0xff] %vm1161_vm2, %v7937_v63  ;;  %8842 = vmatmul.mubr.f32.gmra.mxu0 %v8363_v2  ;;  %v6748_v17 = vcombine.low %v6740_v34, %v6747_v49  ;;  %v8249_v33 = vcombine.low %v8091_v3, %v8099_v20  ;;  %7168 = vst.msk [vmem:[#allocation3 + $0xd8] sm:$0xff] %vm1161_vm2, %v7147_v54 }
 0x295   :  { %v7524_v28 = vcombine.low %v7370_v40, %v7379_v42  ;;  %v8100_v56 = vcombine.high %v7971_v55, %v7971_v55  ;;  %v7525_v23 = vcombine.low %v7387_v41, %v7386_v29  ;;  %v8107_v10 = vrot.slane %v7971_v55, %v19170_v6  ;;  %8846 = vmatprep.mubr.f32.mxu0 %v8369_v53  ;;  %v7149_v5 = vpop.permute.xlu1 %7148 }
 0x296   :  { %v8098_v46 = vrot.slane %v8084_v30, %v19170_v6  ;;  %v8116_v13 = vcombine.high %v7972_v47, %v7972_v47  ;;  %17821 = vmatmul.mubr.msk.f32.gmra.mxu1 %vm131_vm0, %v8365_v52  ;;  %6766 = vst.msk [vmem:[#allocation3 + $0x150] sm:$0xff] %vm131_vm0, %v6748_v17  ;;  %v8263_v31 = vrot.slane %v8249_v33, %v19170_v6 }
 0x297   :  { %v7532_v51 = vrot.slane %v7524_v28, %v19170_v6  ;;  %v8114_v60 = vrot.slane %v8100_v56, %v19170_v6  ;;  %v8123_v44 = vrot.slane %v7972_v47, %v19170_v6  ;;  %17823 = vmatprep.mubr.msk.f32.mxu1 %vm19080_vm3, %v19077_v1  ;;  %v7539_v62 = vrot.slane %v7525_v23, %v19170_v6  ;;  %v8370_v37 = vld [vmem:[#allocation3 + $0x98] sm:$0xff] }
 0x298   :  { %v8115_v50 = vcombine.high %v8107_v10, %v8107_v10  ;;  %v8265_v18 = vcombine.low %v8098_v46, %v8107_v10  ;;  %8847 = vmatmul.mubr.f32.gmra.mxu0 %v8368_v36  ;;  %v8264_v61 = vcombine.low %v8256_v58, %v8263_v31  ;;  %v8130_v26 = vrot.slane %v8116_v13, %v19170_v6  ;;  %v8373_v29 = vld [vmem:[#allocation3 + $0xb0] sm:$0xff]  ;;  %v7941_v41 = vpop.permute.xlu0 %7940 }
 0x299   :  { %v8131_v16 = vcombine.high %v8123_v44, %v8123_v44  ;;  %v8139_v48 = vrot.slane %v7973_v35, %v19170_v6  ;;  %7960 = vst.msk [vmem:[#allocation3 + $0xe0] sm:$0xff] %vm1161_vm2, %v7939_v38  ;;  %v7540_v3 = vcombine.low %v7532_v51, %v7539_v62  ;;  %v8132_v0 = vcombine.high %v7973_v35, %v7973_v35 }
 0x29a   :  { %v8266_v39 = vcombine.low %v8115_v50, %v8114_v60  ;;  %v8273_v32 = vrot.slane %v8265_v18, %v19170_v6  ;;  %17824 = vmatmul.mubr.msk.f32.gmra.mxu1 %vm131_vm0, %v8370_v37  ;;  %8346 = vst.msk [vmem:[#allocation3 + $0xc0] sm:$0xff] %vm131_vm0, %v8264_v61  ;;  %v8155_v42 = vrot.slane %v7974_v59, %v19170_v6 }
 0x29b   :  { %v8282_v45 = vcombine.low %v8123_v44, %v8131_v16  ;;  %v8283_v34 = vcombine.low %v8130_v26, %v8139_v48  ;;  %v8147_v43 = vcombine.high %v8139_v48, %v8139_v48  ;;  %7169 = vst.msk [vmem:[#allocation3 + $0x100] sm:$0xff] %vm1161_vm2, %v7149_v5  ;;  %v8374_v55 = vld [vmem:[#allocation3 + $0xb8] sm:$0xff]  ;;  %17826 = vmatprep.mubr.msk.f32.mxu1 %vm19080_vm3, %v19077_v1  ;;  %7961 = vst.msk [vmem:[#allocation3 + $0x108] sm:$0xff] %vm1161_vm2, %v7941_v41  ;;  %v7151_v10 = vpop.permute.xlu1 %7150 }
 0x29c   :  { %7558 = vst.msk [vmem:[#allocation3 + $0x158] sm:$0xff] %vm131_vm0, %v7540_v3  ;;  %v8280_v57 = vrot.slane %v8266_v39, %v19170_v6  ;;  %v8146_v49 = vrot.slane %v8132_v0, %v19170_v6  ;;  %v8148_v20 = vcombine.high %v7974_v59, %v7974_v59  ;;  %v8164_v40 = vcombine.high %v7975_v27, %v7975_v27  ;;  %v8378_v31 = vld [vmem:[#allocation3 + $0xd8] sm:$0xff] }
 0x29d   :  { %8851 = vmatprep.mubr.f32.mxu0 %v8374_v55  ;;  %v8290_v47 = vrot.slane %v8282_v45, %v19170_v6  ;;  %v8297_v63 = vrot.slane %v8283_v34, %v19170_v6  ;;  %v8163_v2 = vcombine.high %v8155_v42, %v8155_v42  ;;  %v8171_v58 = vrot.slane %v7975_v27, %v19170_v6  ;;  %v7943_v44 = vpop.permute.xlu0 %7942 }
 0x29e   :  { %8852 = vmatmul.mubr.f32.gmra.mxu0 %v8373_v29  ;;  %v8281_v30 = vcombine.low %v8273_v32, %v8280_v57  ;;  %v8299_v17 = vcombine.low %v8147_v43, %v8146_v49  ;;  %v8162_v33 = vrot.slane %v8148_v20, %v19170_v6  ;;  %v8178_v28 = vrot.slane %v8164_v40, %v19170_v6 }
 0x29f   :  { %v8298_v56 = vcombine.low %v8290_v47, %v8297_v63  ;;  %v8300_v52 = vcombine.low %v8155_v42, %v8163_v2  ;;  %v8179_v23 = vcombine.high %v8171_v58, %v8171_v58  ;;  %7170 = vst.msk [vmem:[#allocation3 + $0x128] sm:$0xff] %vm1161_vm2, %v7151_v10  ;;  %7962 = vst.msk [vmem:[#allocation3 + $0x130] sm:$0xff] %vm1161_vm2, %v7943_v44  ;;  %v7153_v50 = vpop.permute.xlu1 %7152 }
 0x2a0   :  { %8347 = vst.msk [vmem:[#allocation3 + $0xe8] sm:$0xff] %vm131_vm0, %v8281_v30  ;;  %v8316_v46 = vcombine.low %v8162_v33, %v8171_v58  ;;  %v8379_v35 = vld [vmem:[#allocation3 + $0xe0] sm:$0xff]  ;;  %v8307_v13 = vrot.slane %v8299_v17, %v19170_v6 }
 0x2a1   :  { %8348 = vst.msk [vmem:[#allocation3 + $0x110] sm:$0xff] %vm131_vm0, %v8298_v56  ;;  %v8314_v54 = vrot.slane %v8300_v52, %v19170_v6  ;;  %v8317_v53 = vcombine.low %v8179_v23, %v8178_v28  ;;  %8856 = vmatprep.mubr.f32.mxu0 %v8379_v35  ;;  %v8375_v51 = vld [vmem:[#allocation3 + $0xc0] sm:$0xff] }
 0x2a2   :  { %v8324_v60 = vrot.slane %v8316_v46, %v19170_v6  ;;  %8857 = vmatmul.mubr.f32.gmra.mxu0 %v8378_v31  ;;  %17827 = vmatmul.mubr.msk.f32.gmra.mxu1 %vm131_vm0, %v8375_v51  ;;  %7171 = vst.msk [vmem:[#allocation3 + $0x150] sm:$0xff] %vm1161_vm2, %v7153_v50  ;;  %v8384_v59 = vld [vmem:[#allocation3 + $0x108] sm:$0xff]  ;;  %v8383_v38 = vld [vmem:[#allocation3 + $0x100] sm:$0xff] }
 0x2a3   :  { %v8315_v36 = vcombine.low %v8307_v13, %v8314_v54  ;;  %v8331_v62 = vrot.slane %v8317_v53, %v19170_v6  ;;  %17829 = vmatprep.mubr.msk.f32.mxu1 %vm19080_vm3, %v19077_v1  ;;  %8861 = vmatprep.mubr.f32.mxu0 %v8384_v59 }
 0x2a4   :  { %v7945_v26 = vpop.permute.xlu0 %7944 }
 0x2a5   :  { %8349 = vst.msk [vmem:[#allocation3 + $0x138] sm:$0xff] %vm131_vm0, %v8315_v36  ;;  %v8332_v18 = vcombine.low %v8324_v60, %v8331_v62 }
 0x2a6   :  { %8862 = vmatmul.mubr.f32.gmra.mxu0 %v8383_v38  ;;  %7963 = vst.msk [vmem:[#allocation3 + $0x158] sm:$0xff] %vm1161_vm2, %v7945_v26  ;;  %v8389_v16 = vld [vmem:[#allocation3 + $0x130] sm:$0xff]  ;;  %v8388_v27 = vld [vmem:[#allocation3 + $0x128] sm:$0xff] }
 0x2a7   :  { %v8380_v61 = vld [vmem:[#allocation3 + $0xe8] sm:$0xff]  ;;  %8350 = vst.msk [vmem:[#allocation3 + $0x160] sm:$0xff] %vm131_vm0, %v8332_v18  ;;  %8866 = vmatprep.mubr.f32.mxu0 %v8389_v16 }
 0x2a8   :  { %17830 = vmatmul.mubr.msk.f32.gmra.mxu1 %vm131_vm0, %v8380_v61  ;;  %v8385_v48 = vld [vmem:[#allocation3 + $0x110] sm:$0xff] }
 0x2a9   :  { %17832 = vmatprep.mubr.msk.f32.mxu1 %vm19080_vm3, %v19077_v1  ;;  %v8393_v39 = vld [vmem:[#allocation3 + $0x150] sm:$0xff] }
 0x2aa   :  { %8867 = vmatmul.mubr.f32.gmra.mxu0 %v8388_v27 }
 0x2ac   :  { %17833 = vmatmul.mubr.msk.f32.gmra.mxu1 %vm131_vm0, %v8385_v48  ;;  %v8390_v37 = vld [vmem:[#allocation3 + $0x138] sm:$0xff] }
 0x2ad   :  { %17835 = vmatprep.mubr.msk.f32.mxu1 %vm19080_vm3, %v19077_v1  ;;  %v8394_v3 = vld [vmem:[#allocation3 + $0x158] sm:$0xff] }
 0x2ae   :  { %8871 = vmatprep.mubr.f32.mxu0 %v8394_v3  ;;  %v8395_v32 = vld [vmem:[#allocation3 + $0x160] sm:$0xff] }
 0x2af   :  { %8872 = vmatmul.mubr.f32.gmra.mxu0 %v8393_v39 }
 0x2b0   :  { %17836 = vmatmul.mubr.msk.f32.gmra.mxu1 %vm131_vm0, %v8390_v37 }
 0x2b1   :  { %17838 = vmatprep.mubr.msk.f32.mxu1 %vm19080_vm3, %v19077_v1 }
 0x2b4   :  { %17839 = vmatmul.mubr.msk.f32.gmra.mxu1 %vm131_vm0, %v8395_v32 }
 0x2b5   :  { %18921 = shalt.err (!%p18918_p0)  }
 0x2b6   :  { %60 = dma.hbm_to_vmem [thread:$0]  %s21933_s3, 12288, %s21264_s17, [#allocation6] }
 0x2b7   :  { %s75_s26 = scalar_lea.hbm %s21933_s3, 24576  ;;  %s18932_s27 = scalar_lea.vmem %s72_s19, 12288 }
 0x2b8   :  { %p18933_p1 = scmp.ne.s32.totalorder %s72_s19, %s18932_s27  ;;  %p18937_p2 = scmp.lt.s32.totalorder %s72_s19, %s21264_s17 }
 0x2b9   :  { %p18938_p3 = scmp.lt.s32.totalorder %s21269_s21, %s18932_s27 }
 0x2bb   :  { %p18939_p4 = por %p18938_p3, %p18937_p2 }
 0x2bd   :  { %p18940_p5 = pnand %p18939_p4, %p18933_p1 }
 0x2bf   :  { %18943 = shalt.err (!%p18940_p5)  }
 0x2c0   :  { %74 = dma.hbm_to_vmem [thread:$0]  %s61_s15, 12288, %s72_s19, [#allocation6 + $0x1] }
 0x2c1   :  { %s89_s29 = scalar_lea.hbm %s21933_s3, 36864  ;;  %s19083_s30 = smov [#allocation5 + $0x600]  }
 0x2c2   :  { %s85_s8 = sshll.u32 %s19083_s30, 4  ;;  %s19084_s9 = smov [#allocation5 + $0x900]   ;;  %s86_s8 = int_to_ptr.vmem [resolvable:$true] %s85_s8 }
 0x2c3   :  { %s99_s10 = sshll.u32 %s19084_s9, 4  ;;  %s18955_s11 = scalar_lea.vmem %s86_s8, 12288  ;;  %s100_s10 = int_to_ptr.vmem [resolvable:$true] %s99_s10 }
 0x2c4   :  { %p18956_p6 = scmp.ne.s32.totalorder %s86_s8, %s18955_s11  ;;  %p18960_p7 = scmp.lt.s32.totalorder %s86_s8, %s21264_s17 }
 0x2c5   :  { %p18961_p8 = scmp.lt.s32.totalorder %s21269_s21, %s18955_s11 }
 0x2c7   :  { %p18962_p9 = por %p18961_p8, %p18960_p7 }
 0x2c9   :  { %p18963_p10 = pnand %p18962_p9, %p18956_p6 }
 0x2cb   :  { %18966 = shalt.err (!%p18963_p10)  }
 0x2cc   :  { %88 = dma.hbm_to_vmem [thread:$0]  %s75_s26, 12288, %s86_s8, [#allocation6 + $0x2] }
 0x2cd   :  { %s103_s12 = scalar_lea.hbm %s21933_s3, 49152  ;;  %s18978_s0 = scalar_lea.vmem %s100_s10, 12288 }
 0x2ce   :  { %p18979_p11 = scmp.ne.s32.totalorder %s100_s10, %s18978_s0  ;;  %p18983_p12 = scmp.lt.s32.totalorder %s100_s10, %s21264_s17 }
 0x2cf   :  { %p18984_p13 = scmp.lt.s32.totalorder %s21269_s21, %s18978_s0 }
 0x2d1   :  { %p18985_p0 = por %p18984_p13, %p18983_p12 }
 0x2d3   :  { %p18986_p1 = pnand %p18985_p0, %p18979_p11 }
 0x2d5   :  { %18989 = shalt.err (!%p18986_p1)  }
 0x2d6   :  { %102 = dma.hbm_to_vmem [thread:$0]  %s89_s29, 12288, %s100_s10, [#allocation6 + $0x3] }
 0x2d7   :  { %s117_s14 = scalar_lea.hbm %s21933_s3, 61440  ;;  %s19085_s15 = smov [#allocation5 + $0xc00]  }
 0x2d8   :  { %s113_s16 = sshll.u32 %s19085_s15, 4  ;;  %s19086_s18 = smov [#allocation5 + $0xf00]   ;;  %s114_s16 = int_to_ptr.vmem [resolvable:$true] %s113_s16 }
 0x2d9   :  { %s127_s19 = sshll.u32 %s19086_s18, 4  ;;  %s19001_s20 = scalar_lea.vmem %s114_s16, 12288  ;;  %s128_s19 = int_to_ptr.vmem [resolvable:$true] %s127_s19 }
 0x2da   :  { %p19002_p2 = scmp.ne.s32.totalorder %s114_s16, %s19001_s20  ;;  %p19006_p3 = scmp.lt.s32.totalorder %s114_s16, %s21264_s17 }
 0x2db   :  { %p19007_p4 = scmp.lt.s32.totalorder %s21269_s21, %s19001_s20 }
 0x2dd   :  { %p19008_p5 = por %p19007_p4, %p19006_p3 }
 0x2df   :  { %p19009_p6 = pnand %p19008_p5, %p19002_p2 }
 0x2e1   :  { %19012 = shalt.err (!%p19009_p6)  }
 0x2e2   :  { %116 = dma.hbm_to_vmem [thread:$0]  %s103_s12, 12288, %s114_s16, [#allocation6 + $0x4] }
 0x2e3   :  { %s19024_s22 = scalar_lea.vmem %s128_s19, 12288  ;;  %p19029_p8 = scmp.lt.s32.totalorder %s128_s19, %s21264_s17 }
 0x2e4   :  { %p19025_p7 = scmp.ne.s32.totalorder %s128_s19, %s19024_s22  ;;  %p19030_p9 = scmp.lt.s32.totalorder %s21269_s21, %s19024_s22 }
 0x2e6   :  { %p19031_p10 = por %p19030_p9, %p19029_p8 }
 0x2e8   :  { %p19032_p11 = pnand %p19031_p10, %p19025_p7 }
 0x2ea   :  { %19035 = shalt.err (!%p19032_p11)  }
 0x2eb   :  { %130 = dma.hbm_to_vmem [thread:$0]  %s117_s14, 12288, %s128_s19, [#allocation6 + $0x5]  ;;  %v172_v57 = vcombine.high %v19175_v7, %v19175_v7  ;;  %v179_v49 = vrot.slane %v19175_v7, %v19170_v6  ;;  %v195_v63 = vrot.slane %v19180_v8, %v19170_v6  ;;  %v188_v2 = vcombine.high %v19180_v8, %v19180_v8 }
 0x2ec   :  { %v211_v58 = vrot.slane %v19185_v9, %v19170_v6  ;;  %v204_v54 = vcombine.high %v19185_v9, %v19185_v9  ;;  %v220_v53 = vcombine.high %v19196_v11, %v19196_v11  ;;  %v227_v31 = vrot.slane %v19196_v11, %v19170_v6 }
 0x2ed   :  { %v186_v29 = vrot.slane %v172_v57, %v19170_v6  ;;  %v187_v47 = vcombine.high %v179_v49, %v179_v49  ;;  %v202_v33 = vrot.slane %v188_v2, %v19170_v6  ;;  %v203_v28 = vcombine.high %v195_v63, %v195_v63 }
 0x2ee   :  { %v219_v56 = vcombine.high %v211_v58, %v211_v58  ;;  %v236_v51 = vcombine.high %v19201_v12, %v19201_v12  ;;  %v243_v60 = vrot.slane %v19201_v12, %v19170_v6  ;;  %v252_v44 = vcombine.high %v19209_v14, %v19209_v14 }
 0x2ef   :  { %v8468_v7 = vcombine.low %v179_v49, %v187_v47  ;;  %v8469_v17 = vcombine.low %v186_v29, %v195_v63  ;;  %v8485_v8 = vcombine.low %v203_v28, %v202_v33  ;;  %v218_v59 = vrot.slane %v204_v54, %v19170_v6 }
 0x2f0   :  { %v8486_v13 = vcombine.low %v211_v58, %v219_v56  ;;  %v259_v11 = vrot.slane %v19209_v14, %v19170_v6  ;;  %v275_v38 = vrot.slane %v19216_v15, %v19170_v6  ;;  %v234_v26 = vrot.slane %v220_v53, %v19170_v6 }
 0x2f1   :  { %v8476_v23 = vrot.slane %v8468_v7, %v19170_v6  ;;  %v8483_v46 = vrot.slane %v8469_v17, %v19170_v6  ;;  %v8493_v9 = vrot.slane %v8485_v8, %v19170_v6  ;;  %v235_v16 = vcombine.high %v227_v31, %v227_v31 }
 0x2f2   :  { %v8500_v18 = vrot.slane %v8486_v13, %v19170_v6  ;;  %v250_v48 = vrot.slane %v236_v51, %v19170_v6  ;;  %v251_v27 = vcombine.high %v243_v60, %v243_v60  ;;  %v266_v37 = vrot.slane %v252_v44, %v19170_v6 }
 0x2f3   :  { %v8484_v62 = vcombine.low %v8476_v23, %v8483_v46  ;;  %v267_v3 = vcombine.high %v259_v11, %v259_v11  ;;  %v268_v39 = vcombine.high %v19216_v15, %v19216_v15  ;;  %v284_v14 = vcombine.high %v19226_v19, %v19226_v19 }
 0x2f4   :  { %v291_v57 = vrot.slane %v19226_v19, %v19170_v6  ;;  %v307_v49 = vrot.slane %v19231_v21, %v19170_v6  ;;  %v8501_v63 = vcombine.low %v8493_v9, %v8500_v18  ;;  %v8502_v2 = vcombine.low %v218_v59, %v227_v31 }
 0x2f5   :  { %v8503_v15 = vcombine.low %v235_v16, %v234_v26  ;;  %v8519_v58 = vcombine.low %v243_v60, %v251_v27  ;;  %v8520_v7 = vcombine.low %v250_v48, %v259_v11  ;;  %v8536_v17 = vcombine.low %v267_v3, %v266_v37 }
 0x2f6   :  { %v282_v33 = vrot.slane %v268_v39, %v19170_v6  ;;  %v298_v56 = vrot.slane %v284_v14, %v19170_v6  ;;  %v299_v23 = vcombine.high %v291_v57, %v291_v57  ;;  %v323_v13 = vrot.slane %v19236_v22, %v19170_v6 }
 0x2f7   :  { %v8510_v31 = vrot.slane %v8502_v2, %v19170_v6  ;;  %v8517_v51 = vrot.slane %v8503_v15, %v19170_v6  ;;  %v8544_v44 = vrot.slane %v8536_v17, %v19170_v6  ;;  %v316_v48 = vcombine.high %v19236_v22, %v19236_v22 }
 0x2f8   :  { %v8554_v59 = vcombine.low %v299_v23, %v298_v56  ;;  %v339_v37 = vrot.slane %v19247_v24, %v19170_v6 }
 0x2f9   :  { %v8518_v14 = vcombine.low %v8510_v31, %v8517_v51  ;;  %v330_v17 = vrot.slane %v316_v48, %v19170_v6 }
 0x2fa   :  { %v347_v56 = vcombine.high %v339_v37, %v339_v37 }
 0x30c   :  { %v17582_v1 = vpop.f32.mrf.mxu1 }
 0x30e   :  { %v17583_v0 = vpop.f32.mrf.mxu1 }
 0x30f   :  { %v17584_v61 = vadd.f32 %v17583_v0, %v17582_v1  ;;  %v283_v1 = vcombine.high %v275_v38, %v275_v38  ;;  %v300_v0 = vcombine.high %v19231_v21, %v19231_v21 }
 0x311   :  { %v8724_v47 = vadd.f32 %v17584_v61, %v8484_v62  ;;  %v8537_v46 = vcombine.low %v275_v38, %v283_v1  ;;  %v314_v8 = vrot.slane %v300_v0, %v19170_v6  ;;  %v8553_v62 = vcombine.low %v282_v33, %v291_v57 }
 0x312   :  { %v331_v33 = vcombine.high %v323_v13, %v323_v13 }
 0x313   :  { %v8551_v61 = vrot.slane %v8537_v46, %v19170_v6  ;;  %v8571_v16 = vcombine.low %v314_v8, %v323_v13  ;;  %v8561_v0 = vrot.slane %v8553_v62, %v19170_v6 }
 0x314   :  { %v21411_v62 = vcombine.low %v331_v33, %v330_v17 }
 0x318   :  { %v17641_v35 = vpop.f32.mrf.mxu0 }
 0x31a   :  { %v17642_v50 = vpop.f32.mrf.mxu0 }
 0x31b   :  { %v17643_v32 = vadd.f32 %v17642_v50, %v17641_v35  ;;  %v315_v35 = vcombine.high %v307_v49, %v307_v49 }
 0x31d   :  { %v8834_v21 = vadd.f32 %v17643_v32, %v8724_v47  ;;  %v8570_v26 = vcombine.low %v307_v49, %v315_v35 }
 0x325   :  { %v21300_v5 = vpop.f32.mrf.mxu1 }
 0x327   :  { %v21302_v45 = vpop.f32.mrf.mxu1 }
 0x328   :  { %v17587_v19 = vadd.f32 %v21302_v45, %v21300_v5  ;;  %v8527_v5 = vrot.slane %v8519_v58, %v19170_v6  ;;  %v8534_v45 = vrot.slane %v8520_v7, %v19170_v6  ;;  %v8578_v58 = vrot.slane %v8570_v26, %v19170_v6 }
 0x329   :  { %v8585_v7 = vrot.slane %v8571_v16, %v19170_v6 }
 0x32a   :  { %v8729_v18 = vadd.f32 %v17587_v19, %v8501_v63  ;;  %v8535_v1 = vcombine.low %v8527_v5, %v8534_v45  ;;  %v8568_v63 = vrot.slane %v8554_v59, %v19170_v6 }
 0x32b   :  { %v21304_v34 = vpop.f32.mrf.mxu1 }
 0x32c   :  { %v8569_v45 = vcombine.low %v8561_v0, %v8568_v63 }
 0x32d   :  { %v21306_v43 = vpop.f32.mrf.mxu1 }
 0x32e   :  { %v17590_v57 = vadd.f32 %v21306_v43, %v21304_v34  ;;  %v8552_v43 = vcombine.low %v8544_v44, %v8551_v61  ;;  %v21409_v44 = vcombine.low %v8578_v58, %v8585_v7  ;;  %v8588_v61 = vcombine.low %v339_v37, %v347_v56 }
 0x32f   :  { %v21308_v42 = vpop.f32.mrf.mxu1  ;;  %v332_v37 = vcombine.high %v19247_v24, %v19247_v24 }
 0x330   :  { %v8734_v46 = vadd.f32 %v17590_v57, %v8518_v14  ;;  %v8595_v57 = vrot.slane %v21411_v62, %v19170_v6  ;;  %v8602_v17 = vrot.slane %v8588_v61, %v19170_v6 }
 0x331   :  { %v21310_v55 = vpop.f32.mrf.mxu1 }
 0x332   :  { %v17593_v8 = vadd.f32 %v21310_v55, %v21308_v42 }
 0x333   :  { %v21316_v20 = vpop.f32.mrf.mxu1 }
 0x335   :  { %v21318_v40 = vpop.f32.mrf.mxu1 }
 0x339   :  { %v21327_v41 = vpop.f32.mrf.mxu1 }
 0x33b   :  { %v21329_v30 = vpop.f32.mrf.mxu1 }
 0x33c   :  { %v17599_v24 = vadd.f32 %v21329_v30, %v21327_v41 }
 0x33e   :  { %v21332_v52 = vpop.f32.mrf.mxu1 }
 0x340   :  { %v21336_v10 = vpop.f32.mrf.mxu1 }
 0x343   :  { %v21350_v36 = vpop.f32.mrf.mxu1 }
 0x345   :  { %v21359_v12 = vpop.f32.mrf.mxu1 }
 0x348   :  { %v21374_v29 = vpop.f32.mrf.mxu1 }
 0x34a   :  { %v21377_v28 = vpop.f32.mrf.mxu1 }
 0x34d   :  { %v17644_v54 = vpop.f32.mrf.mxu0 }
 0x34e   :  { %v8943_v53 = vpop.f32.mrf.mxu1 }
 0x34f   :  { %v8944_v60 = vadd.f32 %v8943_v53, %v8834_v21  ;;  %v17645_v9 = vpop.f32.mrf.mxu0 }
 0x350   :  { %v17816_v50 = vpop.f32.mrf.mxu1  ;;  %v17646_v38 = vadd.f32 %v17645_v9, %v17644_v54 }
 0x351   :  { %v8987_v11 = vmax.f32 %v8944_v60, 0.0 }
 0x352   :  { %v8948_v27 = vpop.f32.mrf.mxu1  ;;  %v8839_v32 = vadd.f32 %v17646_v38, %v8729_v18  ;;  %v8739_v38 = vadd.f32 %v17593_v8, %v8535_v1 }
 0x353   :  { %v9005_v3 = vcombine.high %v8987_v11, %v8987_v11  ;;  %v9012_v39 = vrot.slane %v8987_v11, %v19170_v6 }
 0x354   :  { %v17647_v49 = vpop.f32.mrf.mxu0  ;;  %v17819_v47 = vpop.f32.mrf.mxu1  ;;  %v8949_v15 = vadd.f32 %v8948_v27, %v8839_v32  ;;  %v17596_v27 = vadd.f32 %v21318_v40, %v21316_v20  ;;  %v21427_v20 = vrot.slane %v19252_v25, %v19170_v6 }
 0x355   :  { %v9019_v22 = vrot.slane %v9005_v3, %v19170_v6  ;;  %v9020_v2 = vcombine.high %v9012_v39, %v9012_v39 }
 0x356   :  { %v17648_v19 = vpop.f32.mrf.mxu0  ;;  %v8953_v34 = vpop.f32.mrf.mxu1  ;;  %v8988_v21 = vmax.f32 %v8949_v15, 0.0  ;;  %v8744_v7 = vadd.f32 %v17596_v27, %v8552_v43  ;;  %v363_v41 = vcombine.high %v21427_v20, %v21427_v20 }
 0x357   :  { %v9158_v23 = vcombine.low %v9012_v39, %v9020_v2  ;;  %v9172_v35 = vrot.slane %v9019_v22, %v19170_v6  ;;  %v17649_v54 = vadd.f32 %v17648_v19, %v17647_v49  ;;  %v9021_v60 = vcombine.high %v9019_v22, %v9019_v22 }
 0x358   :  { %v17650_v53 = vpop.f32.mrf.mxu0  ;;  %v17822_v31 = vpop.f32.mrf.mxu1  ;;  %v9022_v5 = vcombine.high %v8988_v21, %v8988_v21  ;;  %v9029_v13 = vrot.slane %v8988_v21, %v19170_v6  ;;  %v348_v49 = vcombine.high %v19252_v25, %v19252_v25 }
 0x359   :  { %v9165_v51 = vrot.slane %v9158_v23, %v19170_v6  ;;  %v8844_v9 = vadd.f32 %v17649_v54, %v8734_v46  ;;  %v346_v46 = vrot.slane %v332_v37, %v19170_v6 }
 0x35a   :  { %v17651_v50 = vpop.f32.mrf.mxu0  ;;  %v8958_v18 = vpop.f32.mrf.mxu1  ;;  %v9036_v55 = vrot.slane %v9022_v5, %v19170_v6  ;;  %v9037_v59 = vcombine.high %v9029_v13, %v9029_v13  ;;  %v9174_v11 = vcombine.low %v9021_v60, %v9029_v13  ;;  %v362_v43 = vrot.slane %v348_v49, %v19170_v6 }
 0x35b   :  { %v9173_v42 = vcombine.low %v9165_v51, %v9172_v35  ;;  %v8954_v26 = vadd.f32 %v8953_v34, %v8844_v9  ;;  %v17652_v16 = vadd.f32 %v17651_v50, %v17650_v53  ;;  %v8749_v60 = vadd.f32 %v17599_v24, %v8569_v45 }
 0x35c   :  { %v17825_v48 = vpop.f32.mrf.mxu1  ;;  %v9038_v3 = vcombine.high %v9036_v55, %v9036_v55  ;;  %v9181_v39 = vrot.slane %v9174_v11, %v19170_v6  ;;  %v9188_v32 = vrot.slane %v9037_v59, %v19170_v6  ;;  %v17602_v9 = vadd.f32 %v21336_v10, %v21332_v52 }
 0x35d   :  { %9362 = vst.msk [vmem:[#allocation4] sm:$0x3f] %vm365_vm1, %v9173_v42  ;;  %v8989_v1 = vmax.f32 %v8954_v26, 0.0  ;;  %v8849_v0 = vadd.f32 %v17652_v16, %v8739_v38  ;;  %v8604_v26 = vcombine.low %v346_v46, %v21427_v20  ;;  %v8605_v16 = vcombine.low %v363_v41, %v362_v43 }
 0x35e   :  { %v17653_v14 = vpop.f32.mrf.mxu0  ;;  %v9189_v40 = vcombine.low %v9181_v39, %v9188_v32  ;;  %v9190_v47 = vcombine.low %v9036_v55, %v9038_v3  ;;  %v8603_v55 = vcombine.low %v8595_v57, %v8602_v17  ;;  %v8754_v37 = vadd.f32 %v17602_v9, %v21409_v44 }
 0x35f   :  { %v9039_v22 = vcombine.high %v8989_v1, %v8989_v1  ;;  %v9046_v2 = vrot.slane %v8989_v1, %v19170_v6  ;;  %v8959_v15 = vadd.f32 %v8958_v18, %v8849_v0  ;;  %v17605_v57 = vadd.f32 %v21359_v12, %v21350_v36 }
 0x360   :  { %v17654_v63 = vpop.f32.mrf.mxu0  ;;  %9363 = vst.msk [vmem:[#allocation4 + $0x8] sm:$0x3f] %vm365_vm1, %v9189_v40  ;;  %v9197_v33 = vrot.slane %v9190_v47, %v19170_v6 }
 0x361   :  { %v17655_v58 = vadd.f32 %v17654_v63, %v17653_v14  ;;  %v9053_v25 = vrot.slane %v9039_v22, %v19170_v6  ;;  %v9054_v19 = vcombine.high %v9046_v2, %v9046_v2  ;;  %v9204_v34 = vrot.slane %v9046_v2, %v19170_v6 }
 0x362   :  { %v8990_v56 = vmax.f32 %v8959_v15, 0.0  ;;  %v17656_v23 = vpop.f32.mrf.mxu0  ;;  %v8963_v21 = vpop.f32.mrf.mxu1  ;;  %v8612_v22 = vrot.slane %v8604_v26, %v19170_v6  ;;  %v8619_v2 = vrot.slane %v8605_v16, %v19170_v6 }
 0x363   :  { %v8854_v30 = vadd.f32 %v17655_v58, %v8744_v7  ;;  %v9055_v8 = vcombine.high %v9053_v25, %v9053_v25  ;;  %v9205_v35 = vcombine.low %v9197_v33, %v9204_v34  ;;  %v9206_v54 = vcombine.low %v9054_v19, %v9053_v25 }
 0x364   :  { %v9056_v53 = vcombine.high %v8990_v56, %v8990_v56  ;;  %v17657_v31 = vpop.f32.mrf.mxu0  ;;  %v17828_v51 = vpop.f32.mrf.mxu1  ;;  %v9063_v5 = vrot.slane %v8990_v56, %v19170_v6  ;;  %v8759_v56 = vadd.f32 %v17605_v57, %v8603_v55  ;;  %v8620_v41 = vcombine.low %v8612_v22, %v8619_v2 }
 0x365   :  { %v8964_v13 = vadd.f32 %v8963_v21, %v8854_v30  ;;  %v17658_v62 = vadd.f32 %v17657_v31, %v17656_v23  ;;  %v9213_v50 = vrot.slane %v9206_v54, %v19170_v6  ;;  %v9220_v18 = vrot.slane %v9055_v8, %v19170_v6  ;;  %9364 = vst.msk [vmem:[#allocation4 + $0x10] sm:$0x3f] %vm365_vm1, %v9205_v35 }
 0x366   :  { %v9070_v42 = vrot.slane %v9056_v53, %v19170_v6  ;;  %v9071_v59 = vcombine.high %v9063_v5, %v9063_v5  ;;  %v17659_v38 = vpop.f32.mrf.mxu0  ;;  %v17608_v54 = vadd.f32 %v21377_v28, %v21374_v29 }
 0x367   :  { %v8991_v11 = vmax.f32 %v8964_v13, 0.0  ;;  %v8859_v45 = vadd.f32 %v17658_v62, %v8749_v60  ;;  %v9221_v48 = vcombine.low %v9213_v50, %v9220_v18 }
 0x368   :  { %v8968_v61 = vpop.f32.mrf.mxu1  ;;  %v9072_v27 = vcombine.high %v9070_v42, %v9070_v42  ;;  %v9222_v52 = vcombine.low %v9063_v5, %v9071_v59  ;;  %v17660_v32 = vpop.f32.mrf.mxu0  ;;  %v9236_v1 = vrot.slane %v9070_v42, %v19170_v6 }
 0x369   :  { %v9073_v10 = vcombine.high %v8991_v11, %v8991_v11  ;;  %v9080_v3 = vrot.slane %v8991_v11, %v19170_v6  ;;  %v8969_v39 = vadd.f32 %v8968_v61, %v8859_v45  ;;  %9365 = vst.msk [vmem:[#allocation4 + $0x18] sm:$0x3f] %vm365_vm1, %v9221_v48  ;;  %v17661_v0 = vadd.f32 %v17660_v32, %v17659_v38 }
 0x36a   :  { %v17831_v14 = vpop.f32.mrf.mxu1  ;;  %v9229_v49 = vrot.slane %v9222_v52, %v19170_v6  ;;  %v17662_v15 = vpop.f32.mrf.mxu0  ;;  %v8764_v45 = vadd.f32 %v17608_v54, %v8620_v41 }
 0x36b   :  { %v9087_v20 = vrot.slane %v9073_v10, %v19170_v6  ;;  %v9088_v40 = vcombine.high %v9080_v3, %v9080_v3  ;;  %v9238_v47 = vcombine.low %v9072_v27, %v9080_v3  ;;  %v8992_v44 = vmax.f32 %v8969_v39, 0.0 }
 0x36c   :  { %v8973_v63 = vpop.f32.mrf.mxu1  ;;  %v8864_v58 = vadd.f32 %v17661_v0, %v8754_v37  ;;  %v9237_v36 = vcombine.low %v9229_v49, %v9236_v1  ;;  %v17663_v34 = vpop.f32.mrf.mxu0 }
 0x36d   :  { %v9089_v12 = vcombine.high %v9087_v20, %v9087_v20  ;;  %v9245_v7 = vrot.slane %v9238_v47, %v19170_v6  ;;  %v9252_v24 = vrot.slane %v9088_v40, %v19170_v6  ;;  %v9090_v33 = vcombine.high %v8992_v44, %v8992_v44 }
 0x36e   :  { %v17834_v17 = vpop.f32.mrf.mxu1  ;;  %v9097_v25 = vrot.slane %v8992_v44, %v19170_v6  ;;  %v8974_v19 = vadd.f32 %v8973_v63, %v8864_v58  ;;  %9366 = vst.msk [vmem:[#allocation4 + $0x20] sm:$0x3f] %vm365_vm1, %v9237_v36  ;;  %v17664_v46 = vadd.f32 %v17663_v34, %v17662_v15 }
 0x36f   :  { %v9253_v23 = vcombine.low %v9245_v7, %v9252_v24  ;;  %v9254_v21 = vcombine.low %v9087_v20, %v9089_v12  ;;  %v9104_v30 = vrot.slane %v9090_v33, %v19170_v6  ;;  %v17665_v51 = vpop.f32.mrf.mxu0 }
 0x370   :  { %v8978_v43 = vpop.f32.mrf.mxu1  ;;  %v9105_v8 = vcombine.high %v9097_v25, %v9097_v25  ;;  %v8993_v35 = vmax.f32 %v8974_v19, 0.0  ;;  %v9268_v31 = vrot.slane %v9097_v25, %v19170_v6  ;;  %v8869_v60 = vadd.f32 %v17664_v46, %v8759_v56 }
 0x371   :  { %9367 = vst.msk [vmem:[#allocation4 + $0x28] sm:$0x3f] %vm365_vm1, %v9253_v23  ;;  %v9261_v53 = vrot.slane %v9254_v21, %v19170_v6  ;;  %v9106_v13 = vcombine.high %v9104_v30, %v9104_v30  ;;  %v17666_v55 = vpop.f32.mrf.mxu0 }
 0x372   :  { %v17837_v5 = vpop.f32.mrf.mxu1  ;;  %v9270_v62 = vcombine.low %v9105_v8, %v9104_v30  ;;  %v9107_v9 = vcombine.high %v8993_v35, %v8993_v35  ;;  %v9114_v50 = vrot.slane %v8993_v35, %v19170_v6  ;;  %v8979_v42 = vadd.f32 %v8978_v43, %v8869_v60 }
 0x373   :  { %v9269_v18 = vcombine.low %v9261_v53, %v9268_v31  ;;  %v9284_v28 = vrot.slane %v9106_v13, %v19170_v6  ;;  %v17667_v26 = vadd.f32 %v17666_v55, %v17665_v51 }
 0x374   :  { %v8983_v59 = vpop.f32.mrf.mxu1  ;;  %v9277_v29 = vrot.slane %v9270_v62, %v19170_v6  ;;  %v9121_v11 = vrot.slane %v9107_v9, %v19170_v6  ;;  %v9122_v38 = vcombine.high %v9114_v50, %v9114_v50  ;;  %v8994_v61 = vmax.f32 %v8979_v42, 0.0 }
 0x375   :  { %9368 = vst.msk [vmem:[#allocation4 + $0x30] sm:$0x3f] %vm365_vm1, %v9269_v18  ;;  %v8874_v39 = vadd.f32 %v17667_v26, %v8764_v45 }
 0x376   :  { %v17840_v16 = vpop.f32.mrf.mxu1  ;;  %v9285_v48 = vcombine.low %v9277_v29, %v9284_v28  ;;  %v9286_v27 = vcombine.low %v9114_v50, %v9122_v38  ;;  %v9123_v52 = vcombine.high %v9121_v11, %v9121_v11  ;;  %v9124_v10 = vcombine.high %v8994_v61, %v8994_v61 }
 0x377   :  { %v9131_v3 = vrot.slane %v8994_v61, %v19170_v6  ;;  %v9300_v14 = vrot.slane %v9121_v11, %v19170_v6  ;;  %v8984_v0 = vadd.f32 %v8983_v59, %v8874_v39 }
 0x378   :  { %9369 = vst.msk [vmem:[#allocation4 + $0x38] sm:$0x3f] %vm365_vm1, %v9285_v48  ;;  %v9293_v32 = vrot.slane %v9286_v27, %v19170_v6  ;;  %v9138_v37 = vrot.slane %v9124_v10, %v19170_v6 }
 0x379   :  { %v9139_v57 = vcombine.high %v9131_v3, %v9131_v3  ;;  %v9302_v1 = vcombine.low %v9123_v52, %v9131_v3  ;;  %v8995_v63 = vmax.f32 %v8984_v0, 0.0 }
 0x37a   :  { %v9301_v49 = vcombine.low %v9293_v32, %v9300_v14  ;;  %v9140_v20 = vcombine.high %v9138_v37, %v9138_v37 }
 0x37b   :  { %v9309_v40 = vrot.slane %v9302_v1, %v19170_v6  ;;  %v9316_v47 = vrot.slane %v9139_v57, %v19170_v6  ;;  %v9141_v44 = vcombine.high %v8995_v63, %v8995_v63  ;;  %v9148_v15 = vrot.slane %v8995_v63, %v19170_v6 }
 0x37c   :  { %9370 = vst.msk [vmem:[#allocation4 + $0x40] sm:$0x3f] %vm365_vm1, %v9301_v49  ;;  %v9318_v2 = vcombine.low %v9138_v37, %v9140_v20 }
 0x37d   :  { %v9317_v22 = vcombine.low %v9309_v40, %v9316_v47  ;;  %v9155_v58 = vrot.slane %v9141_v44, %v19170_v6  ;;  %v9156_v36 = vcombine.high %v9148_v15, %v9148_v15  ;;  %v9332_v7 = vrot.slane %v9148_v15, %v19170_v6 }
 0x37e   :  { %v9325_v12 = vrot.slane %v9318_v2, %v19170_v6 }
 0x37f   :  { %9371 = vst.msk [vmem:[#allocation4 + $0x48] sm:$0x3f] %vm365_vm1, %v9317_v22  ;;  %v9157_v24 = vcombine.high %v9155_v58, %v9155_v58  ;;  %v9334_v33 = vcombine.low %v9156_v36, %v9155_v58 }
 0x380   :  { %v9333_v17 = vcombine.low %v9325_v12, %v9332_v7 }
 0x381   :  { %v9341_v25 = vrot.slane %v9334_v33, %v19170_v6  ;;  %v9348_v19 = vrot.slane %v9157_v24, %v19170_v6 }
 0x382   :  { %9372 = vst.msk [vmem:[#allocation4 + $0x50] sm:$0x3f] %vm365_vm1, %v9333_v17 }
 0x383   :  { %v9349_v34 = vcombine.low %v9341_v25, %v9348_v19 }
 0x385   :  { %9373 = vst.msk [vmem:[#allocation4 + $0x58] sm:$0x3f] %vm365_vm1, %v9349_v34 }
 0x386   :  { %19061 = dma.done.wait [#allocation6], 12288 }
 0x387   :  { %19062 = vsyncadd [#allocation6], 4294955008  ;;  %v19087_v56 = vmov 0   ;;  %v17998_v23 = vld [vmem:[#allocation5 + $0xe4] ss:$16 sps:$4 sm:$0xff]   ;;  %vm9423_vm4 = vcmask 1041409  }
 0x388   :  { %9541 = vmatprep.mubr.bf16.mxu0 %v19087_v56  ;;  %9582 = vmatprep.mubr.bf16.mxu1 %v19087_v56  ;;  %v18000_v21 = vld [vmem:[#allocation5 + $0xec] ss:$16 sps:$4 sm:$0xff]   ;;  %v18002_v46 = vld [vmem:[#allocation5 + $0xe0] ss:$16 sps:$4 sm:$0xff]   ;;  %v18003_v43 = vld [vmem:[#allocation5 + $0xe8] ss:$16 sps:$4 sm:$0xff]  }
 0x389   :  { %9517 = vmatprep.subr.bf16.mxu0 %v17998_v23  ;;  %9558 = vmatprep.subr.bf16.mxu1 %v18000_v21  ;;  %v18004_v41 = vld [vmem:[#allocation5 + $0xc4] ss:$16 sps:$4 sm:$0xff]   ;;  %v18006_v6 = vld [vmem:[#allocation5 + $0xcc] ss:$16 sps:$4 sm:$0xff]   ;;  %v18008_v30 = vld [vmem:[#allocation5 + $0xc0] ss:$16 sps:$4 sm:$0xff]  }
 0x38a   :  { %9518 = vmatpush1.bf16.msra.mxu0 %v18002_v46  ;;  %9559 = vmatpush1.bf16.msra.mxu1 %v18003_v43  ;;  %v18009_v8 = vld [vmem:[#allocation5 + $0xc8] ss:$16 sps:$4 sm:$0xff]   ;;  %v18010_v35 = vld [vmem:[#allocation5 + $0xa4] ss:$16 sps:$4 sm:$0xff]   ;;  %v18012_v54 = vld [vmem:[#allocation5 + $0xac] ss:$16 sps:$4 sm:$0xff]  }
 0x38b   :  { %9519 = vmatprep.subr.bf16.mxu0 %v18004_v41  ;;  %9560 = vmatprep.subr.bf16.mxu1 %v18006_v6  ;;  %v18014_v53 = vld [vmem:[#allocation5 + $0xa0] ss:$16 sps:$4 sm:$0xff]   ;;  %v18015_v31 = vld [vmem:[#allocation5 + $0xa8] ss:$16 sps:$4 sm:$0xff]   ;;  %v18016_v51 = vld [vmem:[#allocation5 + $0x84] ss:$16 sps:$4 sm:$0xff]  }
 0x38c   :  { %v18018_v60 = vld [vmem:[#allocation5 + $0x8c] ss:$16 sps:$4 sm:$0xff]   ;;  %v9398_v5 = vld [vmem:[#allocation4 + $0x1] sm:$0x1]  ;;  %v9399_v13 = vld [vmem:[#allocation4 + $0x31] sm:$0x1] }
 0x38d   :  { %v9400_v62 = vpack.c.bf16 %v9398_v5, %v9398_v5  ;;  %v18020_v9 = vld [vmem:[#allocation5 + $0x80] ss:$16 sps:$4 sm:$0xff]   ;;  %v18021_v50 = vld [vmem:[#allocation5 + $0x88] ss:$16 sps:$4 sm:$0xff]   ;;  %v9401_v18 = vpack.c.bf16 %v9399_v13, %v9399_v13  ;;  %v18024_v42 = vld [vmem:[#allocation5 + $0x64] ss:$16 sps:$4 sm:$0xff]  }
 0x38e   :  { %9520 = vmatpush1.bf16.msra.mxu0 %v18008_v30  ;;  %9561 = vmatpush1.bf16.msra.mxu1 %v18009_v8  ;;  %v18027_v55 = vld [vmem:[#allocation5 + $0x6c] ss:$16 sps:$4 sm:$0xff]   ;;  %v18022_v11 = vld [vmem:[#allocation5 + $0x60] ss:$16 sps:$4 sm:$0xff]   ;;  %v18025_v38 = vld [vmem:[#allocation5 + $0x68] ss:$16 sps:$4 sm:$0xff]  }
 0x38f   :  { %9521 = vmatprep.subr.bf16.mxu0 %v18010_v35  ;;  %9562 = vmatprep.subr.bf16.mxu1 %v18012_v54  ;;  %v9420_v59 = vunpack.c.l.b16 %v9400_v62  ;;  %v9421_v29 = vunpack.c.l.b16 %v9401_v18  ;;  %v18030_v61 = vld [vmem:[#allocation5 + $0x44] ss:$16 sps:$4 sm:$0xff]   ;;  %v18033_v16 = vld [vmem:[#allocation5 + $0x4c] ss:$16 sps:$4 sm:$0xff]   ;;  %v18028_v48 = vld [vmem:[#allocation5 + $0x40] ss:$16 sps:$4 sm:$0xff]  }
 0x390   :  { %v18031_v27 = vld [vmem:[#allocation5 + $0x48] ss:$16 sps:$4 sm:$0xff]   ;;  %v9378_v52 = vld [vmem:[#allocation4] sm:$0x1]  ;;  %v9379_v10 = vld [vmem:[#allocation4 + $0x30] sm:$0x1] }
 0x391   :  { %v9422_v28 = vrot.slane %v9421_v29, 7  ;;  %v18036_v3 = vld [vmem:[#allocation5 + $0x24] ss:$16 sps:$4 sm:$0xff]   ;;  %v18039_v39 = vld [vmem:[#allocation5 + $0x2c] ss:$16 sps:$4 sm:$0xff]   ;;  %v9380_v32 = vpack.c.bf16 %v9378_v52, %v9378_v52  ;;  %v9381_v14 = vpack.c.bf16 %v9379_v10, %v9379_v10 }
 0x392   :  { %9522 = vmatpush1.bf16.msra.mxu0 %v18014_v53  ;;  %9563 = vmatpush1.bf16.msra.mxu1 %v18015_v31  ;;  %v18034_v57 = vld [vmem:[#allocation5 + $0x20] ss:$16 sps:$4 sm:$0xff]   ;;  %v18037_v1 = vld [vmem:[#allocation5 + $0x28] ss:$16 sps:$4 sm:$0xff]   ;;  %v18042_v49 = vld [vmem:[#allocation5 + $0x4] ss:$16 sps:$4 sm:$0xff]  }
 0x393   :  { %9523 = vmatprep.subr.bf16.mxu0 %v18016_v51  ;;  %9564 = vmatprep.subr.bf16.mxu1 %v18018_v60  ;;  %v9424_v45 = vsel %vm9423_vm4, %v9422_v28, %v9420_v59  ;;  %v9594_v37 = vunpack.c.l.b16 %v9381_v14  ;;  %v9593_v0 = vunpack.c.l.b16 %v9380_v32  ;;  %v18045_v20 = vld [vmem:[#allocation5 + $0xc] ss:$16 sps:$4 sm:$0xff]   ;;  %v18040_v47 = vld [vmem:[#allocation5] ss:$16 sps:$4 sm:$0xff]   ;;  %v18043_v63 = vld [vmem:[#allocation5 + $0x8] ss:$16 sps:$4 sm:$0xff]  }
 0x394   :  { %v9425_v26 = vpack.c.b16 %v9424_v45, %v9424_v45  ;;  %v18048_v2 = vld [vmem:[#allocation5 + $0x164] ss:$16 sps:$4 sm:$0xff]   ;;  %v18051_v44 = vld [vmem:[#allocation5 + $0x16c] ss:$16 sps:$4 sm:$0xff]   ;;  %v18046_v15 = vld [vmem:[#allocation5 + $0x160] ss:$16 sps:$4 sm:$0xff]  }
 0x395   :  { %v9595_v40 = vrot.slane %v9594_v37, 7  ;;  %v18049_v36 = vld [vmem:[#allocation5 + $0x168] ss:$16 sps:$4 sm:$0xff]   ;;  %v18054_v12 = vld [vmem:[#allocation5 + $0x144] ss:$16 sps:$4 sm:$0xff]  }
 0x396   :  { %9524 = vmatpush1.bf16.msra.mxu0 %v18020_v9  ;;  %9565 = vmatpush1.bf16.msra.mxu1 %v18021_v50  ;;  %v9764_v7 = vld [vmem:[#allocation4 + $0x32] sm:$0x1]  ;;  %v18057_v24 = vld [vmem:[#allocation5 + $0x14c] ss:$16 sps:$4 sm:$0xff]   ;;  %v9763_v33 = vld [vmem:[#allocation4 + $0x2] sm:$0x1] }
 0x397   :  { %9689 = vmatprep.subr.bf16.mxu0 %v18024_v42  ;;  %9730 = vmatprep.subr.bf16.mxu1 %v18027_v55  ;;  %v9596_v22 = vsel %vm9423_vm4, %v9595_v40, %v9593_v0  ;;  %v9766_v17 = vpack.c.bf16 %v9764_v7, %v9764_v7  ;;  %v18052_v25 = vld [vmem:[#allocation5 + $0x140] ss:$16 sps:$4 sm:$0xff]   ;;  %v18055_v19 = vld [vmem:[#allocation5 + $0x148] ss:$16 sps:$4 sm:$0xff]   ;;  %v18060_v34 = vld [vmem:[#allocation5 + $0x124] ss:$16 sps:$4 sm:$0xff]   ;;  %v9765_v23 = vpack.c.bf16 %v9763_v33, %v9763_v33 }
 0x398   :  { %v9597_v58 = vpack.c.b16 %v9596_v22, %v9596_v22  ;;  %v18063_v46 = vld [vmem:[#allocation5 + $0x12c] ss:$16 sps:$4 sm:$0xff]   ;;  %v18058_v43 = vld [vmem:[#allocation5 + $0x120] ss:$16 sps:$4 sm:$0xff]   ;;  %v18061_v41 = vld [vmem:[#allocation5 + $0x128] ss:$16 sps:$4 sm:$0xff]  }
 0x399   :  { %16776 = vmatmul.mubr.msk.bf16.vlgmr.msra.gmra.mxu0 %vm131_vm0, %v9425_v26  ;;  %16777 = vmatmul.mubr.msk.bf16.vlgmr.msra.gmra.mxu1 %vm131_vm0, %v9425_v26  ;;  %v9786_v21 = vunpack.c.l.b16 %v9766_v17  ;;  %v18066_v6 = vld [vmem:[#allocation5 + $0x104] ss:$16 sps:$4 sm:$0xff]   ;;  %v9785_v30 = vunpack.c.l.b16 %v9765_v23  ;;  %v18069_v35 = vld [vmem:[#allocation5 + $0x10c] ss:$16 sps:$4 sm:$0xff]   ;;  %v18064_v54 = vld [vmem:[#allocation5 + $0x100] ss:$16 sps:$4 sm:$0xff]  }
 0x39a   :  { %9690 = vmatpush1.bf16.msra.mxu0 %v18022_v11  ;;  %9731 = vmatpush1.bf16.msra.mxu1 %v18025_v38  ;;  %v18067_v53 = vld [vmem:[#allocation5 + $0x108] ss:$16 sps:$4 sm:$0xff]   ;;  %v18072_v51 = vld [vmem:[#allocation5 + $0x1e4] ss:$16 sps:$4 sm:$0xff]   ;;  %v18075_v60 = vld [vmem:[#allocation5 + $0x1ec] ss:$16 sps:$4 sm:$0xff]  }
 0x39b   :  { %9691 = vmatprep.subr.bf16.mxu0 %v18030_v61  ;;  %9732 = vmatprep.subr.bf16.mxu1 %v18033_v16  ;;  %v9787_v8 = vrot.slane %v9786_v21, 7  ;;  %v9960_v5 = vld [vmem:[#allocation4 + $0x33] sm:$0x1]  ;;  %v18073_v9 = vld [vmem:[#allocation5 + $0x1e8] ss:$16 sps:$4 sm:$0xff]  }
 0x39c   :  { %9713 = vmatprep.mubr.bf16.mxu0 %v19087_v56  ;;  %9754 = vmatprep.mubr.bf16.mxu1 %v19087_v56  ;;  %v18070_v62 = vld [vmem:[#allocation5 + $0x1e0] ss:$16 sps:$4 sm:$0xff]   ;;  %v18078_v50 = vld [vmem:[#allocation5 + $0x1c4] ss:$16 sps:$4 sm:$0xff]   ;;  %v9962_v18 = vpack.c.bf16 %v9960_v5, %v9960_v5  ;;  %v18081_v42 = vld [vmem:[#allocation5 + $0x1cc] ss:$16 sps:$4 sm:$0xff]  }
 0x39d   :  { %v9788_v31 = vsel %vm9423_vm4, %v9787_v8, %v9785_v30  ;;  %v9959_v55 = vld [vmem:[#allocation4 + $0x3] sm:$0x1]  ;;  %v18079_v29 = vld [vmem:[#allocation5 + $0x1c8] ss:$16 sps:$4 sm:$0xff]   ;;  %v18084_v38 = vld [vmem:[#allocation5 + $0x1a4] ss:$16 sps:$4 sm:$0xff]  }
 0x39e   :  { %9692 = vmatpush1.bf16.msra.mxu0 %v18028_v48  ;;  %9733 = vmatpush1.bf16.msra.mxu1 %v18031_v27  ;;  %v9789_v13 = vpack.c.b16 %v9788_v31, %v9788_v31  ;;  %v18076_v59 = vld [vmem:[#allocation5 + $0x1c0] ss:$16 sps:$4 sm:$0xff]   ;;  %v9961_v28 = vpack.c.bf16 %v9959_v55, %v9959_v55  ;;  %v9982_v11 = vunpack.c.l.b16 %v9962_v18  ;;  %v18087_v45 = vld [vmem:[#allocation5 + $0x1ac] ss:$16 sps:$4 sm:$0xff]   ;;  %v18085_v26 = vld [vmem:[#allocation5 + $0x1a8] ss:$16 sps:$4 sm:$0xff]  }
 0x39f   :  { %9693 = vmatprep.subr.bf16.mxu0 %v18036_v3  ;;  %9734 = vmatprep.subr.bf16.mxu1 %v18039_v39  ;;  %v18082_v61 = vld [vmem:[#allocation5 + $0x1a0] ss:$16 sps:$4 sm:$0xff]   ;;  %v18090_v16 = vld [vmem:[#allocation5 + $0x184] ss:$16 sps:$4 sm:$0xff]   ;;  %v18093_v52 = vld [vmem:[#allocation5 + $0x18c] ss:$16 sps:$4 sm:$0xff]  }
 0x3a0   :  { %v9981_v48 = vunpack.c.l.b16 %v9961_v28  ;;  %v9983_v27 = vrot.slane %v9982_v11, 7  ;;  %v18088_v10 = vld [vmem:[#allocation5 + $0x180] ss:$16 sps:$4 sm:$0xff]   ;;  %v18091_v3 = vld [vmem:[#allocation5 + $0x188] ss:$16 sps:$4 sm:$0xff]  }
 0x3a1   :  { %v18096_v39 = vld [vmem:[#allocation5 + $0x264] ss:$16 sps:$4 sm:$0xff]   ;;  %v18099_v14 = vld [vmem:[#allocation5 + $0x26c] ss:$16 sps:$4 sm:$0xff]   ;;  %v18097_v0 = vld [vmem:[#allocation5 + $0x268] ss:$16 sps:$4 sm:$0xff]  }
 0x3a2   :  { %9694 = vmatpush1.bf16.msra.mxu0 %v18034_v57  ;;  %9735 = vmatpush1.bf16.msra.mxu1 %v18037_v1  ;;  %v9984_v32 = vsel %vm9423_vm4, %v9983_v27, %v9981_v48  ;;  %v10156_v37 = vld [vmem:[#allocation4 + $0x34] sm:$0x1]  ;;  %v18094_v1 = vld [vmem:[#allocation5 + $0x260] ss:$16 sps:$4 sm:$0xff]   ;;  %v18105_v40 = vld [vmem:[#allocation5 + $0x24c] ss:$16 sps:$4 sm:$0xff]  }
 0x3a3   :  { %9695 = vmatprep.subr.bf16.mxu0 %v18042_v49  ;;  %9736 = vmatprep.subr.bf16.mxu1 %v18045_v20  ;;  %v9985_v57 = vpack.c.b16 %v9984_v32, %v9984_v32  ;;  %v10158_v49 = vpack.c.bf16 %v10156_v37, %v10156_v37  ;;  %v18102_v20 = vld [vmem:[#allocation5 + $0x244] ss:$16 sps:$4 sm:$0xff]   ;;  %v18103_v22 = vld [vmem:[#allocation5 + $0x248] ss:$16 sps:$4 sm:$0xff]   ;;  %v18117_v33 = vld [vmem:[#allocation5 + $0x20c] ss:$16 sps:$4 sm:$0xff]  }
 0x3a4   :  { %v18114_v17 = vld [vmem:[#allocation5 + $0x204] ss:$16 sps:$4 sm:$0xff]   ;;  %v18123_v21 = vld [vmem:[#allocation5 + $0x2ec] ss:$16 sps:$4 sm:$0xff]   ;;  %v18127_v31 = vld [vmem:[#allocation5 + $0x2c8] ss:$16 sps:$4 sm:$0xff]  }
 0x3a5   :  { %v18120_v23 = vld [vmem:[#allocation5 + $0x2e4] ss:$16 sps:$4 sm:$0xff]   ;;  %v18141_v55 = vld [vmem:[#allocation5 + $0x28c] ss:$16 sps:$4 sm:$0xff]  }
 0x3a6   :  { %9696 = vmatpush1.bf16.msra.mxu0 %v18040_v47  ;;  %9737 = vmatpush1.bf16.msra.mxu1 %v18043_v63  ;;  %v10155_v47 = vld [vmem:[#allocation4 + $0x4] sm:$0x1]  ;;  %v18100_v63 = vld [vmem:[#allocation5 + $0x240] ss:$16 sps:$4 sm:$0xff]  }
 0x3a7   :  { %9881 = vmatprep.subr.bf16.mxu0 %v18048_v2  ;;  %9922 = vmatprep.subr.bf16.mxu1 %v18051_v44  ;;  %v10157_v2 = vpack.c.bf16 %v10155_v47, %v10155_v47  ;;  %v10178_v44 = vunpack.c.l.b16 %v10158_v49  ;;  %v18126_v8 = vld [vmem:[#allocation5 + $0x2c4] ss:$16 sps:$4 sm:$0xff]  }
 0x3a8   :  { %v18132_v5 = vld [vmem:[#allocation5 + $0x2a4] ss:$16 sps:$4 sm:$0xff]  }
 0x3a9   :  { %16794 = vmatmul.mubr.msk.bf16.vlgmr.msra.gmra.mxu0 %vm131_vm0, %v9597_v58  ;;  %16795 = vmatmul.mubr.msk.bf16.vlgmr.msra.gmra.mxu1 %vm131_vm0, %v9597_v58  ;;  %v18111_v58 = vld [vmem:[#allocation5 + $0x22c] ss:$16 sps:$4 sm:$0xff]   ;;  %v10177_v7 = vunpack.c.l.b16 %v10157_v2 }
 0x3aa   :  { %9882 = vmatpush1.bf16.msra.mxu0 %v18046_v15  ;;  %9923 = vmatpush1.bf16.msra.mxu1 %v18049_v36  ;;  %v18108_v15 = vld [vmem:[#allocation5 + $0x224] ss:$16 sps:$4 sm:$0xff]   ;;  %v18106_v36 = vld [vmem:[#allocation5 + $0x220] ss:$16 sps:$4 sm:$0xff]  }
 0x3ab   :  { %9883 = vmatprep.subr.bf16.mxu0 %v18054_v12  ;;  %9924 = vmatprep.subr.bf16.mxu1 %v18057_v24  ;;  %v18109_v12 = vld [vmem:[#allocation5 + $0x228] ss:$16 sps:$4 sm:$0xff]   ;;  %v10179_v24 = vrot.slane %v10178_v44, 7 }
 0x3ac   :  { %9905 = vmatprep.mubr.bf16.mxu0 %v19087_v56  ;;  %9946 = vmatprep.mubr.bf16.mxu1 %v19087_v56 }
 0x3ae   :  { %9884 = vmatpush1.bf16.msra.mxu0 %v18052_v25  ;;  %9925 = vmatpush1.bf16.msra.mxu1 %v18055_v19  ;;  %v18112_v25 = vld [vmem:[#allocation5 + $0x200] ss:$16 sps:$4 sm:$0xff]   ;;  %v18115_v19 = vld [vmem:[#allocation5 + $0x208] ss:$16 sps:$4 sm:$0xff]  }
 0x3af   :  { %9885 = vmatprep.subr.bf16.mxu0 %v18060_v34  ;;  %9926 = vmatprep.subr.bf16.mxu1 %v18063_v46  ;;  %v10180_v34 = vsel %vm9423_vm4, %v10179_v24, %v10177_v7  ;;  %v10352_v46 = vld [vmem:[#allocation4 + $0x35] sm:$0x1] }
 0x3b0   :  { %v10354_v30 = vpack.c.bf16 %v10352_v46, %v10352_v46 }
 0x3b2   :  { %9886 = vmatpush1.bf16.msra.mxu0 %v18058_v43  ;;  %9927 = vmatpush1.bf16.msra.mxu1 %v18061_v41  ;;  %v10181_v43 = vpack.c.b16 %v10180_v34, %v10180_v34  ;;  %v18118_v41 = vld [vmem:[#allocation5 + $0x2e0] ss:$16 sps:$4 sm:$0xff]  }
 0x3b3   :  { %9887 = vmatprep.subr.bf16.mxu0 %v18066_v6  ;;  %9928 = vmatprep.subr.bf16.mxu1 %v18069_v35  ;;  %v18121_v6 = vld [vmem:[#allocation5 + $0x2e8] ss:$16 sps:$4 sm:$0xff]   ;;  %v18129_v35 = vld [vmem:[#allocation5 + $0x2cc] ss:$16 sps:$4 sm:$0xff]  }
 0x3b6   :  { %9888 = vmatpush1.bf16.msra.mxu0 %v18064_v54  ;;  %9929 = vmatpush1.bf16.msra.mxu1 %v18067_v53  ;;  %v10351_v54 = vld [vmem:[#allocation4 + $0x5] sm:$0x1]  ;;  %v18124_v53 = vld [vmem:[#allocation5 + $0x2c0] ss:$16 sps:$4 sm:$0xff]  }
 0x3b7   :  { %10077 = vmatprep.subr.bf16.mxu0 %v18072_v51  ;;  %10118 = vmatprep.subr.bf16.mxu1 %v18075_v60  ;;  %v10353_v51 = vpack.c.bf16 %v10351_v54, %v10351_v54  ;;  %v10374_v60 = vunpack.c.l.b16 %v10354_v30 }
 0x3b9   :  { %16812 = vmatmul.mubr.msk.bf16.vlgmr.msra.gmra.mxu0 %vm131_vm0, %v9789_v13  ;;  %16813 = vmatmul.mubr.msk.bf16.vlgmr.msra.gmra.mxu1 %vm131_vm0, %v9789_v13  ;;  %v18135_v13 = vld [vmem:[#allocation5 + $0x2ac] ss:$16 sps:$4 sm:$0xff]   ;;  %v10375_v18 = vrot.slane %v10374_v60, 7 }
 0x3ba   :  { %10078 = vmatpush1.bf16.msra.mxu0 %v18070_v62  ;;  %10119 = vmatpush1.bf16.msra.mxu1 %v18073_v9  ;;  %v18130_v62 = vld [vmem:[#allocation5 + $0x2a0] ss:$16 sps:$4 sm:$0xff]   ;;  %v18133_v9 = vld [vmem:[#allocation5 + $0x2a8] ss:$16 sps:$4 sm:$0xff]  }
 0x3bb   :  { %10079 = vmatprep.subr.bf16.mxu0 %v18078_v50  ;;  %10120 = vmatprep.subr.bf16.mxu1 %v18081_v42  ;;  %v10373_v50 = vunpack.c.l.b16 %v10353_v51  ;;  %v18138_v42 = vld [vmem:[#allocation5 + $0x284] ss:$16 sps:$4 sm:$0xff]  }
 0x3bc   :  { %10101 = vmatprep.mubr.bf16.mxu0 %v19087_v56  ;;  %10142 = vmatprep.mubr.bf16.mxu1 %v19087_v56 }
 0x3bd   :  { %v10376_v28 = vsel %vm9423_vm4, %v10375_v18, %v10373_v50 }
 0x3be   :  { %10080 = vmatpush1.bf16.msra.mxu0 %v18076_v59  ;;  %10121 = vmatpush1.bf16.msra.mxu1 %v18079_v29  ;;  %v18136_v59 = vld [vmem:[#allocation5 + $0x280] ss:$16 sps:$4 sm:$0xff]   ;;  %v18139_v29 = vld [vmem:[#allocation5 + $0x288] ss:$16 sps:$4 sm:$0xff]   ;;  %v10377_v11 = vpack.c.b16 %v10376_v28, %v10376_v28 }
 0x3bf   :  { %10081 = vmatprep.subr.bf16.mxu0 %v18084_v38  ;;  %10122 = vmatprep.subr.bf16.mxu1 %v18087_v45 }
 0x3c2   :  { %10082 = vmatpush1.bf16.msra.mxu0 %v18082_v61  ;;  %10123 = vmatpush1.bf16.msra.mxu1 %v18085_v26 }
 0x3c3   :  { %10083 = vmatprep.subr.bf16.mxu0 %v18090_v16  ;;  %10124 = vmatprep.subr.bf16.mxu1 %v18093_v52 }
 0x3c6   :  { %10084 = vmatpush1.bf16.msra.mxu0 %v18088_v10  ;;  %10125 = vmatpush1.bf16.msra.mxu1 %v18091_v3 }
 0x3c7   :  { %10273 = vmatprep.subr.bf16.mxu0 %v18096_v39  ;;  %10314 = vmatprep.subr.bf16.mxu1 %v18099_v14 }
 0x3c9   :  { %16830 = vmatmul.mubr.msk.bf16.vlgmr.msra.gmra.mxu0 %vm131_vm0, %v9985_v57  ;;  %16831 = vmatmul.mubr.msk.bf16.vlgmr.msra.gmra.mxu1 %vm131_vm0, %v9985_v57 }
 0x3ca   :  { %10274 = vmatpush1.bf16.msra.mxu0 %v18094_v1  ;;  %10315 = vmatpush1.bf16.msra.mxu1 %v18097_v0 }
 0x3cb   :  { %10275 = vmatprep.subr.bf16.mxu0 %v18102_v20  ;;  %10316 = vmatprep.subr.bf16.mxu1 %v18105_v40 }
 0x3cc   :  { %10297 = vmatprep.mubr.bf16.mxu0 %v19087_v56  ;;  %10338 = vmatprep.mubr.bf16.mxu1 %v19087_v56 }
 0x3ce   :  { %10276 = vmatpush1.bf16.msra.mxu0 %v18100_v63  ;;  %10317 = vmatpush1.bf16.msra.mxu1 %v18103_v22 }
 0x3cf   :  { %10277 = vmatprep.subr.bf16.mxu0 %v18108_v15  ;;  %10318 = vmatprep.subr.bf16.mxu1 %v18111_v58 }
 0x3d2   :  { %10278 = vmatpush1.bf16.msra.mxu0 %v18106_v36  ;;  %10319 = vmatpush1.bf16.msra.mxu1 %v18109_v12 }
 0x3d3   :  { %10279 = vmatprep.subr.bf16.mxu0 %v18114_v17  ;;  %10320 = vmatprep.subr.bf16.mxu1 %v18117_v33 }
 0x3d6   :  { %10280 = vmatpush1.bf16.msra.mxu0 %v18112_v25  ;;  %10321 = vmatpush1.bf16.msra.mxu1 %v18115_v19 }
 0x3d7   :  { %10469 = vmatprep.subr.bf16.mxu0 %v18120_v23  ;;  %10510 = vmatprep.subr.bf16.mxu1 %v18123_v21 }
 0x3d9   :  { %16848 = vmatmul.mubr.msk.bf16.vlgmr.msra.gmra.mxu0 %vm131_vm0, %v10181_v43  ;;  %16849 = vmatmul.mubr.msk.bf16.vlgmr.msra.gmra.mxu1 %vm131_vm0, %v10181_v43 }
 0x3da   :  { %10470 = vmatpush1.bf16.msra.mxu0 %v18118_v41  ;;  %10511 = vmatpush1.bf16.msra.mxu1 %v18121_v6 }
 0x3db   :  { %10471 = vmatprep.subr.bf16.mxu0 %v18126_v8  ;;  %10512 = vmatprep.subr.bf16.mxu1 %v18129_v35 }
 0x3dc   :  { %10493 = vmatprep.mubr.bf16.mxu0 %v19087_v56  ;;  %10534 = vmatprep.mubr.bf16.mxu1 %v19087_v56 }
 0x3de   :  { %10472 = vmatpush1.bf16.msra.mxu0 %v18124_v53  ;;  %10513 = vmatpush1.bf16.msra.mxu1 %v18127_v31 }
 0x3df   :  { %10473 = vmatprep.subr.bf16.mxu0 %v18132_v5  ;;  %10514 = vmatprep.subr.bf16.mxu1 %v18135_v13 }
 0x3e2   :  { %10474 = vmatpush1.bf16.msra.mxu0 %v18130_v62  ;;  %10515 = vmatpush1.bf16.msra.mxu1 %v18133_v9 }
 0x3e3   :  { %10475 = vmatprep.subr.bf16.mxu0 %v18138_v42  ;;  %10516 = vmatprep.subr.bf16.mxu1 %v18141_v55 }
 0x3e6   :  { %10476 = vmatpush1.bf16.msra.mxu0 %v18136_v59  ;;  %10517 = vmatpush1.bf16.msra.mxu1 %v18139_v29 }
 0x3e9   :  { %16866 = vmatmul.mubr.msk.bf16.vlgmr.msra.gmra.mxu0 %vm131_vm0, %v10377_v11  ;;  %16867 = vmatmul.mubr.msk.bf16.vlgmr.msra.gmra.mxu1 %vm131_vm0, %v10377_v11 }
 0x459   :  { %v9543_v38 = vpop.f32.mrf.mxu0  ;;  %v9584_v45 = vpop.f32.mrf.mxu1 }
 0x45b   :  { %v9545_v61 = vpop.f32.mrf.mxu0  ;;  %v9586_v26 = vpop.f32.mrf.mxu1 }
 0x45d   :  { %v9547_v16 = vpop.f32.mrf.mxu0  ;;  %v9588_v48 = vpop.f32.mrf.mxu1 }
 0x45f   :  { %v9548_v27 = vpop.f32.mrf.mxu0  ;;  %v9589_v52 = vpop.f32.mrf.mxu1 }
 0x469   :  { %v9715_v10 = vpop.f32.mrf.mxu0  ;;  %v9756_v3 = vpop.f32.mrf.mxu1 }
 0x46a   :  { %v9716_v41 = vadd.f32 %v9715_v10, %v9543_v38  ;;  %v9757_v6 = vadd.f32 %v9756_v3, %v9584_v45 }
 0x46b   :  { %v9717_v39 = vpop.f32.mrf.mxu0  ;;  %v9758_v32 = vpop.f32.mrf.mxu1 }
 0x46c   :  { %v9718_v30 = vadd.f32 %v9717_v39, %v9545_v61  ;;  %v9759_v8 = vadd.f32 %v9758_v32, %v9586_v26 }
 0x46d   :  { %v9719_v14 = vpop.f32.mrf.mxu0  ;;  %v9760_v37 = vpop.f32.mrf.mxu1 }
 0x46f   :  { %v9720_v57 = vpop.f32.mrf.mxu0  ;;  %v9761_v1 = vpop.f32.mrf.mxu1 }
 0x479   :  { %v9907_v0 = vpop.f32.mrf.mxu0  ;;  %v9948_v49 = vpop.f32.mrf.mxu1 }
 0x47a   :  { %v9955_v35 = vadd.f32 %v9907_v0, %v9716_v41  ;;  %v9957_v54 = vadd.f32 %v9948_v49, %v9757_v6 }
 0x47b   :  { %v9909_v20 = vpop.f32.mrf.mxu0  ;;  %v9950_v40 = vpop.f32.mrf.mxu1 }
 0x47c   :  { %v9956_v53 = vadd.f32 %v9909_v20, %v9718_v30  ;;  %v9958_v31 = vadd.f32 %v9950_v40, %v9759_v8 }
 0x47d   :  { %v9911_v47 = vpop.f32.mrf.mxu0  ;;  %v9952_v63 = vpop.f32.mrf.mxu1 }
 0x47f   :  { %v9912_v22 = vpop.f32.mrf.mxu0  ;;  %v9953_v2 = vpop.f32.mrf.mxu1 }
 0x489   :  { %v10103_v44 = vpop.f32.mrf.mxu0  ;;  %v10144_v15 = vpop.f32.mrf.mxu1 }
 0x48a   :  { %v10151_v51 = vadd.f32 %v10103_v44, %v9955_v35  ;;  %v10153_v60 = vadd.f32 %v10144_v15, %v9957_v54 }
 0x48b   :  { %v10105_v58 = vpop.f32.mrf.mxu0  ;;  %v10146_v36 = vpop.f32.mrf.mxu1 }
 0x48c   :  { %v10152_v5 = vadd.f32 %v10105_v58, %v9956_v53  ;;  %v10154_v13 = vadd.f32 %v10146_v36, %v9958_v31 }
 0x48d   :  { %v10107_v12 = vpop.f32.mrf.mxu0  ;;  %v10148_v7 = vpop.f32.mrf.mxu1 }
 0x48f   :  { %v10108_v24 = vpop.f32.mrf.mxu0  ;;  %v10149_v17 = vpop.f32.mrf.mxu1 }
 0x499   :  { %v10299_v33 = vpop.f32.mrf.mxu0  ;;  %v10340_v25 = vpop.f32.mrf.mxu1 }
 0x49a   :  { %v10347_v62 = vadd.f32 %v10299_v33, %v10151_v51  ;;  %v10349_v9 = vadd.f32 %v10340_v25, %v10153_v60 }
 0x49b   :  { %v10301_v19 = vpop.f32.mrf.mxu0  ;;  %v10342_v34 = vpop.f32.mrf.mxu1 }
 0x49c   :  { %v10348_v42 = vadd.f32 %v10301_v19, %v10152_v5  ;;  %v10350_v55 = vadd.f32 %v10342_v34, %v10154_v13 }
 0x49d   :  { %v10303_v23 = vpop.f32.mrf.mxu0  ;;  %v10344_v21 = vpop.f32.mrf.mxu1 }
 0x49f   :  { %v10304_v46 = vpop.f32.mrf.mxu0  ;;  %v10345_v43 = vpop.f32.mrf.mxu1 }
 0x4a9   :  { %v10495_v50 = vpop.f32.mrf.mxu0  ;;  %v10536_v18 = vpop.f32.mrf.mxu1 }
 0x4aa   :  { %v21521_v59 = vadd.f32 %v10495_v50, %v10347_v62  ;;  %v21523_v29 = vadd.f32 %v10536_v18, %v10349_v9 }
 0x4ab   :  { %v10497_v28 = vpop.f32.mrf.mxu0  ;;  %v10538_v11 = vpop.f32.mrf.mxu1 }
 0x4ac   :  { %v21525_v38 = vadd.f32 %v10497_v28, %v10348_v42  ;;  %v21527_v45 = vadd.f32 %v10538_v11, %v10350_v55 }
 0x4ad   :  { %v10499_v61 = vpop.f32.mrf.mxu0  ;;  %v10540_v26 = vpop.f32.mrf.mxu1 }
 0x4af   :  { %v10500_v16 = vpop.f32.mrf.mxu0  ;;  %v10541_v48 = vpop.f32.mrf.mxu1 }
 0x4b0   :  { %19063 = dma.done.wait [#allocation6 + $0x1], 12288 }
 0x4b1   :  { %19064 = vsyncadd [#allocation6 + $0x1], 4294955008  ;;  %10692 = vmatprep.mubr.bf16.mxu0 %v19087_v56  ;;  %10733 = vmatprep.mubr.bf16.mxu1 %v19087_v56  ;;  %v18142_v27 = vld [vmem:[#allocation5 + $0x364] ss:$16 sps:$4 sm:$0xff]   ;;  %v18144_v52 = vld [vmem:[#allocation5 + $0x36c] ss:$16 sps:$4 sm:$0xff]  }
 0x4b2   :  { %10668 = vmatprep.subr.bf16.mxu0 %v18142_v27  ;;  %v18146_v10 = vld [vmem:[#allocation5 + $0x360] ss:$16 sps:$4 sm:$0xff]   ;;  %v18147_v3 = vld [vmem:[#allocation5 + $0x368] ss:$16 sps:$4 sm:$0xff]   ;;  %10709 = vmatprep.subr.bf16.mxu1 %v18144_v52  ;;  %v18148_v39 = vld [vmem:[#allocation5 + $0x344] ss:$16 sps:$4 sm:$0xff]  }
 0x4b3   :  { %10669 = vmatpush1.bf16.msra.mxu0 %v18146_v10  ;;  %10710 = vmatpush1.bf16.msra.mxu1 %v18147_v3  ;;  %v18150_v32 = vld [vmem:[#allocation5 + $0x34c] ss:$16 sps:$4 sm:$0xff]   ;;  %v18152_v14 = vld [vmem:[#allocation5 + $0x340] ss:$16 sps:$4 sm:$0xff]   ;;  %v18153_v37 = vld [vmem:[#allocation5 + $0x348] ss:$16 sps:$4 sm:$0xff]  }
 0x4b4   :  { %10670 = vmatprep.subr.bf16.mxu0 %v18148_v39  ;;  %10711 = vmatprep.subr.bf16.mxu1 %v18150_v32  ;;  %v18154_v57 = vld [vmem:[#allocation5 + $0x324] ss:$16 sps:$4 sm:$0xff]   ;;  %v18156_v1 = vld [vmem:[#allocation5 + $0x32c] ss:$16 sps:$4 sm:$0xff]   ;;  %v18158_v0 = vld [vmem:[#allocation5 + $0x320] ss:$16 sps:$4 sm:$0xff]  }
 0x4b5   :  { %v18159_v49 = vld [vmem:[#allocation5 + $0x328] ss:$16 sps:$4 sm:$0xff]   ;;  %v18160_v20 = vld [vmem:[#allocation5 + $0x304] ss:$16 sps:$4 sm:$0xff]   ;;  %v18162_v40 = vld [vmem:[#allocation5 + $0x30c] ss:$16 sps:$4 sm:$0xff]  }
 0x4b6   :  { %v10550_v47 = vld [vmem:[#allocation4 + $0x8] sm:$0x1]  ;;  %v10551_v63 = vld [vmem:[#allocation4 + $0x38] sm:$0x1]  ;;  %v18164_v2 = vld [vmem:[#allocation5 + $0x300] ss:$16 sps:$4 sm:$0xff]  }
 0x4b7   :  { %10671 = vmatpush1.bf16.msra.mxu0 %v18152_v14  ;;  %10712 = vmatpush1.bf16.msra.mxu1 %v18153_v37  ;;  %v10552_v22 = vpack.c.bf16 %v10550_v47, %v10550_v47  ;;  %v18165_v44 = vld [vmem:[#allocation5 + $0x308] ss:$16 sps:$4 sm:$0xff]   ;;  %v10553_v15 = vpack.c.bf16 %v10551_v63, %v10551_v63  ;;  %v18168_v58 = vld [vmem:[#allocation5 + $0x3e4] ss:$16 sps:$4 sm:$0xff]   ;;  %v18171_v36 = vld [vmem:[#allocation5 + $0x3ec] ss:$16 sps:$4 sm:$0xff]  }
 0x4b8   :  { %10672 = vmatprep.subr.bf16.mxu0 %v18154_v57  ;;  %10713 = vmatprep.subr.bf16.mxu1 %v18156_v1  ;;  %v18166_v17 = vld [vmem:[#allocation5 + $0x3e0] ss:$16 sps:$4 sm:$0xff]   ;;  %v18169_v33 = vld [vmem:[#allocation5 + $0x3e8] ss:$16 sps:$4 sm:$0xff]   ;;  %v18174_v19 = vld [vmem:[#allocation5 + $0x3c4] ss:$16 sps:$4 sm:$0xff]  }
 0x4b9   :  { %v10572_v12 = vunpack.c.l.b16 %v10552_v22  ;;  %v10573_v7 = vunpack.c.l.b16 %v10553_v15  ;;  %v18177_v23 = vld [vmem:[#allocation5 + $0x3cc] ss:$16 sps:$4 sm:$0xff]   ;;  %v18172_v21 = vld [vmem:[#allocation5 + $0x3c0] ss:$16 sps:$4 sm:$0xff]   ;;  %v18175_v46 = vld [vmem:[#allocation5 + $0x3c8] ss:$16 sps:$4 sm:$0xff]  }
 0x4ba   :  { %v10746_v43 = vld [vmem:[#allocation4 + $0x9] sm:$0x1]  ;;  %v10747_v41 = vld [vmem:[#allocation4 + $0x39] sm:$0x1]  ;;  %v18180_v6 = vld [vmem:[#allocation5 + $0x3a4] ss:$16 sps:$4 sm:$0xff]  }
 0x4bb   :  { %10673 = vmatpush1.bf16.msra.mxu0 %v18158_v0  ;;  %10714 = vmatpush1.bf16.msra.mxu1 %v18159_v49  ;;  %v10574_v24 = vrot.slane %v10573_v7, 7  ;;  %v18183_v30 = vld [vmem:[#allocation5 + $0x3ac] ss:$16 sps:$4 sm:$0xff]   ;;  %v10748_v8 = vpack.c.bf16 %v10746_v43, %v10746_v43  ;;  %v10749_v35 = vpack.c.bf16 %v10747_v41, %v10747_v41  ;;  %v18178_v53 = vld [vmem:[#allocation5 + $0x3a0] ss:$16 sps:$4 sm:$0xff]  }
 0x4bc   :  { %10674 = vmatprep.subr.bf16.mxu0 %v18160_v20  ;;  %10715 = vmatprep.subr.bf16.mxu1 %v18162_v40  ;;  %v18181_v31 = vld [vmem:[#allocation5 + $0x3a8] ss:$16 sps:$4 sm:$0xff]   ;;  %v18186_v60 = vld [vmem:[#allocation5 + $0x384] ss:$16 sps:$4 sm:$0xff]   ;;  %v18189_v5 = vld [vmem:[#allocation5 + $0x38c] ss:$16 sps:$4 sm:$0xff]  }
 0x4bd   :  { %v10575_v25 = vsel %vm9423_vm4, %v10574_v24, %v10572_v12  ;;  %v10769_v54 = vunpack.c.l.b16 %v10749_v35  ;;  %v10768_v51 = vunpack.c.l.b16 %v10748_v8  ;;  %v18184_v62 = vld [vmem:[#allocation5 + $0x380] ss:$16 sps:$4 sm:$0xff]   ;;  %v18187_v9 = vld [vmem:[#allocation5 + $0x388] ss:$16 sps:$4 sm:$0xff]   ;;  %v18192_v18 = vld [vmem:[#allocation5 + $0x464] ss:$16 sps:$4 sm:$0xff]  }
 0x4be   :  { %v10576_v34 = vpack.c.b16 %v10575_v25, %v10575_v25  ;;  %v18195_v42 = vld [vmem:[#allocation5 + $0x46c] ss:$16 sps:$4 sm:$0xff]   ;;  %v18190_v55 = vld [vmem:[#allocation5 + $0x460] ss:$16 sps:$4 sm:$0xff]   ;;  %v18193_v11 = vld [vmem:[#allocation5 + $0x468] ss:$16 sps:$4 sm:$0xff]  }
 0x4bf   :  { %10675 = vmatpush1.bf16.msra.mxu0 %v18164_v2  ;;  %10716 = vmatpush1.bf16.msra.mxu1 %v18165_v44  ;;  %v10770_v13 = vrot.slane %v10769_v54, 7  ;;  %v18198_v61 = vld [vmem:[#allocation5 + $0x444] ss:$16 sps:$4 sm:$0xff]   ;;  %v10943_v26 = vld [vmem:[#allocation4 + $0x3a] sm:$0x1] }
 0x4c0   :  { %10864 = vmatprep.subr.bf16.mxu0 %v18168_v58  ;;  %10905 = vmatprep.subr.bf16.mxu1 %v18171_v36  ;;  %v18201_v16 = vld [vmem:[#allocation5 + $0x44c] ss:$16 sps:$4 sm:$0xff]   ;;  %v10945_v48 = vpack.c.bf16 %v10943_v26, %v10943_v26  ;;  %v10942_v27 = vld [vmem:[#allocation4 + $0xa] sm:$0x1]  ;;  %v18196_v52 = vld [vmem:[#allocation5 + $0x440] ss:$16 sps:$4 sm:$0xff]  }
 0x4c1   :  { %v10771_v50 = vsel %vm9423_vm4, %v10770_v13, %v10768_v51  ;;  %v18199_v10 = vld [vmem:[#allocation5 + $0x448] ss:$16 sps:$4 sm:$0xff]   ;;  %v18204_v3 = vld [vmem:[#allocation5 + $0x424] ss:$16 sps:$4 sm:$0xff]   ;;  %v10944_v39 = vpack.c.bf16 %v10942_v27, %v10942_v27  ;;  %v18207_v14 = vld [vmem:[#allocation5 + $0x42c] ss:$16 sps:$4 sm:$0xff]  }
 0x4c2   :  { %16884 = vmatmul.mubr.msk.bf16.vlgmr.msra.gmra.mxu0 %vm131_vm0, %v10576_v34  ;;  %16885 = vmatmul.mubr.msk.bf16.vlgmr.msra.gmra.mxu1 %vm131_vm0, %v10576_v34  ;;  %v10772_v28 = vpack.c.b16 %v10771_v50, %v10771_v50  ;;  %v10965_v32 = vunpack.c.l.b16 %v10945_v48  ;;  %v18202_v37 = vld [vmem:[#allocation5 + $0x420] ss:$16 sps:$4 sm:$0xff]   ;;  %v18205_v57 = vld [vmem:[#allocation5 + $0x428] ss:$16 sps:$4 sm:$0xff]   ;;  %v18210_v1 = vld [vmem:[#allocation5 + $0x404] ss:$16 sps:$4 sm:$0xff]  }
 0x4c3   :  { %10865 = vmatpush1.bf16.msra.mxu0 %v18166_v17  ;;  %10906 = vmatpush1.bf16.msra.mxu1 %v18169_v33  ;;  %v10964_v0 = vunpack.c.l.b16 %v10944_v39  ;;  %v18213_v20 = vld [vmem:[#allocation5 + $0x40c] ss:$16 sps:$4 sm:$0xff]   ;;  %v18208_v40 = vld [vmem:[#allocation5 + $0x400] ss:$16 sps:$4 sm:$0xff]   ;;  %v18211_v47 = vld [vmem:[#allocation5 + $0x408] ss:$16 sps:$4 sm:$0xff]  }
 0x4c4   :  { %10866 = vmatprep.subr.bf16.mxu0 %v18174_v19  ;;  %10907 = vmatprep.subr.bf16.mxu1 %v18177_v23  ;;  %v10966_v49 = vrot.slane %v10965_v32, 7  ;;  %v18216_v22 = vld [vmem:[#allocation5 + $0x4e4] ss:$16 sps:$4 sm:$0xff]   ;;  %v18219_v2 = vld [vmem:[#allocation5 + $0x4ec] ss:$16 sps:$4 sm:$0xff]  }
 0x4c5   :  { %10888 = vmatprep.mubr.bf16.mxu0 %v19087_v56  ;;  %10929 = vmatprep.mubr.bf16.mxu1 %v19087_v56  ;;  %v11139_v44 = vld [vmem:[#allocation4 + $0x3b] sm:$0x1]  ;;  %v18214_v58 = vld [vmem:[#allocation5 + $0x4e0] ss:$16 sps:$4 sm:$0xff]   ;;  %v18222_v12 = vld [vmem:[#allocation5 + $0x4c4] ss:$16 sps:$4 sm:$0xff]  }
 0x4c6   :  { %v10967_v63 = vsel %vm9423_vm4, %v10966_v49, %v10964_v0  ;;  %v18217_v36 = vld [vmem:[#allocation5 + $0x4e8] ss:$16 sps:$4 sm:$0xff]   ;;  %v11141_v7 = vpack.c.bf16 %v11139_v44, %v11139_v44  ;;  %v18225_v24 = vld [vmem:[#allocation5 + $0x4cc] ss:$16 sps:$4 sm:$0xff]   ;;  %v18220_v33 = vld [vmem:[#allocation5 + $0x4c0] ss:$16 sps:$4 sm:$0xff]  }
 0x4c7   :  { %10867 = vmatpush1.bf16.msra.mxu0 %v18172_v21  ;;  %10908 = vmatpush1.bf16.msra.mxu1 %v18175_v46  ;;  %v10968_v15 = vpack.c.b16 %v10967_v63, %v10967_v63  ;;  %v11138_v17 = vld [vmem:[#allocation4 + $0xb] sm:$0x1]  ;;  %v18228_v23 = vld [vmem:[#allocation5 + $0x4a4] ss:$16 sps:$4 sm:$0xff]   ;;  %v18231_v21 = vld [vmem:[#allocation5 + $0x4ac] ss:$16 sps:$4 sm:$0xff]  }
 0x4c8   :  { %10868 = vmatprep.subr.bf16.mxu0 %v18180_v6  ;;  %10909 = vmatprep.subr.bf16.mxu1 %v18183_v30  ;;  %v18223_v25 = vld [vmem:[#allocation5 + $0x4c8] ss:$16 sps:$4 sm:$0xff]   ;;  %v11140_v19 = vpack.c.bf16 %v11138_v17, %v11138_v17  ;;  %v11161_v34 = vunpack.c.l.b16 %v11141_v7  ;;  %v18226_v46 = vld [vmem:[#allocation5 + $0x4a0] ss:$16 sps:$4 sm:$0xff]   ;;  %v18234_v41 = vld [vmem:[#allocation5 + $0x484] ss:$16 sps:$4 sm:$0xff]  }
 0x4c9   :  { %v18229_v43 = vld [vmem:[#allocation5 + $0x4a8] ss:$16 sps:$4 sm:$0xff]   ;;  %v18237_v8 = vld [vmem:[#allocation5 + $0x48c] ss:$16 sps:$4 sm:$0xff]   ;;  %v18232_v35 = vld [vmem:[#allocation5 + $0x480] ss:$16 sps:$4 sm:$0xff]  }
 0x4ca   :  { %v11160_v6 = vunpack.c.l.b16 %v11140_v19  ;;  %v11162_v30 = vrot.slane %v11161_v34, 7  ;;  %v18235_v54 = vld [vmem:[#allocation5 + $0x488] ss:$16 sps:$4 sm:$0xff]   ;;  %v18243_v51 = vld [vmem:[#allocation5 + $0x56c] ss:$16 sps:$4 sm:$0xff]  }
 0x4cb   :  { %10869 = vmatpush1.bf16.msra.mxu0 %v18178_v53  ;;  %10910 = vmatpush1.bf16.msra.mxu1 %v18181_v31  ;;  %v18240_v53 = vld [vmem:[#allocation5 + $0x564] ss:$16 sps:$4 sm:$0xff]   ;;  %v18238_v13 = vld [vmem:[#allocation5 + $0x560] ss:$16 sps:$4 sm:$0xff]   ;;  %v18253_v27 = vld [vmem:[#allocation5 + $0x528] ss:$16 sps:$4 sm:$0xff]  }
 0x4cc   :  { %10870 = vmatprep.subr.bf16.mxu0 %v18186_v60  ;;  %10911 = vmatprep.subr.bf16.mxu1 %v18189_v5  ;;  %v11163_v31 = vsel %vm9423_vm4, %v11162_v30, %v11160_v6  ;;  %v11335_v60 = vld [vmem:[#allocation4 + $0x3c] sm:$0x1]  ;;  %v18246_v50 = vld [vmem:[#allocation5 + $0x544] ss:$16 sps:$4 sm:$0xff]   ;;  %v18250_v48 = vld [vmem:[#allocation5 + $0x520] ss:$16 sps:$4 sm:$0xff]  }
 0x4cd   :  { %v11164_v5 = vpack.c.b16 %v11163_v31, %v11163_v31  ;;  %v18252_v26 = vld [vmem:[#allocation5 + $0x524] ss:$16 sps:$4 sm:$0xff]   ;;  %v18261_v39 = vld [vmem:[#allocation5 + $0x50c] ss:$16 sps:$4 sm:$0xff]   ;;  %v18256_v32 = vld [vmem:[#allocation5 + $0x500] ss:$16 sps:$4 sm:$0xff]  }
 0x4ce   :  { %v11531_v0 = vld [vmem:[#allocation4 + $0x3d] sm:$0x1]  ;;  %v18270_v63 = vld [vmem:[#allocation5 + $0x5c4] ss:$16 sps:$4 sm:$0xff]   ;;  %v18268_v44 = vld [vmem:[#allocation5 + $0x5c0] ss:$16 sps:$4 sm:$0xff]  }
 0x4cf   :  { %10871 = vmatpush1.bf16.msra.mxu0 %v18184_v62  ;;  %10912 = vmatpush1.bf16.msra.mxu1 %v18187_v9  ;;  %v18241_v62 = vld [vmem:[#allocation5 + $0x568] ss:$16 sps:$4 sm:$0xff]   ;;  %v11337_v9 = vpack.c.bf16 %v11335_v60, %v11335_v60  ;;  %v18279_v7 = vld [vmem:[#allocation5 + $0x5ac] ss:$16 sps:$4 sm:$0xff]   ;;  %v18282_v19 = vld [vmem:[#allocation5 + $0x584] ss:$16 sps:$4 sm:$0xff]  }
 0x4d0   :  { %11060 = vmatprep.subr.bf16.mxu0 %v18192_v18  ;;  %11101 = vmatprep.subr.bf16.mxu1 %v18195_v42  ;;  %v18249_v18 = vld [vmem:[#allocation5 + $0x54c] ss:$16 sps:$4 sm:$0xff]   ;;  %v18277_v17 = vld [vmem:[#allocation5 + $0x5a8] ss:$16 sps:$4 sm:$0xff]  }
 0x4d1   :  { %v11334_v42 = vld [vmem:[#allocation4 + $0xc] sm:$0x1] }
 0x4d2   :  { %16902 = vmatmul.mubr.msk.bf16.vlgmr.msra.gmra.mxu0 %vm131_vm0, %v10772_v28  ;;  %16903 = vmatmul.mubr.msk.bf16.vlgmr.msra.gmra.mxu1 %vm131_vm0, %v10772_v28  ;;  %v18247_v28 = vld [vmem:[#allocation5 + $0x548] ss:$16 sps:$4 sm:$0xff]   ;;  %v18285_v34 = vld [vmem:[#allocation5 + $0x58c] ss:$16 sps:$4 sm:$0xff]  }
 0x4d3   :  { %11061 = vmatpush1.bf16.msra.mxu0 %v18190_v55  ;;  %11102 = vmatpush1.bf16.msra.mxu1 %v18193_v11  ;;  %v18244_v55 = vld [vmem:[#allocation5 + $0x540] ss:$16 sps:$4 sm:$0xff]   ;;  %v11336_v11 = vpack.c.bf16 %v11334_v42, %v11334_v42 }
 0x4d4   :  { %11062 = vmatprep.subr.bf16.mxu0 %v18198_v61  ;;  %11103 = vmatprep.subr.bf16.mxu1 %v18201_v16  ;;  %v11357_v61 = vunpack.c.l.b16 %v11337_v9  ;;  %v18255_v16 = vld [vmem:[#allocation5 + $0x52c] ss:$16 sps:$4 sm:$0xff]  }
 0x4d5   :  { %11084 = vmatprep.mubr.bf16.mxu0 %v19087_v56  ;;  %11125 = vmatprep.mubr.bf16.mxu1 %v19087_v56 }
 0x4d7   :  { %11063 = vmatpush1.bf16.msra.mxu0 %v18196_v52  ;;  %11104 = vmatpush1.bf16.msra.mxu1 %v18199_v10  ;;  %v11356_v52 = vunpack.c.l.b16 %v11336_v11  ;;  %v11358_v10 = vrot.slane %v11357_v61, 7 }
 0x4d8   :  { %11064 = vmatprep.subr.bf16.mxu0 %v18204_v3  ;;  %11105 = vmatprep.subr.bf16.mxu1 %v18207_v14  ;;  %v18258_v3 = vld [vmem:[#allocation5 + $0x504] ss:$16 sps:$4 sm:$0xff]   ;;  %v18259_v14 = vld [vmem:[#allocation5 + $0x508] ss:$16 sps:$4 sm:$0xff]  }
 0x4db   :  { %11065 = vmatpush1.bf16.msra.mxu0 %v18202_v37  ;;  %11106 = vmatpush1.bf16.msra.mxu1 %v18205_v57  ;;  %v11359_v37 = vsel %vm9423_vm4, %v11358_v10, %v11356_v52  ;;  %v18264_v57 = vld [vmem:[#allocation5 + $0x5e4] ss:$16 sps:$4 sm:$0xff]  }
 0x4dc   :  { %11066 = vmatprep.subr.bf16.mxu0 %v18210_v1  ;;  %11107 = vmatprep.subr.bf16.mxu1 %v18213_v20  ;;  %v18267_v1 = vld [vmem:[#allocation5 + $0x5ec] ss:$16 sps:$4 sm:$0xff]   ;;  %v11360_v49 = vpack.c.b16 %v11359_v37, %v11359_v37  ;;  %v18262_v20 = vld [vmem:[#allocation5 + $0x5e0] ss:$16 sps:$4 sm:$0xff]  }
 0x4df   :  { %11067 = vmatpush1.bf16.msra.mxu0 %v18208_v40  ;;  %11108 = vmatpush1.bf16.msra.mxu1 %v18211_v47  ;;  %v18265_v40 = vld [vmem:[#allocation5 + $0x5e8] ss:$16 sps:$4 sm:$0xff]   ;;  %v11533_v47 = vpack.c.bf16 %v11531_v0, %v11531_v0 }
 0x4e0   :  { %11256 = vmatprep.subr.bf16.mxu0 %v18216_v22  ;;  %11297 = vmatprep.subr.bf16.mxu1 %v18219_v2  ;;  %v18273_v22 = vld [vmem:[#allocation5 + $0x5cc] ss:$16 sps:$4 sm:$0xff]  }
 0x4e1   :  { %v11530_v2 = vld [vmem:[#allocation4 + $0xd] sm:$0x1] }
 0x4e2   :  { %16920 = vmatmul.mubr.msk.bf16.vlgmr.msra.gmra.mxu0 %vm131_vm0, %v10968_v15  ;;  %16921 = vmatmul.mubr.msk.bf16.vlgmr.msra.gmra.mxu1 %vm131_vm0, %v10968_v15  ;;  %v18271_v15 = vld [vmem:[#allocation5 + $0x5c8] ss:$16 sps:$4 sm:$0xff]  }
 0x4e3   :  { %11257 = vmatpush1.bf16.msra.mxu0 %v18214_v58  ;;  %11298 = vmatpush1.bf16.msra.mxu1 %v18217_v36  ;;  %v11532_v58 = vpack.c.bf16 %v11530_v2, %v11530_v2  ;;  %v11553_v36 = vunpack.c.l.b16 %v11533_v47 }
 0x4e4   :  { %11258 = vmatprep.subr.bf16.mxu0 %v18222_v12  ;;  %11299 = vmatprep.subr.bf16.mxu1 %v18225_v24  ;;  %v18276_v12 = vld [vmem:[#allocation5 + $0x5a4] ss:$16 sps:$4 sm:$0xff]   ;;  %v18274_v24 = vld [vmem:[#allocation5 + $0x5a0] ss:$16 sps:$4 sm:$0xff]  }
 0x4e5   :  { %11280 = vmatprep.mubr.bf16.mxu0 %v19087_v56  ;;  %11321 = vmatprep.mubr.bf16.mxu1 %v19087_v56 }
 0x4e7   :  { %11259 = vmatpush1.bf16.msra.mxu0 %v18220_v33  ;;  %11300 = vmatpush1.bf16.msra.mxu1 %v18223_v25  ;;  %v11552_v33 = vunpack.c.l.b16 %v11532_v58  ;;  %v11554_v25 = vrot.slane %v11553_v36, 7 }
 0x4e8   :  { %11260 = vmatprep.subr.bf16.mxu0 %v18228_v23  ;;  %11301 = vmatprep.subr.bf16.mxu1 %v18231_v21  ;;  %v18280_v23 = vld [vmem:[#allocation5 + $0x580] ss:$16 sps:$4 sm:$0xff]   ;;  %v18283_v21 = vld [vmem:[#allocation5 + $0x588] ss:$16 sps:$4 sm:$0xff]  }
 0x4eb   :  { %11261 = vmatpush1.bf16.msra.mxu0 %v18226_v46  ;;  %11302 = vmatpush1.bf16.msra.mxu1 %v18229_v43  ;;  %v11555_v46 = vsel %vm9423_vm4, %v11554_v25, %v11552_v33 }
 0x4ec   :  { %11262 = vmatprep.subr.bf16.mxu0 %v18234_v41  ;;  %11303 = vmatprep.subr.bf16.mxu1 %v18237_v8  ;;  %v11556_v43 = vpack.c.b16 %v11555_v46, %v11555_v46 }
 0x4ef   :  { %11263 = vmatpush1.bf16.msra.mxu0 %v18232_v35  ;;  %11304 = vmatpush1.bf16.msra.mxu1 %v18235_v54 }
 0x4f0   :  { %11452 = vmatprep.subr.bf16.mxu0 %v18240_v53  ;;  %11493 = vmatprep.subr.bf16.mxu1 %v18243_v51 }
 0x4f2   :  { %16938 = vmatmul.mubr.msk.bf16.vlgmr.msra.gmra.mxu0 %vm131_vm0, %v11164_v5  ;;  %16939 = vmatmul.mubr.msk.bf16.vlgmr.msra.gmra.mxu1 %vm131_vm0, %v11164_v5 }
 0x4f3   :  { %11453 = vmatpush1.bf16.msra.mxu0 %v18238_v13  ;;  %11494 = vmatpush1.bf16.msra.mxu1 %v18241_v62 }
 0x4f4   :  { %11454 = vmatprep.subr.bf16.mxu0 %v18246_v50  ;;  %11495 = vmatprep.subr.bf16.mxu1 %v18249_v18 }
 0x4f5   :  { %11476 = vmatprep.mubr.bf16.mxu0 %v19087_v56  ;;  %11517 = vmatprep.mubr.bf16.mxu1 %v19087_v56 }
 0x4f7   :  { %11455 = vmatpush1.bf16.msra.mxu0 %v18244_v55  ;;  %11496 = vmatpush1.bf16.msra.mxu1 %v18247_v28 }
 0x4f8   :  { %11456 = vmatprep.subr.bf16.mxu0 %v18252_v26  ;;  %11497 = vmatprep.subr.bf16.mxu1 %v18255_v16 }
 0x4fb   :  { %11457 = vmatpush1.bf16.msra.mxu0 %v18250_v48  ;;  %11498 = vmatpush1.bf16.msra.mxu1 %v18253_v27 }
 0x4fc   :  { %11458 = vmatprep.subr.bf16.mxu0 %v18258_v3  ;;  %11499 = vmatprep.subr.bf16.mxu1 %v18261_v39 }
 0x4ff   :  { %11459 = vmatpush1.bf16.msra.mxu0 %v18256_v32  ;;  %11500 = vmatpush1.bf16.msra.mxu1 %v18259_v14 }
 0x500   :  { %11648 = vmatprep.subr.bf16.mxu0 %v18264_v57  ;;  %11689 = vmatprep.subr.bf16.mxu1 %v18267_v1 }
 0x502   :  { %16956 = vmatmul.mubr.msk.bf16.vlgmr.msra.gmra.mxu0 %vm131_vm0, %v11360_v49  ;;  %16957 = vmatmul.mubr.msk.bf16.vlgmr.msra.gmra.mxu1 %vm131_vm0, %v11360_v49 }
 0x503   :  { %11649 = vmatpush1.bf16.msra.mxu0 %v18262_v20  ;;  %11690 = vmatpush1.bf16.msra.mxu1 %v18265_v40 }
 0x504   :  { %11650 = vmatprep.subr.bf16.mxu0 %v18270_v63  ;;  %11691 = vmatprep.subr.bf16.mxu1 %v18273_v22 }
 0x505   :  { %11672 = vmatprep.mubr.bf16.mxu0 %v19087_v56  ;;  %11713 = vmatprep.mubr.bf16.mxu1 %v19087_v56 }
 0x507   :  { %11651 = vmatpush1.bf16.msra.mxu0 %v18268_v44  ;;  %11692 = vmatpush1.bf16.msra.mxu1 %v18271_v15 }
 0x508   :  { %11652 = vmatprep.subr.bf16.mxu0 %v18276_v12  ;;  %11693 = vmatprep.subr.bf16.mxu1 %v18279_v7 }
 0x50b   :  { %11653 = vmatpush1.bf16.msra.mxu0 %v18274_v24  ;;  %11694 = vmatpush1.bf16.msra.mxu1 %v18277_v17 }
 0x50c   :  { %11654 = vmatprep.subr.bf16.mxu0 %v18282_v19  ;;  %11695 = vmatprep.subr.bf16.mxu1 %v18285_v34 }
 0x50f   :  { %11655 = vmatpush1.bf16.msra.mxu0 %v18280_v23  ;;  %11696 = vmatpush1.bf16.msra.mxu1 %v18283_v21 }
 0x512   :  { %16974 = vmatmul.mubr.msk.bf16.vlgmr.msra.gmra.mxu0 %vm131_vm0, %v11556_v43  ;;  %16975 = vmatmul.mubr.msk.bf16.vlgmr.msra.gmra.mxu1 %vm131_vm0, %v11556_v43 }
 0x582   :  { %v10694_v41 = vpop.f32.mrf.mxu0  ;;  %v10735_v6 = vpop.f32.mrf.mxu1 }
 0x583   :  { %v10742_v22 = vadd.f32 %v10694_v41, %v21521_v59  ;;  %v10744_v2 = vadd.f32 %v10735_v6, %v21523_v29 }
 0x584   :  { %v10696_v30 = vpop.f32.mrf.mxu0  ;;  %v10737_v8 = vpop.f32.mrf.mxu1 }
 0x585   :  { %v10743_v44 = vadd.f32 %v10696_v30, %v21525_v38  ;;  %v10745_v15 = vadd.f32 %v10737_v8, %v21527_v45 }
 0x586   :  { %v10698_v35 = vpop.f32.mrf.mxu0  ;;  %v10739_v54 = vpop.f32.mrf.mxu1 }
 0x588   :  { %v10699_v53 = vpop.f32.mrf.mxu0  ;;  %v10740_v31 = vpop.f32.mrf.mxu1 }
 0x592   :  { %v10890_v51 = vpop.f32.mrf.mxu0  ;;  %v10931_v60 = vpop.f32.mrf.mxu1 }
 0x593   :  { %v10938_v58 = vadd.f32 %v10890_v51, %v10742_v22  ;;  %v10940_v36 = vadd.f32 %v10931_v60, %v10744_v2 }
 0x594   :  { %v10892_v5 = vpop.f32.mrf.mxu0  ;;  %v10933_v13 = vpop.f32.mrf.mxu1 }
 0x595   :  { %v10939_v12 = vadd.f32 %v10892_v5, %v10743_v44  ;;  %v10941_v7 = vadd.f32 %v10933_v13, %v10745_v15 }
 0x596   :  { %v10894_v62 = vpop.f32.mrf.mxu0  ;;  %v10935_v9 = vpop.f32.mrf.mxu1 }
 0x598   :  { %v10895_v50 = vpop.f32.mrf.mxu0  ;;  %v10936_v18 = vpop.f32.mrf.mxu1 }
 0x5a2   :  { %v11086_v42 = vpop.f32.mrf.mxu0  ;;  %v11127_v55 = vpop.f32.mrf.mxu1 }
 0x5a3   :  { %v11134_v24 = vadd.f32 %v11086_v42, %v10938_v58  ;;  %v11136_v17 = vadd.f32 %v11127_v55, %v10940_v36 }
 0x5a4   :  { %v11088_v28 = vpop.f32.mrf.mxu0  ;;  %v11129_v11 = vpop.f32.mrf.mxu1 }
 0x5a5   :  { %v11135_v33 = vadd.f32 %v11088_v28, %v10939_v12  ;;  %v11137_v25 = vadd.f32 %v11129_v11, %v10941_v7 }
 0x5a6   :  { %v11090_v61 = vpop.f32.mrf.mxu0  ;;  %v11131_v26 = vpop.f32.mrf.mxu1 }
 0x5a8   :  { %v11091_v16 = vpop.f32.mrf.mxu0  ;;  %v11132_v48 = vpop.f32.mrf.mxu1 }
 0x5b2   :  { %v11282_v27 = vpop.f32.mrf.mxu0  ;;  %v11323_v52 = vpop.f32.mrf.mxu1 }
 0x5b3   :  { %v11330_v19 = vadd.f32 %v11282_v27, %v11134_v24  ;;  %v11332_v34 = vadd.f32 %v11323_v52, %v11136_v17 }
 0x5b4   :  { %v11284_v10 = vpop.f32.mrf.mxu0  ;;  %v11325_v3 = vpop.f32.mrf.mxu1 }
 0x5b5   :  { %v11331_v23 = vadd.f32 %v11284_v10, %v11135_v33  ;;  %v11333_v21 = vadd.f32 %v11325_v3, %v11137_v25 }
 0x5b6   :  { %v11286_v39 = vpop.f32.mrf.mxu0  ;;  %v11327_v32 = vpop.f32.mrf.mxu1 }
 0x5b8   :  { %v11287_v14 = vpop.f32.mrf.mxu0  ;;  %v11328_v37 = vpop.f32.mrf.mxu1 }
 0x5c2   :  { %v11478_v57 = vpop.f32.mrf.mxu0  ;;  %v11519_v1 = vpop.f32.mrf.mxu1 }
 0x5c3   :  { %v11526_v46 = vadd.f32 %v11478_v57, %v11330_v19  ;;  %v11528_v59 = vadd.f32 %v11519_v1, %v11332_v34 }
 0x5c4   :  { %v11480_v0 = vpop.f32.mrf.mxu0  ;;  %v11521_v49 = vpop.f32.mrf.mxu1 }
 0x5c5   :  { %v11527_v41 = vadd.f32 %v11480_v0, %v11331_v23  ;;  %v11529_v38 = vadd.f32 %v11521_v49, %v11333_v21 }
 0x5c6   :  { %v11482_v20 = vpop.f32.mrf.mxu0  ;;  %v11523_v40 = vpop.f32.mrf.mxu1 }
 0x5c8   :  { %v11483_v47 = vpop.f32.mrf.mxu0  ;;  %v11524_v63 = vpop.f32.mrf.mxu1 }
 0x5d2   :  { %v11674_v43 = vpop.f32.mrf.mxu0  ;;  %v11715_v29 = vpop.f32.mrf.mxu1 }
 0x5d3   :  { %v21563_v6 = vadd.f32 %v11674_v43, %v11526_v46  ;;  %v21565_v45 = vadd.f32 %v11715_v29, %v11528_v59 }
 0x5d4   :  { %v11676_v30 = vpop.f32.mrf.mxu0  ;;  %v11717_v8 = vpop.f32.mrf.mxu1 }
 0x5d5   :  { %v21567_v35 = vadd.f32 %v11676_v30, %v11527_v41  ;;  %v21569_v54 = vadd.f32 %v11717_v8, %v11529_v38 }
 0x5d6   :  { %v11678_v53 = vpop.f32.mrf.mxu0  ;;  %v11719_v31 = vpop.f32.mrf.mxu1 }
 0x5d8   :  { %v11679_v51 = vpop.f32.mrf.mxu0  ;;  %v11720_v60 = vpop.f32.mrf.mxu1 }
 0x5d9   :  { %19065 = dma.done.wait [#allocation6 + $0x2], 12288 }
 0x5da   :  { %19066 = vsyncadd [#allocation6 + $0x2], 4294955008  ;;  %11871 = vmatprep.mubr.bf16.mxu0 %v19087_v56  ;;  %11912 = vmatprep.mubr.bf16.mxu1 %v19087_v56  ;;  %v18286_v5 = vld [vmem:[#allocation5 + $0x664] ss:$16 sps:$4 sm:$0xff]   ;;  %v18288_v13 = vld [vmem:[#allocation5 + $0x66c] ss:$16 sps:$4 sm:$0xff]  }
 0x5db   :  { %11847 = vmatprep.subr.bf16.mxu0 %v18286_v5  ;;  %v18290_v62 = vld [vmem:[#allocation5 + $0x660] ss:$16 sps:$4 sm:$0xff]   ;;  %v18291_v9 = vld [vmem:[#allocation5 + $0x668] ss:$16 sps:$4 sm:$0xff]   ;;  %11888 = vmatprep.subr.bf16.mxu1 %v18288_v13  ;;  %v18292_v50 = vld [vmem:[#allocation5 + $0x644] ss:$16 sps:$4 sm:$0xff]  }
 0x5dc   :  { %11848 = vmatpush1.bf16.msra.mxu0 %v18290_v62  ;;  %11889 = vmatpush1.bf16.msra.mxu1 %v18291_v9  ;;  %v18294_v18 = vld [vmem:[#allocation5 + $0x64c] ss:$16 sps:$4 sm:$0xff]   ;;  %v18296_v42 = vld [vmem:[#allocation5 + $0x640] ss:$16 sps:$4 sm:$0xff]   ;;  %v18297_v55 = vld [vmem:[#allocation5 + $0x648] ss:$16 sps:$4 sm:$0xff]  }
 0x5dd   :  { %11849 = vmatprep.subr.bf16.mxu0 %v18292_v50  ;;  %11890 = vmatprep.subr.bf16.mxu1 %v18294_v18  ;;  %v18298_v28 = vld [vmem:[#allocation5 + $0x624] ss:$16 sps:$4 sm:$0xff]   ;;  %v18300_v11 = vld [vmem:[#allocation5 + $0x62c] ss:$16 sps:$4 sm:$0xff]   ;;  %v18302_v61 = vld [vmem:[#allocation5 + $0x620] ss:$16 sps:$4 sm:$0xff]  }
 0x5de   :  { %v18303_v26 = vld [vmem:[#allocation5 + $0x628] ss:$16 sps:$4 sm:$0xff]   ;;  %v18304_v16 = vld [vmem:[#allocation5 + $0x604] ss:$16 sps:$4 sm:$0xff]   ;;  %v18306_v48 = vld [vmem:[#allocation5 + $0x60c] ss:$16 sps:$4 sm:$0xff]  }
 0x5df   :  { %v11729_v27 = vld [vmem:[#allocation4 + $0x10] sm:$0x1]  ;;  %v11730_v52 = vld [vmem:[#allocation4 + $0x40] sm:$0x1]  ;;  %v18309_v39 = vld [vmem:[#allocation5 + $0x608] ss:$16 sps:$4 sm:$0xff]  }
 0x5e0   :  { %11850 = vmatpush1.bf16.msra.mxu0 %v18296_v42  ;;  %11891 = vmatpush1.bf16.msra.mxu1 %v18297_v55  ;;  %v11731_v10 = vpack.c.bf16 %v11729_v27, %v11729_v27  ;;  %v18308_v3 = vld [vmem:[#allocation5 + $0x600] ss:$16 sps:$4 sm:$0xff]   ;;  %v11732_v32 = vpack.c.bf16 %v11730_v52, %v11730_v52  ;;  %v18312_v14 = vld [vmem:[#allocation5 + $0x6e4] ss:$16 sps:$4 sm:$0xff]   ;;  %v18315_v37 = vld [vmem:[#allocation5 + $0x6ec] ss:$16 sps:$4 sm:$0xff]  }
 0x5e1   :  { %11851 = vmatprep.subr.bf16.mxu0 %v18298_v28  ;;  %11892 = vmatprep.subr.bf16.mxu1 %v18300_v11  ;;  %v18310_v49 = vld [vmem:[#allocation5 + $0x6e0] ss:$16 sps:$4 sm:$0xff]   ;;  %v18313_v20 = vld [vmem:[#allocation5 + $0x6e8] ss:$16 sps:$4 sm:$0xff]   ;;  %v18318_v47 = vld [vmem:[#allocation5 + $0x6c4] ss:$16 sps:$4 sm:$0xff]  }
 0x5e2   :  { %v11751_v57 = vunpack.c.l.b16 %v11731_v10  ;;  %v11752_v1 = vunpack.c.l.b16 %v11732_v32  ;;  %v18321_v22 = vld [vmem:[#allocation5 + $0x6cc] ss:$16 sps:$4 sm:$0xff]   ;;  %v18316_v2 = vld [vmem:[#allocation5 + $0x6c0] ss:$16 sps:$4 sm:$0xff]   ;;  %v18319_v44 = vld [vmem:[#allocation5 + $0x6c8] ss:$16 sps:$4 sm:$0xff]  }
 0x5e3   :  { %v11925_v15 = vld [vmem:[#allocation4 + $0x11] sm:$0x1]  ;;  %v11926_v58 = vld [vmem:[#allocation4 + $0x41] sm:$0x1]  ;;  %v18324_v36 = vld [vmem:[#allocation5 + $0x6a4] ss:$16 sps:$4 sm:$0xff]  }
 0x5e4   :  { %11852 = vmatpush1.bf16.msra.mxu0 %v18302_v61  ;;  %11893 = vmatpush1.bf16.msra.mxu1 %v18303_v26  ;;  %v11753_v0 = vrot.slane %v11752_v1, 7  ;;  %v18327_v12 = vld [vmem:[#allocation5 + $0x6ac] ss:$16 sps:$4 sm:$0xff]   ;;  %v11927_v7 = vpack.c.bf16 %v11925_v15, %v11925_v15  ;;  %v11928_v24 = vpack.c.bf16 %v11926_v58, %v11926_v58  ;;  %v18322_v33 = vld [vmem:[#allocation5 + $0x6a0] ss:$16 sps:$4 sm:$0xff]  }
 0x5e5   :  { %11853 = vmatprep.subr.bf16.mxu0 %v18304_v16  ;;  %11894 = vmatprep.subr.bf16.mxu1 %v18306_v48  ;;  %v18325_v25 = vld [vmem:[#allocation5 + $0x6a8] ss:$16 sps:$4 sm:$0xff]   ;;  %v18330_v34 = vld [vmem:[#allocation5 + $0x684] ss:$16 sps:$4 sm:$0xff]   ;;  %v18333_v23 = vld [vmem:[#allocation5 + $0x68c] ss:$16 sps:$4 sm:$0xff]  }
 0x5e6   :  { %v11754_v40 = vsel %vm9423_vm4, %v11753_v0, %v11751_v57  ;;  %v11948_v17 = vunpack.c.l.b16 %v11928_v24  ;;  %v11947_v19 = vunpack.c.l.b16 %v11927_v7  ;;  %v18328_v46 = vld [vmem:[#allocation5 + $0x680] ss:$16 sps:$4 sm:$0xff]   ;;  %v18331_v59 = vld [vmem:[#allocation5 + $0x688] ss:$16 sps:$4 sm:$0xff]   ;;  %v18336_v29 = vld [vmem:[#allocation5 + $0x764] ss:$16 sps:$4 sm:$0xff]  }
 0x5e7   :  { %v11755_v63 = vpack.c.b16 %v11754_v40, %v11754_v40  ;;  %v18339_v41 = vld [vmem:[#allocation5 + $0x76c] ss:$16 sps:$4 sm:$0xff]   ;;  %v18334_v38 = vld [vmem:[#allocation5 + $0x760] ss:$16 sps:$4 sm:$0xff]   ;;  %v18337_v8 = vld [vmem:[#allocation5 + $0x768] ss:$16 sps:$4 sm:$0xff]  }
 0x5e8   :  { %11854 = vmatpush1.bf16.msra.mxu0 %v18308_v3  ;;  %11895 = vmatpush1.bf16.msra.mxu1 %v18309_v39  ;;  %v11949_v21 = vrot.slane %v11948_v17, 7  ;;  %v18342_v53 = vld [vmem:[#allocation5 + $0x744] ss:$16 sps:$4 sm:$0xff]   ;;  %v12122_v31 = vld [vmem:[#allocation4 + $0x42] sm:$0x1] }
 0x5e9   :  { %12043 = vmatprep.subr.bf16.mxu0 %v18312_v14  ;;  %12084 = vmatprep.subr.bf16.mxu1 %v18315_v37  ;;  %v18345_v51 = vld [vmem:[#allocation5 + $0x74c] ss:$16 sps:$4 sm:$0xff]   ;;  %v12124_v60 = vpack.c.bf16 %v12122_v31, %v12122_v31  ;;  %v12121_v5 = vld [vmem:[#allocation4 + $0x12] sm:$0x1]  ;;  %v18343_v62 = vld [vmem:[#allocation5 + $0x748] ss:$16 sps:$4 sm:$0xff]  }
 0x5ea   :  { %v11950_v43 = vsel %vm9423_vm4, %v11949_v21, %v11947_v19  ;;  %v18340_v13 = vld [vmem:[#allocation5 + $0x740] ss:$16 sps:$4 sm:$0xff]   ;;  %v18348_v9 = vld [vmem:[#allocation5 + $0x724] ss:$16 sps:$4 sm:$0xff]   ;;  %v12123_v50 = vpack.c.bf16 %v12121_v5, %v12121_v5  ;;  %v18351_v42 = vld [vmem:[#allocation5 + $0x72c] ss:$16 sps:$4 sm:$0xff]  }
 0x5eb   :  { %16992 = vmatmul.mubr.msk.bf16.vlgmr.msra.gmra.mxu0 %vm131_vm0, %v11755_v63  ;;  %16993 = vmatmul.mubr.msk.bf16.vlgmr.msra.gmra.mxu1 %vm131_vm0, %v11755_v63  ;;  %v11951_v30 = vpack.c.b16 %v11950_v43, %v11950_v43  ;;  %v12144_v18 = vunpack.c.l.b16 %v12124_v60  ;;  %v18346_v55 = vld [vmem:[#allocation5 + $0x720] ss:$16 sps:$4 sm:$0xff]   ;;  %v18349_v28 = vld [vmem:[#allocation5 + $0x728] ss:$16 sps:$4 sm:$0xff]   ;;  %v18354_v11 = vld [vmem:[#allocation5 + $0x704] ss:$16 sps:$4 sm:$0xff]  }
 0x5ec   :  { %12044 = vmatpush1.bf16.msra.mxu0 %v18310_v49  ;;  %12085 = vmatpush1.bf16.msra.mxu1 %v18313_v20  ;;  %v12143_v61 = vunpack.c.l.b16 %v12123_v50  ;;  %v18357_v16 = vld [vmem:[#allocation5 + $0x70c] ss:$16 sps:$4 sm:$0xff]   ;;  %v18352_v48 = vld [vmem:[#allocation5 + $0x700] ss:$16 sps:$4 sm:$0xff]   ;;  %v18355_v27 = vld [vmem:[#allocation5 + $0x708] ss:$16 sps:$4 sm:$0xff]  }
 0x5ed   :  { %12045 = vmatprep.subr.bf16.mxu0 %v18318_v47  ;;  %12086 = vmatprep.subr.bf16.mxu1 %v18321_v22  ;;  %v12145_v26 = vrot.slane %v12144_v18, 7  ;;  %v18360_v10 = vld [vmem:[#allocation5 + $0x7e4] ss:$16 sps:$4 sm:$0xff]   ;;  %v18363_v3 = vld [vmem:[#allocation5 + $0x7ec] ss:$16 sps:$4 sm:$0xff]  }
 0x5ee   :  { %12067 = vmatprep.mubr.bf16.mxu0 %v19087_v56  ;;  %12108 = vmatprep.mubr.bf16.mxu1 %v19087_v56  ;;  %v12318_v39 = vld [vmem:[#allocation4 + $0x43] sm:$0x1]  ;;  %v18361_v37 = vld [vmem:[#allocation5 + $0x7e8] ss:$16 sps:$4 sm:$0xff]   ;;  %v18366_v57 = vld [vmem:[#allocation5 + $0x7c4] ss:$16 sps:$4 sm:$0xff]  }
 0x5ef   :  { %v12146_v52 = vsel %vm9423_vm4, %v12145_v26, %v12143_v61  ;;  %v18358_v14 = vld [vmem:[#allocation5 + $0x7e0] ss:$16 sps:$4 sm:$0xff]   ;;  %v12320_v1 = vpack.c.bf16 %v12318_v39, %v12318_v39  ;;  %v18369_v0 = vld [vmem:[#allocation5 + $0x7cc] ss:$16 sps:$4 sm:$0xff]   ;;  %v18367_v40 = vld [vmem:[#allocation5 + $0x7c8] ss:$16 sps:$4 sm:$0xff]  }
 0x5f0   :  { %12046 = vmatpush1.bf16.msra.mxu0 %v18316_v2  ;;  %12087 = vmatpush1.bf16.msra.mxu1 %v18319_v44  ;;  %v12147_v32 = vpack.c.b16 %v12146_v52, %v12146_v52  ;;  %v12317_v49 = vld [vmem:[#allocation4 + $0x13] sm:$0x1]  ;;  %v18372_v22 = vld [vmem:[#allocation5 + $0x7a4] ss:$16 sps:$4 sm:$0xff]   ;;  %v18375_v2 = vld [vmem:[#allocation5 + $0x7ac] ss:$16 sps:$4 sm:$0xff]  }
 0x5f1   :  { %12047 = vmatprep.subr.bf16.mxu0 %v18324_v36  ;;  %12088 = vmatprep.subr.bf16.mxu1 %v18327_v12  ;;  %v18364_v20 = vld [vmem:[#allocation5 + $0x7c0] ss:$16 sps:$4 sm:$0xff]   ;;  %v12319_v47 = vpack.c.bf16 %v12317_v49, %v12317_v49  ;;  %v12340_v63 = vunpack.c.l.b16 %v12320_v1  ;;  %v18373_v15 = vld [vmem:[#allocation5 + $0x7a8] ss:$16 sps:$4 sm:$0xff]   ;;  %v18378_v58 = vld [vmem:[#allocation5 + $0x784] ss:$16 sps:$4 sm:$0xff]  }
 0x5f2   :  { %v18370_v44 = vld [vmem:[#allocation5 + $0x7a0] ss:$16 sps:$4 sm:$0xff]   ;;  %v18381_v7 = vld [vmem:[#allocation5 + $0x78c] ss:$16 sps:$4 sm:$0xff]   ;;  %v18379_v17 = vld [vmem:[#allocation5 + $0x788] ss:$16 sps:$4 sm:$0xff]  }
 0x5f3   :  { %v12339_v36 = vunpack.c.l.b16 %v12319_v47  ;;  %v12341_v12 = vrot.slane %v12340_v63, 7  ;;  %v18376_v24 = vld [vmem:[#allocation5 + $0x780] ss:$16 sps:$4 sm:$0xff]   ;;  %v18387_v19 = vld [vmem:[#allocation5 + $0x86c] ss:$16 sps:$4 sm:$0xff]  }
 0x5f4   :  { %12048 = vmatpush1.bf16.msra.mxu0 %v18322_v33  ;;  %12089 = vmatpush1.bf16.msra.mxu1 %v18325_v25  ;;  %v18384_v33 = vld [vmem:[#allocation5 + $0x864] ss:$16 sps:$4 sm:$0xff]   ;;  %v18382_v21 = vld [vmem:[#allocation5 + $0x860] ss:$16 sps:$4 sm:$0xff]   ;;  %v18397_v5 = vld [vmem:[#allocation5 + $0x828] ss:$16 sps:$4 sm:$0xff]  }
 0x5f5   :  { %12049 = vmatprep.subr.bf16.mxu0 %v18330_v34  ;;  %12090 = vmatprep.subr.bf16.mxu1 %v18333_v23  ;;  %v12342_v25 = vsel %vm9423_vm4, %v12341_v12, %v12339_v36  ;;  %v12514_v34 = vld [vmem:[#allocation4 + $0x44] sm:$0x1]  ;;  %v18394_v60 = vld [vmem:[#allocation5 + $0x820] ss:$16 sps:$4 sm:$0xff]   ;;  %v18405_v50 = vld [vmem:[#allocation5 + $0x80c] ss:$16 sps:$4 sm:$0xff]  }
 0x5f6   :  { %v12343_v23 = vpack.c.b16 %v12342_v25, %v12342_v25  ;;  %v18390_v43 = vld [vmem:[#allocation5 + $0x844] ss:$16 sps:$4 sm:$0xff]   ;;  %v18400_v18 = vld [vmem:[#allocation5 + $0x800] ss:$16 sps:$4 sm:$0xff]   ;;  %v18423_v1 = vld [vmem:[#allocation5 + $0x8ac] ss:$16 sps:$4 sm:$0xff]  }
 0x5f7   :  { %v18396_v31 = vld [vmem:[#allocation5 + $0x824] ss:$16 sps:$4 sm:$0xff]   ;;  %v18412_v39 = vld [vmem:[#allocation5 + $0x8c0] ss:$16 sps:$4 sm:$0xff]   ;;  %v18421_v49 = vld [vmem:[#allocation5 + $0x8a8] ss:$16 sps:$4 sm:$0xff]  }
 0x5f8   :  { %12050 = vmatpush1.bf16.msra.mxu0 %v18328_v46  ;;  %12091 = vmatpush1.bf16.msra.mxu1 %v18331_v59  ;;  %v18385_v46 = vld [vmem:[#allocation5 + $0x868] ss:$16 sps:$4 sm:$0xff]   ;;  %v12516_v59 = vpack.c.bf16 %v12514_v34, %v12514_v34  ;;  %v12710_v61 = vld [vmem:[#allocation4 + $0x45] sm:$0x1]  ;;  %v18429_v63 = vld [vmem:[#allocation5 + $0x88c] ss:$16 sps:$4 sm:$0xff]  }
 0x5f9   :  { %12239 = vmatprep.subr.bf16.mxu0 %v18336_v29  ;;  %12280 = vmatprep.subr.bf16.mxu1 %v18339_v41  ;;  %v18393_v29 = vld [vmem:[#allocation5 + $0x84c] ss:$16 sps:$4 sm:$0xff]   ;;  %v12513_v41 = vld [vmem:[#allocation4 + $0x14] sm:$0x1] }
 0x5fa   :  { %v18414_v52 = vld [vmem:[#allocation5 + $0x8c4] ss:$16 sps:$4 sm:$0xff]  }
 0x5fb   :  { %17010 = vmatmul.mubr.msk.bf16.vlgmr.msra.gmra.mxu0 %vm131_vm0, %v11951_v30  ;;  %17011 = vmatmul.mubr.msk.bf16.vlgmr.msra.gmra.mxu1 %vm131_vm0, %v11951_v30  ;;  %v18391_v30 = vld [vmem:[#allocation5 + $0x848] ss:$16 sps:$4 sm:$0xff]   ;;  %v18426_v47 = vld [vmem:[#allocation5 + $0x884] ss:$16 sps:$4 sm:$0xff]  }
 0x5fc   :  { %12240 = vmatpush1.bf16.msra.mxu0 %v18334_v38  ;;  %12281 = vmatpush1.bf16.msra.mxu1 %v18337_v8  ;;  %v18388_v38 = vld [vmem:[#allocation5 + $0x840] ss:$16 sps:$4 sm:$0xff]   ;;  %v12515_v8 = vpack.c.bf16 %v12513_v41, %v12513_v41 }
 0x5fd   :  { %12241 = vmatprep.subr.bf16.mxu0 %v18342_v53  ;;  %12282 = vmatprep.subr.bf16.mxu1 %v18345_v51  ;;  %v12536_v53 = vunpack.c.l.b16 %v12516_v59  ;;  %v18399_v51 = vld [vmem:[#allocation5 + $0x82c] ss:$16 sps:$4 sm:$0xff]  }
 0x5fe   :  { %12263 = vmatprep.mubr.bf16.mxu0 %v19087_v56  ;;  %12304 = vmatprep.mubr.bf16.mxu1 %v19087_v56 }
 0x600   :  { %12242 = vmatpush1.bf16.msra.mxu0 %v18340_v13  ;;  %12283 = vmatpush1.bf16.msra.mxu1 %v18343_v62  ;;  %v12535_v13 = vunpack.c.l.b16 %v12515_v8  ;;  %v12537_v62 = vrot.slane %v12536_v53, 7 }
 0x601   :  { %12243 = vmatprep.subr.bf16.mxu0 %v18348_v9  ;;  %12284 = vmatprep.subr.bf16.mxu1 %v18351_v42  ;;  %v18402_v9 = vld [vmem:[#allocation5 + $0x804] ss:$16 sps:$4 sm:$0xff]   ;;  %v18403_v42 = vld [vmem:[#allocation5 + $0x808] ss:$16 sps:$4 sm:$0xff]  }
 0x604   :  { %12244 = vmatpush1.bf16.msra.mxu0 %v18346_v55  ;;  %12285 = vmatpush1.bf16.msra.mxu1 %v18349_v28  ;;  %v12538_v55 = vsel %vm9423_vm4, %v12537_v62, %v12535_v13  ;;  %v18408_v28 = vld [vmem:[#allocation5 + $0x8e4] ss:$16 sps:$4 sm:$0xff]  }
 0x605   :  { %12245 = vmatprep.subr.bf16.mxu0 %v18354_v11  ;;  %12286 = vmatprep.subr.bf16.mxu1 %v18357_v16  ;;  %v18411_v11 = vld [vmem:[#allocation5 + $0x8ec] ss:$16 sps:$4 sm:$0xff]   ;;  %v12539_v26 = vpack.c.b16 %v12538_v55, %v12538_v55  ;;  %v18406_v16 = vld [vmem:[#allocation5 + $0x8e0] ss:$16 sps:$4 sm:$0xff]  }
 0x608   :  { %12246 = vmatpush1.bf16.msra.mxu0 %v18352_v48  ;;  %12287 = vmatpush1.bf16.msra.mxu1 %v18355_v27  ;;  %v18409_v48 = vld [vmem:[#allocation5 + $0x8e8] ss:$16 sps:$4 sm:$0xff]   ;;  %v12712_v27 = vpack.c.bf16 %v12710_v61, %v12710_v61 }
 0x609   :  { %12435 = vmatprep.subr.bf16.mxu0 %v18360_v10  ;;  %12476 = vmatprep.subr.bf16.mxu1 %v18363_v3  ;;  %v18417_v10 = vld [vmem:[#allocation5 + $0x8cc] ss:$16 sps:$4 sm:$0xff]   ;;  %v12709_v3 = vld [vmem:[#allocation4 + $0x15] sm:$0x1] }
 0x60b   :  { %17028 = vmatmul.mubr.msk.bf16.vlgmr.msra.gmra.mxu0 %vm131_vm0, %v12147_v32  ;;  %17029 = vmatmul.mubr.msk.bf16.vlgmr.msra.gmra.mxu1 %vm131_vm0, %v12147_v32  ;;  %v18415_v32 = vld [vmem:[#allocation5 + $0x8c8] ss:$16 sps:$4 sm:$0xff]  }
 0x60c   :  { %12436 = vmatpush1.bf16.msra.mxu0 %v18358_v14  ;;  %12477 = vmatpush1.bf16.msra.mxu1 %v18361_v37  ;;  %v12711_v14 = vpack.c.bf16 %v12709_v3, %v12709_v3  ;;  %v12732_v37 = vunpack.c.l.b16 %v12712_v27 }
 0x60d   :  { %12437 = vmatprep.subr.bf16.mxu0 %v18366_v57  ;;  %12478 = vmatprep.subr.bf16.mxu1 %v18369_v0  ;;  %v18420_v57 = vld [vmem:[#allocation5 + $0x8a4] ss:$16 sps:$4 sm:$0xff]   ;;  %v18418_v0 = vld [vmem:[#allocation5 + $0x8a0] ss:$16 sps:$4 sm:$0xff]  }
 0x60e   :  { %12459 = vmatprep.mubr.bf16.mxu0 %v19087_v56  ;;  %12500 = vmatprep.mubr.bf16.mxu1 %v19087_v56 }
 0x610   :  { %12438 = vmatpush1.bf16.msra.mxu0 %v18364_v20  ;;  %12479 = vmatpush1.bf16.msra.mxu1 %v18367_v40  ;;  %v12731_v20 = vunpack.c.l.b16 %v12711_v14  ;;  %v12733_v40 = vrot.slane %v12732_v37, 7 }
 0x611   :  { %12439 = vmatprep.subr.bf16.mxu0 %v18372_v22  ;;  %12480 = vmatprep.subr.bf16.mxu1 %v18375_v2  ;;  %v18424_v22 = vld [vmem:[#allocation5 + $0x880] ss:$16 sps:$4 sm:$0xff]   ;;  %v18427_v2 = vld [vmem:[#allocation5 + $0x888] ss:$16 sps:$4 sm:$0xff]  }
 0x614   :  { %12440 = vmatpush1.bf16.msra.mxu0 %v18370_v44  ;;  %12481 = vmatpush1.bf16.msra.mxu1 %v18373_v15  ;;  %v12734_v44 = vsel %vm9423_vm4, %v12733_v40, %v12731_v20 }
 0x615   :  { %12441 = vmatprep.subr.bf16.mxu0 %v18378_v58  ;;  %12482 = vmatprep.subr.bf16.mxu1 %v18381_v7  ;;  %v12735_v15 = vpack.c.b16 %v12734_v44, %v12734_v44 }
 0x618   :  { %12442 = vmatpush1.bf16.msra.mxu0 %v18376_v24  ;;  %12483 = vmatpush1.bf16.msra.mxu1 %v18379_v17 }
 0x619   :  { %12631 = vmatprep.subr.bf16.mxu0 %v18384_v33  ;;  %12672 = vmatprep.subr.bf16.mxu1 %v18387_v19 }
 0x61b   :  { %17046 = vmatmul.mubr.msk.bf16.vlgmr.msra.gmra.mxu0 %vm131_vm0, %v12343_v23  ;;  %17047 = vmatmul.mubr.msk.bf16.vlgmr.msra.gmra.mxu1 %vm131_vm0, %v12343_v23 }
 0x61c   :  { %12632 = vmatpush1.bf16.msra.mxu0 %v18382_v21  ;;  %12673 = vmatpush1.bf16.msra.mxu1 %v18385_v46 }
 0x61d   :  { %12633 = vmatprep.subr.bf16.mxu0 %v18390_v43  ;;  %12674 = vmatprep.subr.bf16.mxu1 %v18393_v29 }
 0x61e   :  { %12655 = vmatprep.mubr.bf16.mxu0 %v19087_v56  ;;  %12696 = vmatprep.mubr.bf16.mxu1 %v19087_v56 }
 0x620   :  { %12634 = vmatpush1.bf16.msra.mxu0 %v18388_v38  ;;  %12675 = vmatpush1.bf16.msra.mxu1 %v18391_v30 }
 0x621   :  { %12635 = vmatprep.subr.bf16.mxu0 %v18396_v31  ;;  %12676 = vmatprep.subr.bf16.mxu1 %v18399_v51 }
 0x624   :  { %12636 = vmatpush1.bf16.msra.mxu0 %v18394_v60  ;;  %12677 = vmatpush1.bf16.msra.mxu1 %v18397_v5 }
 0x625   :  { %12637 = vmatprep.subr.bf16.mxu0 %v18402_v9  ;;  %12678 = vmatprep.subr.bf16.mxu1 %v18405_v50 }
 0x628   :  { %12638 = vmatpush1.bf16.msra.mxu0 %v18400_v18  ;;  %12679 = vmatpush1.bf16.msra.mxu1 %v18403_v42 }
 0x629   :  { %12827 = vmatprep.subr.bf16.mxu0 %v18408_v28  ;;  %12868 = vmatprep.subr.bf16.mxu1 %v18411_v11 }
 0x62b   :  { %17064 = vmatmul.mubr.msk.bf16.vlgmr.msra.gmra.mxu0 %vm131_vm0, %v12539_v26  ;;  %17065 = vmatmul.mubr.msk.bf16.vlgmr.msra.gmra.mxu1 %vm131_vm0, %v12539_v26 }
 0x62c   :  { %12828 = vmatpush1.bf16.msra.mxu0 %v18406_v16  ;;  %12869 = vmatpush1.bf16.msra.mxu1 %v18409_v48 }
 0x62d   :  { %12829 = vmatprep.subr.bf16.mxu0 %v18414_v52  ;;  %12870 = vmatprep.subr.bf16.mxu1 %v18417_v10 }
 0x62e   :  { %12851 = vmatprep.mubr.bf16.mxu0 %v19087_v56  ;;  %12892 = vmatprep.mubr.bf16.mxu1 %v19087_v56 }
 0x630   :  { %12830 = vmatpush1.bf16.msra.mxu0 %v18412_v39  ;;  %12871 = vmatpush1.bf16.msra.mxu1 %v18415_v32 }
 0x631   :  { %12831 = vmatprep.subr.bf16.mxu0 %v18420_v57  ;;  %12872 = vmatprep.subr.bf16.mxu1 %v18423_v1 }
 0x634   :  { %12832 = vmatpush1.bf16.msra.mxu0 %v18418_v0  ;;  %12873 = vmatpush1.bf16.msra.mxu1 %v18421_v49 }
 0x635   :  { %12833 = vmatprep.subr.bf16.mxu0 %v18426_v47  ;;  %12874 = vmatprep.subr.bf16.mxu1 %v18429_v63 }
 0x638   :  { %12834 = vmatpush1.bf16.msra.mxu0 %v18424_v22  ;;  %12875 = vmatpush1.bf16.msra.mxu1 %v18427_v2 }
 0x63b   :  { %17082 = vmatmul.mubr.msk.bf16.vlgmr.msra.gmra.mxu0 %vm131_vm0, %v12735_v15  ;;  %17083 = vmatmul.mubr.msk.bf16.vlgmr.msra.gmra.mxu1 %vm131_vm0, %v12735_v15 }
 0x6ab   :  { %v11873_v58 = vpop.f32.mrf.mxu0  ;;  %v11914_v36 = vpop.f32.mrf.mxu1 }
 0x6ac   :  { %v11921_v10 = vadd.f32 %v11873_v58, %v21563_v6  ;;  %v11923_v3 = vadd.f32 %v11914_v36, %v21565_v45 }
 0x6ad   :  { %v11875_v12 = vpop.f32.mrf.mxu0  ;;  %v11916_v7 = vpop.f32.mrf.mxu1 }
 0x6ae   :  { %v11922_v39 = vadd.f32 %v11875_v12, %v21567_v35  ;;  %v11924_v32 = vadd.f32 %v11916_v7, %v21569_v54 }
 0x6af   :  { %v11877_v24 = vpop.f32.mrf.mxu0  ;;  %v11918_v17 = vpop.f32.mrf.mxu1 }
 0x6b1   :  { %v11878_v33 = vpop.f32.mrf.mxu0  ;;  %v11919_v25 = vpop.f32.mrf.mxu1 }
 0x6bb   :  { %v12069_v19 = vpop.f32.mrf.mxu0  ;;  %v12110_v34 = vpop.f32.mrf.mxu1 }
 0x6bc   :  { %v12117_v14 = vadd.f32 %v12069_v19, %v11921_v10  ;;  %v12119_v37 = vadd.f32 %v12110_v34, %v11923_v3 }
 0x6bd   :  { %v12071_v23 = vpop.f32.mrf.mxu0  ;;  %v12112_v21 = vpop.f32.mrf.mxu1 }
 0x6be   :  { %v12118_v57 = vadd.f32 %v12071_v23, %v11922_v39  ;;  %v12120_v1 = vadd.f32 %v12112_v21, %v11924_v32 }
 0x6bf   :  { %v12073_v46 = vpop.f32.mrf.mxu0  ;;  %v12114_v59 = vpop.f32.mrf.mxu1 }
 0x6c1   :  { %v12074_v43 = vpop.f32.mrf.mxu0  ;;  %v12115_v29 = vpop.f32.mrf.mxu1 }
 0x6cb   :  { %v12265_v41 = vpop.f32.mrf.mxu0  ;;  %v12306_v38 = vpop.f32.mrf.mxu1 }
 0x6cc   :  { %v12313_v0 = vadd.f32 %v12265_v41, %v12117_v14  ;;  %v12315_v49 = vadd.f32 %v12306_v38, %v12119_v37 }
 0x6cd   :  { %v12267_v30 = vpop.f32.mrf.mxu0  ;;  %v12308_v8 = vpop.f32.mrf.mxu1 }
 0x6ce   :  { %v12314_v20 = vadd.f32 %v12267_v30, %v12118_v57  ;;  %v12316_v40 = vadd.f32 %v12308_v8, %v12120_v1 }
 0x6cf   :  { %v12269_v53 = vpop.f32.mrf.mxu0  ;;  %v12310_v31 = vpop.f32.mrf.mxu1 }
 0x6d1   :  { %v12270_v51 = vpop.f32.mrf.mxu0  ;;  %v12311_v60 = vpop.f32.mrf.mxu1 }
 0x6db   :  { %v12461_v5 = vpop.f32.mrf.mxu0  ;;  %v12502_v13 = vpop.f32.mrf.mxu1 }
 0x6dc   :  { %v12509_v47 = vadd.f32 %v12461_v5, %v12313_v0  ;;  %v12511_v63 = vadd.f32 %v12502_v13, %v12315_v49 }
 0x6dd   :  { %v12463_v62 = vpop.f32.mrf.mxu0  ;;  %v12504_v9 = vpop.f32.mrf.mxu1 }
 0x6de   :  { %v12510_v22 = vadd.f32 %v12463_v62, %v12314_v20  ;;  %v12512_v2 = vadd.f32 %v12504_v9, %v12316_v40 }
 0x6df   :  { %v12465_v50 = vpop.f32.mrf.mxu0  ;;  %v12506_v18 = vpop.f32.mrf.mxu1 }
 0x6e1   :  { %v12466_v42 = vpop.f32.mrf.mxu0  ;;  %v12507_v55 = vpop.f32.mrf.mxu1 }
 0x6eb   :  { %v12657_v28 = vpop.f32.mrf.mxu0  ;;  %v12698_v11 = vpop.f32.mrf.mxu1 }
 0x6ec   :  { %v12705_v44 = vadd.f32 %v12657_v28, %v12509_v47  ;;  %v12707_v6 = vadd.f32 %v12698_v11, %v12511_v63 }
 0x6ed   :  { %v12659_v61 = vpop.f32.mrf.mxu0  ;;  %v12700_v26 = vpop.f32.mrf.mxu1 }
 0x6ee   :  { %v12706_v58 = vadd.f32 %v12659_v61, %v12510_v22  ;;  %v12708_v35 = vadd.f32 %v12700_v26, %v12512_v2 }
 0x6ef   :  { %v12661_v16 = vpop.f32.mrf.mxu0  ;;  %v12702_v48 = vpop.f32.mrf.mxu1 }
 0x6f1   :  { %v12662_v27 = vpop.f32.mrf.mxu0  ;;  %v12703_v52 = vpop.f32.mrf.mxu1 }
 0x6fb   :  { %v12853_v15 = vpop.f32.mrf.mxu0  ;;  %v12894_v45 = vpop.f32.mrf.mxu1 }
 0x6fc   :  { %v21605_v36 = vadd.f32 %v12853_v15, %v12705_v44  ;;  %v21607_v54 = vadd.f32 %v12894_v45, %v12707_v6 }
 0x6fd   :  { %v12855_v12 = vpop.f32.mrf.mxu0  ;;  %v12896_v7 = vpop.f32.mrf.mxu1 }
 0x6fe   :  { %v21609_v24 = vadd.f32 %v12855_v12, %v12706_v58  ;;  %v21611_v17 = vadd.f32 %v12896_v7, %v12708_v35 }
 0x6ff   :  { %v12857_v33 = vpop.f32.mrf.mxu0  ;;  %v12898_v25 = vpop.f32.mrf.mxu1 }
 0x701   :  { %v12858_v19 = vpop.f32.mrf.mxu0  ;;  %v12899_v34 = vpop.f32.mrf.mxu1 }
 0x702   :  { %19067 = dma.done.wait [#allocation6 + $0x3], 12288 }
 0x703   :  { %19068 = vsyncadd [#allocation6 + $0x3], 4294955008  ;;  %13050 = vmatprep.mubr.bf16.mxu0 %v19087_v56  ;;  %13091 = vmatprep.mubr.bf16.mxu1 %v19087_v56  ;;  %v18430_v23 = vld [vmem:[#allocation5 + $0x964] ss:$16 sps:$4 sm:$0xff]   ;;  %v18432_v21 = vld [vmem:[#allocation5 + $0x96c] ss:$16 sps:$4 sm:$0xff]  }
 0x704   :  { %13026 = vmatprep.subr.bf16.mxu0 %v18430_v23  ;;  %v18434_v46 = vld [vmem:[#allocation5 + $0x960] ss:$16 sps:$4 sm:$0xff]   ;;  %v18435_v59 = vld [vmem:[#allocation5 + $0x968] ss:$16 sps:$4 sm:$0xff]   ;;  %13067 = vmatprep.subr.bf16.mxu1 %v18432_v21  ;;  %v18436_v43 = vld [vmem:[#allocation5 + $0x944] ss:$16 sps:$4 sm:$0xff]  }
 0x705   :  { %13027 = vmatpush1.bf16.msra.mxu0 %v18434_v46  ;;  %13068 = vmatpush1.bf16.msra.mxu1 %v18435_v59  ;;  %v18438_v29 = vld [vmem:[#allocation5 + $0x94c] ss:$16 sps:$4 sm:$0xff]   ;;  %v18440_v41 = vld [vmem:[#allocation5 + $0x940] ss:$16 sps:$4 sm:$0xff]   ;;  %v18441_v38 = vld [vmem:[#allocation5 + $0x948] ss:$16 sps:$4 sm:$0xff]  }
 0x706   :  { %13028 = vmatprep.subr.bf16.mxu0 %v18436_v43  ;;  %13069 = vmatprep.subr.bf16.mxu1 %v18438_v29  ;;  %v18442_v30 = vld [vmem:[#allocation5 + $0x924] ss:$16 sps:$4 sm:$0xff]   ;;  %v18444_v8 = vld [vmem:[#allocation5 + $0x92c] ss:$16 sps:$4 sm:$0xff]   ;;  %v18446_v53 = vld [vmem:[#allocation5 + $0x920] ss:$16 sps:$4 sm:$0xff]  }
 0x707   :  { %v18447_v31 = vld [vmem:[#allocation5 + $0x928] ss:$16 sps:$4 sm:$0xff]   ;;  %v18448_v51 = vld [vmem:[#allocation5 + $0x904] ss:$16 sps:$4 sm:$0xff]   ;;  %v18450_v60 = vld [vmem:[#allocation5 + $0x90c] ss:$16 sps:$4 sm:$0xff]  }
 0x708   :  { %v12908_v5 = vld [vmem:[#allocation4 + $0x18] sm:$0x1]  ;;  %v12909_v13 = vld [vmem:[#allocation4 + $0x48] sm:$0x1]  ;;  %v18452_v9 = vld [vmem:[#allocation5 + $0x900] ss:$16 sps:$4 sm:$0xff]  }
 0x709   :  { %13029 = vmatpush1.bf16.msra.mxu0 %v18440_v41  ;;  %13070 = vmatpush1.bf16.msra.mxu1 %v18441_v38  ;;  %v12910_v62 = vpack.c.bf16 %v12908_v5, %v12908_v5  ;;  %v18453_v50 = vld [vmem:[#allocation5 + $0x908] ss:$16 sps:$4 sm:$0xff]   ;;  %v12911_v18 = vpack.c.bf16 %v12909_v13, %v12909_v13  ;;  %v18456_v42 = vld [vmem:[#allocation5 + $0x9e4] ss:$16 sps:$4 sm:$0xff]   ;;  %v18459_v55 = vld [vmem:[#allocation5 + $0x9ec] ss:$16 sps:$4 sm:$0xff]  }
 0x70a   :  { %13030 = vmatprep.subr.bf16.mxu0 %v18442_v30  ;;  %13071 = vmatprep.subr.bf16.mxu1 %v18444_v8  ;;  %v18454_v26 = vld [vmem:[#allocation5 + $0x9e0] ss:$16 sps:$4 sm:$0xff]   ;;  %v18457_v16 = vld [vmem:[#allocation5 + $0x9e8] ss:$16 sps:$4 sm:$0xff]   ;;  %v18462_v27 = vld [vmem:[#allocation5 + $0x9c4] ss:$16 sps:$4 sm:$0xff]  }
 0x70b   :  { %v12930_v28 = vunpack.c.l.b16 %v12910_v62  ;;  %v12931_v11 = vunpack.c.l.b16 %v12911_v18  ;;  %v18465_v10 = vld [vmem:[#allocation5 + $0x9cc] ss:$16 sps:$4 sm:$0xff]   ;;  %v18460_v3 = vld [vmem:[#allocation5 + $0x9c0] ss:$16 sps:$4 sm:$0xff]   ;;  %v18463_v39 = vld [vmem:[#allocation5 + $0x9c8] ss:$16 sps:$4 sm:$0xff]  }
 0x70c   :  { %v13104_v32 = vld [vmem:[#allocation4 + $0x19] sm:$0x1]  ;;  %v13105_v14 = vld [vmem:[#allocation4 + $0x49] sm:$0x1]  ;;  %v18468_v37 = vld [vmem:[#allocation5 + $0x9a4] ss:$16 sps:$4 sm:$0xff]  }
 0x70d   :  { %13031 = vmatpush1.bf16.msra.mxu0 %v18446_v53  ;;  %13072 = vmatpush1.bf16.msra.mxu1 %v18447_v31  ;;  %v12932_v61 = vrot.slane %v12931_v11, 7  ;;  %v18471_v57 = vld [vmem:[#allocation5 + $0x9ac] ss:$16 sps:$4 sm:$0xff]   ;;  %v13106_v1 = vpack.c.bf16 %v13104_v32, %v13104_v32  ;;  %v13107_v0 = vpack.c.bf16 %v13105_v14, %v13105_v14  ;;  %v18466_v20 = vld [vmem:[#allocation5 + $0x9a0] ss:$16 sps:$4 sm:$0xff]  }
 0x70e   :  { %13032 = vmatprep.subr.bf16.mxu0 %v18448_v51  ;;  %13073 = vmatprep.subr.bf16.mxu1 %v18450_v60  ;;  %v18469_v40 = vld [vmem:[#allocation5 + $0x9a8] ss:$16 sps:$4 sm:$0xff]   ;;  %v18474_v63 = vld [vmem:[#allocation5 + $0x984] ss:$16 sps:$4 sm:$0xff]   ;;  %v18477_v22 = vld [vmem:[#allocation5 + $0x98c] ss:$16 sps:$4 sm:$0xff]  }
 0x70f   :  { %v12933_v48 = vsel %vm9423_vm4, %v12932_v61, %v12930_v28  ;;  %v13127_v49 = vunpack.c.l.b16 %v13107_v0  ;;  %v13126_v47 = vunpack.c.l.b16 %v13106_v1  ;;  %v18472_v44 = vld [vmem:[#allocation5 + $0x980] ss:$16 sps:$4 sm:$0xff]   ;;  %v18475_v6 = vld [vmem:[#allocation5 + $0x988] ss:$16 sps:$4 sm:$0xff]   ;;  %v18480_v45 = vld [vmem:[#allocation5 + $0xa64] ss:$16 sps:$4 sm:$0xff]  }
 0x710   :  { %v12934_v52 = vpack.c.b16 %v12933_v48, %v12933_v48  ;;  %v18483_v58 = vld [vmem:[#allocation5 + $0xa6c] ss:$16 sps:$4 sm:$0xff]   ;;  %v18478_v35 = vld [vmem:[#allocation5 + $0xa60] ss:$16 sps:$4 sm:$0xff]   ;;  %v18481_v7 = vld [vmem:[#allocation5 + $0xa68] ss:$16 sps:$4 sm:$0xff]  }
 0x711   :  { %13033 = vmatpush1.bf16.msra.mxu0 %v18452_v9  ;;  %13074 = vmatpush1.bf16.msra.mxu1 %v18453_v50  ;;  %v13128_v2 = vrot.slane %v13127_v49, 7  ;;  %v18486_v33 = vld [vmem:[#allocation5 + $0xa44] ss:$16 sps:$4 sm:$0xff]   ;;  %v13301_v25 = vld [vmem:[#allocation4 + $0x4a] sm:$0x1] }
 0x712   :  { %13222 = vmatprep.subr.bf16.mxu0 %v18456_v42  ;;  %13263 = vmatprep.subr.bf16.mxu1 %v18459_v55  ;;  %v18489_v19 = vld [vmem:[#allocation5 + $0xa4c] ss:$16 sps:$4 sm:$0xff]   ;;  %v13303_v34 = vpack.c.bf16 %v13301_v25, %v13301_v25  ;;  %v13300_v23 = vld [vmem:[#allocation4 + $0x1a] sm:$0x1]  ;;  %v18484_v21 = vld [vmem:[#allocation5 + $0xa40] ss:$16 sps:$4 sm:$0xff]  }
 0x713   :  { %v13129_v15 = vsel %vm9423_vm4, %v13128_v2, %v13126_v47  ;;  %v18487_v46 = vld [vmem:[#allocation5 + $0xa48] ss:$16 sps:$4 sm:$0xff]   ;;  %v18492_v59 = vld [vmem:[#allocation5 + $0xa24] ss:$16 sps:$4 sm:$0xff]   ;;  %v13302_v43 = vpack.c.bf16 %v13300_v23, %v13300_v23  ;;  %v18495_v41 = vld [vmem:[#allocation5 + $0xa2c] ss:$16 sps:$4 sm:$0xff]  }
 0x714   :  { %17100 = vmatmul.mubr.msk.bf16.vlgmr.msra.gmra.mxu0 %vm131_vm0, %v12934_v52  ;;  %17101 = vmatmul.mubr.msk.bf16.vlgmr.msra.gmra.mxu1 %vm131_vm0, %v12934_v52  ;;  %v13130_v12 = vpack.c.b16 %v13129_v15, %v13129_v15  ;;  %v13323_v29 = vunpack.c.l.b16 %v13303_v34  ;;  %v18490_v38 = vld [vmem:[#allocation5 + $0xa20] ss:$16 sps:$4 sm:$0xff]   ;;  %v18493_v30 = vld [vmem:[#allocation5 + $0xa28] ss:$16 sps:$4 sm:$0xff]   ;;  %v18498_v8 = vld [vmem:[#allocation5 + $0xa04] ss:$16 sps:$4 sm:$0xff]  }
 0x715   :  { %13223 = vmatpush1.bf16.msra.mxu0 %v18454_v26  ;;  %13264 = vmatpush1.bf16.msra.mxu1 %v18457_v16  ;;  %v13322_v53 = vunpack.c.l.b16 %v13302_v43  ;;  %v18501_v51 = vld [vmem:[#allocation5 + $0xa0c] ss:$16 sps:$4 sm:$0xff]   ;;  %v18496_v60 = vld [vmem:[#allocation5 + $0xa00] ss:$16 sps:$4 sm:$0xff]   ;;  %v18499_v5 = vld [vmem:[#allocation5 + $0xa08] ss:$16 sps:$4 sm:$0xff]  }
 0x716   :  { %13224 = vmatprep.subr.bf16.mxu0 %v18462_v27  ;;  %13265 = vmatprep.subr.bf16.mxu1 %v18465_v10  ;;  %v13324_v31 = vrot.slane %v13323_v29, 7  ;;  %v18504_v62 = vld [vmem:[#allocation5 + $0xae4] ss:$16 sps:$4 sm:$0xff]   ;;  %v18507_v9 = vld [vmem:[#allocation5 + $0xaec] ss:$16 sps:$4 sm:$0xff]  }
 0x717   :  { %13246 = vmatprep.mubr.bf16.mxu0 %v19087_v56  ;;  %13287 = vmatprep.mubr.bf16.mxu1 %v19087_v56  ;;  %v13497_v50 = vld [vmem:[#allocation4 + $0x4b] sm:$0x1]  ;;  %v18502_v42 = vld [vmem:[#allocation5 + $0xae0] ss:$16 sps:$4 sm:$0xff]   ;;  %v18510_v28 = vld [vmem:[#allocation5 + $0xac4] ss:$16 sps:$4 sm:$0xff]  }
 0x718   :  { %v13325_v13 = vsel %vm9423_vm4, %v13324_v31, %v13322_v53  ;;  %v18505_v55 = vld [vmem:[#allocation5 + $0xae8] ss:$16 sps:$4 sm:$0xff]   ;;  %v13499_v11 = vpack.c.bf16 %v13497_v50, %v13497_v50  ;;  %v18513_v61 = vld [vmem:[#allocation5 + $0xacc] ss:$16 sps:$4 sm:$0xff]   ;;  %v18508_v16 = vld [vmem:[#allocation5 + $0xac0] ss:$16 sps:$4 sm:$0xff]  }
 0x719   :  { %13225 = vmatpush1.bf16.msra.mxu0 %v18460_v3  ;;  %13266 = vmatpush1.bf16.msra.mxu1 %v18463_v39  ;;  %v13326_v18 = vpack.c.b16 %v13325_v13, %v13325_v13  ;;  %v13496_v26 = vld [vmem:[#allocation4 + $0x1b] sm:$0x1]  ;;  %v18516_v10 = vld [vmem:[#allocation5 + $0xaa4] ss:$16 sps:$4 sm:$0xff]   ;;  %v18519_v3 = vld [vmem:[#allocation5 + $0xaac] ss:$16 sps:$4 sm:$0xff]  }
 0x71a   :  { %13226 = vmatprep.subr.bf16.mxu0 %v18468_v37  ;;  %13267 = vmatprep.subr.bf16.mxu1 %v18471_v57  ;;  %v18511_v48 = vld [vmem:[#allocation5 + $0xac8] ss:$16 sps:$4 sm:$0xff]   ;;  %v13498_v27 = vpack.c.bf16 %v13496_v26, %v13496_v26  ;;  %v13519_v52 = vunpack.c.l.b16 %v13499_v11  ;;  %v18514_v39 = vld [vmem:[#allocation5 + $0xaa0] ss:$16 sps:$4 sm:$0xff]   ;;  %v18522_v14 = vld [vmem:[#allocation5 + $0xa84] ss:$16 sps:$4 sm:$0xff]  }
 0x71b   :  { %v18517_v32 = vld [vmem:[#allocation5 + $0xaa8] ss:$16 sps:$4 sm:$0xff]   ;;  %v18525_v1 = vld [vmem:[#allocation5 + $0xa8c] ss:$16 sps:$4 sm:$0xff]   ;;  %v18520_v0 = vld [vmem:[#allocation5 + $0xa80] ss:$16 sps:$4 sm:$0xff]  }
 0x71c   :  { %v13518_v37 = vunpack.c.l.b16 %v13498_v27  ;;  %v13520_v57 = vrot.slane %v13519_v52, 7  ;;  %v18523_v49 = vld [vmem:[#allocation5 + $0xa88] ss:$16 sps:$4 sm:$0xff]   ;;  %v18531_v47 = vld [vmem:[#allocation5 + $0xb6c] ss:$16 sps:$4 sm:$0xff]  }
 0x71d   :  { %13227 = vmatpush1.bf16.msra.mxu0 %v18466_v20  ;;  %13268 = vmatpush1.bf16.msra.mxu1 %v18469_v40  ;;  %v18528_v20 = vld [vmem:[#allocation5 + $0xb64] ss:$16 sps:$4 sm:$0xff]   ;;  %v18526_v2 = vld [vmem:[#allocation5 + $0xb60] ss:$16 sps:$4 sm:$0xff]   ;;  %v18541_v23 = vld [vmem:[#allocation5 + $0xb28] ss:$16 sps:$4 sm:$0xff]  }
 0x71e   :  { %13228 = vmatprep.subr.bf16.mxu0 %v18474_v63  ;;  %13269 = vmatprep.subr.bf16.mxu1 %v18477_v22  ;;  %v13521_v40 = vsel %vm9423_vm4, %v13520_v57, %v13518_v37  ;;  %v13693_v63 = vld [vmem:[#allocation4 + $0x4c] sm:$0x1]  ;;  %v18534_v15 = vld [vmem:[#allocation5 + $0xb44] ss:$16 sps:$4 sm:$0xff]   ;;  %v18538_v34 = vld [vmem:[#allocation5 + $0xb20] ss:$16 sps:$4 sm:$0xff]  }
 0x71f   :  { %v13522_v22 = vpack.c.b16 %v13521_v40, %v13521_v40  ;;  %v18540_v25 = vld [vmem:[#allocation5 + $0xb24] ss:$16 sps:$4 sm:$0xff]   ;;  %v18549_v43 = vld [vmem:[#allocation5 + $0xb0c] ss:$16 sps:$4 sm:$0xff]   ;;  %v18544_v29 = vld [vmem:[#allocation5 + $0xb00] ss:$16 sps:$4 sm:$0xff]  }
 0x720   :  { %v13889_v53 = vld [vmem:[#allocation4 + $0x4d] sm:$0x1]  ;;  %v18558_v13 = vld [vmem:[#allocation5 + $0xbc4] ss:$16 sps:$4 sm:$0xff]   ;;  %v18556_v50 = vld [vmem:[#allocation5 + $0xbc0] ss:$16 sps:$4 sm:$0xff]  }
 0x721   :  { %13229 = vmatpush1.bf16.msra.mxu0 %v18472_v44  ;;  %13270 = vmatpush1.bf16.msra.mxu1 %v18475_v6  ;;  %v18529_v44 = vld [vmem:[#allocation5 + $0xb68] ss:$16 sps:$4 sm:$0xff]   ;;  %v13695_v6 = vpack.c.bf16 %v13693_v63, %v13693_v63  ;;  %v18567_v11 = vld [vmem:[#allocation5 + $0xbac] ss:$16 sps:$4 sm:$0xff]   ;;  %v18570_v27 = vld [vmem:[#allocation5 + $0xb84] ss:$16 sps:$4 sm:$0xff]  }
 0x722   :  { %13418 = vmatprep.subr.bf16.mxu0 %v18480_v45  ;;  %13459 = vmatprep.subr.bf16.mxu1 %v18483_v58  ;;  %v18537_v45 = vld [vmem:[#allocation5 + $0xb4c] ss:$16 sps:$4 sm:$0xff]   ;;  %v18565_v26 = vld [vmem:[#allocation5 + $0xba8] ss:$16 sps:$4 sm:$0xff]  }
 0x723   :  { %v13692_v58 = vld [vmem:[#allocation4 + $0x1c] sm:$0x1] }
 0x724   :  { %17118 = vmatmul.mubr.msk.bf16.vlgmr.msra.gmra.mxu0 %vm131_vm0, %v13130_v12  ;;  %17119 = vmatmul.mubr.msk.bf16.vlgmr.msra.gmra.mxu1 %vm131_vm0, %v13130_v12  ;;  %v18535_v12 = vld [vmem:[#allocation5 + $0xb48] ss:$16 sps:$4 sm:$0xff]   ;;  %v18573_v52 = vld [vmem:[#allocation5 + $0xb8c] ss:$16 sps:$4 sm:$0xff]  }
 0x725   :  { %13419 = vmatpush1.bf16.msra.mxu0 %v18478_v35  ;;  %13460 = vmatpush1.bf16.msra.mxu1 %v18481_v7  ;;  %v18532_v35 = vld [vmem:[#allocation5 + $0xb40] ss:$16 sps:$4 sm:$0xff]   ;;  %v13694_v7 = vpack.c.bf16 %v13692_v58, %v13692_v58 }
 0x726   :  { %13420 = vmatprep.subr.bf16.mxu0 %v18486_v33  ;;  %13461 = vmatprep.subr.bf16.mxu1 %v18489_v19  ;;  %v13715_v33 = vunpack.c.l.b16 %v13695_v6  ;;  %v18543_v19 = vld [vmem:[#allocation5 + $0xb2c] ss:$16 sps:$4 sm:$0xff]  }
 0x727   :  { %13442 = vmatprep.mubr.bf16.mxu0 %v19087_v56  ;;  %13483 = vmatprep.mubr.bf16.mxu1 %v19087_v56 }
 0x729   :  { %13421 = vmatpush1.bf16.msra.mxu0 %v18484_v21  ;;  %13462 = vmatpush1.bf16.msra.mxu1 %v18487_v46  ;;  %v13714_v21 = vunpack.c.l.b16 %v13694_v7  ;;  %v13716_v46 = vrot.slane %v13715_v33, 7 }
 0x72a   :  { %13422 = vmatprep.subr.bf16.mxu0 %v18492_v59  ;;  %13463 = vmatprep.subr.bf16.mxu1 %v18495_v41  ;;  %v18546_v59 = vld [vmem:[#allocation5 + $0xb04] ss:$16 sps:$4 sm:$0xff]   ;;  %v18547_v41 = vld [vmem:[#allocation5 + $0xb08] ss:$16 sps:$4 sm:$0xff]  }
 0x72d   :  { %13423 = vmatpush1.bf16.msra.mxu0 %v18490_v38  ;;  %13464 = vmatpush1.bf16.msra.mxu1 %v18493_v30  ;;  %v13717_v38 = vsel %vm9423_vm4, %v13716_v46, %v13714_v21  ;;  %v18552_v30 = vld [vmem:[#allocation5 + $0xbe4] ss:$16 sps:$4 sm:$0xff]  }
 0x72e   :  { %13424 = vmatprep.subr.bf16.mxu0 %v18498_v8  ;;  %13465 = vmatprep.subr.bf16.mxu1 %v18501_v51  ;;  %v18555_v8 = vld [vmem:[#allocation5 + $0xbec] ss:$16 sps:$4 sm:$0xff]   ;;  %v13718_v31 = vpack.c.b16 %v13717_v38, %v13717_v38  ;;  %v18550_v51 = vld [vmem:[#allocation5 + $0xbe0] ss:$16 sps:$4 sm:$0xff]  }
 0x731   :  { %13425 = vmatpush1.bf16.msra.mxu0 %v18496_v60  ;;  %13466 = vmatpush1.bf16.msra.mxu1 %v18499_v5  ;;  %v18553_v60 = vld [vmem:[#allocation5 + $0xbe8] ss:$16 sps:$4 sm:$0xff]   ;;  %v13891_v5 = vpack.c.bf16 %v13889_v53, %v13889_v53 }
 0x732   :  { %13614 = vmatprep.subr.bf16.mxu0 %v18504_v62  ;;  %13655 = vmatprep.subr.bf16.mxu1 %v18507_v9  ;;  %v18561_v62 = vld [vmem:[#allocation5 + $0xbcc] ss:$16 sps:$4 sm:$0xff]  }
 0x733   :  { %v13888_v9 = vld [vmem:[#allocation4 + $0x1d] sm:$0x1] }
 0x734   :  { %17136 = vmatmul.mubr.msk.bf16.vlgmr.msra.gmra.mxu0 %vm131_vm0, %v13326_v18  ;;  %17137 = vmatmul.mubr.msk.bf16.vlgmr.msra.gmra.mxu1 %vm131_vm0, %v13326_v18  ;;  %v18559_v18 = vld [vmem:[#allocation5 + $0xbc8] ss:$16 sps:$4 sm:$0xff]  }
 0x735   :  { %13615 = vmatpush1.bf16.msra.mxu0 %v18502_v42  ;;  %13656 = vmatpush1.bf16.msra.mxu1 %v18505_v55  ;;  %v13890_v42 = vpack.c.bf16 %v13888_v9, %v13888_v9  ;;  %v13911_v55 = vunpack.c.l.b16 %v13891_v5 }
 0x736   :  { %13616 = vmatprep.subr.bf16.mxu0 %v18510_v28  ;;  %13657 = vmatprep.subr.bf16.mxu1 %v18513_v61  ;;  %v18564_v28 = vld [vmem:[#allocation5 + $0xba4] ss:$16 sps:$4 sm:$0xff]   ;;  %v18562_v61 = vld [vmem:[#allocation5 + $0xba0] ss:$16 sps:$4 sm:$0xff]  }
 0x737   :  { %13638 = vmatprep.mubr.bf16.mxu0 %v19087_v56  ;;  %13679 = vmatprep.mubr.bf16.mxu1 %v19087_v56 }
 0x739   :  { %13617 = vmatpush1.bf16.msra.mxu0 %v18508_v16  ;;  %13658 = vmatpush1.bf16.msra.mxu1 %v18511_v48  ;;  %v13910_v16 = vunpack.c.l.b16 %v13890_v42  ;;  %v13912_v48 = vrot.slane %v13911_v55, 7 }
 0x73a   :  { %13618 = vmatprep.subr.bf16.mxu0 %v18516_v10  ;;  %13659 = vmatprep.subr.bf16.mxu1 %v18519_v3  ;;  %v18568_v10 = vld [vmem:[#allocation5 + $0xb80] ss:$16 sps:$4 sm:$0xff]   ;;  %v18571_v3 = vld [vmem:[#allocation5 + $0xb88] ss:$16 sps:$4 sm:$0xff]  }
 0x73d   :  { %13619 = vmatpush1.bf16.msra.mxu0 %v18514_v39  ;;  %13660 = vmatpush1.bf16.msra.mxu1 %v18517_v32  ;;  %v13913_v39 = vsel %vm9423_vm4, %v13912_v48, %v13910_v16 }
 0x73e   :  { %13620 = vmatprep.subr.bf16.mxu0 %v18522_v14  ;;  %13661 = vmatprep.subr.bf16.mxu1 %v18525_v1  ;;  %v13914_v32 = vpack.c.b16 %v13913_v39, %v13913_v39 }
 0x741   :  { %13621 = vmatpush1.bf16.msra.mxu0 %v18520_v0  ;;  %13662 = vmatpush1.bf16.msra.mxu1 %v18523_v49 }
 0x742   :  { %13810 = vmatprep.subr.bf16.mxu0 %v18528_v20  ;;  %13851 = vmatprep.subr.bf16.mxu1 %v18531_v47 }
 0x744   :  { %17154 = vmatmul.mubr.msk.bf16.vlgmr.msra.gmra.mxu0 %vm131_vm0, %v13522_v22  ;;  %17155 = vmatmul.mubr.msk.bf16.vlgmr.msra.gmra.mxu1 %vm131_vm0, %v13522_v22 }
 0x745   :  { %13811 = vmatpush1.bf16.msra.mxu0 %v18526_v2  ;;  %13852 = vmatpush1.bf16.msra.mxu1 %v18529_v44 }
 0x746   :  { %13812 = vmatprep.subr.bf16.mxu0 %v18534_v15  ;;  %13853 = vmatprep.subr.bf16.mxu1 %v18537_v45 }
 0x747   :  { %13834 = vmatprep.mubr.bf16.mxu0 %v19087_v56  ;;  %13875 = vmatprep.mubr.bf16.mxu1 %v19087_v56 }
 0x749   :  { %13813 = vmatpush1.bf16.msra.mxu0 %v18532_v35  ;;  %13854 = vmatpush1.bf16.msra.mxu1 %v18535_v12 }
 0x74a   :  { %13814 = vmatprep.subr.bf16.mxu0 %v18540_v25  ;;  %13855 = vmatprep.subr.bf16.mxu1 %v18543_v19 }
 0x74d   :  { %13815 = vmatpush1.bf16.msra.mxu0 %v18538_v34  ;;  %13856 = vmatpush1.bf16.msra.mxu1 %v18541_v23 }
 0x74e   :  { %13816 = vmatprep.subr.bf16.mxu0 %v18546_v59  ;;  %13857 = vmatprep.subr.bf16.mxu1 %v18549_v43 }
 0x751   :  { %13817 = vmatpush1.bf16.msra.mxu0 %v18544_v29  ;;  %13858 = vmatpush1.bf16.msra.mxu1 %v18547_v41 }
 0x752   :  { %14006 = vmatprep.subr.bf16.mxu0 %v18552_v30  ;;  %14047 = vmatprep.subr.bf16.mxu1 %v18555_v8 }
 0x754   :  { %17172 = vmatmul.mubr.msk.bf16.vlgmr.msra.gmra.mxu0 %vm131_vm0, %v13718_v31  ;;  %17173 = vmatmul.mubr.msk.bf16.vlgmr.msra.gmra.mxu1 %vm131_vm0, %v13718_v31 }
 0x755   :  { %14007 = vmatpush1.bf16.msra.mxu0 %v18550_v51  ;;  %14048 = vmatpush1.bf16.msra.mxu1 %v18553_v60 }
 0x756   :  { %14008 = vmatprep.subr.bf16.mxu0 %v18558_v13  ;;  %14049 = vmatprep.subr.bf16.mxu1 %v18561_v62 }
 0x757   :  { %14030 = vmatprep.mubr.bf16.mxu0 %v19087_v56  ;;  %14071 = vmatprep.mubr.bf16.mxu1 %v19087_v56 }
 0x759   :  { %14009 = vmatpush1.bf16.msra.mxu0 %v18556_v50  ;;  %14050 = vmatpush1.bf16.msra.mxu1 %v18559_v18 }
 0x75a   :  { %14010 = vmatprep.subr.bf16.mxu0 %v18564_v28  ;;  %14051 = vmatprep.subr.bf16.mxu1 %v18567_v11 }
 0x75d   :  { %14011 = vmatpush1.bf16.msra.mxu0 %v18562_v61  ;;  %14052 = vmatpush1.bf16.msra.mxu1 %v18565_v26 }
 0x75e   :  { %14012 = vmatprep.subr.bf16.mxu0 %v18570_v27  ;;  %14053 = vmatprep.subr.bf16.mxu1 %v18573_v52 }
 0x761   :  { %14013 = vmatpush1.bf16.msra.mxu0 %v18568_v10  ;;  %14054 = vmatpush1.bf16.msra.mxu1 %v18571_v3 }
 0x764   :  { %17190 = vmatmul.mubr.msk.bf16.vlgmr.msra.gmra.mxu0 %vm131_vm0, %v13914_v32  ;;  %17191 = vmatmul.mubr.msk.bf16.vlgmr.msra.gmra.mxu1 %vm131_vm0, %v13914_v32 }
 0x7d4   :  { %v13052_v14 = vpop.f32.mrf.mxu0  ;;  %v13093_v37 = vpop.f32.mrf.mxu1 }
 0x7d5   :  { %v13100_v62 = vadd.f32 %v13052_v14, %v21605_v36  ;;  %v13102_v9 = vadd.f32 %v13093_v37, %v21607_v54 }
 0x7d6   :  { %v13054_v57 = vpop.f32.mrf.mxu0  ;;  %v13095_v1 = vpop.f32.mrf.mxu1 }
 0x7d7   :  { %v13101_v50 = vadd.f32 %v13054_v57, %v21609_v24  ;;  %v13103_v18 = vadd.f32 %v13095_v1, %v21611_v17 }
 0x7d8   :  { %v13056_v0 = vpop.f32.mrf.mxu0  ;;  %v13097_v49 = vpop.f32.mrf.mxu1 }
 0x7da   :  { %v13057_v20 = vpop.f32.mrf.mxu0  ;;  %v13098_v40 = vpop.f32.mrf.mxu1 }
 0x7e4   :  { %v13248_v47 = vpop.f32.mrf.mxu0  ;;  %v13289_v63 = vpop.f32.mrf.mxu1 }
 0x7e5   :  { %v13296_v42 = vadd.f32 %v13248_v47, %v13100_v62  ;;  %v13298_v55 = vadd.f32 %v13289_v63, %v13102_v9 }
 0x7e6   :  { %v13250_v22 = vpop.f32.mrf.mxu0  ;;  %v13291_v2 = vpop.f32.mrf.mxu1 }
 0x7e7   :  { %v13297_v28 = vadd.f32 %v13250_v22, %v13101_v50  ;;  %v13299_v11 = vadd.f32 %v13291_v2, %v13103_v18 }
 0x7e8   :  { %v13252_v44 = vpop.f32.mrf.mxu0  ;;  %v13293_v6 = vpop.f32.mrf.mxu1 }
 0x7ea   :  { %v13253_v15 = vpop.f32.mrf.mxu0  ;;  %v13294_v45 = vpop.f32.mrf.mxu1 }
 0x7f4   :  { %v13444_v58 = vpop.f32.mrf.mxu0  ;;  %v13485_v35 = vpop.f32.mrf.mxu1 }
 0x7f5   :  { %v13492_v61 = vadd.f32 %v13444_v58, %v13296_v42  ;;  %v13494_v26 = vadd.f32 %v13485_v35, %v13298_v55 }
 0x7f6   :  { %v13446_v12 = vpop.f32.mrf.mxu0  ;;  %v13487_v7 = vpop.f32.mrf.mxu1 }
 0x7f7   :  { %v13493_v16 = vadd.f32 %v13446_v12, %v13297_v28  ;;  %v13495_v48 = vadd.f32 %v13487_v7, %v13299_v11 }
 0x7f8   :  { %v13448_v33 = vpop.f32.mrf.mxu0  ;;  %v13489_v25 = vpop.f32.mrf.mxu1 }
 0x7fa   :  { %v13449_v19 = vpop.f32.mrf.mxu0  ;;  %v13490_v34 = vpop.f32.mrf.mxu1 }
 0x804   :  { %v13640_v23 = vpop.f32.mrf.mxu0  ;;  %v13681_v21 = vpop.f32.mrf.mxu1 }
 0x805   :  { %v13688_v27 = vadd.f32 %v13640_v23, %v13492_v61  ;;  %v13690_v52 = vadd.f32 %v13681_v21, %v13494_v26 }
 0x806   :  { %v13642_v46 = vpop.f32.mrf.mxu0  ;;  %v13683_v59 = vpop.f32.mrf.mxu1 }
 0x807   :  { %v13689_v10 = vadd.f32 %v13642_v46, %v13493_v16  ;;  %v13691_v3 = vadd.f32 %v13683_v59, %v13495_v48 }
 0x808   :  { %v13644_v43 = vpop.f32.mrf.mxu0  ;;  %v13685_v29 = vpop.f32.mrf.mxu1 }
 0x80a   :  { %v13645_v41 = vpop.f32.mrf.mxu0  ;;  %v13686_v38 = vpop.f32.mrf.mxu1 }
 0x814   :  { %v13836_v30 = vpop.f32.mrf.mxu0  ;;  %v13877_v8 = vpop.f32.mrf.mxu1 }
 0x815   :  { %v13884_v39 = vadd.f32 %v13836_v30, %v13688_v27  ;;  %v13886_v36 = vadd.f32 %v13877_v8, %v13690_v52 }
 0x816   :  { %v13838_v53 = vpop.f32.mrf.mxu0  ;;  %v13879_v31 = vpop.f32.mrf.mxu1 }
 0x817   :  { %v13885_v14 = vadd.f32 %v13838_v53, %v13689_v10  ;;  %v13887_v24 = vadd.f32 %v13879_v31, %v13691_v3 }
 0x818   :  { %v13840_v51 = vpop.f32.mrf.mxu0  ;;  %v13881_v60 = vpop.f32.mrf.mxu1 }
 0x81a   :  { %v13841_v5 = vpop.f32.mrf.mxu0  ;;  %v13882_v13 = vpop.f32.mrf.mxu1 }
 0x824   :  { %v14032_v32 = vpop.f32.mrf.mxu0  ;;  %v14073_v54 = vpop.f32.mrf.mxu1 }
 0x825   :  { %v21647_v37 = vadd.f32 %v14032_v32, %v13884_v39  ;;  %v21649_v17 = vadd.f32 %v14073_v54, %v13886_v36 }
 0x826   :  { %v14034_v57 = vpop.f32.mrf.mxu0  ;;  %v14075_v1 = vpop.f32.mrf.mxu1 }
 0x827   :  { %v21651_v0 = vadd.f32 %v14034_v57, %v13885_v14  ;;  %v21653_v49 = vadd.f32 %v14075_v1, %v13887_v24 }
 0x828   :  { %v14036_v20 = vpop.f32.mrf.mxu0  ;;  %v14077_v40 = vpop.f32.mrf.mxu1 }
 0x82a   :  { %v14037_v47 = vpop.f32.mrf.mxu0  ;;  %v14078_v63 = vpop.f32.mrf.mxu1 }
 0x82b   :  { %19069 = dma.done.wait [#allocation6 + $0x4], 12288 }
 0x82c   :  { %19070 = vsyncadd [#allocation6 + $0x4], 4294955008  ;;  %14229 = vmatprep.mubr.bf16.mxu0 %v19087_v56  ;;  %14270 = vmatprep.mubr.bf16.mxu1 %v19087_v56  ;;  %v18574_v22 = vld [vmem:[#allocation5 + $0xc64] ss:$16 sps:$4 sm:$0xff]   ;;  %v18576_v2 = vld [vmem:[#allocation5 + $0xc6c] ss:$16 sps:$4 sm:$0xff]  }
 0x82d   :  { %14205 = vmatprep.subr.bf16.mxu0 %v18574_v22  ;;  %v18578_v44 = vld [vmem:[#allocation5 + $0xc60] ss:$16 sps:$4 sm:$0xff]   ;;  %v18579_v6 = vld [vmem:[#allocation5 + $0xc68] ss:$16 sps:$4 sm:$0xff]   ;;  %14246 = vmatprep.subr.bf16.mxu1 %v18576_v2  ;;  %v18580_v15 = vld [vmem:[#allocation5 + $0xc44] ss:$16 sps:$4 sm:$0xff]  }
 0x82e   :  { %14206 = vmatpush1.bf16.msra.mxu0 %v18578_v44  ;;  %14247 = vmatpush1.bf16.msra.mxu1 %v18579_v6  ;;  %v18582_v45 = vld [vmem:[#allocation5 + $0xc4c] ss:$16 sps:$4 sm:$0xff]   ;;  %v18584_v58 = vld [vmem:[#allocation5 + $0xc40] ss:$16 sps:$4 sm:$0xff]   ;;  %v18585_v35 = vld [vmem:[#allocation5 + $0xc48] ss:$16 sps:$4 sm:$0xff]  }
 0x82f   :  { %14207 = vmatprep.subr.bf16.mxu0 %v18580_v15  ;;  %14248 = vmatprep.subr.bf16.mxu1 %v18582_v45  ;;  %v18586_v12 = vld [vmem:[#allocation5 + $0xc24] ss:$16 sps:$4 sm:$0xff]   ;;  %v18588_v7 = vld [vmem:[#allocation5 + $0xc2c] ss:$16 sps:$4 sm:$0xff]   ;;  %v18590_v33 = vld [vmem:[#allocation5 + $0xc20] ss:$16 sps:$4 sm:$0xff]  }
 0x830   :  { %v18591_v25 = vld [vmem:[#allocation5 + $0xc28] ss:$16 sps:$4 sm:$0xff]   ;;  %v18592_v19 = vld [vmem:[#allocation5 + $0xc04] ss:$16 sps:$4 sm:$0xff]   ;;  %v18594_v34 = vld [vmem:[#allocation5 + $0xc0c] ss:$16 sps:$4 sm:$0xff]  }
 0x831   :  { %v14087_v23 = vld [vmem:[#allocation4 + $0x20] sm:$0x1]  ;;  %v14088_v21 = vld [vmem:[#allocation4 + $0x50] sm:$0x1]  ;;  %v18597_v43 = vld [vmem:[#allocation5 + $0xc08] ss:$16 sps:$4 sm:$0xff]  }
 0x832   :  { %14208 = vmatpush1.bf16.msra.mxu0 %v18584_v58  ;;  %14249 = vmatpush1.bf16.msra.mxu1 %v18585_v35  ;;  %v14089_v46 = vpack.c.bf16 %v14087_v23, %v14087_v23  ;;  %v18596_v59 = vld [vmem:[#allocation5 + $0xc00] ss:$16 sps:$4 sm:$0xff]   ;;  %v14090_v29 = vpack.c.bf16 %v14088_v21, %v14088_v21  ;;  %v18600_v41 = vld [vmem:[#allocation5 + $0xce4] ss:$16 sps:$4 sm:$0xff]   ;;  %v18603_v38 = vld [vmem:[#allocation5 + $0xcec] ss:$16 sps:$4 sm:$0xff]  }
 0x833   :  { %14209 = vmatprep.subr.bf16.mxu0 %v18586_v12  ;;  %14250 = vmatprep.subr.bf16.mxu1 %v18588_v7  ;;  %v18598_v31 = vld [vmem:[#allocation5 + $0xce0] ss:$16 sps:$4 sm:$0xff]   ;;  %v18601_v51 = vld [vmem:[#allocation5 + $0xce8] ss:$16 sps:$4 sm:$0xff]   ;;  %v18606_v5 = vld [vmem:[#allocation5 + $0xcc4] ss:$16 sps:$4 sm:$0xff]  }
 0x834   :  { %v14109_v30 = vunpack.c.l.b16 %v14089_v46  ;;  %v14110_v8 = vunpack.c.l.b16 %v14090_v29  ;;  %v18609_v62 = vld [vmem:[#allocation5 + $0xccc] ss:$16 sps:$4 sm:$0xff]   ;;  %v18604_v9 = vld [vmem:[#allocation5 + $0xcc0] ss:$16 sps:$4 sm:$0xff]   ;;  %v18607_v50 = vld [vmem:[#allocation5 + $0xcc8] ss:$16 sps:$4 sm:$0xff]  }
 0x835   :  { %v14283_v18 = vld [vmem:[#allocation4 + $0x21] sm:$0x1]  ;;  %v14284_v42 = vld [vmem:[#allocation4 + $0x51] sm:$0x1]  ;;  %v18612_v55 = vld [vmem:[#allocation5 + $0xca4] ss:$16 sps:$4 sm:$0xff]  }
 0x836   :  { %14210 = vmatpush1.bf16.msra.mxu0 %v18590_v33  ;;  %14251 = vmatpush1.bf16.msra.mxu1 %v18591_v25  ;;  %v14111_v53 = vrot.slane %v14110_v8, 7  ;;  %v18615_v28 = vld [vmem:[#allocation5 + $0xcac] ss:$16 sps:$4 sm:$0xff]   ;;  %v14285_v11 = vpack.c.bf16 %v14283_v18, %v14283_v18  ;;  %v14286_v61 = vpack.c.bf16 %v14284_v42, %v14284_v42  ;;  %v18610_v16 = vld [vmem:[#allocation5 + $0xca0] ss:$16 sps:$4 sm:$0xff]  }
 0x837   :  { %14211 = vmatprep.subr.bf16.mxu0 %v18592_v19  ;;  %14252 = vmatprep.subr.bf16.mxu1 %v18594_v34  ;;  %v18613_v48 = vld [vmem:[#allocation5 + $0xca8] ss:$16 sps:$4 sm:$0xff]   ;;  %v18618_v52 = vld [vmem:[#allocation5 + $0xc84] ss:$16 sps:$4 sm:$0xff]   ;;  %v18621_v10 = vld [vmem:[#allocation5 + $0xc8c] ss:$16 sps:$4 sm:$0xff]  }
 0x838   :  { %v14112_v60 = vsel %vm9423_vm4, %v14111_v53, %v14109_v30  ;;  %v14306_v26 = vunpack.c.l.b16 %v14286_v61  ;;  %v14305_v27 = vunpack.c.l.b16 %v14285_v11  ;;  %v18616_v39 = vld [vmem:[#allocation5 + $0xc80] ss:$16 sps:$4 sm:$0xff]   ;;  %v18619_v36 = vld [vmem:[#allocation5 + $0xc88] ss:$16 sps:$4 sm:$0xff]   ;;  %v18624_v54 = vld [vmem:[#allocation5 + $0xd64] ss:$16 sps:$4 sm:$0xff]  }
 0x839   :  { %v14113_v13 = vpack.c.b16 %v14112_v60, %v14112_v60  ;;  %v18627_v14 = vld [vmem:[#allocation5 + $0xd6c] ss:$16 sps:$4 sm:$0xff]   ;;  %v18622_v24 = vld [vmem:[#allocation5 + $0xd60] ss:$16 sps:$4 sm:$0xff]   ;;  %v18625_v1 = vld [vmem:[#allocation5 + $0xd68] ss:$16 sps:$4 sm:$0xff]  }
 0x83a   :  { %14212 = vmatpush1.bf16.msra.mxu0 %v18596_v59  ;;  %14253 = vmatpush1.bf16.msra.mxu1 %v18597_v43  ;;  %v14307_v3 = vrot.slane %v14306_v26, 7  ;;  %v18630_v20 = vld [vmem:[#allocation5 + $0xd44] ss:$16 sps:$4 sm:$0xff]   ;;  %v14480_v40 = vld [vmem:[#allocation4 + $0x52] sm:$0x1] }
 0x83b   :  { %14401 = vmatprep.subr.bf16.mxu0 %v18600_v41  ;;  %14442 = vmatprep.subr.bf16.mxu1 %v18603_v38  ;;  %v18633_v47 = vld [vmem:[#allocation5 + $0xd4c] ss:$16 sps:$4 sm:$0xff]   ;;  %v14482_v63 = vpack.c.bf16 %v14480_v40, %v14480_v40  ;;  %v14479_v22 = vld [vmem:[#allocation4 + $0x22] sm:$0x1]  ;;  %v18631_v44 = vld [vmem:[#allocation5 + $0xd48] ss:$16 sps:$4 sm:$0xff]  }
 0x83c   :  { %v14308_v32 = vsel %vm9423_vm4, %v14307_v3, %v14305_v27  ;;  %v18628_v2 = vld [vmem:[#allocation5 + $0xd40] ss:$16 sps:$4 sm:$0xff]   ;;  %v18636_v6 = vld [vmem:[#allocation5 + $0xd24] ss:$16 sps:$4 sm:$0xff]   ;;  %v14481_v15 = vpack.c.bf16 %v14479_v22, %v14479_v22  ;;  %v18639_v58 = vld [vmem:[#allocation5 + $0xd2c] ss:$16 sps:$4 sm:$0xff]  }
 0x83d   :  { %17208 = vmatmul.mubr.msk.bf16.vlgmr.msra.gmra.mxu0 %vm131_vm0, %v14113_v13  ;;  %17209 = vmatmul.mubr.msk.bf16.vlgmr.msra.gmra.mxu1 %vm131_vm0, %v14113_v13  ;;  %v14309_v57 = vpack.c.b16 %v14308_v32, %v14308_v32  ;;  %v14502_v45 = vunpack.c.l.b16 %v14482_v63  ;;  %v18634_v35 = vld [vmem:[#allocation5 + $0xd20] ss:$16 sps:$4 sm:$0xff]   ;;  %v18637_v12 = vld [vmem:[#allocation5 + $0xd28] ss:$16 sps:$4 sm:$0xff]   ;;  %v18642_v7 = vld [vmem:[#allocation5 + $0xd04] ss:$16 sps:$4 sm:$0xff]  }
 0x83e   :  { %14402 = vmatpush1.bf16.msra.mxu0 %v18598_v31  ;;  %14443 = vmatpush1.bf16.msra.mxu1 %v18601_v51  ;;  %v14501_v33 = vunpack.c.l.b16 %v14481_v15  ;;  %v18645_v19 = vld [vmem:[#allocation5 + $0xd0c] ss:$16 sps:$4 sm:$0xff]   ;;  %v18640_v34 = vld [vmem:[#allocation5 + $0xd00] ss:$16 sps:$4 sm:$0xff]   ;;  %v18643_v23 = vld [vmem:[#allocation5 + $0xd08] ss:$16 sps:$4 sm:$0xff]  }
 0x83f   :  { %14403 = vmatprep.subr.bf16.mxu0 %v18606_v5  ;;  %14444 = vmatprep.subr.bf16.mxu1 %v18609_v62  ;;  %v14503_v25 = vrot.slane %v14502_v45, 7  ;;  %v18648_v46 = vld [vmem:[#allocation5 + $0xde4] ss:$16 sps:$4 sm:$0xff]   ;;  %v18651_v59 = vld [vmem:[#allocation5 + $0xdec] ss:$16 sps:$4 sm:$0xff]  }
 0x840   :  { %14425 = vmatprep.mubr.bf16.mxu0 %v19087_v56  ;;  %14466 = vmatprep.mubr.bf16.mxu1 %v19087_v56  ;;  %v14676_v43 = vld [vmem:[#allocation4 + $0x53] sm:$0x1]  ;;  %v18649_v38 = vld [vmem:[#allocation5 + $0xde8] ss:$16 sps:$4 sm:$0xff]   ;;  %v18654_v30 = vld [vmem:[#allocation5 + $0xdc4] ss:$16 sps:$4 sm:$0xff]  }
 0x841   :  { %v14504_v21 = vsel %vm9423_vm4, %v14503_v25, %v14501_v33  ;;  %v18646_v41 = vld [vmem:[#allocation5 + $0xde0] ss:$16 sps:$4 sm:$0xff]   ;;  %v14678_v8 = vpack.c.bf16 %v14676_v43, %v14676_v43  ;;  %v18657_v53 = vld [vmem:[#allocation5 + $0xdcc] ss:$16 sps:$4 sm:$0xff]   ;;  %v18655_v60 = vld [vmem:[#allocation5 + $0xdc8] ss:$16 sps:$4 sm:$0xff]  }
 0x842   :  { %14404 = vmatpush1.bf16.msra.mxu0 %v18604_v9  ;;  %14445 = vmatpush1.bf16.msra.mxu1 %v18607_v50  ;;  %v14505_v29 = vpack.c.b16 %v14504_v21, %v14504_v21  ;;  %v14675_v31 = vld [vmem:[#allocation4 + $0x23] sm:$0x1]  ;;  %v18660_v62 = vld [vmem:[#allocation5 + $0xda4] ss:$16 sps:$4 sm:$0xff]   ;;  %v18663_v9 = vld [vmem:[#allocation5 + $0xdac] ss:$16 sps:$4 sm:$0xff]  }
 0x843   :  { %14405 = vmatprep.subr.bf16.mxu0 %v18612_v55  ;;  %14446 = vmatprep.subr.bf16.mxu1 %v18615_v28  ;;  %v18652_v51 = vld [vmem:[#allocation5 + $0xdc0] ss:$16 sps:$4 sm:$0xff]   ;;  %v14677_v5 = vpack.c.bf16 %v14675_v31, %v14675_v31  ;;  %v14698_v13 = vunpack.c.l.b16 %v14678_v8  ;;  %v18661_v18 = vld [vmem:[#allocation5 + $0xda8] ss:$16 sps:$4 sm:$0xff]   ;;  %v18666_v42 = vld [vmem:[#allocation5 + $0xd84] ss:$16 sps:$4 sm:$0xff]  }
 0x844   :  { %v18658_v50 = vld [vmem:[#allocation5 + $0xda0] ss:$16 sps:$4 sm:$0xff]   ;;  %v18669_v11 = vld [vmem:[#allocation5 + $0xd8c] ss:$16 sps:$4 sm:$0xff]   ;;  %v18667_v26 = vld [vmem:[#allocation5 + $0xd88] ss:$16 sps:$4 sm:$0xff]  }
 0x845   :  { %v14697_v55 = vunpack.c.l.b16 %v14677_v5  ;;  %v14699_v28 = vrot.slane %v14698_v13, 7  ;;  %v18664_v61 = vld [vmem:[#allocation5 + $0xd80] ss:$16 sps:$4 sm:$0xff]   ;;  %v18675_v27 = vld [vmem:[#allocation5 + $0xe6c] ss:$16 sps:$4 sm:$0xff]  }
 0x846   :  { %14406 = vmatpush1.bf16.msra.mxu0 %v18610_v16  ;;  %14447 = vmatpush1.bf16.msra.mxu1 %v18613_v48  ;;  %v18672_v16 = vld [vmem:[#allocation5 + $0xe64] ss:$16 sps:$4 sm:$0xff]   ;;  %v18670_v3 = vld [vmem:[#allocation5 + $0xe60] ss:$16 sps:$4 sm:$0xff]   ;;  %v18685_v22 = vld [vmem:[#allocation5 + $0xe28] ss:$16 sps:$4 sm:$0xff]  }
 0x847   :  { %14407 = vmatprep.subr.bf16.mxu0 %v18618_v52  ;;  %14448 = vmatprep.subr.bf16.mxu1 %v18621_v10  ;;  %v14700_v48 = vsel %vm9423_vm4, %v14699_v28, %v14697_v55  ;;  %v14872_v52 = vld [vmem:[#allocation4 + $0x54] sm:$0x1]  ;;  %v18682_v63 = vld [vmem:[#allocation5 + $0xe20] ss:$16 sps:$4 sm:$0xff]   ;;  %v18693_v15 = vld [vmem:[#allocation5 + $0xe0c] ss:$16 sps:$4 sm:$0xff]  }
 0x848   :  { %v14701_v10 = vpack.c.b16 %v14700_v48, %v14700_v48  ;;  %v18678_v32 = vld [vmem:[#allocation5 + $0xe44] ss:$16 sps:$4 sm:$0xff]   ;;  %v18688_v45 = vld [vmem:[#allocation5 + $0xe00] ss:$16 sps:$4 sm:$0xff]   ;;  %v18711_v8 = vld [vmem:[#allocation5 + $0xeac] ss:$16 sps:$4 sm:$0xff]  }
 0x849   :  { %v18684_v40 = vld [vmem:[#allocation5 + $0xe24] ss:$16 sps:$4 sm:$0xff]   ;;  %v18700_v43 = vld [vmem:[#allocation5 + $0xec0] ss:$16 sps:$4 sm:$0xff]   ;;  %v18709_v31 = vld [vmem:[#allocation5 + $0xea8] ss:$16 sps:$4 sm:$0xff]  }
 0x84a   :  { %14408 = vmatpush1.bf16.msra.mxu0 %v18616_v39  ;;  %14449 = vmatpush1.bf16.msra.mxu1 %v18619_v36  ;;  %v18673_v39 = vld [vmem:[#allocation5 + $0xe68] ss:$16 sps:$4 sm:$0xff]   ;;  %v14874_v36 = vpack.c.bf16 %v14872_v52, %v14872_v52  ;;  %v15068_v33 = vld [vmem:[#allocation4 + $0x55] sm:$0x1]  ;;  %v18717_v13 = vld [vmem:[#allocation5 + $0xe8c] ss:$16 sps:$4 sm:$0xff]  }
 0x84b   :  { %14597 = vmatprep.subr.bf16.mxu0 %v18624_v54  ;;  %14638 = vmatprep.subr.bf16.mxu1 %v18627_v14  ;;  %v18681_v54 = vld [vmem:[#allocation5 + $0xe4c] ss:$16 sps:$4 sm:$0xff]   ;;  %v14871_v14 = vld [vmem:[#allocation4 + $0x24] sm:$0x1] }
 0x84c   :  { %v18702_v21 = vld [vmem:[#allocation5 + $0xec4] ss:$16 sps:$4 sm:$0xff]  }
 0x84d   :  { %17226 = vmatmul.mubr.msk.bf16.vlgmr.msra.gmra.mxu0 %vm131_vm0, %v14309_v57  ;;  %17227 = vmatmul.mubr.msk.bf16.vlgmr.msra.gmra.mxu1 %vm131_vm0, %v14309_v57  ;;  %v18679_v57 = vld [vmem:[#allocation5 + $0xe48] ss:$16 sps:$4 sm:$0xff]   ;;  %v18714_v5 = vld [vmem:[#allocation5 + $0xe84] ss:$16 sps:$4 sm:$0xff]  }
 0x84e   :  { %14598 = vmatpush1.bf16.msra.mxu0 %v18622_v24  ;;  %14639 = vmatpush1.bf16.msra.mxu1 %v18625_v1  ;;  %v18676_v24 = vld [vmem:[#allocation5 + $0xe40] ss:$16 sps:$4 sm:$0xff]   ;;  %v14873_v1 = vpack.c.bf16 %v14871_v14, %v14871_v14 }
 0x84f   :  { %14599 = vmatprep.subr.bf16.mxu0 %v18630_v20  ;;  %14640 = vmatprep.subr.bf16.mxu1 %v18633_v47  ;;  %v14894_v20 = vunpack.c.l.b16 %v14874_v36  ;;  %v18687_v47 = vld [vmem:[#allocation5 + $0xe2c] ss:$16 sps:$4 sm:$0xff]  }
 0x850   :  { %14621 = vmatprep.mubr.bf16.mxu0 %v19087_v56  ;;  %14662 = vmatprep.mubr.bf16.mxu1 %v19087_v56 }
 0x852   :  { %14600 = vmatpush1.bf16.msra.mxu0 %v18628_v2  ;;  %14641 = vmatpush1.bf16.msra.mxu1 %v18631_v44  ;;  %v14893_v2 = vunpack.c.l.b16 %v14873_v1  ;;  %v14895_v44 = vrot.slane %v14894_v20, 7 }
 0x853   :  { %14601 = vmatprep.subr.bf16.mxu0 %v18636_v6  ;;  %14642 = vmatprep.subr.bf16.mxu1 %v18639_v58  ;;  %v18690_v6 = vld [vmem:[#allocation5 + $0xe04] ss:$16 sps:$4 sm:$0xff]   ;;  %v18691_v58 = vld [vmem:[#allocation5 + $0xe08] ss:$16 sps:$4 sm:$0xff]  }
 0x856   :  { %14602 = vmatpush1.bf16.msra.mxu0 %v18634_v35  ;;  %14643 = vmatpush1.bf16.msra.mxu1 %v18637_v12  ;;  %v14896_v35 = vsel %vm9423_vm4, %v14895_v44, %v14893_v2  ;;  %v18696_v12 = vld [vmem:[#allocation5 + $0xee4] ss:$16 sps:$4 sm:$0xff]  }
 0x857   :  { %14603 = vmatprep.subr.bf16.mxu0 %v18642_v7  ;;  %14644 = vmatprep.subr.bf16.mxu1 %v18645_v19  ;;  %v18699_v7 = vld [vmem:[#allocation5 + $0xeec] ss:$16 sps:$4 sm:$0xff]   ;;  %v14897_v25 = vpack.c.b16 %v14896_v35, %v14896_v35  ;;  %v18694_v19 = vld [vmem:[#allocation5 + $0xee0] ss:$16 sps:$4 sm:$0xff]  }
 0x85a   :  { %14604 = vmatpush1.bf16.msra.mxu0 %v18640_v34  ;;  %14645 = vmatpush1.bf16.msra.mxu1 %v18643_v23  ;;  %v18697_v34 = vld [vmem:[#allocation5 + $0xee8] ss:$16 sps:$4 sm:$0xff]   ;;  %v15070_v23 = vpack.c.bf16 %v15068_v33, %v15068_v33 }
 0x85b   :  { %14793 = vmatprep.subr.bf16.mxu0 %v18648_v46  ;;  %14834 = vmatprep.subr.bf16.mxu1 %v18651_v59  ;;  %v18705_v46 = vld [vmem:[#allocation5 + $0xecc] ss:$16 sps:$4 sm:$0xff]   ;;  %v15067_v59 = vld [vmem:[#allocation4 + $0x25] sm:$0x1] }
 0x85d   :  { %17244 = vmatmul.mubr.msk.bf16.vlgmr.msra.gmra.mxu0 %vm131_vm0, %v14505_v29  ;;  %17245 = vmatmul.mubr.msk.bf16.vlgmr.msra.gmra.mxu1 %vm131_vm0, %v14505_v29  ;;  %v18703_v29 = vld [vmem:[#allocation5 + $0xec8] ss:$16 sps:$4 sm:$0xff]  }
 0x85e   :  { %14794 = vmatpush1.bf16.msra.mxu0 %v18646_v41  ;;  %14835 = vmatpush1.bf16.msra.mxu1 %v18649_v38  ;;  %v15069_v41 = vpack.c.bf16 %v15067_v59, %v15067_v59  ;;  %v15090_v38 = vunpack.c.l.b16 %v15070_v23 }
 0x85f   :  { %14795 = vmatprep.subr.bf16.mxu0 %v18654_v30  ;;  %14836 = vmatprep.subr.bf16.mxu1 %v18657_v53  ;;  %v18708_v30 = vld [vmem:[#allocation5 + $0xea4] ss:$16 sps:$4 sm:$0xff]   ;;  %v18706_v53 = vld [vmem:[#allocation5 + $0xea0] ss:$16 sps:$4 sm:$0xff]  }
 0x860   :  { %14817 = vmatprep.mubr.bf16.mxu0 %v19087_v56  ;;  %14858 = vmatprep.mubr.bf16.mxu1 %v19087_v56 }
 0x862   :  { %14796 = vmatpush1.bf16.msra.mxu0 %v18652_v51  ;;  %14837 = vmatpush1.bf16.msra.mxu1 %v18655_v60  ;;  %v15089_v51 = vunpack.c.l.b16 %v15069_v41  ;;  %v15091_v60 = vrot.slane %v15090_v38, 7 }
 0x863   :  { %14797 = vmatprep.subr.bf16.mxu0 %v18660_v62  ;;  %14838 = vmatprep.subr.bf16.mxu1 %v18663_v9  ;;  %v18712_v62 = vld [vmem:[#allocation5 + $0xe80] ss:$16 sps:$4 sm:$0xff]   ;;  %v18715_v9 = vld [vmem:[#allocation5 + $0xe88] ss:$16 sps:$4 sm:$0xff]  }
 0x866   :  { %14798 = vmatpush1.bf16.msra.mxu0 %v18658_v50  ;;  %14839 = vmatpush1.bf16.msra.mxu1 %v18661_v18  ;;  %v15092_v50 = vsel %vm9423_vm4, %v15091_v60, %v15089_v51 }
 0x867   :  { %14799 = vmatprep.subr.bf16.mxu0 %v18666_v42  ;;  %14840 = vmatprep.subr.bf16.mxu1 %v18669_v11  ;;  %v15093_v18 = vpack.c.b16 %v15092_v50, %v15092_v50 }
 0x86a   :  { %14800 = vmatpush1.bf16.msra.mxu0 %v18664_v61  ;;  %14841 = vmatpush1.bf16.msra.mxu1 %v18667_v26 }
 0x86b   :  { %14989 = vmatprep.subr.bf16.mxu0 %v18672_v16  ;;  %15030 = vmatprep.subr.bf16.mxu1 %v18675_v27 }
 0x86d   :  { %17262 = vmatmul.mubr.msk.bf16.vlgmr.msra.gmra.mxu0 %vm131_vm0, %v14701_v10  ;;  %17263 = vmatmul.mubr.msk.bf16.vlgmr.msra.gmra.mxu1 %vm131_vm0, %v14701_v10 }
 0x86e   :  { %14990 = vmatpush1.bf16.msra.mxu0 %v18670_v3  ;;  %15031 = vmatpush1.bf16.msra.mxu1 %v18673_v39 }
 0x86f   :  { %14991 = vmatprep.subr.bf16.mxu0 %v18678_v32  ;;  %15032 = vmatprep.subr.bf16.mxu1 %v18681_v54 }
 0x870   :  { %15013 = vmatprep.mubr.bf16.mxu0 %v19087_v56  ;;  %15054 = vmatprep.mubr.bf16.mxu1 %v19087_v56 }
 0x872   :  { %14992 = vmatpush1.bf16.msra.mxu0 %v18676_v24  ;;  %15033 = vmatpush1.bf16.msra.mxu1 %v18679_v57 }
 0x873   :  { %14993 = vmatprep.subr.bf16.mxu0 %v18684_v40  ;;  %15034 = vmatprep.subr.bf16.mxu1 %v18687_v47 }
 0x876   :  { %14994 = vmatpush1.bf16.msra.mxu0 %v18682_v63  ;;  %15035 = vmatpush1.bf16.msra.mxu1 %v18685_v22 }
 0x877   :  { %14995 = vmatprep.subr.bf16.mxu0 %v18690_v6  ;;  %15036 = vmatprep.subr.bf16.mxu1 %v18693_v15 }
 0x87a   :  { %14996 = vmatpush1.bf16.msra.mxu0 %v18688_v45  ;;  %15037 = vmatpush1.bf16.msra.mxu1 %v18691_v58 }
 0x87b   :  { %15185 = vmatprep.subr.bf16.mxu0 %v18696_v12  ;;  %15226 = vmatprep.subr.bf16.mxu1 %v18699_v7 }
 0x87d   :  { %17280 = vmatmul.mubr.msk.bf16.vlgmr.msra.gmra.mxu0 %vm131_vm0, %v14897_v25  ;;  %17281 = vmatmul.mubr.msk.bf16.vlgmr.msra.gmra.mxu1 %vm131_vm0, %v14897_v25 }
 0x87e   :  { %15186 = vmatpush1.bf16.msra.mxu0 %v18694_v19  ;;  %15227 = vmatpush1.bf16.msra.mxu1 %v18697_v34 }
 0x87f   :  { %15187 = vmatprep.subr.bf16.mxu0 %v18702_v21  ;;  %15228 = vmatprep.subr.bf16.mxu1 %v18705_v46 }
 0x880   :  { %15209 = vmatprep.mubr.bf16.mxu0 %v19087_v56  ;;  %15250 = vmatprep.mubr.bf16.mxu1 %v19087_v56 }
 0x882   :  { %15188 = vmatpush1.bf16.msra.mxu0 %v18700_v43  ;;  %15229 = vmatpush1.bf16.msra.mxu1 %v18703_v29 }
 0x883   :  { %15189 = vmatprep.subr.bf16.mxu0 %v18708_v30  ;;  %15230 = vmatprep.subr.bf16.mxu1 %v18711_v8 }
 0x886   :  { %15190 = vmatpush1.bf16.msra.mxu0 %v18706_v53  ;;  %15231 = vmatpush1.bf16.msra.mxu1 %v18709_v31 }
 0x887   :  { %15191 = vmatprep.subr.bf16.mxu0 %v18714_v5  ;;  %15232 = vmatprep.subr.bf16.mxu1 %v18717_v13 }
 0x88a   :  { %15192 = vmatpush1.bf16.msra.mxu0 %v18712_v62  ;;  %15233 = vmatpush1.bf16.msra.mxu1 %v18715_v9 }
 0x88d   :  { %17298 = vmatmul.mubr.msk.bf16.vlgmr.msra.gmra.mxu0 %vm131_vm0, %v15093_v18  ;;  %17299 = vmatmul.mubr.msk.bf16.vlgmr.msra.gmra.mxu1 %vm131_vm0, %v15093_v18 }
 0x8fd   :  { %v14231_v42 = vpop.f32.mrf.mxu0  ;;  %v14272_v55 = vpop.f32.mrf.mxu1 }
 0x8fe   :  { %v14279_v46 = vadd.f32 %v14231_v42, %v21647_v37  ;;  %v14281_v59 = vadd.f32 %v14272_v55, %v21649_v17 }
 0x8ff   :  { %v14233_v28 = vpop.f32.mrf.mxu0  ;;  %v14274_v11 = vpop.f32.mrf.mxu1 }
 0x900   :  { %v14280_v43 = vadd.f32 %v14233_v28, %v21651_v0  ;;  %v14282_v29 = vadd.f32 %v14274_v11, %v21653_v49 }
 0x901   :  { %v14235_v61 = vpop.f32.mrf.mxu0  ;;  %v14276_v26 = vpop.f32.mrf.mxu1 }
 0x903   :  { %v14236_v16 = vpop.f32.mrf.mxu0  ;;  %v14277_v48 = vpop.f32.mrf.mxu1 }
 0x90d   :  { %v14427_v27 = vpop.f32.mrf.mxu0  ;;  %v14468_v52 = vpop.f32.mrf.mxu1 }
 0x90e   :  { %v14475_v41 = vadd.f32 %v14427_v27, %v14279_v46  ;;  %v14477_v38 = vadd.f32 %v14468_v52, %v14281_v59 }
 0x90f   :  { %v14429_v10 = vpop.f32.mrf.mxu0  ;;  %v14470_v3 = vpop.f32.mrf.mxu1 }
 0x910   :  { %v14476_v30 = vadd.f32 %v14429_v10, %v14280_v43  ;;  %v14478_v8 = vadd.f32 %v14470_v3, %v14282_v29 }
 0x911   :  { %v14431_v39 = vpop.f32.mrf.mxu0  ;;  %v14472_v36 = vpop.f32.mrf.mxu1 }
 0x913   :  { %v14432_v32 = vpop.f32.mrf.mxu0  ;;  %v14473_v54 = vpop.f32.mrf.mxu1 }
 0x91d   :  { %v14623_v14 = vpop.f32.mrf.mxu0  ;;  %v14664_v24 = vpop.f32.mrf.mxu1 }
 0x91e   :  { %v14671_v53 = vadd.f32 %v14623_v14, %v14475_v41  ;;  %v14673_v31 = vadd.f32 %v14664_v24, %v14477_v38 }
 0x91f   :  { %v14625_v57 = vpop.f32.mrf.mxu0  ;;  %v14666_v1 = vpop.f32.mrf.mxu1 }
 0x920   :  { %v14672_v51 = vadd.f32 %v14625_v57, %v14476_v30  ;;  %v14674_v60 = vadd.f32 %v14666_v1, %v14478_v8 }
 0x921   :  { %v14627_v20 = vpop.f32.mrf.mxu0  ;;  %v14668_v40 = vpop.f32.mrf.mxu1 }
 0x923   :  { %v14628_v47 = vpop.f32.mrf.mxu0  ;;  %v14669_v63 = vpop.f32.mrf.mxu1 }
 0x92d   :  { %v14819_v22 = vpop.f32.mrf.mxu0  ;;  %v14860_v2 = vpop.f32.mrf.mxu1 }
 0x92e   :  { %v14867_v5 = vadd.f32 %v14819_v22, %v14671_v53  ;;  %v14869_v13 = vadd.f32 %v14860_v2, %v14673_v31 }
 0x92f   :  { %v14821_v44 = vpop.f32.mrf.mxu0  ;;  %v14862_v6 = vpop.f32.mrf.mxu1 }
 0x930   :  { %v14868_v62 = vadd.f32 %v14821_v44, %v14672_v51  ;;  %v14870_v9 = vadd.f32 %v14862_v6, %v14674_v60 }
 0x931   :  { %v14823_v15 = vpop.f32.mrf.mxu0  ;;  %v14864_v45 = vpop.f32.mrf.mxu1 }
 0x933   :  { %v14824_v58 = vpop.f32.mrf.mxu0  ;;  %v14865_v35 = vpop.f32.mrf.mxu1 }
 0x93d   :  { %v15015_v12 = vpop.f32.mrf.mxu0  ;;  %v15056_v7 = vpop.f32.mrf.mxu1 }
 0x93e   :  { %v15063_v50 = vadd.f32 %v15015_v12, %v14867_v5  ;;  %v15065_v37 = vadd.f32 %v15056_v7, %v14869_v13 }
 0x93f   :  { %v15017_v33 = vpop.f32.mrf.mxu0  ;;  %v15058_v25 = vpop.f32.mrf.mxu1 }
 0x940   :  { %v15064_v42 = vadd.f32 %v15017_v33, %v14868_v62  ;;  %v15066_v0 = vadd.f32 %v15058_v25, %v14870_v9 }
 0x941   :  { %v15019_v19 = vpop.f32.mrf.mxu0  ;;  %v15060_v34 = vpop.f32.mrf.mxu1 }
 0x943   :  { %v15020_v23 = vpop.f32.mrf.mxu0  ;;  %v15061_v21 = vpop.f32.mrf.mxu1 }
 0x94d   :  { %v15211_v18 = vpop.f32.mrf.mxu0  ;;  %v15252_v17 = vpop.f32.mrf.mxu1 }
 0x94e   :  { %v21689_v55 = vadd.f32 %v15211_v18, %v15063_v50  ;;  %v21691_v49 = vadd.f32 %v15252_v17, %v15065_v37 }
 0x94f   :  { %v15213_v28 = vpop.f32.mrf.mxu0  ;;  %v15254_v11 = vpop.f32.mrf.mxu1 }
 0x950   :  { %v21693_v61 = vadd.f32 %v15213_v28, %v15064_v42  ;;  %v21695_v26 = vadd.f32 %v15254_v11, %v15066_v0 }
 0x951   :  { %v15215_v16 = vpop.f32.mrf.mxu0  ;;  %v15256_v48 = vpop.f32.mrf.mxu1 }
 0x953   :  { %v15216_v27 = vpop.f32.mrf.mxu0  ;;  %v15257_v52 = vpop.f32.mrf.mxu1 }
 0x954   :  { %19071 = dma.done.wait [#allocation6 + $0x5], 12288 }
 0x955   :  { %19072 = vsyncadd [#allocation6 + $0x5], 4294955008  ;;  %15408 = vmatprep.mubr.bf16.mxu0 %v19087_v56  ;;  %15449 = vmatprep.mubr.bf16.mxu1 %v19087_v56  ;;  %v18718_v10 = vld [vmem:[#allocation5 + $0xf64] ss:$16 sps:$4 sm:$0xff]   ;;  %v18720_v3 = vld [vmem:[#allocation5 + $0xf6c] ss:$16 sps:$4 sm:$0xff]  }
 0x956   :  { %15384 = vmatprep.subr.bf16.mxu0 %v18718_v10  ;;  %v18722_v39 = vld [vmem:[#allocation5 + $0xf60] ss:$16 sps:$4 sm:$0xff]   ;;  %v18723_v36 = vld [vmem:[#allocation5 + $0xf68] ss:$16 sps:$4 sm:$0xff]   ;;  %15425 = vmatprep.subr.bf16.mxu1 %v18720_v3  ;;  %v18724_v32 = vld [vmem:[#allocation5 + $0xf44] ss:$16 sps:$4 sm:$0xff]  }
 0x957   :  { %15385 = vmatpush1.bf16.msra.mxu0 %v18722_v39  ;;  %15426 = vmatpush1.bf16.msra.mxu1 %v18723_v36  ;;  %v18726_v54 = vld [vmem:[#allocation5 + $0xf4c] ss:$16 sps:$4 sm:$0xff]   ;;  %v18728_v14 = vld [vmem:[#allocation5 + $0xf40] ss:$16 sps:$4 sm:$0xff]   ;;  %v18729_v24 = vld [vmem:[#allocation5 + $0xf48] ss:$16 sps:$4 sm:$0xff]  }
 0x958   :  { %15386 = vmatprep.subr.bf16.mxu0 %v18724_v32  ;;  %15427 = vmatprep.subr.bf16.mxu1 %v18726_v54  ;;  %v18730_v57 = vld [vmem:[#allocation5 + $0xf24] ss:$16 sps:$4 sm:$0xff]   ;;  %v18732_v1 = vld [vmem:[#allocation5 + $0xf2c] ss:$16 sps:$4 sm:$0xff]   ;;  %v18734_v20 = vld [vmem:[#allocation5 + $0xf20] ss:$16 sps:$4 sm:$0xff]  }
 0x959   :  { %v18735_v40 = vld [vmem:[#allocation5 + $0xf28] ss:$16 sps:$4 sm:$0xff]   ;;  %v18736_v47 = vld [vmem:[#allocation5 + $0xf04] ss:$16 sps:$4 sm:$0xff]   ;;  %v18738_v63 = vld [vmem:[#allocation5 + $0xf0c] ss:$16 sps:$4 sm:$0xff]  }
 0x95a   :  { %v15266_v22 = vld [vmem:[#allocation4 + $0x28] sm:$0x1]  ;;  %v15267_v2 = vld [vmem:[#allocation4 + $0x58] sm:$0x1]  ;;  %v18740_v6 = vld [vmem:[#allocation5 + $0xf00] ss:$16 sps:$4 sm:$0xff]  }
 0x95b   :  { %15387 = vmatpush1.bf16.msra.mxu0 %v18728_v14  ;;  %15428 = vmatpush1.bf16.msra.mxu1 %v18729_v24  ;;  %v15268_v44 = vpack.c.bf16 %v15266_v22, %v15266_v22  ;;  %v18741_v15 = vld [vmem:[#allocation5 + $0xf08] ss:$16 sps:$4 sm:$0xff]   ;;  %v15269_v45 = vpack.c.bf16 %v15267_v2, %v15267_v2  ;;  %v18744_v58 = vld [vmem:[#allocation5 + $0xfe4] ss:$16 sps:$4 sm:$0xff]   ;;  %v18747_v35 = vld [vmem:[#allocation5 + $0xfec] ss:$16 sps:$4 sm:$0xff]  }
 0x95c   :  { %15388 = vmatprep.subr.bf16.mxu0 %v18730_v57  ;;  %15429 = vmatprep.subr.bf16.mxu1 %v18732_v1  ;;  %v18742_v25 = vld [vmem:[#allocation5 + $0xfe0] ss:$16 sps:$4 sm:$0xff]   ;;  %v18745_v19 = vld [vmem:[#allocation5 + $0xfe8] ss:$16 sps:$4 sm:$0xff]   ;;  %v18750_v23 = vld [vmem:[#allocation5 + $0xfc4] ss:$16 sps:$4 sm:$0xff]  }
 0x95d   :  { %v15288_v12 = vunpack.c.l.b16 %v15268_v44  ;;  %v15289_v7 = vunpack.c.l.b16 %v15269_v45  ;;  %v18753_v46 = vld [vmem:[#allocation5 + $0xfcc] ss:$16 sps:$4 sm:$0xff]   ;;  %v18748_v59 = vld [vmem:[#allocation5 + $0xfc0] ss:$16 sps:$4 sm:$0xff]   ;;  %v18751_v43 = vld [vmem:[#allocation5 + $0xfc8] ss:$16 sps:$4 sm:$0xff]  }
 0x95e   :  { %v15462_v29 = vld [vmem:[#allocation4 + $0x29] sm:$0x1]  ;;  %v15463_v41 = vld [vmem:[#allocation4 + $0x59] sm:$0x1]  ;;  %v18756_v38 = vld [vmem:[#allocation5 + $0xfa4] ss:$16 sps:$4 sm:$0xff]  }
 0x95f   :  { %15389 = vmatpush1.bf16.msra.mxu0 %v18734_v20  ;;  %15430 = vmatpush1.bf16.msra.mxu1 %v18735_v40  ;;  %v15290_v33 = vrot.slane %v15289_v7, 7  ;;  %v18759_v30 = vld [vmem:[#allocation5 + $0xfac] ss:$16 sps:$4 sm:$0xff]   ;;  %v15464_v8 = vpack.c.bf16 %v15462_v29, %v15462_v29  ;;  %v15465_v53 = vpack.c.bf16 %v15463_v41, %v15463_v41  ;;  %v18754_v51 = vld [vmem:[#allocation5 + $0xfa0] ss:$16 sps:$4 sm:$0xff]   ;;  %vm16683_vm5 = vcmask 123904  }
 0x960   :  { %15390 = vmatprep.subr.bf16.mxu0 %v18736_v47  ;;  %15431 = vmatprep.subr.bf16.mxu1 %v18738_v63  ;;  %v18757_v60 = vld [vmem:[#allocation5 + $0xfa8] ss:$16 sps:$4 sm:$0xff]   ;;  %v18762_v13 = vld [vmem:[#allocation5 + $0xf84] ss:$16 sps:$4 sm:$0xff]   ;;  %v18765_v62 = vld [vmem:[#allocation5 + $0xf8c] ss:$16 sps:$4 sm:$0xff]  }
 0x961   :  { %v15291_v34 = vsel %vm9423_vm4, %v15290_v33, %v15288_v12  ;;  %v15485_v31 = vunpack.c.l.b16 %v15465_v53  ;;  %v15484_v5 = vunpack.c.l.b16 %v15464_v8  ;;  %v18760_v50 = vld [vmem:[#allocation5 + $0xf80] ss:$16 sps:$4 sm:$0xff]   ;;  %v18763_v37 = vld [vmem:[#allocation5 + $0xf88] ss:$16 sps:$4 sm:$0xff]   ;;  %v18768_v17 = vld [vmem:[#allocation5 + $0x1064] ss:$16 sps:$4 sm:$0xff]  }
 0x962   :  { %v15292_v21 = vpack.c.b16 %v15291_v34, %v15291_v34  ;;  %v18771_v42 = vld [vmem:[#allocation5 + $0x106c] ss:$16 sps:$4 sm:$0xff]   ;;  %v18766_v0 = vld [vmem:[#allocation5 + $0x1060] ss:$16 sps:$4 sm:$0xff]   ;;  %v18769_v11 = vld [vmem:[#allocation5 + $0x1068] ss:$16 sps:$4 sm:$0xff]  }
 0x963   :  { %15391 = vmatpush1.bf16.msra.mxu0 %v18740_v6  ;;  %15432 = vmatpush1.bf16.msra.mxu1 %v18741_v15  ;;  %v15486_v9 = vrot.slane %v15485_v31, 7  ;;  %v18774_v16 = vld [vmem:[#allocation5 + $0x1044] ss:$16 sps:$4 sm:$0xff]   ;;  %v15659_v48 = vld [vmem:[#allocation4 + $0x5a] sm:$0x1] }
 0x964   :  { %15580 = vmatprep.subr.bf16.mxu0 %v18744_v58  ;;  %15621 = vmatprep.subr.bf16.mxu1 %v18747_v35  ;;  %v18777_v27 = vld [vmem:[#allocation5 + $0x104c] ss:$16 sps:$4 sm:$0xff]   ;;  %v15661_v52 = vpack.c.bf16 %v15659_v48, %v15659_v48  ;;  %v15658_v10 = vld [vmem:[#allocation4 + $0x2a] sm:$0x1]  ;;  %v18772_v3 = vld [vmem:[#allocation5 + $0x1040] ss:$16 sps:$4 sm:$0xff]  }
 0x965   :  { %v15487_v18 = vsel %vm9423_vm4, %v15486_v9, %v15484_v5  ;;  %v18775_v39 = vld [vmem:[#allocation5 + $0x1048] ss:$16 sps:$4 sm:$0xff]   ;;  %v18780_v36 = vld [vmem:[#allocation5 + $0x1024] ss:$16 sps:$4 sm:$0xff]   ;;  %v15660_v32 = vpack.c.bf16 %v15658_v10, %v15658_v10  ;;  %v18783_v14 = vld [vmem:[#allocation5 + $0x102c] ss:$16 sps:$4 sm:$0xff]  }
 0x966   :  { %17316 = vmatmul.mubr.msk.bf16.vlgmr.msra.gmra.mxu0 %vm131_vm0, %v15292_v21  ;;  %17317 = vmatmul.mubr.msk.bf16.vlgmr.msra.gmra.mxu1 %vm131_vm0, %v15292_v21  ;;  %v15488_v28 = vpack.c.b16 %v15487_v18, %v15487_v18  ;;  %v15681_v54 = vunpack.c.l.b16 %v15661_v52  ;;  %v18778_v24 = vld [vmem:[#allocation5 + $0x1020] ss:$16 sps:$4 sm:$0xff]   ;;  %v18781_v57 = vld [vmem:[#allocation5 + $0x1028] ss:$16 sps:$4 sm:$0xff]   ;;  %v18786_v1 = vld [vmem:[#allocation5 + $0x1004] ss:$16 sps:$4 sm:$0xff]  }
 0x967   :  { %15581 = vmatpush1.bf16.msra.mxu0 %v18742_v25  ;;  %15622 = vmatpush1.bf16.msra.mxu1 %v18745_v19  ;;  %v15680_v20 = vunpack.c.l.b16 %v15660_v32  ;;  %v18789_v47 = vld [vmem:[#allocation5 + $0x100c] ss:$16 sps:$4 sm:$0xff]   ;;  %v18784_v63 = vld [vmem:[#allocation5 + $0x1000] ss:$16 sps:$4 sm:$0xff]   ;;  %v18787_v22 = vld [vmem:[#allocation5 + $0x1008] ss:$16 sps:$4 sm:$0xff]  }
 0x968   :  { %15582 = vmatprep.subr.bf16.mxu0 %v18750_v23  ;;  %15623 = vmatprep.subr.bf16.mxu1 %v18753_v46  ;;  %v15682_v40 = vrot.slane %v15681_v54, 7  ;;  %v18792_v44 = vld [vmem:[#allocation5 + $0x10e4] ss:$16 sps:$4 sm:$0xff]   ;;  %v18795_v6 = vld [vmem:[#allocation5 + $0x10ec] ss:$16 sps:$4 sm:$0xff]  }
 0x969   :  { %15604 = vmatprep.mubr.bf16.mxu0 %v19087_v56  ;;  %15645 = vmatprep.mubr.bf16.mxu1 %v19087_v56  ;;  %v15855_v15 = vld [vmem:[#allocation4 + $0x5b] sm:$0x1]  ;;  %v18790_v58 = vld [vmem:[#allocation5 + $0x10e0] ss:$16 sps:$4 sm:$0xff]   ;;  %v18798_v12 = vld [vmem:[#allocation5 + $0x10c4] ss:$16 sps:$4 sm:$0xff]  }
 0x96a   :  { %v15683_v2 = vsel %vm9423_vm4, %v15682_v40, %v15680_v20  ;;  %v18793_v35 = vld [vmem:[#allocation5 + $0x10e8] ss:$16 sps:$4 sm:$0xff]   ;;  %v15857_v7 = vpack.c.bf16 %v15855_v15, %v15855_v15  ;;  %v18801_v33 = vld [vmem:[#allocation5 + $0x10cc] ss:$16 sps:$4 sm:$0xff]   ;;  %v18796_v19 = vld [vmem:[#allocation5 + $0x10c0] ss:$16 sps:$4 sm:$0xff]  }
 0x96b   :  { %15583 = vmatpush1.bf16.msra.mxu0 %v18748_v59  ;;  %15624 = vmatpush1.bf16.msra.mxu1 %v18751_v43  ;;  %v15684_v45 = vpack.c.b16 %v15683_v2, %v15683_v2  ;;  %v15854_v25 = vld [vmem:[#allocation4 + $0x2b] sm:$0x1]  ;;  %v18804_v46 = vld [vmem:[#allocation5 + $0x10a4] ss:$16 sps:$4 sm:$0xff]   ;;  %v18807_v59 = vld [vmem:[#allocation5 + $0x10ac] ss:$16 sps:$4 sm:$0xff]  }
 0x96c   :  { %15584 = vmatprep.subr.bf16.mxu0 %v18756_v38  ;;  %15625 = vmatprep.subr.bf16.mxu1 %v18759_v30  ;;  %v18799_v34 = vld [vmem:[#allocation5 + $0x10c8] ss:$16 sps:$4 sm:$0xff]   ;;  %v15856_v23 = vpack.c.bf16 %v15854_v25, %v15854_v25  ;;  %v15877_v21 = vunpack.c.l.b16 %v15857_v7  ;;  %v18802_v43 = vld [vmem:[#allocation5 + $0x10a0] ss:$16 sps:$4 sm:$0xff]   ;;  %v18810_v41 = vld [vmem:[#allocation5 + $0x1084] ss:$16 sps:$4 sm:$0xff]  }
 0x96d   :  { %v18805_v29 = vld [vmem:[#allocation5 + $0x10a8] ss:$16 sps:$4 sm:$0xff]   ;;  %v18813_v8 = vld [vmem:[#allocation5 + $0x108c] ss:$16 sps:$4 sm:$0xff]   ;;  %v18808_v53 = vld [vmem:[#allocation5 + $0x1080] ss:$16 sps:$4 sm:$0xff]  }
 0x96e   :  { %v15876_v38 = vunpack.c.l.b16 %v15856_v23  ;;  %v15878_v30 = vrot.slane %v15877_v21, 7  ;;  %v18811_v31 = vld [vmem:[#allocation5 + $0x1088] ss:$16 sps:$4 sm:$0xff]   ;;  %v18819_v5 = vld [vmem:[#allocation5 + $0x116c] ss:$16 sps:$4 sm:$0xff]  }
 0x96f   :  { %15585 = vmatpush1.bf16.msra.mxu0 %v18754_v51  ;;  %15626 = vmatpush1.bf16.msra.mxu1 %v18757_v60  ;;  %v18816_v51 = vld [vmem:[#allocation5 + $0x1164] ss:$16 sps:$4 sm:$0xff]   ;;  %v18814_v9 = vld [vmem:[#allocation5 + $0x1160] ss:$16 sps:$4 sm:$0xff]   ;;  %v18829_v10 = vld [vmem:[#allocation5 + $0x1128] ss:$16 sps:$4 sm:$0xff]  }
 0x970   :  { %15586 = vmatprep.subr.bf16.mxu0 %v18762_v13  ;;  %15627 = vmatprep.subr.bf16.mxu1 %v18765_v62  ;;  %v15879_v60 = vsel %vm9423_vm4, %v15878_v30, %v15876_v38  ;;  %v16051_v13 = vld [vmem:[#allocation4 + $0x5c] sm:$0x1]  ;;  %v18822_v18 = vld [vmem:[#allocation5 + $0x1144] ss:$16 sps:$4 sm:$0xff]   ;;  %v18826_v52 = vld [vmem:[#allocation5 + $0x1120] ss:$16 sps:$4 sm:$0xff]  }
 0x971   :  { %v15880_v62 = vpack.c.b16 %v15879_v60, %v15879_v60  ;;  %v18828_v48 = vld [vmem:[#allocation5 + $0x1124] ss:$16 sps:$4 sm:$0xff]   ;;  %v18837_v32 = vld [vmem:[#allocation5 + $0x110c] ss:$16 sps:$4 sm:$0xff]   ;;  %v18832_v54 = vld [vmem:[#allocation5 + $0x1100] ss:$16 sps:$4 sm:$0xff]  }
 0x972   :  { %v16247_v20 = vld [vmem:[#allocation4 + $0x5d] sm:$0x1]  ;;  %v18846_v2 = vld [vmem:[#allocation5 + $0x11c4] ss:$16 sps:$4 sm:$0xff]   ;;  %v18844_v15 = vld [vmem:[#allocation5 + $0x11c0] ss:$16 sps:$4 sm:$0xff]  }
 0x973   :  { %15587 = vmatpush1.bf16.msra.mxu0 %v18760_v50  ;;  %15628 = vmatpush1.bf16.msra.mxu1 %v18763_v37  ;;  %v18817_v50 = vld [vmem:[#allocation5 + $0x1168] ss:$16 sps:$4 sm:$0xff]   ;;  %v16053_v37 = vpack.c.bf16 %v16051_v13, %v16051_v13  ;;  %v18855_v7 = vld [vmem:[#allocation5 + $0x11ac] ss:$16 sps:$4 sm:$0xff]   ;;  %v18858_v23 = vld [vmem:[#allocation5 + $0x1184] ss:$16 sps:$4 sm:$0xff]  }
 0x974   :  { %15776 = vmatprep.subr.bf16.mxu0 %v18768_v17  ;;  %15817 = vmatprep.subr.bf16.mxu1 %v18771_v42  ;;  %v18825_v17 = vld [vmem:[#allocation5 + $0x114c] ss:$16 sps:$4 sm:$0xff]   ;;  %v18853_v25 = vld [vmem:[#allocation5 + $0x11a8] ss:$16 sps:$4 sm:$0xff]   ;;  %v16487_v38 = vld [vmem:[%s21935_s5 + $0x78] sm:$0xff] }
 0x975   :  { %v16050_v42 = vld [vmem:[#allocation4 + $0x2c] sm:$0x1]  ;;  %v16519_v30 = vld [vmem:[%s21935_s5 + $0x178] sm:$0xff]  ;;  %v16501_v60 = vld [vmem:[%s21935_s5 + $0xe8] sm:$0xff] }
 0x976   :  { %17334 = vmatmul.mubr.msk.bf16.vlgmr.msra.gmra.mxu0 %vm131_vm0, %v15488_v28  ;;  %17335 = vmatmul.mubr.msk.bf16.vlgmr.msra.gmra.mxu1 %vm131_vm0, %v15488_v28  ;;  %v18823_v28 = vld [vmem:[#allocation5 + $0x1148] ss:$16 sps:$4 sm:$0xff]   ;;  %v18861_v21 = vld [vmem:[#allocation5 + $0x118c] ss:$16 sps:$4 sm:$0xff]   ;;  %v16485_v13 = vld [vmem:[%s21935_s5 + $0x68] sm:$0xff] }
 0x977   :  { %15777 = vmatpush1.bf16.msra.mxu0 %v18766_v0  ;;  %15818 = vmatpush1.bf16.msra.mxu1 %v18769_v11  ;;  %v18820_v0 = vld [vmem:[#allocation5 + $0x1140] ss:$16 sps:$4 sm:$0xff]   ;;  %v16052_v11 = vpack.c.bf16 %v16050_v42, %v16050_v42 }
 0x978   :  { %15778 = vmatprep.subr.bf16.mxu0 %v18774_v16  ;;  %15819 = vmatprep.subr.bf16.mxu1 %v18777_v27  ;;  %v16073_v16 = vunpack.c.l.b16 %v16053_v37  ;;  %v18831_v27 = vld [vmem:[#allocation5 + $0x112c] ss:$16 sps:$4 sm:$0xff]   ;;  %v16531_v42 = vld [vmem:[%s21935_s5 + $0x1d8] sm:$0xff] }
 0x979   :  { %15800 = vmatprep.mubr.bf16.mxu0 %v19087_v56  ;;  %15841 = vmatprep.mubr.bf16.mxu1 %v19087_v56  ;;  %v16484_v37 = vld [vmem:[%s21935_s5 + $0x60] sm:$0xff] }
 0x97b   :  { %15779 = vmatpush1.bf16.msra.mxu0 %v18772_v3  ;;  %15820 = vmatpush1.bf16.msra.mxu1 %v18775_v39  ;;  %v16072_v3 = vunpack.c.l.b16 %v16052_v11  ;;  %v16074_v39 = vrot.slane %v16073_v16, 7  ;;  %v16498_v11 = vld [vmem:[%s21935_s5 + $0xd0] sm:$0xff] }
 0x97c   :  { %15780 = vmatprep.subr.bf16.mxu0 %v18780_v36  ;;  %15821 = vmatprep.subr.bf16.mxu1 %v18783_v14  ;;  %v18834_v36 = vld [vmem:[#allocation5 + $0x1104] ss:$16 sps:$4 sm:$0xff]   ;;  %v18835_v14 = vld [vmem:[#allocation5 + $0x1108] ss:$16 sps:$4 sm:$0xff]  }
 0x97d   :  { %v16530_v16 = vld [vmem:[%s21935_s5 + $0x1d0] sm:$0xff] }
 0x97f   :  { %15781 = vmatpush1.bf16.msra.mxu0 %v18778_v24  ;;  %15822 = vmatpush1.bf16.msra.mxu1 %v18781_v57  ;;  %v16075_v24 = vsel %vm9423_vm4, %v16074_v39, %v16072_v3  ;;  %v18840_v57 = vld [vmem:[#allocation5 + $0x11e4] ss:$16 sps:$4 sm:$0xff]  }
 0x980   :  { %15782 = vmatprep.subr.bf16.mxu0 %v18786_v1  ;;  %15823 = vmatprep.subr.bf16.mxu1 %v18789_v47  ;;  %v18843_v1 = vld [vmem:[#allocation5 + $0x11ec] ss:$16 sps:$4 sm:$0xff]   ;;  %v16076_v40 = vpack.c.b16 %v16075_v24, %v16075_v24  ;;  %v18838_v47 = vld [vmem:[#allocation5 + $0x11e0] ss:$16 sps:$4 sm:$0xff]  }
 0x981   :  { %v16481_v3 = vld [vmem:[%s21935_s5 + $0x48] sm:$0xff]  ;;  %v16495_v24 = vld [vmem:[%s21935_s5 + $0xb8] sm:$0xff] }
 0x982   :  { %v16513_v39 = vld [vmem:[%s21935_s5 + $0x148] sm:$0xff] }
 0x983   :  { %15783 = vmatpush1.bf16.msra.mxu0 %v18784_v63  ;;  %15824 = vmatpush1.bf16.msra.mxu1 %v18787_v22  ;;  %v18841_v63 = vld [vmem:[#allocation5 + $0x11e8] ss:$16 sps:$4 sm:$0xff]   ;;  %v16249_v22 = vpack.c.bf16 %v16247_v20, %v16247_v20  ;;  %v16511_v20 = vld [vmem:[%s21935_s5 + $0x138] sm:$0xff] }
 0x984   :  { %15972 = vmatprep.subr.bf16.mxu0 %v18792_v44  ;;  %16013 = vmatprep.subr.bf16.mxu1 %v18795_v6  ;;  %v18849_v44 = vld [vmem:[#allocation5 + $0x11cc] ss:$16 sps:$4 sm:$0xff]  }
 0x985   :  { %v16246_v6 = vld [vmem:[#allocation4 + $0x2d] sm:$0x1] }
 0x986   :  { %17352 = vmatmul.mubr.msk.bf16.vlgmr.msra.gmra.mxu0 %vm131_vm0, %v15684_v45  ;;  %17353 = vmatmul.mubr.msk.bf16.vlgmr.msra.gmra.mxu1 %vm131_vm0, %v15684_v45  ;;  %v18847_v45 = vld [vmem:[#allocation5 + $0x11c8] ss:$16 sps:$4 sm:$0xff]  }
 0x987   :  { %15973 = vmatpush1.bf16.msra.mxu0 %v18790_v58  ;;  %16014 = vmatpush1.bf16.msra.mxu1 %v18793_v35  ;;  %v16248_v58 = vpack.c.bf16 %v16246_v6, %v16246_v6  ;;  %v16269_v35 = vunpack.c.l.b16 %v16249_v22  ;;  %v16510_v22 = vld [vmem:[%s21935_s5 + $0x130] sm:$0xff]  ;;  %v16477_v6 = vld [vmem:[%s21935_s5 + $0x28] sm:$0xff] }
 0x988   :  { %15974 = vmatprep.subr.bf16.mxu0 %v18798_v12  ;;  %16015 = vmatprep.subr.bf16.mxu1 %v18801_v33  ;;  %v18852_v12 = vld [vmem:[#allocation5 + $0x11a4] ss:$16 sps:$4 sm:$0xff]   ;;  %v18850_v33 = vld [vmem:[#allocation5 + $0x11a0] ss:$16 sps:$4 sm:$0xff]  }
 0x989   :  { %15996 = vmatprep.mubr.bf16.mxu0 %v19087_v56  ;;  %16037 = vmatprep.mubr.bf16.mxu1 %v19087_v56 }
 0x98b   :  { %15975 = vmatpush1.bf16.msra.mxu0 %v18796_v19  ;;  %16016 = vmatpush1.bf16.msra.mxu1 %v18799_v34  ;;  %v16268_v19 = vunpack.c.l.b16 %v16248_v58  ;;  %v16270_v34 = vrot.slane %v16269_v35, 7  ;;  %v16524_v58 = vld [vmem:[%s21935_s5 + $0x1a0] sm:$0xff] }
 0x98c   :  { %15976 = vmatprep.subr.bf16.mxu0 %v18804_v46  ;;  %16017 = vmatprep.subr.bf16.mxu1 %v18807_v59  ;;  %v18856_v46 = vld [vmem:[#allocation5 + $0x1180] ss:$16 sps:$4 sm:$0xff]   ;;  %v18859_v59 = vld [vmem:[#allocation5 + $0x1188] ss:$16 sps:$4 sm:$0xff]  }
 0x98d   :  { %v16476_v35 = vld [vmem:[%s21935_s5 + $0x20] sm:$0xff] }
 0x98f   :  { %15977 = vmatpush1.bf16.msra.mxu0 %v18802_v43  ;;  %16018 = vmatpush1.bf16.msra.mxu1 %v18805_v29  ;;  %v16271_v43 = vsel %vm9423_vm4, %v16270_v34, %v16268_v19  ;;  %v16507_v19 = vld [vmem:[%s21935_s5 + $0x118] sm:$0xff]  ;;  %v16490_v34 = vld [vmem:[%s21935_s5 + $0x90] sm:$0xff] }
 0x990   :  { %15978 = vmatprep.subr.bf16.mxu0 %v18810_v41  ;;  %16019 = vmatprep.subr.bf16.mxu1 %v18813_v8  ;;  %v16272_v29 = vpack.c.b16 %v16271_v43, %v16271_v43  ;;  %v16535_v41 = vld [vmem:[%s21935_s5 + $0x1f8] sm:$0xff]  ;;  %v16502_v8 = vld [vmem:[%s21935_s5 + $0xf0] sm:$0xff]  ;;  %v16521_v43 = vld [vmem:[%s21935_s5 + $0x188] sm:$0xff] }
 0x993   :  { %15979 = vmatpush1.bf16.msra.mxu0 %v18808_v53  ;;  %16020 = vmatpush1.bf16.msra.mxu1 %v18811_v31  ;;  %v16534_v53 = vld [vmem:[%s21935_s5 + $0x1f0] sm:$0xff] }
 0x994   :  { %16168 = vmatprep.subr.bf16.mxu0 %v18816_v51  ;;  %16209 = vmatprep.subr.bf16.mxu1 %v18819_v5  ;;  %v16486_v31 = vld [vmem:[%s21935_s5 + $0x70] sm:$0xff]  ;;  %v16533_v5 = vld [vmem:[%s21935_s5 + $0x1e8] sm:$0xff] }
 0x995   :  { %v16518_v51 = vld [vmem:[%s21935_s5 + $0x170] sm:$0xff] }
 0x996   :  { %17370 = vmatmul.mubr.msk.bf16.vlgmr.msra.gmra.mxu0 %vm131_vm0, %v15880_v62  ;;  %17371 = vmatmul.mubr.msk.bf16.vlgmr.msra.gmra.mxu1 %vm131_vm0, %v15880_v62  ;;  %v16517_v62 = vld [vmem:[%s21935_s5 + $0x168] sm:$0xff] }
 0x997   :  { %16169 = vmatpush1.bf16.msra.mxu0 %v18814_v9  ;;  %16210 = vmatpush1.bf16.msra.mxu1 %v18817_v50  ;;  %v16500_v9 = vld [vmem:[%s21935_s5 + $0xe0] sm:$0xff] }
 0x998   :  { %16170 = vmatprep.subr.bf16.mxu0 %v18822_v18  ;;  %16211 = vmatprep.subr.bf16.mxu1 %v18825_v17  ;;  %v16532_v50 = vld [vmem:[%s21935_s5 + $0x1e0] sm:$0xff]  ;;  %v16499_v17 = vld [vmem:[%s21935_s5 + $0xd8] sm:$0xff] }
 0x999   :  { %16192 = vmatprep.mubr.bf16.mxu0 %v19087_v56  ;;  %16233 = vmatprep.mubr.bf16.mxu1 %v19087_v56  ;;  %v16516_v18 = vld [vmem:[%s21935_s5 + $0x160] sm:$0xff] }
 0x99b   :  { %16171 = vmatpush1.bf16.msra.mxu0 %v18820_v0  ;;  %16212 = vmatpush1.bf16.msra.mxu1 %v18823_v28  ;;  %v16483_v0 = vld [vmem:[%s21935_s5 + $0x58] sm:$0xff] }
 0x99c   :  { %16172 = vmatprep.subr.bf16.mxu0 %v18828_v48  ;;  %16213 = vmatprep.subr.bf16.mxu1 %v18831_v27  ;;  %v16515_v28 = vld [vmem:[%s21935_s5 + $0x158] sm:$0xff]  ;;  %v16482_v48 = vld [vmem:[%s21935_s5 + $0x50] sm:$0xff] }
 0x99d   :  { %v16514_v27 = vld [vmem:[%s21935_s5 + $0x150] sm:$0xff] }
 0x99f   :  { %16173 = vmatpush1.bf16.msra.mxu0 %v18826_v52  ;;  %16214 = vmatpush1.bf16.msra.mxu1 %v18829_v10  ;;  %v16497_v52 = vld [vmem:[%s21935_s5 + $0xc8] sm:$0xff] }
 0x9a0   :  { %16174 = vmatprep.subr.bf16.mxu0 %v18834_v36  ;;  %16215 = vmatprep.subr.bf16.mxu1 %v18837_v32  ;;  %v16529_v10 = vld [vmem:[%s21935_s5 + $0x1c8] sm:$0xff]  ;;  %v16496_v36 = vld [vmem:[%s21935_s5 + $0xc0] sm:$0xff] }
 0x9a1   :  { %v16528_v32 = vld [vmem:[%s21935_s5 + $0x1c0] sm:$0xff] }
 0x9a3   :  { %16175 = vmatpush1.bf16.msra.mxu0 %v18832_v54  ;;  %16216 = vmatpush1.bf16.msra.mxu1 %v18835_v14  ;;  %v16480_v54 = vld [vmem:[%s21935_s5 + $0x40] sm:$0xff] }
 0x9a4   :  { %16364 = vmatprep.subr.bf16.mxu0 %v18840_v57  ;;  %16405 = vmatprep.subr.bf16.mxu1 %v18843_v1  ;;  %v16512_v14 = vld [vmem:[%s21935_s5 + $0x140] sm:$0xff]  ;;  %v16527_v57 = vld [vmem:[%s21935_s5 + $0x1b8] sm:$0xff] }
 0x9a5   :  { %v16479_v1 = vld [vmem:[%s21935_s5 + $0x38] sm:$0xff] }
 0x9a6   :  { %17388 = vmatmul.mubr.msk.bf16.vlgmr.msra.gmra.mxu0 %vm131_vm0, %v16076_v40  ;;  %17389 = vmatmul.mubr.msk.bf16.vlgmr.msra.gmra.mxu1 %vm131_vm0, %v16076_v40  ;;  %v16494_v40 = vld [vmem:[%s21935_s5 + $0xb0] sm:$0xff] }
 0x9a7   :  { %16365 = vmatpush1.bf16.msra.mxu0 %v18838_v47  ;;  %16406 = vmatpush1.bf16.msra.mxu1 %v18841_v63  ;;  %v16526_v47 = vld [vmem:[%s21935_s5 + $0x1b0] sm:$0xff] }
 0x9a8   :  { %16366 = vmatprep.subr.bf16.mxu0 %v18846_v2  ;;  %16407 = vmatprep.subr.bf16.mxu1 %v18849_v44  ;;  %v16478_v63 = vld [vmem:[%s21935_s5 + $0x30] sm:$0xff]  ;;  %v16493_v2 = vld [vmem:[%s21935_s5 + $0xa8] sm:$0xff] }
 0x9a9   :  { %16388 = vmatprep.mubr.bf16.mxu0 %v19087_v56  ;;  %16429 = vmatprep.mubr.bf16.mxu1 %v19087_v56  ;;  %v16503_v56 = vld [vmem:[%s21935_s5 + $0xf8] sm:$0xff]  ;;  %v16525_v44 = vld [vmem:[%s21935_s5 + $0x1a8] sm:$0xff] }
 0x9ab   :  { %16367 = vmatpush1.bf16.msra.mxu0 %v18844_v15  ;;  %16408 = vmatpush1.bf16.msra.mxu1 %v18847_v45  ;;  %v16509_v15 = vld [vmem:[%s21935_s5 + $0x128] sm:$0xff]  ;;  %v16492_v45 = vld [vmem:[%s21935_s5 + $0xa0] sm:$0xff] }
 0x9ac   :  { %16368 = vmatprep.subr.bf16.mxu0 %v18852_v12  ;;  %16409 = vmatprep.subr.bf16.mxu1 %v18855_v7  ;;  %v16508_v12 = vld [vmem:[%s21935_s5 + $0x120] sm:$0xff]  ;;  %v16491_v7 = vld [vmem:[%s21935_s5 + $0x98] sm:$0xff] }
 0x9af   :  { %16369 = vmatpush1.bf16.msra.mxu0 %v18850_v33  ;;  %16410 = vmatpush1.bf16.msra.mxu1 %v18853_v25  ;;  %v16523_v33 = vld [vmem:[%s21935_s5 + $0x198] sm:$0xff] }
 0x9b0   :  { %16370 = vmatprep.subr.bf16.mxu0 %v18858_v23  ;;  %16411 = vmatprep.subr.bf16.mxu1 %v18861_v21  ;;  %v16475_v25 = vld [vmem:[%s21935_s5 + $0x18] sm:$0xff]  ;;  %v16522_v23 = vld [vmem:[%s21935_s5 + $0x190] sm:$0xff] }
 0x9b1   :  { %v16474_v21 = vld [vmem:[%s21935_s5 + $0x10] sm:$0xff] }
 0x9b3   :  { %16371 = vmatpush1.bf16.msra.mxu0 %v18856_v46  ;;  %16412 = vmatpush1.bf16.msra.mxu1 %v18859_v59  ;;  %v16506_v46 = vld [vmem:[%s21935_s5 + $0x110] sm:$0xff]  ;;  %v16489_v59 = vld [vmem:[%s21935_s5 + $0x88] sm:$0xff] }
 0x9b4   :  { %17685 = vmatprep.subr.mxu0 %v16503_v56  ;;  %17720 = vmatprep.subr.mxu1 %v16535_v41  ;;  %v16505_v56 = vld [vmem:[%s21935_s5 + $0x108] sm:$0xff]  ;;  %v16488_v41 = vld [vmem:[%s21935_s5 + $0x80] sm:$0xff] }
 0x9b6   :  { %17406 = vmatmul.mubr.msk.bf16.vlgmr.msra.gmra.mxu0 %vm131_vm0, %v16272_v29  ;;  %17407 = vmatmul.mubr.msk.bf16.vlgmr.msra.gmra.mxu1 %vm131_vm0, %v16272_v29  ;;  %v16473_v29 = vld [vmem:[%s21935_s5 + $0x8] sm:$0xff] }
 0x9b7   :  { %17686 = vmatpush3.msra.mxu0 %v16487_v38  ;;  %17721 = vmatpush3.msra.mxu1 %v16519_v30  ;;  %v16520_v38 = vld [vmem:[%s21935_s5 + $0x180] sm:$0xff] }
 0x9b8   :  { %17687 = vmatprep.subr.mxu0 %v16502_v8  ;;  %17722 = vmatprep.subr.mxu1 %v16534_v53  ;;  %v16472_v30 = vld [vmem:[%s21935_s5] sm:$0xff] }
 0x9b9   :  { %17688 = vmatpush3.msra.mxu0 %v16486_v31  ;;  %17723 = vmatpush3.msra.mxu1 %v16518_v51  ;;  %v16504_v8 = vld [vmem:[%s21935_s5 + $0x100] sm:$0xff]  ;;  %s19088_s5 = smov [#allocation12]  }
 0x9ba   :  { %17689 = vmatprep.subr.mxu0 %v16501_v60  ;;  %17724 = vmatprep.subr.mxu1 %v16533_v5  ;;  %s16691_s8 = sshll.u32 %s19088_s5, 4  ;;  %s16692_s8 = int_to_ptr.vmem [resolvable:$true] %s16691_s8 }
 0x9bb   :  { %17690 = vmatpush3.msra.mxu0 %v16485_v13  ;;  %17725 = vmatpush3.msra.mxu1 %v16517_v62  ;;  %s19037_s9 = scalar_lea.vmem %s16692_s8, 32  ;;  %p19042_p13 = scmp.lt.s32.totalorder %s16692_s8, %s16692_s8 }
 0x9bc   :  { %17691 = vmatprep.subr.mxu0 %v16500_v9  ;;  %17726 = vmatprep.subr.mxu1 %v16532_v50  ;;  %p19038_p12 = scmp.ne.s32.totalorder %s16692_s8, %s19037_s9  ;;  %p19043_p0 = scmp.lt.s32.totalorder %s19037_s9, %s19037_s9 }
 0x9bd   :  { %17692 = vmatpush3.msra.mxu0 %v16484_v37  ;;  %17727 = vmatpush3.msra.mxu1 %v16516_v18 }
 0x9be   :  { %17693 = vmatprep.subr.mxu0 %v16499_v17  ;;  %17728 = vmatprep.subr.mxu1 %v16531_v42  ;;  %p19044_p1 = por %p19043_p0, %p19042_p13 }
 0x9bf   :  { %17694 = vmatpush3.msra.mxu0 %v16483_v0  ;;  %17729 = vmatpush3.msra.mxu1 %v16515_v28 }
 0x9c0   :  { %17695 = vmatprep.subr.mxu0 %v16498_v11  ;;  %17730 = vmatprep.subr.mxu1 %v16530_v16  ;;  %p19045_p2 = pnand %p19044_p1, %p19038_p12 }
 0x9c1   :  { %17696 = vmatpush3.msra.mxu0 %v16482_v48  ;;  %17731 = vmatpush3.msra.mxu1 %v16514_v27 }
 0x9c2   :  { %17697 = vmatprep.subr.mxu0 %v16497_v52  ;;  %17732 = vmatprep.subr.mxu1 %v16529_v10 }
 0x9c3   :  { %17698 = vmatpush3.msra.mxu0 %v16481_v3  ;;  %17733 = vmatpush3.msra.mxu1 %v16513_v39 }
 0x9c4   :  { %17699 = vmatprep.subr.mxu0 %v16496_v36  ;;  %17734 = vmatprep.subr.mxu1 %v16528_v32 }
 0x9c5   :  { %17700 = vmatpush3.msra.mxu0 %v16480_v54  ;;  %17735 = vmatpush3.msra.mxu1 %v16512_v14 }
 0x9c6   :  { %17701 = vmatprep.subr.mxu0 %v16495_v24  ;;  %17736 = vmatprep.subr.mxu1 %v16527_v57 }
 0x9c7   :  { %17702 = vmatpush3.msra.mxu0 %v16479_v1  ;;  %17737 = vmatpush3.msra.mxu1 %v16511_v20 }
 0x9c8   :  { %17703 = vmatprep.subr.mxu0 %v16494_v40  ;;  %17738 = vmatprep.subr.mxu1 %v16526_v47 }
 0x9c9   :  { %17704 = vmatpush3.msra.mxu0 %v16478_v63  ;;  %17739 = vmatpush3.msra.mxu1 %v16510_v22 }
 0x9ca   :  { %17705 = vmatprep.subr.mxu0 %v16493_v2  ;;  %17740 = vmatprep.subr.mxu1 %v16525_v44 }
 0x9cb   :  { %17706 = vmatpush3.msra.mxu0 %v16477_v6  ;;  %17741 = vmatpush3.msra.mxu1 %v16509_v15 }
 0x9cc   :  { %17707 = vmatprep.subr.mxu0 %v16492_v45  ;;  %17742 = vmatprep.subr.mxu1 %v16524_v58 }
 0x9cd   :  { %17708 = vmatpush3.msra.mxu0 %v16476_v35  ;;  %17743 = vmatpush3.msra.mxu1 %v16508_v12 }
 0x9ce   :  { %17709 = vmatprep.subr.mxu0 %v16491_v7  ;;  %17744 = vmatprep.subr.mxu1 %v16523_v33 }
 0x9cf   :  { %17710 = vmatpush3.msra.mxu0 %v16475_v25  ;;  %17745 = vmatpush3.msra.mxu1 %v16507_v19 }
 0x9d0   :  { %17711 = vmatprep.subr.mxu0 %v16490_v34  ;;  %17746 = vmatprep.subr.mxu1 %v16522_v23 }
 0x9d1   :  { %17712 = vmatpush3.msra.mxu0 %v16474_v21  ;;  %17747 = vmatpush3.msra.mxu1 %v16506_v46  ;;  %v16446_v46 = vsub.s32 0, %v19167_v4 }
 0x9d2   :  { %17713 = vmatprep.subr.mxu0 %v16489_v59  ;;  %17748 = vmatprep.subr.mxu1 %v16521_v43  ;;  %v16454_v59 = vsub.s32 2, %v19167_v4  ;;  %v16450_v43 = vsub.s32 1, %v19167_v4 }
 0x9d3   :  { %17714 = vmatpush3.msra.mxu0 %v16473_v29  ;;  %17749 = vmatpush3.msra.mxu1 %v16505_v56 }
 0x9d4   :  { %17715 = vmatprep.subr.mxu0 %v16488_v41  ;;  %17750 = vmatprep.subr.mxu1 %v16520_v38  ;;  %v16442_v41 = vld [vmem:[#allocation7] sm:$0xf] }
 0x9d5   :  { %17716 = vmatpush3.msra.mxu0 %v16472_v30  ;;  %17751 = vmatpush3.msra.mxu1 %v16504_v8 }
 0xa26   :  { %v15410_v53 = vpop.f32.mrf.mxu0  ;;  %v15451_v31 = vpop.f32.mrf.mxu1 }
 0xa27   :  { %v15458_v58 = vadd.f32 %v15410_v53, %v21689_v55  ;;  %v15460_v35 = vadd.f32 %v15451_v31, %v21691_v49  ;;  %v16458_v55 = vsub.s32 3, %v19167_v4  ;;  %v16447_v31 = vrot.slane %v16442_v41, %v16446_v46 }
 0xa28   :  { %v15412_v51 = vpop.f32.mrf.mxu0  ;;  %v15453_v60 = vpop.f32.mrf.mxu1 }
 0xa29   :  { %v15459_v12 = vadd.f32 %v15412_v51, %v21693_v61  ;;  %v15461_v7 = vadd.f32 %v15453_v60, %v21695_v26  ;;  %v16455_v60 = vrot.slane %v16442_v41, %v16454_v59 }
 0xa2a   :  { %v15414_v5 = vpop.f32.mrf.mxu0  ;;  %v15455_v13 = vpop.f32.mrf.mxu1 }
 0xa2b   :  { %v16451_v5 = vrot.slane %v16442_v41, %v16450_v43  ;;  %v16459_v13 = vrot.slane %v16442_v41, %v16458_v55 }
 0xa2c   :  { %v15415_v62 = vpop.f32.mrf.mxu0  ;;  %v15456_v9 = vpop.f32.mrf.mxu1 }
 0xa36   :  { %v15606_v50 = vpop.f32.mrf.mxu0  ;;  %v15647_v37 = vpop.f32.mrf.mxu1 }
 0xa37   :  { %v15654_v33 = vadd.f32 %v15606_v50, %v15458_v58  ;;  %v15656_v25 = vadd.f32 %v15647_v37, %v15460_v35 }
 0xa38   :  { %v15608_v18 = vpop.f32.mrf.mxu0  ;;  %v15649_v17 = vpop.f32.mrf.mxu1 }
 0xa39   :  { %v15655_v19 = vadd.f32 %v15608_v18, %v15459_v12  ;;  %v15657_v34 = vadd.f32 %v15649_v17, %v15461_v7 }
 0xa3a   :  { %v15610_v42 = vpop.f32.mrf.mxu0  ;;  %v15651_v0 = vpop.f32.mrf.mxu1 }
 0xa3c   :  { %v15611_v28 = vpop.f32.mrf.mxu0  ;;  %v15652_v11 = vpop.f32.mrf.mxu1 }
 0xa46   :  { %v15802_v16 = vpop.f32.mrf.mxu0  ;;  %v15843_v48 = vpop.f32.mrf.mxu1 }
 0xa47   :  { %v15850_v23 = vadd.f32 %v15802_v16, %v15654_v33  ;;  %v15852_v21 = vadd.f32 %v15843_v48, %v15656_v25 }
 0xa48   :  { %v15804_v27 = vpop.f32.mrf.mxu0  ;;  %v15845_v52 = vpop.f32.mrf.mxu1 }
 0xa49   :  { %v15851_v29 = vadd.f32 %v15804_v27, %v15655_v19  ;;  %v15853_v49 = vadd.f32 %v15845_v52, %v15657_v34 }
 0xa4a   :  { %v15806_v10 = vpop.f32.mrf.mxu0  ;;  %v15847_v3 = vpop.f32.mrf.mxu1 }
 0xa4c   :  { %v15807_v39 = vpop.f32.mrf.mxu0  ;;  %v15848_v36 = vpop.f32.mrf.mxu1 }
 0xa56   :  { %v15998_v32 = vpop.f32.mrf.mxu0  ;;  %v16039_v54 = vpop.f32.mrf.mxu1 }
 0xa57   :  { %v16046_v56 = vadd.f32 %v15998_v32, %v15850_v23  ;;  %v16048_v61 = vadd.f32 %v16039_v54, %v15852_v21 }
 0xa58   :  { %v16000_v14 = vpop.f32.mrf.mxu0  ;;  %v16041_v24 = vpop.f32.mrf.mxu1 }
 0xa59   :  { %v16047_v26 = vadd.f32 %v16000_v14, %v15851_v29  ;;  %v16049_v38 = vadd.f32 %v16041_v24, %v15853_v49  ;;  %v17408_v24 = vld [vmem:[#allocation10] ss:$0 sm:$0xff] }
 0xa5a   :  { %v16002_v57 = vpop.f32.mrf.mxu0  ;;  %v16043_v1 = vpop.f32.mrf.mxu1 }
 0xa5c   :  { %v16003_v20 = vpop.f32.mrf.mxu0  ;;  %v16044_v40 = vpop.f32.mrf.mxu1 }
 0xa66   :  { %v16194_v47 = vpop.f32.mrf.mxu0  ;;  %v16235_v63 = vpop.f32.mrf.mxu1 }
 0xa67   :  { %v16242_v30 = vadd.f32 %v16194_v47, %v16046_v56  ;;  %v16244_v8 = vadd.f32 %v16235_v63, %v16048_v61 }
 0xa68   :  { %v16196_v22 = vpop.f32.mrf.mxu0  ;;  %v16237_v2 = vpop.f32.mrf.mxu1 }
 0xa69   :  { %v16243_v62 = vadd.f32 %v16196_v22, %v16047_v26  ;;  %v16245_v9 = vadd.f32 %v16237_v2, %v16049_v38 }
 0xa6a   :  { %v16198_v44 = vpop.f32.mrf.mxu0  ;;  %v16239_v6 = vpop.f32.mrf.mxu1 }
 0xa6c   :  { %v16199_v15 = vpop.f32.mrf.mxu0  ;;  %v16240_v45 = vpop.f32.mrf.mxu1 }
 0xa76   :  { %v16390_v53 = vpop.f32.mrf.mxu0  ;;  %v16431_v51 = vpop.f32.mrf.mxu1 }
 0xa77   :  { %v16438_v50 = vadd.f32 %v16390_v53, %v16242_v30  ;;  %v16440_v37 = vadd.f32 %v16431_v51, %v16244_v8 }
 0xa78   :  { %v16392_v4 = vpop.f32.mrf.mxu0  ;;  %v16433_v18 = vpop.f32.mrf.mxu1 }
 0xa79   :  { %v16439_v17 = vadd.f32 %v16392_v4, %v16243_v62  ;;  %v16441_v42 = vadd.f32 %v16433_v18, %v16245_v9  ;;  %v16464_v0 = vadd.f32 %v16447_v31, %v16438_v50  ;;  %v16466_v28 = vadd.f32 %v16455_v60, %v16440_v37 }
 0xa7a   :  { %v16394_v11 = vpop.f32.mrf.mxu0  ;;  %v16435_v16 = vpop.f32.mrf.mxu1 }
 0xa7b   :  { %v16465_v48 = vadd.f32 %v16451_v5, %v16439_v17  ;;  %v16467_v27 = vadd.f32 %v16459_v13, %v16441_v42  ;;  %v16468_v36 = vmax.f32 %v16464_v0, 0.0  ;;  %v16470_v32 = vmax.f32 %v16466_v28, 0.0 }
 0xa7c   :  { %v16395_v52 = vpop.f32.mrf.mxu0  ;;  %v16436_v10 = vpop.f32.mrf.mxu1 }
 0xa7d   :  { %v16469_v3 = vmax.f32 %v16465_v48, 0.0  ;;  %v16471_v39 = vmax.f32 %v16467_v27, 0.0 }
 0xa7f   :  { %16607 = vmatprep.mubr.f32.mxu0 %v16469_v3  ;;  %16677 = vmatprep.mubr.f32.mxu1 %v16471_v39 }
 0xa80   :  { %16608 = vmatmul.mubr.f32.vlgmr.msra.gmra.mxu0 %v16468_v36  ;;  %16678 = vmatmul.mubr.f32.vlgmr.msra.gmra.mxu1 %v16470_v32 }
 0xb40   :  { %v17717_v54 = vpop.f32.mrf.mxu0  ;;  %v17752_v14 = vpop.f32.mrf.mxu1 }
 0xb42   :  { %v17718_v57 = vpop.f32.mrf.mxu0  ;;  %v17753_v1 = vpop.f32.mrf.mxu1 }
 0xb43   :  { %v17719_v20 = vadd.f32 %v17718_v57, %v17717_v54  ;;  %v17754_v47 = vadd.f32 %v17753_v1, %v17752_v14 }
 0xb45   :  { %v16610_v40 = vadd.f32 %v17719_v20, %v17408_v24 }
 0xb47   :  { %v16680_v63 = vadd.f32 %v17754_v47, %v16610_v40 }
 0xb49   :  { %16684 = vst.msk [vmem:[#allocation12] sm:$0x3] %vm16683_vm5, %v16680_v63 }
 0xb4a   :  { %19048 = shalt.err (!%p19045_p2)
}
 0xb4b   :  { %16694 = dma.vmem_to_hbm [thread:$0]  %s16692_s8, 32, %s21937_s7, [#allocation9]  }
 0xb4c   :  { %19073 = dma.done.wait [#allocation9], 32  }
 0xb4d   :  { %19074 = vsyncadd [#allocation9], 4294967264 }
 0xb4e   :  { %16698 = vsyncpa [#allocation8], 1 }
 0xb4f   :  { %16699 = vsyncpa [#allocation11], 1 }
 0xb50   :  { %16700 = vsyncpa [#allocation9], 1 }
 0xb51   :  { %16701 = vsyncmov [#allocation6] }
 0xb54   :  { %s16702_s4 = vpop.sfrf %16701 }
 0xb55   :  { %p17409_p3 = scmp.ne.s32.totalorder %s16702_s4, 0 }
 0xb57   :  { %16706 = shalt.err (%p17409_p3)  }
 0xb58   :  { %16708 = vsyncmov [#allocation6 + $0x1] }
 0xb5b   :  { %s16709_s6 = vpop.sfrf %16708 }
 0xb5c   :  { %p17410_p4 = scmp.ne.s32.totalorder %s16709_s6, 0 }
 0xb5e   :  { %16713 = shalt.err (%p17410_p4)  }
 0xb5f   :  { %16715 = vsyncmov [#allocation6 + $0x2] }
 0xb62   :  { %s16716_s12 = vpop.sfrf %16715 }
 0xb63   :  { %p17411_p5 = scmp.ne.s32.totalorder %s16716_s12, 0 }
 0xb65   :  { %16720 = shalt.err (%p17411_p5)  }
 0xb66   :  { %16722 = vsyncmov [#allocation6 + $0x3] }
 0xb69   :  { %s16723_s0 = vpop.sfrf %16722 }
 0xb6a   :  { %p17412_p6 = scmp.ne.s32.totalorder %s16723_s0, 0 }
 0xb6c   :  { %16727 = shalt.err (%p17412_p6)  }
 0xb6d   :  { %16729 = vsyncmov [#allocation6 + $0x4] }
 0xb70   :  { %s16730_s7 = vpop.sfrf %16729 }
 0xb71   :  { %p17413_p7 = scmp.ne.s32.totalorder %s16730_s7, 0 }
 0xb73   :  { %16734 = shalt.err (%p17413_p7)  }
 0xb74   :  { %16736 = vsyncmov [#allocation6 + $0x5] }
 0xb77   :  { %s16737_s13 = vpop.sfrf %16736 }
 0xb78   :  { %p17414_p8 = scmp.ne.s32.totalorder %s16737_s13, 0 }
 0xb7a   :  { %16741 = shalt.err (%p17414_p8)  }

</bundles_post_ra>
